<compile_context>
chip_gen: v7x
topology: tpu7x:2x2x1
jax: 0.10.0
libtpu: 0.0.40
codegen_flags: <defaults>
</compile_context>

<pallas_src>
import functools
import math

import jax
import jax.numpy as jnp
from jax.experimental import pallas as pl
from jax.experimental.pallas import tpu as pltpu

ACT_DTYPE = jnp.bfloat16   # activation / weight dtype fed to the MXU
_NEG_BIG = -1e30           # max-pool padding value (finite, bf16-representable)
_SINGLE_K_MAX = 2048       # contractions up to this size run as one MXU block


def _round_up(x, m):
    return (x + m - 1) // m * m


# ---------------------------------------------------------------------------
# Fused matmul + bias (+ residual) + ReLU kernels (1x1 convs / im2col convs).
# BN scale is pre-folded into the (pre-transposed, bf16) weights at init, so
# the epilogue only adds bias (+ residual) and applies ReLU.
# ---------------------------------------------------------------------------
def _mm_kernel(x_ref, w_ref, b_ref, o_ref, *, relu):
    y = jnp.dot(x_ref[...], w_ref[...], preferred_element_type=jnp.float32)
    y = y + b_ref[...]
    if relu:
        y = jnp.maximum(y, 0.0)
    o_ref[...] = y.astype(o_ref.dtype)


def _mm_res_kernel(x_ref, w_ref, b_ref, r_ref, o_ref, *, relu):
    y = jnp.dot(x_ref[...], w_ref[...], preferred_element_type=jnp.float32)
    y = y + b_ref[...] + r_ref[...].astype(jnp.float32)
    if relu:
        y = jnp.maximum(y, 0.0)
    o_ref[...] = y.astype(o_ref.dtype)


def _mm_acc_kernel(x_ref, w_ref, b_ref, o_ref, acc_ref, *, relu):
    k = pl.program_id(2)

    @pl.when(k == 0)
    def _():
        acc_ref[...] = jnp.zeros_like(acc_ref)

    acc_ref[...] += jnp.dot(x_ref[...], w_ref[...],
                            preferred_element_type=jnp.float32)

    @pl.when(k == pl.num_programs(2) - 1)
    def _():
        y = acc_ref[...] + b_ref[...]
        if relu:
            y = jnp.maximum(y, 0.0)
        o_ref[...] = y.astype(o_ref.dtype)


def _mm_acc_res_kernel(x_ref, w_ref, b_ref, r_ref, o_ref, acc_ref, *, relu):
    k = pl.program_id(2)

    @pl.when(k == 0)
    def _():
        acc_ref[...] = jnp.zeros_like(acc_ref)

    acc_ref[...] += jnp.dot(x_ref[...], w_ref[...],
                            preferred_element_type=jnp.float32)

    @pl.when(k == pl.num_programs(2) - 1)
    def _():
        y = acc_ref[...] + b_ref[...] + r_ref[...].astype(jnp.float32)
        if relu:
            y = jnp.maximum(y, 0.0)
        o_ref[...] = y.astype(o_ref.dtype)


def fused_matmul_bias(x, w, bias, residual=None, relu=True):
    """act(x @ w + bias [+ residual]); x:(M,K), w:(K,N) bf16, bias:(1,N) f32."""
    M, K = x.shape
    Kw, N = w.shape
    assert K == Kw and bias.shape == (1, N)

    # M (sublane) only needs 16-granularity for bf16; lane dims stay 128-dense
    # for N>=128 and use full-extent blocks for narrow layers.
    Mp = _round_up(M, 16)
    tm = min(256, Mp)
    Mp = _round_up(Mp, tm)

    if N < 128 or N % 128 != 0:
        tn = N
    elif N >= 512:
        tn = 256
    elif N == 256 and Mp == tm:
        tn = 128        # gives the second TensorCore (v7x) a block to work on
    else:
        tn = N
    if N % tn != 0:
        tn = N

    xp = x.astype(ACT_DTYPE)
    if Mp != M:
        xp = jnp.pad(xp, ((0, Mp - M), (0, 0)))
    rp = None
    if residual is not None:
        rp = residual.astype(ACT_DTYPE)
        if Mp != M:
            rp = jnp.pad(rp, ((0, Mp - M), (0, 0)))

    flops = 2 * Mp * N * K
    bytes_accessed = 2 * (Mp * K + K * N + Mp * N) + 4 * N
    if rp is not None:
        bytes_accessed += 2 * Mp * N

    if K <= _SINGLE_K_MAX:
        # Fast path: whole K in one block -> no f32 scratch accumulator.
        grid = (Mp // tm, N // tn)
        in_specs = [
            pl.BlockSpec((tm, K), lambda i, j: (i, 0)),
            pl.BlockSpec((K, tn), lambda i, j: (0, j)),
            pl.BlockSpec((1, tn), lambda i, j: (0, j)),
        ]
        out_spec = pl.BlockSpec((tm, tn), lambda i, j: (i, j))
        if rp is None:
            kernel = functools.partial(_mm_kernel, relu=relu)
            args = (xp, w, bias)
        else:
            kernel = functools.partial(_mm_res_kernel, relu=relu)
            in_specs.append(pl.BlockSpec((tm, tn), lambda i, j: (i, j)))
            args = (xp, w, bias, rp)
        out = pl.pallas_call(
            kernel,
            out_shape=jax.ShapeDtypeStruct((Mp, N), ACT_DTYPE),
            grid_spec=pltpu.PrefetchScalarGridSpec(
                num_scalar_prefetch=0, grid=grid,
                in_specs=in_specs, out_specs=out_spec),
            compiler_params=pltpu.CompilerParams(
                dimension_semantics=("parallel", "parallel")),
            cost_estimate=pl.CostEstimate(
                flops=flops, transcendentals=0,
                bytes_accessed=bytes_accessed),
        )(*args)
    else:
        # General path (unused at these sizes): tile K with f32 accumulator.
        tk = 512
        Kp = _round_up(K, tk)
        xp = jnp.pad(xp, ((0, 0), (0, Kp - K)))
        wp = jnp.pad(w, ((0, Kp - K), (0, 0)))
        grid = (Mp // tm, N // tn, Kp // tk)
        in_specs = [
            pl.BlockSpec((tm, tk), lambda i, j, k: (i, k)),
            pl.BlockSpec((tk, tn), lambda i, j, k: (k, j)),
            pl.BlockSpec((1, tn), lambda i, j, k: (0, j)),
        ]
        out_spec = pl.BlockSpec((tm, tn), lambda i, j, k: (i, j))
        if rp is None:
            kernel = functools.partial(_mm_acc_kernel, relu=relu)
            args = (xp, wp, bias)
        else:
            kernel = functools.partial(_mm_acc_res_kernel, relu=relu)
            in_specs.append(pl.BlockSpec((tm, tn), lambda i, j, k: (i, j)))
            args = (xp, wp, bias, rp)
        out = pl.pallas_call(
            kernel,
            out_shape=jax.ShapeDtypeStruct((Mp, N), ACT_DTYPE),
            grid_spec=pltpu.PrefetchScalarGridSpec(
                num_scalar_prefetch=0, grid=grid,
                in_specs=in_specs, out_specs=out_spec,
                scratch_shapes=[pltpu.VMEM((tm, tn), jnp.float32)]),
            compiler_params=pltpu.CompilerParams(
                dimension_semantics=("parallel", "parallel", "arbitrary")),
            cost_estimate=pl.CostEstimate(
                flops=flops, transcendentals=0,
                bytes_accessed=bytes_accessed),
        )(*args)

    return out[:M] if Mp != M else out


# ---------------------------------------------------------------------------
# Direct 3x3 stride-1 conv: taps folded into the kernel (no im2col in HBM).
# The padded image is flattened to (Hp*Wp, Cin); tap (i,j) is the contiguous
# row-window at offset i*Wp + j, so every tap is a plain slice of the same
# VMEM block.  Output is "wide" (Ho x Wp columns); garbage columns sliced off.
# ---------------------------------------------------------------------------
def _wide_conv_kernel(x_ref, w_ref, b_ref, o_ref, *, taps, relu):
    # x_ref: (Lp, Cin)  w_ref: (9, Cin, Cout)  b_ref: (1, Cout)  o_ref: (Mw, Cout)
    mw = o_ref.shape[0]
    acc = jnp.zeros(o_ref.shape, jnp.float32)
    for idx, t in enumerate(taps):
        acc = acc + jnp.dot(x_ref[pl.ds(t, mw), :], w_ref[idx],
                            preferred_element_type=jnp.float32)
    y = acc + b_ref[...]
    if relu:
        y = jnp.maximum(y, 0.0)
    o_ref[...] = y.astype(o_ref.dtype)


def conv3x3_s1(x, w_taps, bias, relu=True):
    B, H, W, C = x.shape
    T, Cin, Cout = w_taps.shape
    assert T == 9 and Cin == C
    Hp, Wp = H + 2, W + 2
    Mw = H * Wp                                  # wide output rows per image
    Mwp = _round_up(Mw, 8)
    taps = tuple(i * Wp + j for i in range(3) for j in range(3))
    Lp = _round_up(max(Hp * Wp, Mwp + max(taps)), 8)

    xp = jnp.pad(x, ((0, 0), (1, 1), (1, 1), (0, 0))).reshape(B, Hp * Wp, C)
    if Lp != Hp * Wp:
        xp = jnp.pad(xp, ((0, 0), (0, Lp - Hp * Wp), (0, 0)))

    out_wide = pl.pallas_call(
        functools.partial(_wide_conv_kernel, taps=taps, relu=relu),
        out_shape=jax.ShapeDtypeStruct((B, Mwp, Cout), ACT_DTYPE),
        grid_spec=pltpu.PrefetchScalarGridSpec(
            num_scalar_prefetch=0,
            grid=(B,),
            in_specs=[pl.BlockSpec((None, Lp, C), lambda b: (b, 0, 0)),
                      pl.BlockSpec((9, Cin, Cout), lambda b: (0, 0, 0)),
                      pl.BlockSpec((1, Cout), lambda b: (0, 0))],
            out_specs=pl.BlockSpec((None, Mwp, Cout), lambda b: (b, 0, 0))),
        compiler_params=pltpu.CompilerParams(
            dimension_semantics=("parallel",)),
        cost_estimate=pl.CostEstimate(
            flops=2 * B * Mwp * Cin * Cout * 9, transcendentals=0,
            bytes_accessed=2 * B * (Lp * Cin + Mwp * Cout) + 2 * 9 * Cin * Cout),
    )(xp, w_taps, bias)

    out = out_wide[:, :Mw, :].reshape(B, H, Wp, Cout)[:, :, :W, :]
    return out


# ---------------------------------------------------------------------------
# MaxPool2d(3, 2, 1): single padded input pass; 9-tap max computed in-kernel
# from contiguous slices of one VMEM block (same wide-window trick), then a
# cheap stride-2 subsample of the small pooled tensor outside.
# ---------------------------------------------------------------------------
def _wide_pool_kernel(x_ref, o_ref, *, taps):
    mw = o_ref.shape[0]
    m = x_ref[pl.ds(taps[0], mw), :]
    for t in taps[1:]:
        m = jnp.maximum(m, x_ref[pl.ds(t, mw), :])
    o_ref[...] = m


def maxpool3x3_s2_p1(x):
    B, H, W, C = x.shape
    Ho = (H + 2 - 3) // 2 + 1
    Wo = (W + 2 - 3) // 2 + 1
    Hp, Wp = H + 2, W + 2
    Mw = H * Wp
    Mwp = _round_up(Mw, 8)
    taps = tuple(i * Wp + j for i in range(3) for j in range(3))
    Lp = _round_up(max(Hp * Wp, Mwp + max(taps)), 8)

    xp = jnp.pad(x, ((0, 0), (1, 1), (1, 1), (0, 0)),
                 constant_values=_NEG_BIG).reshape(B, Hp * Wp, C)
    if Lp != Hp * Wp:
        xp = jnp.pad(xp, ((0, 0), (0, Lp - Hp * Wp), (0, 0)),
                     constant_values=_NEG_BIG)

    out_wide = pl.pallas_call(
        functools.partial(_wide_pool_kernel, taps=taps),
        out_shape=jax.ShapeDtypeStruct((B, Mwp, C), x.dtype),
        grid_spec=pltpu.PrefetchScalarGridSpec(
            num_scalar_prefetch=0,
            grid=(B,),
            in_specs=[pl.BlockSpec((None, Lp, C), lambda b: (b, 0, 0))],
            out_specs=pl.BlockSpec((None, Mwp, C), lambda b: (b, 0, 0))),
        compiler_params=pltpu.CompilerParams(
            dimension_semantics=("parallel",)),
    )(xp)

    ow = out_wide[:, :Mw, :].reshape(B, H, Wp, C)
    return ow[:, 0:2 * Ho:2, 0:2 * Wo:2, :]


# ---------------------------------------------------------------------------
# Conv wrappers
# ---------------------------------------------------------------------------
def conv1x1(x, w2d, bias, stride=1, relu=True, residual=None):
    if stride != 1:
        x = x[:, ::stride, ::stride, :]
    B, H, W, C = x.shape
    N = w2d.shape[1]
    r2d = None if residual is None else residual.reshape(B * H * W, N)
    out = fused_matmul_bias(x.reshape(B * H * W, C), w2d, bias,
                            residual=r2d, relu=relu)
    return out.reshape(B, H, W, N)


def conv_im2col(x, w2d, bias, ksize, stride, padding, relu=True):
    # Only the 7x7 stem and the three stride-2 3x3 convs take this path.
    # TODO(synk): fold these taps into the kernel too (phase-split of the
    # padded input) so no im2col patches remain at all.
    B, H, W, C = x.shape
    Ho = (H + 2 * padding - ksize) // stride + 1
    Wo = (W + 2 * padding - ksize) // stride + 1
    xp = jnp.pad(x, ((0, 0), (padding, padding), (padding, padding), (0, 0)))
    cols = [xp[:, i:i + Ho * stride:stride, j:j + Wo * stride:stride, :]
            for i in range(ksize) for j in range(ksize)]
    patches = jnp.concatenate(cols, axis=-1).reshape(B * Ho * Wo,
                                                     ksize * ksize * C)
    out = fused_matmul_bias(patches, w2d, bias, relu=relu)
    return out.reshape(B, Ho, Wo, -1)


# ---------------------------------------------------------------------------
# Bottleneck / Backbone forward
# ---------------------------------------------------------------------------
def bottleneck_forward(x, p):
    s = p['stride']
    out = conv1x1(x, p['w1'], p['b1'], relu=True)
    if s == 1:
        out = conv3x3_s1(out, p['w2t'], p['b2'], relu=True)
    else:
        out = conv_im2col(out, p['w2'], p['b2'], ksize=3, stride=s, padding=1,
                          relu=True)
    identity = (conv1x1(x, p['wd'], p['bd'], stride=s, relu=False)
                if 'wd' in p else x)
    # conv3 + bn3 + residual add + final ReLU fused into one kernel epilogue
    return conv1x1(out, p['w3'], p['b3'], relu=True, residual=identity)


def backbone_forward(params, x_nchw):
    x = jnp.transpose(x_nchw, (0, 2, 3, 1)).astype(ACT_DTYPE)   # NCHW -> NHWC
    c1 = conv_im2col(x, params['stem_w'], params['stem_b'], ksize=7, stride=2,
                     padding=3, relu=True)
    c1 = maxpool3x3_s2_p1(c1)

    feats = []
    cur = c1
    for name in ('layer2', 'layer3', 'layer4', 'layer5'):
        for blk in params[name]:
            cur = bottleneck_forward(cur, blk)
        feats.append(cur)
    # return NCHW f32 like the PyTorch module
    return [jnp.transpose(f, (0, 3, 1, 2)).astype(jnp.float32) for f in feats]


# ---------------------------------------------------------------------------
# One-time parameter init + kernel-ready preparation (BN folding, transpose,
# bf16 cast all happen here, never in the forward pass).
# ---------------------------------------------------------------------------
def _conv_init(key, cout, cin, kh, kw):
    fan_in = cin * kh * kw
    return jax.random.normal(key, (cout, cin, kh, kw), jnp.float32) \
        * (1.0 / math.sqrt(fan_in))


def _bn_fold(c, eps=1e-5):
    # Eval-mode BatchNorm with PyTorch-default statistics.
    gamma = jnp.ones((c,), jnp.float32)
    beta = jnp.zeros((c,), jnp.float32)
    mean = jnp.zeros((c,), jnp.float32)
    var = jnp.ones((c,), jnp.float32)
    scale = gamma / jnp.sqrt(var + eps)
    bias = beta - mean * scale
    return scale, bias.reshape(1, c)


def _prep_mm_weight(w_oihw, scale):
    cout, cin, kh, kw = w_oihw.shape
    w2d = jnp.transpose(w_oihw, (2, 3, 1, 0)).reshape(kh * kw * cin, cout)
    return (w2d * scale[None, :]).astype(ACT_DTYPE)


def _prep_tap_weight(w_oihw, scale):
    cout, cin, kh, kw = w_oihw.shape
    wt = jnp.transpose(w_oihw, (2, 3, 1, 0)).reshape(kh * kw, cin, cout)
    return (wt * scale[None, None, :]).astype(ACT_DTYPE)


def _init_bottleneck(key, cin, cout, stride, expansion=4):
    mid = cout // expansion
    k1, k2, k3, k4 = jax.random.split(key, 4)
    s1, b1 = _bn_fold(mid)
    s2, b2 = _bn_fold(mid)
    s3, b3 = _bn_fold(cout)
    w2 = _conv_init(k2, mid, mid, 3, 3)
    p = dict(stride=stride,
             w1=_prep_mm_weight(_conv_init(k1, mid, cin, 1, 1), s1), b1=b1,
             b2=b2,
             w3=_prep_mm_weight(_conv_init(k3, cout, mid, 1, 1), s3), b3=b3)
    if stride == 1:
        p['w2t'] = _prep_tap_weight(w2, s2)     # direct-conv layout (9,Cin,Cout)
    else:
        p['w2'] = _prep_mm_weight(w2, s2)       # im2col layout (9*Cin,Cout)
    if stride != 1 or cin != cout:
        sd, bd = _bn_fold(cout)
        p['wd'] = _prep_mm_weight(_conv_init(k4, cout, cin, 1, 1), sd)
        p['bd'] = bd
    return p


def init_backbone(key):
    keys = iter(jax.random.split(key, 32))
    params = {}
    s0, b0 = _bn_fold(64)
    params['stem_w'] = _prep_mm_weight(_conv_init(next(keys), 64, 3, 7, 7), s0)
    params['stem_b'] = b0

    def make_layer(cin, cout, n, first_stride):
        blocks = [_init_bottleneck(next(keys), cin, cout, first_stride)]
        for _ in range(n - 1):
            blocks.append(_init_bottleneck(next(keys), cout, cout, 1))
        return blocks

    params['layer2'] = make_layer(64, 64, 3, 1)
    params['layer3'] = make_layer(64, 128, 4, 2)
    params['layer4'] = make_layer(128, 256, 6, 2)
    params['layer5'] = make_layer(256, 512, 3, 2)
    return params


if __name__ == "__main__":
    key = jax.random.PRNGKey(0)
    pkey, xkey = jax.random.split(key)
    params = init_backbone(pkey)                   # kernel-ready parameters
    x = jax.random.normal(xkey, (2, 3, 32, 32), jnp.float32)   # NCHW input

    fwd = jax.jit(functools.partial(backbone_forward, params))
    outs = jax.block_until_ready(fwd(x))

    expected = [(2, 64, 8, 8), (2, 128, 4, 4), (2, 256, 2, 2), (2, 512, 1, 1)]
    got = [tuple(o.shape) for o in outs]
    assert got == expected, f"shape mismatch: {got} vs {expected}"
    assert all(bool(jnp.all(jnp.isfinite(o))) for o in outs)
    print("KERNEL_OK")
</pallas_src>

<mosaic_0001>
module attributes {stable_mosaic.version = 11 : i64} {
  func.func @_mm_kernel(%arg0: i32, %arg1: i32, %arg2: memref<256x147xbf16, #tpu.memory_space<vmem>>, %arg3: memref<147x64xbf16, #tpu.memory_space<vmem>>, %arg4: memref<1x64xf32, #tpu.memory_space<vmem>>, %arg5: memref<256x64xbf16, #tpu.memory_space<vmem>>) attributes {dimension_semantics = [#tpu.dimension_semantics<parallel>, #tpu.dimension_semantics<parallel>], iteration_bounds = array<i64: 2, 1>, scalar_prefetch = 0 : i64, scratch_operands = 0 : i64, tpu.core_type = #tpu.core_type<tc>, window_params = [{transform_indices = @transform_0, window_bounds = array<i64: 256, 147>}, {transform_indices = @transform_1, window_bounds = array<i64: 147, 64>}, {transform_indices = @transform_2, window_bounds = array<i64: 1, 64>}, {transform_indices = @transform_3, window_bounds = array<i64: 256, 64>}]} {
    %c0 = arith.constant 0 : index
    %c0_0 = arith.constant 0 : index
    %0 = vector.load %arg2[%c0, %c0_0] : memref<256x147xbf16, #tpu.memory_space<vmem>>, vector<256x147xbf16>
    %c0_1 = arith.constant 0 : index
    %c0_2 = arith.constant 0 : index
    %1 = vector.load %arg3[%c0_1, %c0_2] : memref<147x64xbf16, #tpu.memory_space<vmem>>, vector<147x64xbf16>
    %cst = arith.constant dense<0.000000e+00> : vector<256x64xf32>
    %2 = tpu.matmul %0, %1, %cst {dimension_numbers = #tpu.dot_dimension_numbers<[1], [0], [0], [1], [0, 0, 1, 1], [], []>} : vector<256x147xbf16>, vector<147x64xbf16>, vector<256x64xf32> -> vector<256x64xf32>
    %c0_3 = arith.constant 0 : index
    %c0_4 = arith.constant 0 : index
    %3 = vector.load %arg4[%c0_3, %c0_4] : memref<1x64xf32, #tpu.memory_space<vmem>>, vector<1x64xf32>
    %4 = vector.broadcast %3 : vector<1x64xf32> to vector<256x64xf32>
    %5 = arith.addf %2, %4 : vector<256x64xf32>
    %cst_5 = arith.constant 0.000000e+00 : f32
    %6 = vector.broadcast %cst_5 : f32 to vector<256x64xf32>
    %7 = arith.maximumf %5, %6 : vector<256x64xf32>
    %8 = arith.truncf %7 : vector<256x64xf32> to vector<256x64xbf16>
    %c0_6 = arith.constant 0 : index
    %c0_7 = arith.constant 0 : index
    %9 = vector.load %arg5[%c0_6, %c0_7] : memref<256x64xbf16, #tpu.memory_space<vmem>>, vector<256x64xbf16>
    tpu.vector_store %arg5[%c0_6, %c0_7], %8 {strides = array<i32>} : memref<256x64xbf16, #tpu.memory_space<vmem>>, vector<256x64xbf16>,
    return
  }
  func.func @transform_0(%arg0: i32, %arg1: i32) -> (i32, i32) {
    %c0_i32 = arith.constant 0 : i32
    %c0_i32_0 = arith.constant 0 : i32
    return %arg0, %c0_i32 : i32, i32
  }
  func.func @transform_1(%arg0: i32, %arg1: i32) -> (i32, i32) {
    %c0_i32 = arith.constant 0 : i32
    %c0_i32_0 = arith.constant 0 : i32
    return %c0_i32, %arg1 : i32, i32
  }
  func.func @transform_2(%arg0: i32, %arg1: i32) -> (i32, i32) {
    %c0_i32 = arith.constant 0 : i32
    %c0_i32_0 = arith.constant 0 : i32
    return %c0_i32, %arg1 : i32, i32
  }
  func.func @transform_3(%arg0: i32, %arg1: i32) -> (i32, i32) {
    %c0_i32 = arith.constant 0 : i32
    return %arg0, %arg1 : i32, i32
  }
}

module attributes {stable_mosaic.version = 11 : i64} {
  func.func @_wide_pool_kernel(%arg0: i32, %arg1: memref<1x328x64xbf16, #tpu.memory_space<vmem>>, %arg2: memref<1x288x64xbf16, #tpu.memory_space<vmem>>) attributes {dimension_semantics = [#tpu.dimension_semantics<parallel>], iteration_bounds = array<i64: 2>, scalar_prefetch = 0 : i64, scratch_operands = 0 : i64, tpu.core_type = #tpu.core_type<tc>, window_params = [{transform_indices = @transform_0, window_bounds = array<i64: 1, 328, 64>}, {transform_indices = @transform_1, window_bounds = array<i64: 1, 288, 64>}]} {
    %c0 = arith.constant 0 : index
    %c0_0 = arith.constant 0 : index
    %c0_1 = arith.constant 0 : index
    %0 = vector.load %arg1[%c0, %c0_0, %c0_1] : memref<1x328x64xbf16, #tpu.memory_space<vmem>>, vector<1x288x64xbf16>
    %1 = vector.shape_cast %0 : vector<1x288x64xbf16> to vector<288x64xbf16>
    %c0_2 = arith.constant 0 : index
    %c1 = arith.constant 1 : index
    %c0_3 = arith.constant 0 : index
    %2 = vector.load %arg1[%c0_2, %c1, %c0_3] : memref<1x328x64xbf16, #tpu.memory_space<vmem>>, vector<1x288x64xbf16>
    %3 = vector.shape_cast %2 : vector<1x288x64xbf16> to vector<288x64xbf16>
    %4 = arith.maximumf %1, %3 : vector<288x64xbf16>
    %c0_4 = arith.constant 0 : index
    %c2 = arith.constant 2 : index
    %c0_5 = arith.constant 0 : index
    %5 = vector.load %arg1[%c0_4, %c2, %c0_5] : memref<1x328x64xbf16, #tpu.memory_space<vmem>>, vector<1x288x64xbf16>
    %6 = vector.shape_cast %5 : vector<1x288x64xbf16> to vector<288x64xbf16>
    %7 = arith.maximumf %4, %6 : vector<288x64xbf16>
    %c0_6 = arith.constant 0 : index
    %c18 = arith.constant 18 : index
    %c0_7 = arith.constant 0 : index
    %8 = vector.load %arg1[%c0_6, %c18, %c0_7] : memref<1x328x64xbf16, #tpu.memory_space<vmem>>, vector<1x288x64xbf16>
    %9 = vector.shape_cast %8 : vector<1x288x64xbf16> to vector<288x64xbf16>
    %10 = arith.maximumf %7, %9 : vector<288x64xbf16>
    %c0_8 = arith.constant 0 : index
    %c19 = arith.constant 19 : index
    %c0_9 = arith.constant 0 : index
    %11 = vector.load %arg1[%c0_8, %c19, %c0_9] : memref<1x328x64xbf16, #tpu.memory_space<vmem>>, vector<1x288x64xbf16>
    %12 = vector.shape_cast %11 : vector<1x288x64xbf16> to vector<288x64xbf16>
    %13 = arith.maximumf %10, %12 : vector<288x64xbf16>
    %c0_10 = arith.constant 0 : index
    %c20 = arith.constant 20 : index
    %c0_11 = arith.constant 0 : index
    %14 = vector.load %arg1[%c0_10, %c20, %c0_11] : memref<1x328x64xbf16, #tpu.memory_space<vmem>>, vector<1x288x64xbf16>
    %15 = vector.shape_cast %14 : vector<1x288x64xbf16> to vector<288x64xbf16>
    %16 = arith.maximumf %13, %15 : vector<288x64xbf16>
    %c0_12 = arith.constant 0 : index
    %c36 = arith.constant 36 : index
    %c0_13 = arith.constant 0 : index
    %17 = vector.load %arg1[%c0_12, %c36, %c0_13] : memref<1x328x64xbf16, #tpu.memory_space<vmem>>, vector<1x288x64xbf16>
    %18 = vector.shape_cast %17 : vector<1x288x64xbf16> to vector<288x64xbf16>
    %19 = arith.maximumf %16, %18 : vector<288x64xbf16>
    %c0_14 = arith.constant 0 : index
    %c37 = arith.constant 37 : index
    %c0_15 = arith.constant 0 : index
    %20 = vector.load %arg1[%c0_14, %c37, %c0_15] : memref<1x328x64xbf16, #tpu.memory_space<vmem>>, vector<1x288x64xbf16>
    %21 = vector.shape_cast %20 : vector<1x288x64xbf16> to vector<288x64xbf16>
    %22 = arith.maximumf %19, %21 : vector<288x64xbf16>
    %c0_16 = arith.constant 0 : index
    %c38 = arith.constant 38 : index
    %c0_17 = arith.constant 0 : index
    %23 = vector.load %arg1[%c0_16, %c38, %c0_17] : memref<1x328x64xbf16, #tpu.memory_space<vmem>>, vector<1x288x64xbf16>
    %24 = vector.shape_cast %23 : vector<1x288x64xbf16> to vector<288x64xbf16>
    %25 = arith.maximumf %22, %24 : vector<288x64xbf16>
    %c0_18 = arith.constant 0 : index
    %c0_19 = arith.constant 0 : index
    %c0_20 = arith.constant 0 : index
    %26 = vector.load %arg2[%c0_18, %c0_19, %c0_20] : memref<1x288x64xbf16, #tpu.memory_space<vmem>>, vector<1x288x64xbf16>
    %27 = vector.shape_cast %26 : vector<1x288x64xbf16> to vector<288x64xbf16>
    %28 = vector.shape_cast %25 : vector<288x64xbf16> to vector<1x288x64xbf16>
    tpu.vector_store %arg2[%c0_18, %c0_19, %c0_20], %28 {strides = array<i32>} : memref<1x288x64xbf16, #tpu.memory_space<vmem>>, vector<1x288x64xbf16>,
    return
  }
  func.func @transform_0(%arg0: i32) -> (i32, i32, i32) {
    %c0_i32 = arith.constant 0 : i32
    %c0_i32_0 = arith.constant 0 : i32
    %c0_i32_1 = arith.constant 0 : i32
    return %arg0, %c0_i32, %c0_i32_0 : i32, i32, i32
  }
  func.func @transform_1(%arg0: i32) -> (i32, i32, i32) {
    %c0_i32 = arith.constant 0 : i32
    %c0_i32_0 = arith.constant 0 : i32
    %c0_i32_1 = arith.constant 0 : i32
    return %arg0, %c0_i32, %c0_i32_0 : i32, i32, i32
  }
}

module attributes {stable_mosaic.version = 11 : i64} {
  func.func @_mm_kernel(%arg0: i32, %arg1: i32, %arg2: memref<128x64xbf16, #tpu.memory_space<vmem>>, %arg3: memref<64x16xbf16, #tpu.memory_space<vmem>>, %arg4: memref<1x16xf32, #tpu.memory_space<vmem>>, %arg5: memref<128x16xbf16, #tpu.memory_space<vmem>>) attributes {dimension_semantics = [#tpu.dimension_semantics<parallel>, #tpu.dimension_semantics<parallel>], iteration_bounds = array<i64: 1, 1>, scalar_prefetch = 0 : i64, scratch_operands = 0 : i64, tpu.core_type = #tpu.core_type<tc>, window_params = [{transform_indices = @transform_0, window_bounds = array<i64: 128, 64>}, {transform_indices = @transform_1, window_bounds = array<i64: 64, 16>}, {transform_indices = @transform_2, window_bounds = array<i64: 1, 16>}, {transform_indices = @transform_3, window_bounds = array<i64: 128, 16>}]} {
    %c0 = arith.constant 0 : index
    %c0_0 = arith.constant 0 : index
    %0 = vector.load %arg2[%c0, %c0_0] : memref<128x64xbf16, #tpu.memory_space<vmem>>, vector<128x64xbf16>
    %c0_1 = arith.constant 0 : index
    %c0_2 = arith.constant 0 : index
    %1 = vector.load %arg3[%c0_1, %c0_2] : memref<64x16xbf16, #tpu.memory_space<vmem>>, vector<64x16xbf16>
    %cst = arith.constant dense<0.000000e+00> : vector<128x16xf32>
    %2 = tpu.matmul %0, %1, %cst {dimension_numbers = #tpu.dot_dimension_numbers<[1], [0], [0], [1], [0, 0, 1, 1], [], []>} : vector<128x64xbf16>, vector<64x16xbf16>, vector<128x16xf32> -> vector<128x16xf32>
    %c0_3 = arith.constant 0 : index
    %c0_4 = arith.constant 0 : index
    %3 = vector.load %arg4[%c0_3, %c0_4] : memref<1x16xf32, #tpu.memory_space<vmem>>, vector<1x16xf32>
    %4 = vector.broadcast %3 : vector<1x16xf32> to vector<128x16xf32>
    %5 = arith.addf %2, %4 : vector<128x16xf32>
    %cst_5 = arith.constant 0.000000e+00 : f32
    %6 = vector.broadcast %cst_5 : f32 to vector<128x16xf32>
    %7 = arith.maximumf %5, %6 : vector<128x16xf32>
    %8 = arith.truncf %7 : vector<128x16xf32> to vector<128x16xbf16>
    %c0_6 = arith.constant 0 : index
    %c0_7 = arith.constant 0 : index
    %9 = vector.load %arg5[%c0_6, %c0_7] : memref<128x16xbf16, #tpu.memory_space<vmem>>, vector<128x16xbf16>
    tpu.vector_store %arg5[%c0_6, %c0_7], %8 {strides = array<i32>} : memref<128x16xbf16, #tpu.memory_space<vmem>>, vector<128x16xbf16>,
    return
  }
  func.func @transform_0(%arg0: i32, %arg1: i32) -> (i32, i32) {
    %c0_i32 = arith.constant 0 : i32
    %c0_i32_0 = arith.constant 0 : i32
    return %arg0, %c0_i32 : i32, i32
  }
  func.func @transform_1(%arg0: i32, %arg1: i32) -> (i32, i32) {
    %c0_i32 = arith.constant 0 : i32
    %c0_i32_0 = arith.constant 0 : i32
    return %c0_i32, %arg1 : i32, i32
  }
  func.func @transform_2(%arg0: i32, %arg1: i32) -> (i32, i32) {
    %c0_i32 = arith.constant 0 : i32
    %c0_i32_0 = arith.constant 0 : i32
    return %c0_i32, %arg1 : i32, i32
  }
  func.func @transform_3(%arg0: i32, %arg1: i32) -> (i32, i32) {
    %c0_i32 = arith.constant 0 : i32
    return %arg0, %arg1 : i32, i32
  }
}

module attributes {stable_mosaic.version = 11 : i64} {
  func.func @_wide_conv_kernel(%arg0: i32, %arg1: memref<1x104x16xbf16, #tpu.memory_space<vmem>>, %arg2: memref<9x16x16xbf16, #tpu.memory_space<vmem>>, %arg3: memref<1x16xf32, #tpu.memory_space<vmem>>, %arg4: memref<1x80x16xbf16, #tpu.memory_space<vmem>>) attributes {dimension_semantics = [#tpu.dimension_semantics<parallel>], iteration_bounds = array<i64: 2>, scalar_prefetch = 0 : i64, scratch_operands = 0 : i64, tpu.core_type = #tpu.core_type<tc>, window_params = [{transform_indices = @transform_0, window_bounds = array<i64: 1, 104, 16>}, {pipeline_mode = #tpu.pipeline_mode<synchronous>, transform_indices = @transform_1, window_bounds = array<i64: 9, 16, 16>}, {pipeline_mode = #tpu.pipeline_mode<synchronous>, transform_indices = @transform_2, window_bounds = array<i64: 1, 16>}, {transform_indices = @transform_3, window_bounds = array<i64: 1, 80, 16>}]} {
    %cst = arith.constant 0.000000e+00 : f32
    %0 = vector.broadcast %cst : f32 to vector<80x16xf32>
    %c0 = arith.constant 0 : index
    %c0_0 = arith.constant 0 : index
    %c0_1 = arith.constant 0 : index
    %1 = vector.load %arg1[%c0, %c0_0, %c0_1] : memref<1x104x16xbf16, #tpu.memory_space<vmem>>, vector<1x80x16xbf16>
    %2 = vector.shape_cast %1 : vector<1x80x16xbf16> to vector<80x16xbf16>
    %c0_2 = arith.constant 0 : index
    %c0_3 = arith.constant 0 : index
    %c0_4 = arith.constant 0 : index
    %3 = vector.load %arg2[%c0_2, %c0_3, %c0_4] : memref<9x16x16xbf16, #tpu.memory_space<vmem>>, vector<1x16x16xbf16>
    %4 = vector.shape_cast %3 : vector<1x16x16xbf16> to vector<16x16xbf16>
    %cst_5 = arith.constant dense<0.000000e+00> : vector<80x16xf32>
    %5 = tpu.matmul %2, %4, %cst_5 {dimension_numbers = #tpu.dot_dimension_numbers<[1], [0], [0], [1], [0, 0, 1, 1], [], []>} : vector<80x16xbf16>, vector<16x16xbf16>, vector<80x16xf32> -> vector<80x16xf32>
    %6 = arith.addf %0, %5 : vector<80x16xf32>
    %c0_6 = arith.constant 0 : index
    %c1 = arith.constant 1 : index
    %c0_7 = arith.constant 0 : index
    %7 = vector.load %arg1[%c0_6, %c1, %c0_7] : memref<1x104x16xbf16, #tpu.memory_space<vmem>>, vector<1x80x16xbf16>
    %8 = vector.shape_cast %7 : vector<1x80x16xbf16> to vector<80x16xbf16>
    %c1_8 = arith.constant 1 : index
    %c0_9 = arith.constant 0 : index
    %c0_10 = arith.constant 0 : index
    %9 = vector.load %arg2[%c1_8, %c0_9, %c0_10] : memref<9x16x16xbf16, #tpu.memory_space<vmem>>, vector<1x16x16xbf16>
    %10 = vector.shape_cast %9 : vector<1x16x16xbf16> to vector<16x16xbf16>
    %cst_11 = arith.constant dense<0.000000e+00> : vector<80x16xf32>
    %11 = tpu.matmul %8, %10, %cst_11 {dimension_numbers = #tpu.dot_dimension_numbers<[1], [0], [0], [1], [0, 0, 1, 1], [], []>} : vector<80x16xbf16>, vector<16x16xbf16>, vector<80x16xf32> -> vector<80x16xf32>
    %12 = arith.addf %6, %11 : vector<80x16xf32>
    %c0_12 = arith.constant 0 : index
    %c2 = arith.constant 2 : index
    %c0_13 = arith.constant 0 : index
    %13 = vector.load %arg1[%c0_12, %c2, %c0_13] : memref<1x104x16xbf16, #tpu.memory_space<vmem>>, vector<1x80x16xbf16>
    %14 = vector.shape_cast %13 : vector<1x80x16xbf16> to vector<80x16xbf16>
    %c2_14 = arith.constant 2 : index
    %c0_15 = arith.constant 0 : index
    %c0_16 = arith.constant 0 : index
    %15 = vector.load %arg2[%c2_14, %c0_15, %c0_16] : memref<9x16x16xbf16, #tpu.memory_space<vmem>>, vector<1x16x16xbf16>
    %16 = vector.shape_cast %15 : vector<1x16x16xbf16> to vector<16x16xbf16>
    %cst_17 = arith.constant dense<0.000000e+00> : vector<80x16xf32>
    %17 = tpu.matmul %14, %16, %cst_17 {dimension_numbers = #tpu.dot_dimension_numbers<[1], [0], [0], [1], [0, 0, 1, 1], [], []>} : vector<80x16xbf16>, vector<16x16xbf16>, vector<80x16xf32> -> vector<80x16xf32>
    %18 = arith.addf %12, %17 : vector<80x16xf32>
    %c0_18 = arith.constant 0 : index
    %c10 = arith.constant 10 : index
    %c0_19 = arith.constant 0 : index
    %19 = vector.load %arg1[%c0_18, %c10, %c0_19] : memref<1x104x16xbf16, #tpu.memory_space<vmem>>, vector<1x80x16xbf16>
    %20 = vector.shape_cast %19 : vector<1x80x16xbf16> to vector<80x16xbf16>
    %c3 = arith.constant 3 : index
    %c0_20 = arith.constant 0 : index
    %c0_21 = arith.constant 0 : index
    %21 = vector.load %arg2[%c3, %c0_20, %c0_21] : memref<9x16x16xbf16, #tpu.memory_space<vmem>>, vector<1x16x16xbf16>
    %22 = vector.shape_cast %21 : vector<1x16x16xbf16> to vector<16x16xbf16>
    %cst_22 = arith.constant dense<0.000000e+00> : vector<80x16xf32>
    %23 = tpu.matmul %20, %22, %cst_22 {dimension_numbers = #tpu.dot_dimension_numbers<[1], [0], [0], [1], [0, 0, 1, 1], [], []>} : vector<80x16xbf16>, vector<16x16xbf16>, vector<80x16xf32> -> vector<80x16xf32>
    %24 = arith.addf %18, %23 : vector<80x16xf32>
    %c0_23 = arith.constant 0 : index
    %c11 = arith.constant 11 : index
    %c0_24 = arith.constant 0 : index
    %25 = vector.load %arg1[%c0_23, %c11, %c0_24] : memref<1x104x16xbf16, #tpu.memory_space<vmem>>, vector<1x80x16xbf16>
    %26 = vector.shape_cast %25 : vector<1x80x16xbf16> to vector<80x16xbf16>
    %c4 = arith.constant 4 : index
    %c0_25 = arith.constant 0 : index
    %c0_26 = arith.constant 0 : index
    %27 = vector.load %arg2[%c4, %c0_25, %c0_26] : memref<9x16x16xbf16, #tpu.memory_space<vmem>>, vector<1x16x16xbf16>
    %28 = vector.shape_cast %27 : vector<1x16x16xbf16> to vector<16x16xbf16>
    %cst_27 = arith.constant dense<0.000000e+00> : vector<80x16xf32>
    %29 = tpu.matmul %26, %28, %cst_27 {dimension_numbers = #tpu.dot_dimension_numbers<[1], [0], [0], [1], [0, 0, 1, 1], [], []>} : vector<80x16xbf16>, vector<16x16xbf16>, vector<80x16xf32> -> vector<80x16xf32>
    %30 = arith.addf %24, %29 : vector<80x16xf32>
    %c0_28 = arith.constant 0 : index
    %c12 = arith.constant 12 : index
    %c0_29 = arith.constant 0 : index
    %31 = vector.load %arg1[%c0_28, %c12, %c0_29] : memref<1x104x16xbf16, #tpu.memory_space<vmem>>, vector<1x80x16xbf16>
    %32 = vector.shape_cast %31 : vector<1x80x16xbf16> to vector<80x16xbf16>
    %c5 = arith.constant 5 : index
    %c0_30 = arith.constant 0 : index
    %c0_31 = arith.constant 0 : index
    %33 = vector.load %arg2[%c5, %c0_30, %c0_31] : memref<9x16x16xbf16, #tpu.memory_space<vmem>>, vector<1x16x16xbf16>
    %34 = vector.shape_cast %33 : vector<1x16x16xbf16> to vector<16x16xbf16>
    %cst_32 = arith.constant dense<0.000000e+00> : vector<80x16xf32>
    %35 = tpu.matmul %32, %34, %cst_32 {dimension_numbers = #tpu.dot_dimension_numbers<[1], [0], [0], [1], [0, 0, 1, 1], [], []>} : vector<80x16xbf16>, vector<16x16xbf16>, vector<80x16xf32> -> vector<80x16xf32>
    %36 = arith.addf %30, %35 : vector<80x16xf32>
    %c0_33 = arith.constant 0 : index
    %c20 = arith.constant 20 : index
    %c0_34 = arith.constant 0 : index
    %37 = vector.load %arg1[%c0_33, %c20, %c0_34] : memref<1x104x16xbf16, #tpu.memory_space<vmem>>, vector<1x80x16xbf16>
    %38 = vector.shape_cast %37 : vector<1x80x16xbf16> to vector<80x16xbf16>
    %c6 = arith.constant 6 : index
    %c0_35 = arith.constant 0 : index
    %c0_36 = arith.constant 0 : index
    %39 = vector.load %arg2[%c6, %c0_35, %c0_36] : memref<9x16x16xbf16, #tpu.memory_space<vmem>>, vector<1x16x16xbf16>
    %40 = vector.shape_cast %39 : vector<1x16x16xbf16> to vector<16x16xbf16>
    %cst_37 = arith.constant dense<0.000000e+00> : vector<80x16xf32>
    %41 = tpu.matmul %38, %40, %cst_37 {dimension_numbers = #tpu.dot_dimension_numbers<[1], [0], [0], [1], [0, 0, 1, 1], [], []>} : vector<80x16xbf16>, vector<16x16xbf16>, vector<80x16xf32> -> vector<80x16xf32>
    %42 = arith.addf %36, %41 : vector<80x16xf32>
    %c0_38 = arith.constant 0 : index
    %c21 = arith.constant 21 : index
    %c0_39 = arith.constant 0 : index
    %43 = vector.load %arg1[%c0_38, %c21, %c0_39] : memref<1x104x16xbf16, #tpu.memory_space<vmem>>, vector<1x80x16xbf16>
    %44 = vector.shape_cast %43 : vector<1x80x16xbf16> to vector<80x16xbf16>
    %c7 = arith.constant 7 : index
    %c0_40 = arith.constant 0 : index
    %c0_41 = arith.constant 0 : index
    %45 = vector.load %arg2[%c7, %c0_40, %c0_41] : memref<9x16x16xbf16, #tpu.memory_space<vmem>>, vector<1x16x16xbf16>
    %46 = vector.shape_cast %45 : vector<1x16x16xbf16> to vector<16x16xbf16>
    %cst_42 = arith.constant dense<0.000000e+00> : vector<80x16xf32>
    %47 = tpu.matmul %44, %46, %cst_42 {dimension_numbers = #tpu.dot_dimension_numbers<[1], [0], [0], [1], [0, 0, 1, 1], [], []>} : vector<80x16xbf16>, vector<16x16xbf16>, vector<80x16xf32> -> vector<80x16xf32>
    %48 = arith.addf %42, %47 : vector<80x16xf32>
    %c0_43 = arith.constant 0 : index
    %c22 = arith.constant 22 : index
    %c0_44 = arith.constant 0 : index
    %49 = vector.load %arg1[%c0_43, %c22, %c0_44] : memref<1x104x16xbf16, #tpu.memory_space<vmem>>, vector<1x80x16xbf16>
    %50 = vector.shape_cast %49 : vector<1x80x16xbf16> to vector<80x16xbf16>
    %c8 = arith.constant 8 : index
    %c0_45 = arith.constant 0 : index
    %c0_46 = arith.constant 0 : index
    %51 = vector.load %arg2[%c8, %c0_45, %c0_46] : memref<9x16x16xbf16, #tpu.memory_space<vmem>>, vector<1x16x16xbf16>
    %52 = vector.shape_cast %51 : vector<1x16x16xbf16> to vector<16x16xbf16>
    %cst_47 = arith.constant dense<0.000000e+00> : vector<80x16xf32>
    %53 = tpu.matmul %50, %52, %cst_47 {dimension_numbers = #tpu.dot_dimension_numbers<[1], [0], [0], [1], [0, 0, 1, 1], [], []>} : vector<80x16xbf16>, vector<16x16xbf16>, vector<80x16xf32> -> vector<80x16xf32>
    %54 = arith.addf %48, %53 : vector<80x16xf32>
    %c0_48 = arith.constant 0 : index
    %c0_49 = arith.constant 0 : index
    %55 = vector.load %arg3[%c0_48, %c0_49] : memref<1x16xf32, #tpu.memory_space<vmem>>, vector<1x16xf32>
    %56 = vector.broadcast %55 : vector<1x16xf32> to vector<80x16xf32>
    %57 = arith.addf %54, %56 : vector<80x16xf32>
    %cst_50 = arith.constant 0.000000e+00 : f32
    %58 = vector.broadcast %cst_50 : f32 to vector<80x16xf32>
    %59 = arith.maximumf %57, %58 : vector<80x16xf32>
    %60 = arith.truncf %59 : vector<80x16xf32> to vector<80x16xbf16>
    %c0_51 = arith.constant 0 : index
    %c0_52 = arith.constant 0 : index
    %c0_53 = arith.constant 0 : index
    %61 = vector.load %arg4[%c0_51, %c0_52, %c0_53] : memref<1x80x16xbf16, #tpu.memory_space<vmem>>, vector<1x80x16xbf16>
    %62 = vector.shape_cast %61 : vector<1x80x16xbf16> to vector<80x16xbf16>
    %63 = vector.shape_cast %60 : vector<80x16xbf16> to vector<1x80x16xbf16>
    tpu.vector_store %arg4[%c0_51, %c0_52, %c0_53], %63 {strides = array<i32>} : memref<1x80x16xbf16, #tpu.memory_space<vmem>>, vector<1x80x16xbf16>,
    return
  }
  func.func @transform_0(%arg0: i32) -> (i32, i32, i32) {
    %c0_i32 = arith.constant 0 : i32
    %c0_i32_0 = arith.constant 0 : i32
    %c0_i32_1 = arith.constant 0 : i32
    return %arg0, %c0_i32, %c0_i32_0 : i32, i32, i32
  }
  func.func @transform_1(%arg0: i32) -> (i32, i32, i32) {
    %c0_i32 = arith.constant 0 : i32
    %c0_i32_0 = arith.constant 0 : i32
    %c0_i32_1 = arith.constant 0 : i32
    %c0_i32_2 = arith.constant 0 : i32
    return %c0_i32, %c0_i32_0, %c0_i32_1 : i32, i32, i32
  }
  func.func @transform_2(%arg0: i32) -> (i32, i32) {
    %c0_i32 = arith.constant 0 : i32
    %c0_i32_0 = arith.constant 0 : i32
    %c0_i32_1 = arith.constant 0 : i32
    return %c0_i32, %c0_i32_0 : i32, i32
  }
  func.func @transform_3(%arg0: i32) -> (i32, i32, i32) {
    %c0_i32 = arith.constant 0 : i32
    %c0_i32_0 = arith.constant 0 : i32
    %c0_i32_1 = arith.constant 0 : i32
    return %arg0, %c0_i32, %c0_i32_0 : i32, i32, i32
  }
}

module attributes {stable_mosaic.version = 11 : i64} {
  func.func @_mm_res_kernel(%arg0: i32, %arg1: i32, %arg2: memref<128x16xbf16, #tpu.memory_space<vmem>>, %arg3: memref<16x64xbf16, #tpu.memory_space<vmem>>, %arg4: memref<1x64xf32, #tpu.memory_space<vmem>>, %arg5: memref<128x64xbf16, #tpu.memory_space<vmem>>, %arg6: memref<128x64xbf16, #tpu.memory_space<vmem>>) attributes {dimension_semantics = [#tpu.dimension_semantics<parallel>, #tpu.dimension_semantics<parallel>], iteration_bounds = array<i64: 1, 1>, scalar_prefetch = 0 : i64, scratch_operands = 0 : i64, tpu.core_type = #tpu.core_type<tc>, window_params = [{transform_indices = @transform_0, window_bounds = array<i64: 128, 16>}, {transform_indices = @transform_1, window_bounds = array<i64: 16, 64>}, {transform_indices = @transform_2, window_bounds = array<i64: 1, 64>}, {transform_indices = @transform_3, window_bounds = array<i64: 128, 64>}, {transform_indices = @transform_4, window_bounds = array<i64: 128, 64>}]} {
    %c0 = arith.constant 0 : index
    %c0_0 = arith.constant 0 : index
    %0 = vector.load %arg2[%c0, %c0_0] : memref<128x16xbf16, #tpu.memory_space<vmem>>, vector<128x16xbf16>
    %c0_1 = arith.constant 0 : index
    %c0_2 = arith.constant 0 : index
    %1 = vector.load %arg3[%c0_1, %c0_2] : memref<16x64xbf16, #tpu.memory_space<vmem>>, vector<16x64xbf16>
    %cst = arith.constant dense<0.000000e+00> : vector<128x64xf32>
    %2 = tpu.matmul %0, %1, %cst {dimension_numbers = #tpu.dot_dimension_numbers<[1], [0], [0], [1], [0, 0, 1, 1], [], []>} : vector<128x16xbf16>, vector<16x64xbf16>, vector<128x64xf32> -> vector<128x64xf32>
    %c0_3 = arith.constant 0 : index
    %c0_4 = arith.constant 0 : index
    %3 = vector.load %arg4[%c0_3, %c0_4] : memref<1x64xf32, #tpu.memory_space<vmem>>, vector<1x64xf32>
    %4 = vector.broadcast %3 : vector<1x64xf32> to vector<128x64xf32>
    %5 = arith.addf %2, %4 : vector<128x64xf32>
    %c0_5 = arith.constant 0 : index
    %c0_6 = arith.constant 0 : index
    %6 = vector.load %arg5[%c0_5, %c0_6] : memref<128x64xbf16, #tpu.memory_space<vmem>>, vector<128x64xbf16>
    %7 = arith.extf %6 : vector<128x64xbf16> to vector<128x64xf32>
    %8 = arith.addf %5, %7 : vector<128x64xf32>
    %cst_7 = arith.constant 0.000000e+00 : f32
    %9 = vector.broadcast %cst_7 : f32 to vector<128x64xf32>
    %10 = arith.maximumf %8, %9 : vector<128x64xf32>
    %11 = arith.truncf %10 : vector<128x64xf32> to vector<128x64xbf16>
    %c0_8 = arith.constant 0 : index
    %c0_9 = arith.constant 0 : index
    %12 = vector.load %arg6[%c0_8, %c0_9] : memref<128x64xbf16, #tpu.memory_space<vmem>>, vector<128x64xbf16>
    tpu.vector_store %arg6[%c0_8, %c0_9], %11 {strides = array<i32>} : memref<128x64xbf16, #tpu.memory_space<vmem>>, vector<128x64xbf16>,
    return
  }
  func.func @transform_0(%arg0: i32, %arg1: i32) -> (i32, i32) {
    %c0_i32 = arith.constant 0 : i32
    %c0_i32_0 = arith.constant 0 : i32
    return %arg0, %c0_i32 : i32, i32
  }
  func.func @transform_1(%arg0: i32, %arg1: i32) -> (i32, i32) {
    %c0_i32 = arith.constant 0 : i32
    %c0_i32_0 = arith.constant 0 : i32
    return %c0_i32, %arg1 : i32, i32
  }
  func.func @transform_2(%arg0: i32, %arg1: i32) -> (i32, i32) {
    %c0_i32 = arith.constant 0 : i32
    %c0_i32_0 = arith.constant 0 : i32
    return %c0_i32, %arg1 : i32, i32
  }
  func.func @transform_3(%arg0: i32, %arg1: i32) -> (i32, i32) {
    %c0_i32 = arith.constant 0 : i32
    return %arg0, %arg1 : i32, i32
  }
  func.func @transform_4(%arg0: i32, %arg1: i32) -> (i32, i32) {
    %c0_i32 = arith.constant 0 : i32
    return %arg0, %arg1 : i32, i32
  }
}

module attributes {stable_mosaic.version = 11 : i64} {
  func.func @_mm_kernel(%arg0: i32, %arg1: i32, %arg2: memref<128x64xbf16, #tpu.memory_space<vmem>>, %arg3: memref<64x32xbf16, #tpu.memory_space<vmem>>, %arg4: memref<1x32xf32, #tpu.memory_space<vmem>>, %arg5: memref<128x32xbf16, #tpu.memory_space<vmem>>) attributes {dimension_semantics = [#tpu.dimension_semantics<parallel>, #tpu.dimension_semantics<parallel>], iteration_bounds = array<i64: 1, 1>, scalar_prefetch = 0 : i64, scratch_operands = 0 : i64, tpu.core_type = #tpu.core_type<tc>, window_params = [{transform_indices = @transform_0, window_bounds = array<i64: 128, 64>}, {transform_indices = @transform_1, window_bounds = array<i64: 64, 32>}, {transform_indices = @transform_2, window_bounds = array<i64: 1, 32>}, {transform_indices = @transform_3, window_bounds = array<i64: 128, 32>}]} {
    %c0 = arith.constant 0 : index
    %c0_0 = arith.constant 0 : index
    %0 = vector.load %arg2[%c0, %c0_0] : memref<128x64xbf16, #tpu.memory_space<vmem>>, vector<128x64xbf16>
    %c0_1 = arith.constant 0 : index
    %c0_2 = arith.constant 0 : index
    %1 = vector.load %arg3[%c0_1, %c0_2] : memref<64x32xbf16, #tpu.memory_space<vmem>>, vector<64x32xbf16>
    %cst = arith.constant dense<0.000000e+00> : vector<128x32xf32>
    %2 = tpu.matmul %0, %1, %cst {dimension_numbers = #tpu.dot_dimension_numbers<[1], [0], [0], [1], [0, 0, 1, 1], [], []>} : vector<128x64xbf16>, vector<64x32xbf16>, vector<128x32xf32> -> vector<128x32xf32>
    %c0_3 = arith.constant 0 : index
    %c0_4 = arith.constant 0 : index
    %3 = vector.load %arg4[%c0_3, %c0_4] : memref<1x32xf32, #tpu.memory_space<vmem>>, vector<1x32xf32>
    %4 = vector.broadcast %3 : vector<1x32xf32> to vector<128x32xf32>
    %5 = arith.addf %2, %4 : vector<128x32xf32>
    %cst_5 = arith.constant 0.000000e+00 : f32
    %6 = vector.broadcast %cst_5 : f32 to vector<128x32xf32>
    %7 = arith.maximumf %5, %6 : vector<128x32xf32>
    %8 = arith.truncf %7 : vector<128x32xf32> to vector<128x32xbf16>
    %c0_6 = arith.constant 0 : index
    %c0_7 = arith.constant 0 : index
    %9 = vector.load %arg5[%c0_6, %c0_7] : memref<128x32xbf16, #tpu.memory_space<vmem>>, vector<128x32xbf16>
    tpu.vector_store %arg5[%c0_6, %c0_7], %8 {strides = array<i32>} : memref<128x32xbf16, #tpu.memory_space<vmem>>, vector<128x32xbf16>,
    return
  }
  func.func @transform_0(%arg0: i32, %arg1: i32) -> (i32, i32) {
    %c0_i32 = arith.constant 0 : i32
    %c0_i32_0 = arith.constant 0 : i32
    return %arg0, %c0_i32 : i32, i32
  }
  func.func @transform_1(%arg0: i32, %arg1: i32) -> (i32, i32) {
    %c0_i32 = arith.constant 0 : i32
    %c0_i32_0 = arith.constant 0 : i32
    return %c0_i32, %arg1 : i32, i32
  }
  func.func @transform_2(%arg0: i32, %arg1: i32) -> (i32, i32) {
    %c0_i32 = arith.constant 0 : i32
    %c0_i32_0 = arith.constant 0 : i32
    return %c0_i32, %arg1 : i32, i32
  }
  func.func @transform_3(%arg0: i32, %arg1: i32) -> (i32, i32) {
    %c0_i32 = arith.constant 0 : i32
    return %arg0, %arg1 : i32, i32
  }
}

module attributes {stable_mosaic.version = 11 : i64} {
  func.func @_mm_res_kernel(%arg0: i32, %arg1: i32, %arg2: memref<32x32xbf16, #tpu.memory_space<vmem>>, %arg3: memref<32x128xbf16, #tpu.memory_space<vmem>>, %arg4: memref<1x128xf32, #tpu.memory_space<vmem>>, %arg5: memref<32x128xbf16, #tpu.memory_space<vmem>>, %arg6: memref<32x128xbf16, #tpu.memory_space<vmem>>) attributes {dimension_semantics = [#tpu.dimension_semantics<parallel>, #tpu.dimension_semantics<parallel>], iteration_bounds = array<i64: 1, 1>, scalar_prefetch = 0 : i64, scratch_operands = 0 : i64, tpu.core_type = #tpu.core_type<tc>, window_params = [{transform_indices = @transform_0, window_bounds = array<i64: 32, 32>}, {transform_indices = @transform_1, window_bounds = array<i64: 32, 128>}, {transform_indices = @transform_2, window_bounds = array<i64: 1, 128>}, {transform_indices = @transform_3, window_bounds = array<i64: 32, 128>}, {transform_indices = @transform_4, window_bounds = array<i64: 32, 128>}]} {
    %c0 = arith.constant 0 : index
    %c0_0 = arith.constant 0 : index
    %0 = vector.load %arg2[%c0, %c0_0] : memref<32x32xbf16, #tpu.memory_space<vmem>>, vector<32x32xbf16>
    %c0_1 = arith.constant 0 : index
    %c0_2 = arith.constant 0 : index
    %1 = vector.load %arg3[%c0_1, %c0_2] : memref<32x128xbf16, #tpu.memory_space<vmem>>, vector<32x128xbf16>
    %cst = arith.constant dense<0.000000e+00> : vector<32x128xf32>
    %2 = tpu.matmul %0, %1, %cst {dimension_numbers = #tpu.dot_dimension_numbers<[1], [0], [0], [1], [0, 0, 1, 1], [], []>} : vector<32x32xbf16>, vector<32x128xbf16>, vector<32x128xf32> -> vector<32x128xf32>
    %c0_3 = arith.constant 0 : index
    %c0_4 = arith.constant 0 : index
    %3 = vector.load %arg4[%c0_3, %c0_4] : memref<1x128xf32, #tpu.memory_space<vmem>>, vector<1x128xf32>
    %4 = vector.broadcast %3 : vector<1x128xf32> to vector<32x128xf32>
    %5 = arith.addf %2, %4 : vector<32x128xf32>
    %c0_5 = arith.constant 0 : index
    %c0_6 = arith.constant 0 : index
    %6 = vector.load %arg5[%c0_5, %c0_6] : memref<32x128xbf16, #tpu.memory_space<vmem>>, vector<32x128xbf16>
    %7 = arith.extf %6 : vector<32x128xbf16> to vector<32x128xf32>
    %8 = arith.addf %5, %7 : vector<32x128xf32>
    %cst_7 = arith.constant 0.000000e+00 : f32
    %9 = vector.broadcast %cst_7 : f32 to vector<32x128xf32>
    %10 = arith.maximumf %8, %9 : vector<32x128xf32>
    %11 = arith.truncf %10 : vector<32x128xf32> to vector<32x128xbf16>
    %c0_8 = arith.constant 0 : index
    %c0_9 = arith.constant 0 : index
    %12 = vector.load %arg6[%c0_8, %c0_9] : memref<32x128xbf16, #tpu.memory_space<vmem>>, vector<32x128xbf16>
    tpu.vector_store %arg6[%c0_8, %c0_9], %11 {strides = array<i32>} : memref<32x128xbf16, #tpu.memory_space<vmem>>, vector<32x128xbf16>,
    return
  }
  func.func @transform_0(%arg0: i32, %arg1: i32) -> (i32, i32) {
    %c0_i32 = arith.constant 0 : i32
    %c0_i32_0 = arith.constant 0 : i32
    return %arg0, %c0_i32 : i32, i32
  }
  func.func @transform_1(%arg0: i32, %arg1: i32) -> (i32, i32) {
    %c0_i32 = arith.constant 0 : i32
    %c0_i32_0 = arith.constant 0 : i32
    return %c0_i32, %arg1 : i32, i32
  }
  func.func @transform_2(%arg0: i32, %arg1: i32) -> (i32, i32) {
    %c0_i32 = arith.constant 0 : i32
    %c0_i32_0 = arith.constant 0 : i32
    return %c0_i32, %arg1 : i32, i32
  }
  func.func @transform_3(%arg0: i32, %arg1: i32) -> (i32, i32) {
    %c0_i32 = arith.constant 0 : i32
    return %arg0, %arg1 : i32, i32
  }
  func.func @transform_4(%arg0: i32, %arg1: i32) -> (i32, i32) {
    %c0_i32 = arith.constant 0 : i32
    return %arg0, %arg1 : i32, i32
  }
}

module attributes {stable_mosaic.version = 11 : i64} {
  func.func @_mm_kernel(%arg0: i32, %arg1: i32, %arg2: memref<32x288xbf16, #tpu.memory_space<vmem>>, %arg3: memref<288x32xbf16, #tpu.memory_space<vmem>>, %arg4: memref<1x32xf32, #tpu.memory_space<vmem>>, %arg5: memref<32x32xbf16, #tpu.memory_space<vmem>>) attributes {dimension_semantics = [#tpu.dimension_semantics<parallel>, #tpu.dimension_semantics<parallel>], iteration_bounds = array<i64: 1, 1>, scalar_prefetch = 0 : i64, scratch_operands = 0 : i64, tpu.core_type = #tpu.core_type<tc>, window_params = [{transform_indices = @transform_0, window_bounds = array<i64: 32, 288>}, {transform_indices = @transform_1, window_bounds = array<i64: 288, 32>}, {transform_indices = @transform_2, window_bounds = array<i64: 1, 32>}, {transform_indices = @transform_3, window_bounds = array<i64: 32, 32>}]} {
    %c0 = arith.constant 0 : index
    %c0_0 = arith.constant 0 : index
    %0 = vector.load %arg2[%c0, %c0_0] : memref<32x288xbf16, #tpu.memory_space<vmem>>, vector<32x288xbf16>
    %c0_1 = arith.constant 0 : index
    %c0_2 = arith.constant 0 : index
    %1 = vector.load %arg3[%c0_1, %c0_2] : memref<288x32xbf16, #tpu.memory_space<vmem>>, vector<288x32xbf16>
    %cst = arith.constant dense<0.000000e+00> : vector<32x32xf32>
    %2 = tpu.matmul %0, %1, %cst {dimension_numbers = #tpu.dot_dimension_numbers<[1], [0], [0], [1], [0, 0, 1, 1], [], []>} : vector<32x288xbf16>, vector<288x32xbf16>, vector<32x32xf32> -> vector<32x32xf32>
    %c0_3 = arith.constant 0 : index
    %c0_4 = arith.constant 0 : index
    %3 = vector.load %arg4[%c0_3, %c0_4] : memref<1x32xf32, #tpu.memory_space<vmem>>, vector<1x32xf32>
    %4 = vector.broadcast %3 : vector<1x32xf32> to vector<32x32xf32>
    %5 = arith.addf %2, %4 : vector<32x32xf32>
    %cst_5 = arith.constant 0.000000e+00 : f32
    %6 = vector.broadcast %cst_5 : f32 to vector<32x32xf32>
    %7 = arith.maximumf %5, %6 : vector<32x32xf32>
    %8 = arith.truncf %7 : vector<32x32xf32> to vector<32x32xbf16>
    %c0_6 = arith.constant 0 : index
    %c0_7 = arith.constant 0 : index
    %9 = vector.load %arg5[%c0_6, %c0_7] : memref<32x32xbf16, #tpu.memory_space<vmem>>, vector<32x32xbf16>
    tpu.vector_store %arg5[%c0_6, %c0_7], %8 {strides = array<i32>} : memref<32x32xbf16, #tpu.memory_space<vmem>>, vector<32x32xbf16>,
    return
  }
  func.func @transform_0(%arg0: i32, %arg1: i32) -> (i32, i32) {
    %c0_i32 = arith.constant 0 : i32
    %c0_i32_0 = arith.constant 0 : i32
    return %arg0, %c0_i32 : i32, i32
  }
  func.func @transform_1(%arg0: i32, %arg1: i32) -> (i32, i32) {
    %c0_i32 = arith.constant 0 : i32
    %c0_i32_0 = arith.constant 0 : i32
    return %c0_i32, %arg1 : i32, i32
  }
  func.func @transform_2(%arg0: i32, %arg1: i32) -> (i32, i32) {
    %c0_i32 = arith.constant 0 : i32
    %c0_i32_0 = arith.constant 0 : i32
    return %c0_i32, %arg1 : i32, i32
  }
  func.func @transform_3(%arg0: i32, %arg1: i32) -> (i32, i32) {
    %c0_i32 = arith.constant 0 : i32
    return %arg0, %arg1 : i32, i32
  }
}

module attributes {stable_mosaic.version = 11 : i64} {
  func.func @_mm_kernel(%arg0: i32, %arg1: i32, %arg2: memref<32x64xbf16, #tpu.memory_space<vmem>>, %arg3: memref<64x128xbf16, #tpu.memory_space<vmem>>, %arg4: memref<1x128xf32, #tpu.memory_space<vmem>>, %arg5: memref<32x128xbf16, #tpu.memory_space<vmem>>) attributes {dimension_semantics = [#tpu.dimension_semantics<parallel>, #tpu.dimension_semantics<parallel>], iteration_bounds = array<i64: 1, 1>, scalar_prefetch = 0 : i64, scratch_operands = 0 : i64, tpu.core_type = #tpu.core_type<tc>, window_params = [{transform_indices = @transform_0, window_bounds = array<i64: 32, 64>}, {transform_indices = @transform_1, window_bounds = array<i64: 64, 128>}, {transform_indices = @transform_2, window_bounds = array<i64: 1, 128>}, {transform_indices = @transform_3, window_bounds = array<i64: 32, 128>}]} {
    %c0 = arith.constant 0 : index
    %c0_0 = arith.constant 0 : index
    %0 = vector.load %arg2[%c0, %c0_0] : memref<32x64xbf16, #tpu.memory_space<vmem>>, vector<32x64xbf16>
    %c0_1 = arith.constant 0 : index
    %c0_2 = arith.constant 0 : index
    %1 = vector.load %arg3[%c0_1, %c0_2] : memref<64x128xbf16, #tpu.memory_space<vmem>>, vector<64x128xbf16>
    %cst = arith.constant dense<0.000000e+00> : vector<32x128xf32>
    %2 = tpu.matmul %0, %1, %cst {dimension_numbers = #tpu.dot_dimension_numbers<[1], [0], [0], [1], [0, 0, 1, 1], [], []>} : vector<32x64xbf16>, vector<64x128xbf16>, vector<32x128xf32> -> vector<32x128xf32>
    %c0_3 = arith.constant 0 : index
    %c0_4 = arith.constant 0 : index
    %3 = vector.load %arg4[%c0_3, %c0_4] : memref<1x128xf32, #tpu.memory_space<vmem>>, vector<1x128xf32>
    %4 = vector.broadcast %3 : vector<1x128xf32> to vector<32x128xf32>
    %5 = arith.addf %2, %4 : vector<32x128xf32>
    %6 = arith.truncf %5 : vector<32x128xf32> to vector<32x128xbf16>
    %c0_5 = arith.constant 0 : index
    %c0_6 = arith.constant 0 : index
    %7 = vector.load %arg5[%c0_5, %c0_6] : memref<32x128xbf16, #tpu.memory_space<vmem>>, vector<32x128xbf16>
    tpu.vector_store %arg5[%c0_5, %c0_6], %6 {strides = array<i32>} : memref<32x128xbf16, #tpu.memory_space<vmem>>, vector<32x128xbf16>,
    return
  }
  func.func @transform_0(%arg0: i32, %arg1: i32) -> (i32, i32) {
    %c0_i32 = arith.constant 0 : i32
    %c0_i32_0 = arith.constant 0 : i32
    return %arg0, %c0_i32 : i32, i32
  }
  func.func @transform_1(%arg0: i32, %arg1: i32) -> (i32, i32) {
    %c0_i32 = arith.constant 0 : i32
    %c0_i32_0 = arith.constant 0 : i32
    return %c0_i32, %arg1 : i32, i32
  }
  func.func @transform_2(%arg0: i32, %arg1: i32) -> (i32, i32) {
    %c0_i32 = arith.constant 0 : i32
    %c0_i32_0 = arith.constant 0 : i32
    return %c0_i32, %arg1 : i32, i32
  }
  func.func @transform_3(%arg0: i32, %arg1: i32) -> (i32, i32) {
    %c0_i32 = arith.constant 0 : i32
    return %arg0, %arg1 : i32, i32
  }
}

module attributes {stable_mosaic.version = 11 : i64} {
  func.func @_mm_kernel(%arg0: i32, %arg1: i32, %arg2: memref<32x128xbf16, #tpu.memory_space<vmem>>, %arg3: memref<128x32xbf16, #tpu.memory_space<vmem>>, %arg4: memref<1x32xf32, #tpu.memory_space<vmem>>, %arg5: memref<32x32xbf16, #tpu.memory_space<vmem>>) attributes {dimension_semantics = [#tpu.dimension_semantics<parallel>, #tpu.dimension_semantics<parallel>], iteration_bounds = array<i64: 1, 1>, scalar_prefetch = 0 : i64, scratch_operands = 0 : i64, tpu.core_type = #tpu.core_type<tc>, window_params = [{transform_indices = @transform_0, window_bounds = array<i64: 32, 128>}, {transform_indices = @transform_1, window_bounds = array<i64: 128, 32>}, {transform_indices = @transform_2, window_bounds = array<i64: 1, 32>}, {transform_indices = @transform_3, window_bounds = array<i64: 32, 32>}]} {
    %c0 = arith.constant 0 : index
    %c0_0 = arith.constant 0 : index
    %0 = vector.load %arg2[%c0, %c0_0] : memref<32x128xbf16, #tpu.memory_space<vmem>>, vector<32x128xbf16>
    %c0_1 = arith.constant 0 : index
    %c0_2 = arith.constant 0 : index
    %1 = vector.load %arg3[%c0_1, %c0_2] : memref<128x32xbf16, #tpu.memory_space<vmem>>, vector<128x32xbf16>
    %cst = arith.constant dense<0.000000e+00> : vector<32x32xf32>
    %2 = tpu.matmul %0, %1, %cst {dimension_numbers = #tpu.dot_dimension_numbers<[1], [0], [0], [1], [0, 0, 1, 1], [], []>} : vector<32x128xbf16>, vector<128x32xbf16>, vector<32x32xf32> -> vector<32x32xf32>
    %c0_3 = arith.constant 0 : index
    %c0_4 = arith.constant 0 : index
    %3 = vector.load %arg4[%c0_3, %c0_4] : memref<1x32xf32, #tpu.memory_space<vmem>>, vector<1x32xf32>
    %4 = vector.broadcast %3 : vector<1x32xf32> to vector<32x32xf32>
    %5 = arith.addf %2, %4 : vector<32x32xf32>
    %cst_5 = arith.constant 0.000000e+00 : f32
    %6 = vector.broadcast %cst_5 : f32 to vector<32x32xf32>
    %7 = arith.maximumf %5, %6 : vector<32x32xf32>
    %8 = arith.truncf %7 : vector<32x32xf32> to vector<32x32xbf16>
    %c0_6 = arith.constant 0 : index
    %c0_7 = arith.constant 0 : index
    %9 = vector.load %arg5[%c0_6, %c0_7] : memref<32x32xbf16, #tpu.memory_space<vmem>>, vector<32x32xbf16>
    tpu.vector_store %arg5[%c0_6, %c0_7], %8 {strides = array<i32>} : memref<32x32xbf16, #tpu.memory_space<vmem>>, vector<32x32xbf16>,
    return
  }
  func.func @transform_0(%arg0: i32, %arg1: i32) -> (i32, i32) {
    %c0_i32 = arith.constant 0 : i32
    %c0_i32_0 = arith.constant 0 : i32
    return %arg0, %c0_i32 : i32, i32
  }
  func.func @transform_1(%arg0: i32, %arg1: i32) -> (i32, i32) {
    %c0_i32 = arith.constant 0 : i32
    %c0_i32_0 = arith.constant 0 : i32
    return %c0_i32, %arg1 : i32, i32
  }
  func.func @transform_2(%arg0: i32, %arg1: i32) -> (i32, i32) {
    %c0_i32 = arith.constant 0 : i32
    %c0_i32_0 = arith.constant 0 : i32
    return %c0_i32, %arg1 : i32, i32
  }
  func.func @transform_3(%arg0: i32, %arg1: i32) -> (i32, i32) {
    %c0_i32 = arith.constant 0 : i32
    return %arg0, %arg1 : i32, i32
  }
}

module attributes {stable_mosaic.version = 11 : i64} {
  func.func @_wide_conv_kernel(%arg0: i32, %arg1: memref<1x40x32xbf16, #tpu.memory_space<vmem>>, %arg2: memref<9x32x32xbf16, #tpu.memory_space<vmem>>, %arg3: memref<1x32xf32, #tpu.memory_space<vmem>>, %arg4: memref<1x24x32xbf16, #tpu.memory_space<vmem>>) attributes {dimension_semantics = [#tpu.dimension_semantics<parallel>], iteration_bounds = array<i64: 2>, scalar_prefetch = 0 : i64, scratch_operands = 0 : i64, tpu.core_type = #tpu.core_type<tc>, window_params = [{transform_indices = @transform_0, window_bounds = array<i64: 1, 40, 32>}, {pipeline_mode = #tpu.pipeline_mode<synchronous>, transform_indices = @transform_1, window_bounds = array<i64: 9, 32, 32>}, {pipeline_mode = #tpu.pipeline_mode<synchronous>, transform_indices = @transform_2, window_bounds = array<i64: 1, 32>}, {transform_indices = @transform_3, window_bounds = array<i64: 1, 24, 32>}]} {
    %cst = arith.constant 0.000000e+00 : f32
    %0 = vector.broadcast %cst : f32 to vector<24x32xf32>
    %c0 = arith.constant 0 : index
    %c0_0 = arith.constant 0 : index
    %c0_1 = arith.constant 0 : index
    %1 = vector.load %arg1[%c0, %c0_0, %c0_1] : memref<1x40x32xbf16, #tpu.memory_space<vmem>>, vector<1x24x32xbf16>
    %2 = vector.shape_cast %1 : vector<1x24x32xbf16> to vector<24x32xbf16>
    %c0_2 = arith.constant 0 : index
    %c0_3 = arith.constant 0 : index
    %c0_4 = arith.constant 0 : index
    %3 = vector.load %arg2[%c0_2, %c0_3, %c0_4] : memref<9x32x32xbf16, #tpu.memory_space<vmem>>, vector<1x32x32xbf16>
    %4 = vector.shape_cast %3 : vector<1x32x32xbf16> to vector<32x32xbf16>
    %cst_5 = arith.constant dense<0.000000e+00> : vector<24x32xf32>
    %5 = tpu.matmul %2, %4, %cst_5 {dimension_numbers = #tpu.dot_dimension_numbers<[1], [0], [0], [1], [0, 0, 1, 1], [], []>} : vector<24x32xbf16>, vector<32x32xbf16>, vector<24x32xf32> -> vector<24x32xf32>
    %6 = arith.addf %0, %5 : vector<24x32xf32>
    %c0_6 = arith.constant 0 : index
    %c1 = arith.constant 1 : index
    %c0_7 = arith.constant 0 : index
    %7 = vector.load %arg1[%c0_6, %c1, %c0_7] : memref<1x40x32xbf16, #tpu.memory_space<vmem>>, vector<1x24x32xbf16>
    %8 = vector.shape_cast %7 : vector<1x24x32xbf16> to vector<24x32xbf16>
    %c1_8 = arith.constant 1 : index
    %c0_9 = arith.constant 0 : index
    %c0_10 = arith.constant 0 : index
    %9 = vector.load %arg2[%c1_8, %c0_9, %c0_10] : memref<9x32x32xbf16, #tpu.memory_space<vmem>>, vector<1x32x32xbf16>
    %10 = vector.shape_cast %9 : vector<1x32x32xbf16> to vector<32x32xbf16>
    %cst_11 = arith.constant dense<0.000000e+00> : vector<24x32xf32>
    %11 = tpu.matmul %8, %10, %cst_11 {dimension_numbers = #tpu.dot_dimension_numbers<[1], [0], [0], [1], [0, 0, 1, 1], [], []>} : vector<24x32xbf16>, vector<32x32xbf16>, vector<24x32xf32> -> vector<24x32xf32>
    %12 = arith.addf %6, %11 : vector<24x32xf32>
    %c0_12 = arith.constant 0 : index
    %c2 = arith.constant 2 : index
    %c0_13 = arith.constant 0 : index
    %13 = vector.load %arg1[%c0_12, %c2, %c0_13] : memref<1x40x32xbf16, #tpu.memory_space<vmem>>, vector<1x24x32xbf16>
    %14 = vector.shape_cast %13 : vector<1x24x32xbf16> to vector<24x32xbf16>
    %c2_14 = arith.constant 2 : index
    %c0_15 = arith.constant 0 : index
    %c0_16 = arith.constant 0 : index
    %15 = vector.load %arg2[%c2_14, %c0_15, %c0_16] : memref<9x32x32xbf16, #tpu.memory_space<vmem>>, vector<1x32x32xbf16>
    %16 = vector.shape_cast %15 : vector<1x32x32xbf16> to vector<32x32xbf16>
    %cst_17 = arith.constant dense<0.000000e+00> : vector<24x32xf32>
    %17 = tpu.matmul %14, %16, %cst_17 {dimension_numbers = #tpu.dot_dimension_numbers<[1], [0], [0], [1], [0, 0, 1, 1], [], []>} : vector<24x32xbf16>, vector<32x32xbf16>, vector<24x32xf32> -> vector<24x32xf32>
    %18 = arith.addf %12, %17 : vector<24x32xf32>
    %c0_18 = arith.constant 0 : index
    %c6 = arith.constant 6 : index
    %c0_19 = arith.constant 0 : index
    %19 = vector.load %arg1[%c0_18, %c6, %c0_19] : memref<1x40x32xbf16, #tpu.memory_space<vmem>>, vector<1x24x32xbf16>
    %20 = vector.shape_cast %19 : vector<1x24x32xbf16> to vector<24x32xbf16>
    %c3 = arith.constant 3 : index
    %c0_20 = arith.constant 0 : index
    %c0_21 = arith.constant 0 : index
    %21 = vector.load %arg2[%c3, %c0_20, %c0_21] : memref<9x32x32xbf16, #tpu.memory_space<vmem>>, vector<1x32x32xbf16>
    %22 = vector.shape_cast %21 : vector<1x32x32xbf16> to vector<32x32xbf16>
    %cst_22 = arith.constant dense<0.000000e+00> : vector<24x32xf32>
    %23 = tpu.matmul %20, %22, %cst_22 {dimension_numbers = #tpu.dot_dimension_numbers<[1], [0], [0], [1], [0, 0, 1, 1], [], []>} : vector<24x32xbf16>, vector<32x32xbf16>, vector<24x32xf32> -> vector<24x32xf32>
    %24 = arith.addf %18, %23 : vector<24x32xf32>
    %c0_23 = arith.constant 0 : index
    %c7 = arith.constant 7 : index
    %c0_24 = arith.constant 0 : index
    %25 = vector.load %arg1[%c0_23, %c7, %c0_24] : memref<1x40x32xbf16, #tpu.memory_space<vmem>>, vector<1x24x32xbf16>
    %26 = vector.shape_cast %25 : vector<1x24x32xbf16> to vector<24x32xbf16>
    %c4 = arith.constant 4 : index
    %c0_25 = arith.constant 0 : index
    %c0_26 = arith.constant 0 : index
    %27 = vector.load %arg2[%c4, %c0_25, %c0_26] : memref<9x32x32xbf16, #tpu.memory_space<vmem>>, vector<1x32x32xbf16>
    %28 = vector.shape_cast %27 : vector<1x32x32xbf16> to vector<32x32xbf16>
    %cst_27 = arith.constant dense<0.000000e+00> : vector<24x32xf32>
    %29 = tpu.matmul %26, %28, %cst_27 {dimension_numbers = #tpu.dot_dimension_numbers<[1], [0], [0], [1], [0, 0, 1, 1], [], []>} : vector<24x32xbf16>, vector<32x32xbf16>, vector<24x32xf32> -> vector<24x32xf32>
    %30 = arith.addf %24, %29 : vector<24x32xf32>
    %c0_28 = arith.constant 0 : index
    %c8 = arith.constant 8 : index
    %c0_29 = arith.constant 0 : index
    %31 = vector.load %arg1[%c0_28, %c8, %c0_29] : memref<1x40x32xbf16, #tpu.memory_space<vmem>>, vector<1x24x32xbf16>
    %32 = vector.shape_cast %31 : vector<1x24x32xbf16> to vector<24x32xbf16>
    %c5 = arith.constant 5 : index
    %c0_30 = arith.constant 0 : index
    %c0_31 = arith.constant 0 : index
    %33 = vector.load %arg2[%c5, %c0_30, %c0_31] : memref<9x32x32xbf16, #tpu.memory_space<vmem>>, vector<1x32x32xbf16>
    %34 = vector.shape_cast %33 : vector<1x32x32xbf16> to vector<32x32xbf16>
    %cst_32 = arith.constant dense<0.000000e+00> : vector<24x32xf32>
    %35 = tpu.matmul %32, %34, %cst_32 {dimension_numbers = #tpu.dot_dimension_numbers<[1], [0], [0], [1], [0, 0, 1, 1], [], []>} : vector<24x32xbf16>, vector<32x32xbf16>, vector<24x32xf32> -> vector<24x32xf32>
    %36 = arith.addf %30, %35 : vector<24x32xf32>
    %c0_33 = arith.constant 0 : index
    %c12 = arith.constant 12 : index
    %c0_34 = arith.constant 0 : index
    %37 = vector.load %arg1[%c0_33, %c12, %c0_34] : memref<1x40x32xbf16, #tpu.memory_space<vmem>>, vector<1x24x32xbf16>
    %38 = vector.shape_cast %37 : vector<1x24x32xbf16> to vector<24x32xbf16>
    %c6_35 = arith.constant 6 : index
    %c0_36 = arith.constant 0 : index
    %c0_37 = arith.constant 0 : index
    %39 = vector.load %arg2[%c6_35, %c0_36, %c0_37] : memref<9x32x32xbf16, #tpu.memory_space<vmem>>, vector<1x32x32xbf16>
    %40 = vector.shape_cast %39 : vector<1x32x32xbf16> to vector<32x32xbf16>
    %cst_38 = arith.constant dense<0.000000e+00> : vector<24x32xf32>
    %41 = tpu.matmul %38, %40, %cst_38 {dimension_numbers = #tpu.dot_dimension_numbers<[1], [0], [0], [1], [0, 0, 1, 1], [], []>} : vector<24x32xbf16>, vector<32x32xbf16>, vector<24x32xf32> -> vector<24x32xf32>
    %42 = arith.addf %36, %41 : vector<24x32xf32>
    %c0_39 = arith.constant 0 : index
    %c13 = arith.constant 13 : index
    %c0_40 = arith.constant 0 : index
    %43 = vector.load %arg1[%c0_39, %c13, %c0_40] : memref<1x40x32xbf16, #tpu.memory_space<vmem>>, vector<1x24x32xbf16>
    %44 = vector.shape_cast %43 : vector<1x24x32xbf16> to vector<24x32xbf16>
    %c7_41 = arith.constant 7 : index
    %c0_42 = arith.constant 0 : index
    %c0_43 = arith.constant 0 : index
    %45 = vector.load %arg2[%c7_41, %c0_42, %c0_43] : memref<9x32x32xbf16, #tpu.memory_space<vmem>>, vector<1x32x32xbf16>
    %46 = vector.shape_cast %45 : vector<1x32x32xbf16> to vector<32x32xbf16>
    %cst_44 = arith.constant dense<0.000000e+00> : vector<24x32xf32>
    %47 = tpu.matmul %44, %46, %cst_44 {dimension_numbers = #tpu.dot_dimension_numbers<[1], [0], [0], [1], [0, 0, 1, 1], [], []>} : vector<24x32xbf16>, vector<32x32xbf16>, vector<24x32xf32> -> vector<24x32xf32>
    %48 = arith.addf %42, %47 : vector<24x32xf32>
    %c0_45 = arith.constant 0 : index
    %c14 = arith.constant 14 : index
    %c0_46 = arith.constant 0 : index
    %49 = vector.load %arg1[%c0_45, %c14, %c0_46] : memref<1x40x32xbf16, #tpu.memory_space<vmem>>, vector<1x24x32xbf16>
    %50 = vector.shape_cast %49 : vector<1x24x32xbf16> to vector<24x32xbf16>
    %c8_47 = arith.constant 8 : index
    %c0_48 = arith.constant 0 : index
    %c0_49 = arith.constant 0 : index
    %51 = vector.load %arg2[%c8_47, %c0_48, %c0_49] : memref<9x32x32xbf16, #tpu.memory_space<vmem>>, vector<1x32x32xbf16>
    %52 = vector.shape_cast %51 : vector<1x32x32xbf16> to vector<32x32xbf16>
    %cst_50 = arith.constant dense<0.000000e+00> : vector<24x32xf32>
    %53 = tpu.matmul %50, %52, %cst_50 {dimension_numbers = #tpu.dot_dimension_numbers<[1], [0], [0], [1], [0, 0, 1, 1], [], []>} : vector<24x32xbf16>, vector<32x32xbf16>, vector<24x32xf32> -> vector<24x32xf32>
    %54 = arith.addf %48, %53 : vector<24x32xf32>
    %c0_51 = arith.constant 0 : index
    %c0_52 = arith.constant 0 : index
    %55 = vector.load %arg3[%c0_51, %c0_52] : memref<1x32xf32, #tpu.memory_space<vmem>>, vector<1x32xf32>
    %56 = vector.broadcast %55 : vector<1x32xf32> to vector<24x32xf32>
    %57 = arith.addf %54, %56 : vector<24x32xf32>
    %cst_53 = arith.constant 0.000000e+00 : f32
    %58 = vector.broadcast %cst_53 : f32 to vector<24x32xf32>
    %59 = arith.maximumf %57, %58 : vector<24x32xf32>
    %60 = arith.truncf %59 : vector<24x32xf32> to vector<24x32xbf16>
    %c0_54 = arith.constant 0 : index
    %c0_55 = arith.constant 0 : index
    %c0_56 = arith.constant 0 : index
    %61 = vector.load %arg4[%c0_54, %c0_55, %c0_56] : memref<1x24x32xbf16, #tpu.memory_space<vmem>>, vector<1x24x32xbf16>
    %62 = vector.shape_cast %61 : vector<1x24x32xbf16> to vector<24x32xbf16>
    %63 = vector.shape_cast %60 : vector<24x32xbf16> to vector<1x24x32xbf16>
    tpu.vector_store %arg4[%c0_54, %c0_55, %c0_56], %63 {strides = array<i32>} : memref<1x24x32xbf16, #tpu.memory_space<vmem>>, vector<1x24x32xbf16>,
    return
  }
  func.func @transform_0(%arg0: i32) -> (i32, i32, i32) {
    %c0_i32 = arith.constant 0 : i32
    %c0_i32_0 = arith.constant 0 : i32
    %c0_i32_1 = arith.constant 0 : i32
    return %arg0, %c0_i32, %c0_i32_0 : i32, i32, i32
  }
  func.func @transform_1(%arg0: i32) -> (i32, i32, i32) {
    %c0_i32 = arith.constant 0 : i32
    %c0_i32_0 = arith.constant 0 : i32
    %c0_i32_1 = arith.constant 0 : i32
    %c0_i32_2 = arith.constant 0 : i32
    return %c0_i32, %c0_i32_0, %c0_i32_1 : i32, i32, i32
  }
  func.func @transform_2(%arg0: i32) -> (i32, i32) {
    %c0_i32 = arith.constant 0 : i32
    %c0_i32_0 = arith.constant 0 : i32
    %c0_i32_1 = arith.constant 0 : i32
    return %c0_i32, %c0_i32_0 : i32, i32
  }
  func.func @transform_3(%arg0: i32) -> (i32, i32, i32) {
    %c0_i32 = arith.constant 0 : i32
    %c0_i32_0 = arith.constant 0 : i32
    %c0_i32_1 = arith.constant 0 : i32
    return %arg0, %c0_i32, %c0_i32_0 : i32, i32, i32
  }
}

module attributes {stable_mosaic.version = 11 : i64} {
  func.func @_mm_kernel(%arg0: i32, %arg1: i32, %arg2: memref<32x128xbf16, #tpu.memory_space<vmem>>, %arg3: memref<128x64xbf16, #tpu.memory_space<vmem>>, %arg4: memref<1x64xf32, #tpu.memory_space<vmem>>, %arg5: memref<32x64xbf16, #tpu.memory_space<vmem>>) attributes {dimension_semantics = [#tpu.dimension_semantics<parallel>, #tpu.dimension_semantics<parallel>], iteration_bounds = array<i64: 1, 1>, scalar_prefetch = 0 : i64, scratch_operands = 0 : i64, tpu.core_type = #tpu.core_type<tc>, window_params = [{transform_indices = @transform_0, window_bounds = array<i64: 32, 128>}, {transform_indices = @transform_1, window_bounds = array<i64: 128, 64>}, {transform_indices = @transform_2, window_bounds = array<i64: 1, 64>}, {transform_indices = @transform_3, window_bounds = array<i64: 32, 64>}]} {
    %c0 = arith.constant 0 : index
    %c0_0 = arith.constant 0 : index
    %0 = vector.load %arg2[%c0, %c0_0] : memref<32x128xbf16, #tpu.memory_space<vmem>>, vector<32x128xbf16>
    %c0_1 = arith.constant 0 : index
    %c0_2 = arith.constant 0 : index
    %1 = vector.load %arg3[%c0_1, %c0_2] : memref<128x64xbf16, #tpu.memory_space<vmem>>, vector<128x64xbf16>
    %cst = arith.constant dense<0.000000e+00> : vector<32x64xf32>
    %2 = tpu.matmul %0, %1, %cst {dimension_numbers = #tpu.dot_dimension_numbers<[1], [0], [0], [1], [0, 0, 1, 1], [], []>} : vector<32x128xbf16>, vector<128x64xbf16>, vector<32x64xf32> -> vector<32x64xf32>
    %c0_3 = arith.constant 0 : index
    %c0_4 = arith.constant 0 : index
    %3 = vector.load %arg4[%c0_3, %c0_4] : memref<1x64xf32, #tpu.memory_space<vmem>>, vector<1x64xf32>
    %4 = vector.broadcast %3 : vector<1x64xf32> to vector<32x64xf32>
    %5 = arith.addf %2, %4 : vector<32x64xf32>
    %cst_5 = arith.constant 0.000000e+00 : f32
    %6 = vector.broadcast %cst_5 : f32 to vector<32x64xf32>
    %7 = arith.maximumf %5, %6 : vector<32x64xf32>
    %8 = arith.truncf %7 : vector<32x64xf32> to vector<32x64xbf16>
    %c0_6 = arith.constant 0 : index
    %c0_7 = arith.constant 0 : index
    %9 = vector.load %arg5[%c0_6, %c0_7] : memref<32x64xbf16, #tpu.memory_space<vmem>>, vector<32x64xbf16>
    tpu.vector_store %arg5[%c0_6, %c0_7], %8 {strides = array<i32>} : memref<32x64xbf16, #tpu.memory_space<vmem>>, vector<32x64xbf16>,
    return
  }
  func.func @transform_0(%arg0: i32, %arg1: i32) -> (i32, i32) {
    %c0_i32 = arith.constant 0 : i32
    %c0_i32_0 = arith.constant 0 : i32
    return %arg0, %c0_i32 : i32, i32
  }
  func.func @transform_1(%arg0: i32, %arg1: i32) -> (i32, i32) {
    %c0_i32 = arith.constant 0 : i32
    %c0_i32_0 = arith.constant 0 : i32
    return %c0_i32, %arg1 : i32, i32
  }
  func.func @transform_2(%arg0: i32, %arg1: i32) -> (i32, i32) {
    %c0_i32 = arith.constant 0 : i32
    %c0_i32_0 = arith.constant 0 : i32
    return %c0_i32, %arg1 : i32, i32
  }
  func.func @transform_3(%arg0: i32, %arg1: i32) -> (i32, i32) {
    %c0_i32 = arith.constant 0 : i32
    return %arg0, %arg1 : i32, i32
  }
}

module attributes {stable_mosaic.version = 11 : i64} {
  func.func @_mm_kernel(%arg0: i32, %arg1: i32, %arg2: memref<16x576xbf16, #tpu.memory_space<vmem>>, %arg3: memref<576x64xbf16, #tpu.memory_space<vmem>>, %arg4: memref<1x64xf32, #tpu.memory_space<vmem>>, %arg5: memref<16x64xbf16, #tpu.memory_space<vmem>>) attributes {dimension_semantics = [#tpu.dimension_semantics<parallel>, #tpu.dimension_semantics<parallel>], iteration_bounds = array<i64: 1, 1>, scalar_prefetch = 0 : i64, scratch_operands = 0 : i64, tpu.core_type = #tpu.core_type<tc>, window_params = [{transform_indices = @transform_0, window_bounds = array<i64: 16, 576>}, {transform_indices = @transform_1, window_bounds = array<i64: 576, 64>}, {transform_indices = @transform_2, window_bounds = array<i64: 1, 64>}, {transform_indices = @transform_3, window_bounds = array<i64: 16, 64>}]} {
    %c0 = arith.constant 0 : index
    %c0_0 = arith.constant 0 : index
    %0 = vector.load %arg2[%c0, %c0_0] : memref<16x576xbf16, #tpu.memory_space<vmem>>, vector<16x576xbf16>
    %c0_1 = arith.constant 0 : index
    %c0_2 = arith.constant 0 : index
    %1 = vector.load %arg3[%c0_1, %c0_2] : memref<576x64xbf16, #tpu.memory_space<vmem>>, vector<576x64xbf16>
    %cst = arith.constant dense<0.000000e+00> : vector<16x64xf32>
    %2 = tpu.matmul %0, %1, %cst {dimension_numbers = #tpu.dot_dimension_numbers<[1], [0], [0], [1], [0, 0, 1, 1], [], []>} : vector<16x576xbf16>, vector<576x64xbf16>, vector<16x64xf32> -> vector<16x64xf32>
    %c0_3 = arith.constant 0 : index
    %c0_4 = arith.constant 0 : index
    %3 = vector.load %arg4[%c0_3, %c0_4] : memref<1x64xf32, #tpu.memory_space<vmem>>, vector<1x64xf32>
    %4 = vector.broadcast %3 : vector<1x64xf32> to vector<16x64xf32>
    %5 = arith.addf %2, %4 : vector<16x64xf32>
    %cst_5 = arith.constant 0.000000e+00 : f32
    %6 = vector.broadcast %cst_5 : f32 to vector<16x64xf32>
    %7 = arith.maximumf %5, %6 : vector<16x64xf32>
    %8 = arith.truncf %7 : vector<16x64xf32> to vector<16x64xbf16>
    %c0_6 = arith.constant 0 : index
    %c0_7 = arith.constant 0 : index
    %9 = vector.load %arg5[%c0_6, %c0_7] : memref<16x64xbf16, #tpu.memory_space<vmem>>, vector<16x64xbf16>
    tpu.vector_store %arg5[%c0_6, %c0_7], %8 {strides = array<i32>} : memref<16x64xbf16, #tpu.memory_space<vmem>>, vector<16x64xbf16>,
    return
  }
  func.func @transform_0(%arg0: i32, %arg1: i32) -> (i32, i32) {
    %c0_i32 = arith.constant 0 : i32
    %c0_i32_0 = arith.constant 0 : i32
    return %arg0, %c0_i32 : i32, i32
  }
  func.func @transform_1(%arg0: i32, %arg1: i32) -> (i32, i32) {
    %c0_i32 = arith.constant 0 : i32
    %c0_i32_0 = arith.constant 0 : i32
    return %c0_i32, %arg1 : i32, i32
  }
  func.func @transform_2(%arg0: i32, %arg1: i32) -> (i32, i32) {
    %c0_i32 = arith.constant 0 : i32
    %c0_i32_0 = arith.constant 0 : i32
    return %c0_i32, %arg1 : i32, i32
  }
  func.func @transform_3(%arg0: i32, %arg1: i32) -> (i32, i32) {
    %c0_i32 = arith.constant 0 : i32
    return %arg0, %arg1 : i32, i32
  }
}

module attributes {stable_mosaic.version = 11 : i64} {
  func.func @_mm_kernel(%arg0: i32, %arg1: i32, %arg2: memref<16x128xbf16, #tpu.memory_space<vmem>>, %arg3: memref<128x128xbf16, #tpu.memory_space<vmem>>, %arg4: memref<1x128xf32, #tpu.memory_space<vmem>>, %arg5: memref<16x128xbf16, #tpu.memory_space<vmem>>) attributes {dimension_semantics = [#tpu.dimension_semantics<parallel>, #tpu.dimension_semantics<parallel>], iteration_bounds = array<i64: 1, 2>, scalar_prefetch = 0 : i64, scratch_operands = 0 : i64, tpu.core_type = #tpu.core_type<tc>, window_params = [{transform_indices = @transform_0, window_bounds = array<i64: 16, 128>}, {transform_indices = @transform_1, window_bounds = array<i64: 128, 128>}, {transform_indices = @transform_2, window_bounds = array<i64: 1, 128>}, {transform_indices = @transform_3, window_bounds = array<i64: 16, 128>}]} {
    %c0 = arith.constant 0 : index
    %c0_0 = arith.constant 0 : index
    %0 = vector.load %arg2[%c0, %c0_0] : memref<16x128xbf16, #tpu.memory_space<vmem>>, vector<16x128xbf16>
    %c0_1 = arith.constant 0 : index
    %c0_2 = arith.constant 0 : index
    %1 = vector.load %arg3[%c0_1, %c0_2] : memref<128x128xbf16, #tpu.memory_space<vmem>>, vector<128x128xbf16>
    %cst = arith.constant dense<0.000000e+00> : vector<16x128xf32>
    %2 = tpu.matmul %0, %1, %cst {dimension_numbers = #tpu.dot_dimension_numbers<[1], [0], [0], [1], [0, 0, 1, 1], [], []>} : vector<16x128xbf16>, vector<128x128xbf16>, vector<16x128xf32> -> vector<16x128xf32>
    %c0_3 = arith.constant 0 : index
    %c0_4 = arith.constant 0 : index
    %3 = vector.load %arg4[%c0_3, %c0_4] : memref<1x128xf32, #tpu.memory_space<vmem>>, vector<1x128xf32>
    %4 = vector.broadcast %3 : vector<1x128xf32> to vector<16x128xf32>
    %5 = arith.addf %2, %4 : vector<16x128xf32>
    %6 = arith.truncf %5 : vector<16x128xf32> to vector<16x128xbf16>
    %c0_5 = arith.constant 0 : index
    %c0_6 = arith.constant 0 : index
    %7 = vector.load %arg5[%c0_5, %c0_6] : memref<16x128xbf16, #tpu.memory_space<vmem>>, vector<16x128xbf16>
    tpu.vector_store %arg5[%c0_5, %c0_6], %6 {strides = array<i32>} : memref<16x128xbf16, #tpu.memory_space<vmem>>, vector<16x128xbf16>,
    return
  }
  func.func @transform_0(%arg0: i32, %arg1: i32) -> (i32, i32) {
    %c0_i32 = arith.constant 0 : i32
    %c0_i32_0 = arith.constant 0 : i32
    return %arg0, %c0_i32 : i32, i32
  }
  func.func @transform_1(%arg0: i32, %arg1: i32) -> (i32, i32) {
    %c0_i32 = arith.constant 0 : i32
    %c0_i32_0 = arith.constant 0 : i32
    return %c0_i32, %arg1 : i32, i32
  }
  func.func @transform_2(%arg0: i32, %arg1: i32) -> (i32, i32) {
    %c0_i32 = arith.constant 0 : i32
    %c0_i32_0 = arith.constant 0 : i32
    return %c0_i32, %arg1 : i32, i32
  }
  func.func @transform_3(%arg0: i32, %arg1: i32) -> (i32, i32) {
    %c0_i32 = arith.constant 0 : i32
    return %arg0, %arg1 : i32, i32
  }
}

module attributes {stable_mosaic.version = 11 : i64} {
  func.func @_mm_kernel(%arg0: i32, %arg1: i32, %arg2: memref<16x256xbf16, #tpu.memory_space<vmem>>, %arg3: memref<256x64xbf16, #tpu.memory_space<vmem>>, %arg4: memref<1x64xf32, #tpu.memory_space<vmem>>, %arg5: memref<16x64xbf16, #tpu.memory_space<vmem>>) attributes {dimension_semantics = [#tpu.dimension_semantics<parallel>, #tpu.dimension_semantics<parallel>], iteration_bounds = array<i64: 1, 1>, scalar_prefetch = 0 : i64, scratch_operands = 0 : i64, tpu.core_type = #tpu.core_type<tc>, window_params = [{transform_indices = @transform_0, window_bounds = array<i64: 16, 256>}, {transform_indices = @transform_1, window_bounds = array<i64: 256, 64>}, {transform_indices = @transform_2, window_bounds = array<i64: 1, 64>}, {transform_indices = @transform_3, window_bounds = array<i64: 16, 64>}]} {
    %c0 = arith.constant 0 : index
    %c0_0 = arith.constant 0 : index
    %0 = vector.load %arg2[%c0, %c0_0] : memref<16x256xbf16, #tpu.memory_space<vmem>>, vector<16x256xbf16>
    %c0_1 = arith.constant 0 : index
    %c0_2 = arith.constant 0 : index
    %1 = vector.load %arg3[%c0_1, %c0_2] : memref<256x64xbf16, #tpu.memory_space<vmem>>, vector<256x64xbf16>
    %cst = arith.constant dense<0.000000e+00> : vector<16x64xf32>
    %2 = tpu.matmul %0, %1, %cst {dimension_numbers = #tpu.dot_dimension_numbers<[1], [0], [0], [1], [0, 0, 1, 1], [], []>} : vector<16x256xbf16>, vector<256x64xbf16>, vector<16x64xf32> -> vector<16x64xf32>
    %c0_3 = arith.constant 0 : index
    %c0_4 = arith.constant 0 : index
    %3 = vector.load %arg4[%c0_3, %c0_4] : memref<1x64xf32, #tpu.memory_space<vmem>>, vector<1x64xf32>
    %4 = vector.broadcast %3 : vector<1x64xf32> to vector<16x64xf32>
    %5 = arith.addf %2, %4 : vector<16x64xf32>
    %cst_5 = arith.constant 0.000000e+00 : f32
    %6 = vector.broadcast %cst_5 : f32 to vector<16x64xf32>
    %7 = arith.maximumf %5, %6 : vector<16x64xf32>
    %8 = arith.truncf %7 : vector<16x64xf32> to vector<16x64xbf16>
    %c0_6 = arith.constant 0 : index
    %c0_7 = arith.constant 0 : index
    %9 = vector.load %arg5[%c0_6, %c0_7] : memref<16x64xbf16, #tpu.memory_space<vmem>>, vector<16x64xbf16>
    tpu.vector_store %arg5[%c0_6, %c0_7], %8 {strides = array<i32>} : memref<16x64xbf16, #tpu.memory_space<vmem>>, vector<16x64xbf16>,
    return
  }
  func.func @transform_0(%arg0: i32, %arg1: i32) -> (i32, i32) {
    %c0_i32 = arith.constant 0 : i32
    %c0_i32_0 = arith.constant 0 : i32
    return %arg0, %c0_i32 : i32, i32
  }
  func.func @transform_1(%arg0: i32, %arg1: i32) -> (i32, i32) {
    %c0_i32 = arith.constant 0 : i32
    %c0_i32_0 = arith.constant 0 : i32
    return %c0_i32, %arg1 : i32, i32
  }
  func.func @transform_2(%arg0: i32, %arg1: i32) -> (i32, i32) {
    %c0_i32 = arith.constant 0 : i32
    %c0_i32_0 = arith.constant 0 : i32
    return %c0_i32, %arg1 : i32, i32
  }
  func.func @transform_3(%arg0: i32, %arg1: i32) -> (i32, i32) {
    %c0_i32 = arith.constant 0 : i32
    return %arg0, %arg1 : i32, i32
  }
}

module attributes {stable_mosaic.version = 11 : i64} {
  func.func @_mm_res_kernel(%arg0: i32, %arg1: i32, %arg2: memref<16x64xbf16, #tpu.memory_space<vmem>>, %arg3: memref<64x128xbf16, #tpu.memory_space<vmem>>, %arg4: memref<1x128xf32, #tpu.memory_space<vmem>>, %arg5: memref<16x128xbf16, #tpu.memory_space<vmem>>, %arg6: memref<16x128xbf16, #tpu.memory_space<vmem>>) attributes {dimension_semantics = [#tpu.dimension_semantics<parallel>, #tpu.dimension_semantics<parallel>], iteration_bounds = array<i64: 1, 2>, scalar_prefetch = 0 : i64, scratch_operands = 0 : i64, tpu.core_type = #tpu.core_type<tc>, window_params = [{transform_indices = @transform_0, window_bounds = array<i64: 16, 64>}, {transform_indices = @transform_1, window_bounds = array<i64: 64, 128>}, {transform_indices = @transform_2, window_bounds = array<i64: 1, 128>}, {transform_indices = @transform_3, window_bounds = array<i64: 16, 128>}, {transform_indices = @transform_4, window_bounds = array<i64: 16, 128>}]} {
    %c0 = arith.constant 0 : index
    %c0_0 = arith.constant 0 : index
    %0 = vector.load %arg2[%c0, %c0_0] : memref<16x64xbf16, #tpu.memory_space<vmem>>, vector<16x64xbf16>
    %c0_1 = arith.constant 0 : index
    %c0_2 = arith.constant 0 : index
    %1 = vector.load %arg3[%c0_1, %c0_2] : memref<64x128xbf16, #tpu.memory_space<vmem>>, vector<64x128xbf16>
    %cst = arith.constant dense<0.000000e+00> : vector<16x128xf32>
    %2 = tpu.matmul %0, %1, %cst {dimension_numbers = #tpu.dot_dimension_numbers<[1], [0], [0], [1], [0, 0, 1, 1], [], []>} : vector<16x64xbf16>, vector<64x128xbf16>, vector<16x128xf32> -> vector<16x128xf32>
    %c0_3 = arith.constant 0 : index
    %c0_4 = arith.constant 0 : index
    %3 = vector.load %arg4[%c0_3, %c0_4] : memref<1x128xf32, #tpu.memory_space<vmem>>, vector<1x128xf32>
    %4 = vector.broadcast %3 : vector<1x128xf32> to vector<16x128xf32>
    %5 = arith.addf %2, %4 : vector<16x128xf32>
    %c0_5 = arith.constant 0 : index
    %c0_6 = arith.constant 0 : index
    %6 = vector.load %arg5[%c0_5, %c0_6] : memref<16x128xbf16, #tpu.memory_space<vmem>>, vector<16x128xbf16>
    %7 = arith.extf %6 : vector<16x128xbf16> to vector<16x128xf32>
    %8 = arith.addf %5, %7 : vector<16x128xf32>
    %cst_7 = arith.constant 0.000000e+00 : f32
    %9 = vector.broadcast %cst_7 : f32 to vector<16x128xf32>
    %10 = arith.maximumf %8, %9 : vector<16x128xf32>
    %11 = arith.truncf %10 : vector<16x128xf32> to vector<16x128xbf16>
    %c0_8 = arith.constant 0 : index
    %c0_9 = arith.constant 0 : index
    %12 = vector.load %arg6[%c0_8, %c0_9] : memref<16x128xbf16, #tpu.memory_space<vmem>>, vector<16x128xbf16>
    tpu.vector_store %arg6[%c0_8, %c0_9], %11 {strides = array<i32>} : memref<16x128xbf16, #tpu.memory_space<vmem>>, vector<16x128xbf16>,
    return
  }
  func.func @transform_0(%arg0: i32, %arg1: i32) -> (i32, i32) {
    %c0_i32 = arith.constant 0 : i32
    %c0_i32_0 = arith.constant 0 : i32
    return %arg0, %c0_i32 : i32, i32
  }
  func.func @transform_1(%arg0: i32, %arg1: i32) -> (i32, i32) {
    %c0_i32 = arith.constant 0 : i32
    %c0_i32_0 = arith.constant 0 : i32
    return %c0_i32, %arg1 : i32, i32
  }
  func.func @transform_2(%arg0: i32, %arg1: i32) -> (i32, i32) {
    %c0_i32 = arith.constant 0 : i32
    %c0_i32_0 = arith.constant 0 : i32
    return %c0_i32, %arg1 : i32, i32
  }
  func.func @transform_3(%arg0: i32, %arg1: i32) -> (i32, i32) {
    %c0_i32 = arith.constant 0 : i32
    return %arg0, %arg1 : i32, i32
  }
  func.func @transform_4(%arg0: i32, %arg1: i32) -> (i32, i32) {
    %c0_i32 = arith.constant 0 : i32
    return %arg0, %arg1 : i32, i32
  }
}

module attributes {stable_mosaic.version = 11 : i64} {
  func.func @_wide_conv_kernel(%arg0: i32, %arg1: memref<1x24x64xbf16, #tpu.memory_space<vmem>>, %arg2: memref<9x64x64xbf16, #tpu.memory_space<vmem>>, %arg3: memref<1x64xf32, #tpu.memory_space<vmem>>, %arg4: memref<1x8x64xbf16, #tpu.memory_space<vmem>>) attributes {dimension_semantics = [#tpu.dimension_semantics<parallel>], iteration_bounds = array<i64: 2>, scalar_prefetch = 0 : i64, scratch_operands = 0 : i64, tpu.core_type = #tpu.core_type<tc>, window_params = [{transform_indices = @transform_0, window_bounds = array<i64: 1, 24, 64>}, {pipeline_mode = #tpu.pipeline_mode<synchronous>, transform_indices = @transform_1, window_bounds = array<i64: 9, 64, 64>}, {pipeline_mode = #tpu.pipeline_mode<synchronous>, transform_indices = @transform_2, window_bounds = array<i64: 1, 64>}, {transform_indices = @transform_3, window_bounds = array<i64: 1, 8, 64>}]} {
    %cst = arith.constant 0.000000e+00 : f32
    %0 = vector.broadcast %cst : f32 to vector<8x64xf32>
    %c0 = arith.constant 0 : index
    %c0_0 = arith.constant 0 : index
    %c0_1 = arith.constant 0 : index
    %1 = vector.load %arg1[%c0, %c0_0, %c0_1] : memref<1x24x64xbf16, #tpu.memory_space<vmem>>, vector<1x8x64xbf16>
    %2 = vector.shape_cast %1 : vector<1x8x64xbf16> to vector<8x64xbf16>
    %c0_2 = arith.constant 0 : index
    %c0_3 = arith.constant 0 : index
    %c0_4 = arith.constant 0 : index
    %3 = vector.load %arg2[%c0_2, %c0_3, %c0_4] : memref<9x64x64xbf16, #tpu.memory_space<vmem>>, vector<1x64x64xbf16>
    %4 = vector.shape_cast %3 : vector<1x64x64xbf16> to vector<64x64xbf16>
    %cst_5 = arith.constant dense<0.000000e+00> : vector<8x64xf32>
    %5 = tpu.matmul %2, %4, %cst_5 {dimension_numbers = #tpu.dot_dimension_numbers<[1], [0], [0], [1], [0, 0, 1, 1], [], []>} : vector<8x64xbf16>, vector<64x64xbf16>, vector<8x64xf32> -> vector<8x64xf32>
    %6 = arith.addf %0, %5 : vector<8x64xf32>
    %c0_6 = arith.constant 0 : index
    %c1 = arith.constant 1 : index
    %c0_7 = arith.constant 0 : index
    %7 = vector.load %arg1[%c0_6, %c1, %c0_7] : memref<1x24x64xbf16, #tpu.memory_space<vmem>>, vector<1x8x64xbf16>
    %8 = vector.shape_cast %7 : vector<1x8x64xbf16> to vector<8x64xbf16>
    %c1_8 = arith.constant 1 : index
    %c0_9 = arith.constant 0 : index
    %c0_10 = arith.constant 0 : index
    %9 = vector.load %arg2[%c1_8, %c0_9, %c0_10] : memref<9x64x64xbf16, #tpu.memory_space<vmem>>, vector<1x64x64xbf16>
    %10 = vector.shape_cast %9 : vector<1x64x64xbf16> to vector<64x64xbf16>
    %cst_11 = arith.constant dense<0.000000e+00> : vector<8x64xf32>
    %11 = tpu.matmul %8, %10, %cst_11 {dimension_numbers = #tpu.dot_dimension_numbers<[1], [0], [0], [1], [0, 0, 1, 1], [], []>} : vector<8x64xbf16>, vector<64x64xbf16>, vector<8x64xf32> -> vector<8x64xf32>
    %12 = arith.addf %6, %11 : vector<8x64xf32>
    %c0_12 = arith.constant 0 : index
    %c2 = arith.constant 2 : index
    %c0_13 = arith.constant 0 : index
    %13 = vector.load %arg1[%c0_12, %c2, %c0_13] : memref<1x24x64xbf16, #tpu.memory_space<vmem>>, vector<1x8x64xbf16>
    %14 = vector.shape_cast %13 : vector<1x8x64xbf16> to vector<8x64xbf16>
    %c2_14 = arith.constant 2 : index
    %c0_15 = arith.constant 0 : index
    %c0_16 = arith.constant 0 : index
    %15 = vector.load %arg2[%c2_14, %c0_15, %c0_16] : memref<9x64x64xbf16, #tpu.memory_space<vmem>>, vector<1x64x64xbf16>
    %16 = vector.shape_cast %15 : vector<1x64x64xbf16> to vector<64x64xbf16>
    %cst_17 = arith.constant dense<0.000000e+00> : vector<8x64xf32>
    %17 = tpu.matmul %14, %16, %cst_17 {dimension_numbers = #tpu.dot_dimension_numbers<[1], [0], [0], [1], [0, 0, 1, 1], [], []>} : vector<8x64xbf16>, vector<64x64xbf16>, vector<8x64xf32> -> vector<8x64xf32>
    %18 = arith.addf %12, %17 : vector<8x64xf32>
    %c0_18 = arith.constant 0 : index
    %c4 = arith.constant 4 : index
    %c0_19 = arith.constant 0 : index
    %19 = vector.load %arg1[%c0_18, %c4, %c0_19] : memref<1x24x64xbf16, #tpu.memory_space<vmem>>, vector<1x8x64xbf16>
    %20 = vector.shape_cast %19 : vector<1x8x64xbf16> to vector<8x64xbf16>
    %c3 = arith.constant 3 : index
    %c0_20 = arith.constant 0 : index
    %c0_21 = arith.constant 0 : index
    %21 = vector.load %arg2[%c3, %c0_20, %c0_21] : memref<9x64x64xbf16, #tpu.memory_space<vmem>>, vector<1x64x64xbf16>
    %22 = vector.shape_cast %21 : vector<1x64x64xbf16> to vector<64x64xbf16>
    %cst_22 = arith.constant dense<0.000000e+00> : vector<8x64xf32>
    %23 = tpu.matmul %20, %22, %cst_22 {dimension_numbers = #tpu.dot_dimension_numbers<[1], [0], [0], [1], [0, 0, 1, 1], [], []>} : vector<8x64xbf16>, vector<64x64xbf16>, vector<8x64xf32> -> vector<8x64xf32>
    %24 = arith.addf %18, %23 : vector<8x64xf32>
    %c0_23 = arith.constant 0 : index
    %c5 = arith.constant 5 : index
    %c0_24 = arith.constant 0 : index
    %25 = vector.load %arg1[%c0_23, %c5, %c0_24] : memref<1x24x64xbf16, #tpu.memory_space<vmem>>, vector<1x8x64xbf16>
    %26 = vector.shape_cast %25 : vector<1x8x64xbf16> to vector<8x64xbf16>
    %c4_25 = arith.constant 4 : index
    %c0_26 = arith.constant 0 : index
    %c0_27 = arith.constant 0 : index
    %27 = vector.load %arg2[%c4_25, %c0_26, %c0_27] : memref<9x64x64xbf16, #tpu.memory_space<vmem>>, vector<1x64x64xbf16>
    %28 = vector.shape_cast %27 : vector<1x64x64xbf16> to vector<64x64xbf16>
    %cst_28 = arith.constant dense<0.000000e+00> : vector<8x64xf32>
    %29 = tpu.matmul %26, %28, %cst_28 {dimension_numbers = #tpu.dot_dimension_numbers<[1], [0], [0], [1], [0, 0, 1, 1], [], []>} : vector<8x64xbf16>, vector<64x64xbf16>, vector<8x64xf32> -> vector<8x64xf32>
    %30 = arith.addf %24, %29 : vector<8x64xf32>
    %c0_29 = arith.constant 0 : index
    %c6 = arith.constant 6 : index
    %c0_30 = arith.constant 0 : index
    %31 = vector.load %arg1[%c0_29, %c6, %c0_30] : memref<1x24x64xbf16, #tpu.memory_space<vmem>>, vector<1x8x64xbf16>
    %32 = vector.shape_cast %31 : vector<1x8x64xbf16> to vector<8x64xbf16>
    %c5_31 = arith.constant 5 : index
    %c0_32 = arith.constant 0 : index
    %c0_33 = arith.constant 0 : index
    %33 = vector.load %arg2[%c5_31, %c0_32, %c0_33] : memref<9x64x64xbf16, #tpu.memory_space<vmem>>, vector<1x64x64xbf16>
    %34 = vector.shape_cast %33 : vector<1x64x64xbf16> to vector<64x64xbf16>
    %cst_34 = arith.constant dense<0.000000e+00> : vector<8x64xf32>
    %35 = tpu.matmul %32, %34, %cst_34 {dimension_numbers = #tpu.dot_dimension_numbers<[1], [0], [0], [1], [0, 0, 1, 1], [], []>} : vector<8x64xbf16>, vector<64x64xbf16>, vector<8x64xf32> -> vector<8x64xf32>
    %36 = arith.addf %30, %35 : vector<8x64xf32>
    %c0_35 = arith.constant 0 : index
    %c8 = arith.constant 8 : index
    %c0_36 = arith.constant 0 : index
    %37 = vector.load %arg1[%c0_35, %c8, %c0_36] : memref<1x24x64xbf16, #tpu.memory_space<vmem>>, vector<1x8x64xbf16>
    %38 = vector.shape_cast %37 : vector<1x8x64xbf16> to vector<8x64xbf16>
    %c6_37 = arith.constant 6 : index
    %c0_38 = arith.constant 0 : index
    %c0_39 = arith.constant 0 : index
    %39 = vector.load %arg2[%c6_37, %c0_38, %c0_39] : memref<9x64x64xbf16, #tpu.memory_space<vmem>>, vector<1x64x64xbf16>
    %40 = vector.shape_cast %39 : vector<1x64x64xbf16> to vector<64x64xbf16>
    %cst_40 = arith.constant dense<0.000000e+00> : vector<8x64xf32>
    %41 = tpu.matmul %38, %40, %cst_40 {dimension_numbers = #tpu.dot_dimension_numbers<[1], [0], [0], [1], [0, 0, 1, 1], [], []>} : vector<8x64xbf16>, vector<64x64xbf16>, vector<8x64xf32> -> vector<8x64xf32>
    %42 = arith.addf %36, %41 : vector<8x64xf32>
    %c0_41 = arith.constant 0 : index
    %c9 = arith.constant 9 : index
    %c0_42 = arith.constant 0 : index
    %43 = vector.load %arg1[%c0_41, %c9, %c0_42] : memref<1x24x64xbf16, #tpu.memory_space<vmem>>, vector<1x8x64xbf16>
    %44 = vector.shape_cast %43 : vector<1x8x64xbf16> to vector<8x64xbf16>
    %c7 = arith.constant 7 : index
    %c0_43 = arith.constant 0 : index
    %c0_44 = arith.constant 0 : index
    %45 = vector.load %arg2[%c7, %c0_43, %c0_44] : memref<9x64x64xbf16, #tpu.memory_space<vmem>>, vector<1x64x64xbf16>
    %46 = vector.shape_cast %45 : vector<1x64x64xbf16> to vector<64x64xbf16>
    %cst_45 = arith.constant dense<0.000000e+00> : vector<8x64xf32>
    %47 = tpu.matmul %44, %46, %cst_45 {dimension_numbers = #tpu.dot_dimension_numbers<[1], [0], [0], [1], [0, 0, 1, 1], [], []>} : vector<8x64xbf16>, vector<64x64xbf16>, vector<8x64xf32> -> vector<8x64xf32>
    %48 = arith.addf %42, %47 : vector<8x64xf32>
    %c0_46 = arith.constant 0 : index
    %c10 = arith.constant 10 : index
    %c0_47 = arith.constant 0 : index
    %49 = vector.load %arg1[%c0_46, %c10, %c0_47] : memref<1x24x64xbf16, #tpu.memory_space<vmem>>, vector<1x8x64xbf16>
    %50 = vector.shape_cast %49 : vector<1x8x64xbf16> to vector<8x64xbf16>
    %c8_48 = arith.constant 8 : index
    %c0_49 = arith.constant 0 : index
    %c0_50 = arith.constant 0 : index
    %51 = vector.load %arg2[%c8_48, %c0_49, %c0_50] : memref<9x64x64xbf16, #tpu.memory_space<vmem>>, vector<1x64x64xbf16>
    %52 = vector.shape_cast %51 : vector<1x64x64xbf16> to vector<64x64xbf16>
    %cst_51 = arith.constant dense<0.000000e+00> : vector<8x64xf32>
    %53 = tpu.matmul %50, %52, %cst_51 {dimension_numbers = #tpu.dot_dimension_numbers<[1], [0], [0], [1], [0, 0, 1, 1], [], []>} : vector<8x64xbf16>, vector<64x64xbf16>, vector<8x64xf32> -> vector<8x64xf32>
    %54 = arith.addf %48, %53 : vector<8x64xf32>
    %c0_52 = arith.constant 0 : index
    %c0_53 = arith.constant 0 : index
    %55 = vector.load %arg3[%c0_52, %c0_53] : memref<1x64xf32, #tpu.memory_space<vmem>>, vector<1x64xf32>
    %56 = vector.broadcast %55 : vector<1x64xf32> to vector<8x64xf32>
    %57 = arith.addf %54, %56 : vector<8x64xf32>
    %cst_54 = arith.constant 0.000000e+00 : f32
    %58 = vector.broadcast %cst_54 : f32 to vector<8x64xf32>
    %59 = arith.maximumf %57, %58 : vector<8x64xf32>
    %60 = arith.truncf %59 : vector<8x64xf32> to vector<8x64xbf16>
    %c0_55 = arith.constant 0 : index
    %c0_56 = arith.constant 0 : index
    %c0_57 = arith.constant 0 : index
    %61 = vector.load %arg4[%c0_55, %c0_56, %c0_57] : memref<1x8x64xbf16, #tpu.memory_space<vmem>>, vector<1x8x64xbf16>
    %62 = vector.shape_cast %61 : vector<1x8x64xbf16> to vector<8x64xbf16>
    %63 = vector.shape_cast %60 : vector<8x64xbf16> to vector<1x8x64xbf16>
    tpu.vector_store %arg4[%c0_55, %c0_56, %c0_57], %63 {strides = array<i32>} : memref<1x8x64xbf16, #tpu.memory_space<vmem>>, vector<1x8x64xbf16>,
    return
  }
  func.func @transform_0(%arg0: i32) -> (i32, i32, i32) {
    %c0_i32 = arith.constant 0 : i32
    %c0_i32_0 = arith.constant 0 : i32
    %c0_i32_1 = arith.constant 0 : i32
    return %arg0, %c0_i32, %c0_i32_0 : i32, i32, i32
  }
  func.func @transform_1(%arg0: i32) -> (i32, i32, i32) {
    %c0_i32 = arith.constant 0 : i32
    %c0_i32_0 = arith.constant 0 : i32
    %c0_i32_1 = arith.constant 0 : i32
    %c0_i32_2 = arith.constant 0 : i32
    return %c0_i32, %c0_i32_0, %c0_i32_1 : i32, i32, i32
  }
  func.func @transform_2(%arg0: i32) -> (i32, i32) {
    %c0_i32 = arith.constant 0 : i32
    %c0_i32_0 = arith.constant 0 : i32
    %c0_i32_1 = arith.constant 0 : i32
    return %c0_i32, %c0_i32_0 : i32, i32
  }
  func.func @transform_3(%arg0: i32) -> (i32, i32, i32) {
    %c0_i32 = arith.constant 0 : i32
    %c0_i32_0 = arith.constant 0 : i32
    %c0_i32_1 = arith.constant 0 : i32
    return %arg0, %c0_i32, %c0_i32_0 : i32, i32, i32
  }
}

module attributes {stable_mosaic.version = 11 : i64} {
  func.func @_mm_kernel(%arg0: i32, %arg1: i32, %arg2: memref<16x256xbf16, #tpu.memory_space<vmem>>, %arg3: memref<256x256xbf16, #tpu.memory_space<vmem>>, %arg4: memref<1x256xf32, #tpu.memory_space<vmem>>, %arg5: memref<16x256xbf16, #tpu.memory_space<vmem>>) attributes {dimension_semantics = [#tpu.dimension_semantics<parallel>, #tpu.dimension_semantics<parallel>], iteration_bounds = array<i64: 1, 2>, scalar_prefetch = 0 : i64, scratch_operands = 0 : i64, tpu.core_type = #tpu.core_type<tc>, window_params = [{transform_indices = @transform_0, window_bounds = array<i64: 16, 256>}, {transform_indices = @transform_1, window_bounds = array<i64: 256, 256>}, {transform_indices = @transform_2, window_bounds = array<i64: 1, 256>}, {transform_indices = @transform_3, window_bounds = array<i64: 16, 256>}]} {
    %c0 = arith.constant 0 : index
    %c0_0 = arith.constant 0 : index
    %0 = vector.load %arg2[%c0, %c0_0] : memref<16x256xbf16, #tpu.memory_space<vmem>>, vector<16x256xbf16>
    %c0_1 = arith.constant 0 : index
    %c0_2 = arith.constant 0 : index
    %1 = vector.load %arg3[%c0_1, %c0_2] : memref<256x256xbf16, #tpu.memory_space<vmem>>, vector<256x256xbf16>
    %cst = arith.constant dense<0.000000e+00> : vector<16x256xf32>
    %2 = tpu.matmul %0, %1, %cst {dimension_numbers = #tpu.dot_dimension_numbers<[1], [0], [0], [1], [0, 0, 1, 1], [], []>} : vector<16x256xbf16>, vector<256x256xbf16>, vector<16x256xf32> -> vector<16x256xf32>
    %c0_3 = arith.constant 0 : index
    %c0_4 = arith.constant 0 : index
    %3 = vector.load %arg4[%c0_3, %c0_4] : memref<1x256xf32, #tpu.memory_space<vmem>>, vector<1x256xf32>
    %4 = vector.broadcast %3 : vector<1x256xf32> to vector<16x256xf32>
    %5 = arith.addf %2, %4 : vector<16x256xf32>
    %6 = arith.truncf %5 : vector<16x256xf32> to vector<16x256xbf16>
    %c0_5 = arith.constant 0 : index
    %c0_6 = arith.constant 0 : index
    %7 = vector.load %arg5[%c0_5, %c0_6] : memref<16x256xbf16, #tpu.memory_space<vmem>>, vector<16x256xbf16>
    tpu.vector_store %arg5[%c0_5, %c0_6], %6 {strides = array<i32>} : memref<16x256xbf16, #tpu.memory_space<vmem>>, vector<16x256xbf16>,
    return
  }
  func.func @transform_0(%arg0: i32, %arg1: i32) -> (i32, i32) {
    %c0_i32 = arith.constant 0 : i32
    %c0_i32_0 = arith.constant 0 : i32
    return %arg0, %c0_i32 : i32, i32
  }
  func.func @transform_1(%arg0: i32, %arg1: i32) -> (i32, i32) {
    %c0_i32 = arith.constant 0 : i32
    %c0_i32_0 = arith.constant 0 : i32
    return %c0_i32, %arg1 : i32, i32
  }
  func.func @transform_2(%arg0: i32, %arg1: i32) -> (i32, i32) {
    %c0_i32 = arith.constant 0 : i32
    %c0_i32_0 = arith.constant 0 : i32
    return %c0_i32, %arg1 : i32, i32
  }
  func.func @transform_3(%arg0: i32, %arg1: i32) -> (i32, i32) {
    %c0_i32 = arith.constant 0 : i32
    return %arg0, %arg1 : i32, i32
  }
}

module attributes {stable_mosaic.version = 11 : i64} {
  func.func @_mm_kernel(%arg0: i32, %arg1: i32, %arg2: memref<16x256xbf16, #tpu.memory_space<vmem>>, %arg3: memref<256x128xbf16, #tpu.memory_space<vmem>>, %arg4: memref<1x128xf32, #tpu.memory_space<vmem>>, %arg5: memref<16x128xbf16, #tpu.memory_space<vmem>>) attributes {dimension_semantics = [#tpu.dimension_semantics<parallel>, #tpu.dimension_semantics<parallel>], iteration_bounds = array<i64: 1, 1>, scalar_prefetch = 0 : i64, scratch_operands = 0 : i64, tpu.core_type = #tpu.core_type<tc>, window_params = [{transform_indices = @transform_0, window_bounds = array<i64: 16, 256>}, {transform_indices = @transform_1, window_bounds = array<i64: 256, 128>}, {transform_indices = @transform_2, window_bounds = array<i64: 1, 128>}, {transform_indices = @transform_3, window_bounds = array<i64: 16, 128>}]} {
    %c0 = arith.constant 0 : index
    %c0_0 = arith.constant 0 : index
    %0 = vector.load %arg2[%c0, %c0_0] : memref<16x256xbf16, #tpu.memory_space<vmem>>, vector<16x256xbf16>
    %c0_1 = arith.constant 0 : index
    %c0_2 = arith.constant 0 : index
    %1 = vector.load %arg3[%c0_1, %c0_2] : memref<256x128xbf16, #tpu.memory_space<vmem>>, vector<256x128xbf16>
    %cst = arith.constant dense<0.000000e+00> : vector<16x128xf32>
    %2 = tpu.matmul %0, %1, %cst {dimension_numbers = #tpu.dot_dimension_numbers<[1], [0], [0], [1], [0, 0, 1, 1], [], []>} : vector<16x256xbf16>, vector<256x128xbf16>, vector<16x128xf32> -> vector<16x128xf32>
    %c0_3 = arith.constant 0 : index
    %c0_4 = arith.constant 0 : index
    %3 = vector.load %arg4[%c0_3, %c0_4] : memref<1x128xf32, #tpu.memory_space<vmem>>, vector<1x128xf32>
    %4 = vector.broadcast %3 : vector<1x128xf32> to vector<16x128xf32>
    %5 = arith.addf %2, %4 : vector<16x128xf32>
    %cst_5 = arith.constant 0.000000e+00 : f32
    %6 = vector.broadcast %cst_5 : f32 to vector<16x128xf32>
    %7 = arith.maximumf %5, %6 : vector<16x128xf32>
    %8 = arith.truncf %7 : vector<16x128xf32> to vector<16x128xbf16>
    %c0_6 = arith.constant 0 : index
    %c0_7 = arith.constant 0 : index
    %9 = vector.load %arg5[%c0_6, %c0_7] : memref<16x128xbf16, #tpu.memory_space<vmem>>, vector<16x128xbf16>
    tpu.vector_store %arg5[%c0_6, %c0_7], %8 {strides = array<i32>} : memref<16x128xbf16, #tpu.memory_space<vmem>>, vector<16x128xbf16>,
    return
  }
  func.func @transform_0(%arg0: i32, %arg1: i32) -> (i32, i32) {
    %c0_i32 = arith.constant 0 : i32
    %c0_i32_0 = arith.constant 0 : i32
    return %arg0, %c0_i32 : i32, i32
  }
  func.func @transform_1(%arg0: i32, %arg1: i32) -> (i32, i32) {
    %c0_i32 = arith.constant 0 : i32
    %c0_i32_0 = arith.constant 0 : i32
    return %c0_i32, %arg1 : i32, i32
  }
  func.func @transform_2(%arg0: i32, %arg1: i32) -> (i32, i32) {
    %c0_i32 = arith.constant 0 : i32
    %c0_i32_0 = arith.constant 0 : i32
    return %c0_i32, %arg1 : i32, i32
  }
  func.func @transform_3(%arg0: i32, %arg1: i32) -> (i32, i32) {
    %c0_i32 = arith.constant 0 : i32
    return %arg0, %arg1 : i32, i32
  }
}

module attributes {stable_mosaic.version = 11 : i64} {
  func.func @_mm_kernel(%arg0: i32, %arg1: i32, %arg2: memref<16x1152xbf16, #tpu.memory_space<vmem>>, %arg3: memref<1152x128xbf16, #tpu.memory_space<vmem>>, %arg4: memref<1x128xf32, #tpu.memory_space<vmem>>, %arg5: memref<16x128xbf16, #tpu.memory_space<vmem>>) attributes {dimension_semantics = [#tpu.dimension_semantics<parallel>, #tpu.dimension_semantics<parallel>], iteration_bounds = array<i64: 1, 1>, scalar_prefetch = 0 : i64, scratch_operands = 0 : i64, tpu.core_type = #tpu.core_type<tc>, window_params = [{transform_indices = @transform_0, window_bounds = array<i64: 16, 1152>}, {transform_indices = @transform_1, window_bounds = array<i64: 1152, 128>}, {transform_indices = @transform_2, window_bounds = array<i64: 1, 128>}, {transform_indices = @transform_3, window_bounds = array<i64: 16, 128>}]} {
    %c0 = arith.constant 0 : index
    %c0_0 = arith.constant 0 : index
    %0 = vector.load %arg2[%c0, %c0_0] : memref<16x1152xbf16, #tpu.memory_space<vmem>>, vector<16x1152xbf16>
    %c0_1 = arith.constant 0 : index
    %c0_2 = arith.constant 0 : index
    %1 = vector.load %arg3[%c0_1, %c0_2] : memref<1152x128xbf16, #tpu.memory_space<vmem>>, vector<1152x128xbf16>
    %cst = arith.constant dense<0.000000e+00> : vector<16x128xf32>
    %2 = tpu.matmul %0, %1, %cst {dimension_numbers = #tpu.dot_dimension_numbers<[1], [0], [0], [1], [0, 0, 1, 1], [], []>} : vector<16x1152xbf16>, vector<1152x128xbf16>, vector<16x128xf32> -> vector<16x128xf32>
    %c0_3 = arith.constant 0 : index
    %c0_4 = arith.constant 0 : index
    %3 = vector.load %arg4[%c0_3, %c0_4] : memref<1x128xf32, #tpu.memory_space<vmem>>, vector<1x128xf32>
    %4 = vector.broadcast %3 : vector<1x128xf32> to vector<16x128xf32>
    %5 = arith.addf %2, %4 : vector<16x128xf32>
    %cst_5 = arith.constant 0.000000e+00 : f32
    %6 = vector.broadcast %cst_5 : f32 to vector<16x128xf32>
    %7 = arith.maximumf %5, %6 : vector<16x128xf32>
    %8 = arith.truncf %7 : vector<16x128xf32> to vector<16x128xbf16>
    %c0_6 = arith.constant 0 : index
    %c0_7 = arith.constant 0 : index
    %9 = vector.load %arg5[%c0_6, %c0_7] : memref<16x128xbf16, #tpu.memory_space<vmem>>, vector<16x128xbf16>
    tpu.vector_store %arg5[%c0_6, %c0_7], %8 {strides = array<i32>} : memref<16x128xbf16, #tpu.memory_space<vmem>>, vector<16x128xbf16>,
    return
  }
  func.func @transform_0(%arg0: i32, %arg1: i32) -> (i32, i32) {
    %c0_i32 = arith.constant 0 : i32
    %c0_i32_0 = arith.constant 0 : i32
    return %arg0, %c0_i32 : i32, i32
  }
  func.func @transform_1(%arg0: i32, %arg1: i32) -> (i32, i32) {
    %c0_i32 = arith.constant 0 : i32
    %c0_i32_0 = arith.constant 0 : i32
    return %c0_i32, %arg1 : i32, i32
  }
  func.func @transform_2(%arg0: i32, %arg1: i32) -> (i32, i32) {
    %c0_i32 = arith.constant 0 : i32
    %c0_i32_0 = arith.constant 0 : i32
    return %c0_i32, %arg1 : i32, i32
  }
  func.func @transform_3(%arg0: i32, %arg1: i32) -> (i32, i32) {
    %c0_i32 = arith.constant 0 : i32
    return %arg0, %arg1 : i32, i32
  }
}

module attributes {stable_mosaic.version = 11 : i64} {
  func.func @_mm_kernel(%arg0: i32, %arg1: i32, %arg2: memref<16x512xbf16, #tpu.memory_space<vmem>>, %arg3: memref<512x128xbf16, #tpu.memory_space<vmem>>, %arg4: memref<1x128xf32, #tpu.memory_space<vmem>>, %arg5: memref<16x128xbf16, #tpu.memory_space<vmem>>) attributes {dimension_semantics = [#tpu.dimension_semantics<parallel>, #tpu.dimension_semantics<parallel>], iteration_bounds = array<i64: 1, 1>, scalar_prefetch = 0 : i64, scratch_operands = 0 : i64, tpu.core_type = #tpu.core_type<tc>, window_params = [{transform_indices = @transform_0, window_bounds = array<i64: 16, 512>}, {transform_indices = @transform_1, window_bounds = array<i64: 512, 128>}, {transform_indices = @transform_2, window_bounds = array<i64: 1, 128>}, {transform_indices = @transform_3, window_bounds = array<i64: 16, 128>}]} {
    %c0 = arith.constant 0 : index
    %c0_0 = arith.constant 0 : index
    %0 = vector.load %arg2[%c0, %c0_0] : memref<16x512xbf16, #tpu.memory_space<vmem>>, vector<16x512xbf16>
    %c0_1 = arith.constant 0 : index
    %c0_2 = arith.constant 0 : index
    %1 = vector.load %arg3[%c0_1, %c0_2] : memref<512x128xbf16, #tpu.memory_space<vmem>>, vector<512x128xbf16>
    %cst = arith.constant dense<0.000000e+00> : vector<16x128xf32>
    %2 = tpu.matmul %0, %1, %cst {dimension_numbers = #tpu.dot_dimension_numbers<[1], [0], [0], [1], [0, 0, 1, 1], [], []>} : vector<16x512xbf16>, vector<512x128xbf16>, vector<16x128xf32> -> vector<16x128xf32>
    %c0_3 = arith.constant 0 : index
    %c0_4 = arith.constant 0 : index
    %3 = vector.load %arg4[%c0_3, %c0_4] : memref<1x128xf32, #tpu.memory_space<vmem>>, vector<1x128xf32>
    %4 = vector.broadcast %3 : vector<1x128xf32> to vector<16x128xf32>
    %5 = arith.addf %2, %4 : vector<16x128xf32>
    %cst_5 = arith.constant 0.000000e+00 : f32
    %6 = vector.broadcast %cst_5 : f32 to vector<16x128xf32>
    %7 = arith.maximumf %5, %6 : vector<16x128xf32>
    %8 = arith.truncf %7 : vector<16x128xf32> to vector<16x128xbf16>
    %c0_6 = arith.constant 0 : index
    %c0_7 = arith.constant 0 : index
    %9 = vector.load %arg5[%c0_6, %c0_7] : memref<16x128xbf16, #tpu.memory_space<vmem>>, vector<16x128xbf16>
    tpu.vector_store %arg5[%c0_6, %c0_7], %8 {strides = array<i32>} : memref<16x128xbf16, #tpu.memory_space<vmem>>, vector<16x128xbf16>,
    return
  }
  func.func @transform_0(%arg0: i32, %arg1: i32) -> (i32, i32) {
    %c0_i32 = arith.constant 0 : i32
    %c0_i32_0 = arith.constant 0 : i32
    return %arg0, %c0_i32 : i32, i32
  }
  func.func @transform_1(%arg0: i32, %arg1: i32) -> (i32, i32) {
    %c0_i32 = arith.constant 0 : i32
    %c0_i32_0 = arith.constant 0 : i32
    return %c0_i32, %arg1 : i32, i32
  }
  func.func @transform_2(%arg0: i32, %arg1: i32) -> (i32, i32) {
    %c0_i32 = arith.constant 0 : i32
    %c0_i32_0 = arith.constant 0 : i32
    return %c0_i32, %arg1 : i32, i32
  }
  func.func @transform_3(%arg0: i32, %arg1: i32) -> (i32, i32) {
    %c0_i32 = arith.constant 0 : i32
    return %arg0, %arg1 : i32, i32
  }
}

module attributes {stable_mosaic.version = 11 : i64} {
  func.func @_mm_res_kernel(%arg0: i32, %arg1: i32, %arg2: memref<16x128xbf16, #tpu.memory_space<vmem>>, %arg3: memref<128x256xbf16, #tpu.memory_space<vmem>>, %arg4: memref<1x256xf32, #tpu.memory_space<vmem>>, %arg5: memref<16x256xbf16, #tpu.memory_space<vmem>>, %arg6: memref<16x256xbf16, #tpu.memory_space<vmem>>) attributes {dimension_semantics = [#tpu.dimension_semantics<parallel>, #tpu.dimension_semantics<parallel>], iteration_bounds = array<i64: 1, 2>, scalar_prefetch = 0 : i64, scratch_operands = 0 : i64, tpu.core_type = #tpu.core_type<tc>, window_params = [{transform_indices = @transform_0, window_bounds = array<i64: 16, 128>}, {transform_indices = @transform_1, window_bounds = array<i64: 128, 256>}, {transform_indices = @transform_2, window_bounds = array<i64: 1, 256>}, {transform_indices = @transform_3, window_bounds = array<i64: 16, 256>}, {transform_indices = @transform_4, window_bounds = array<i64: 16, 256>}]} {
    %c0 = arith.constant 0 : index
    %c0_0 = arith.constant 0 : index
    %0 = vector.load %arg2[%c0, %c0_0] : memref<16x128xbf16, #tpu.memory_space<vmem>>, vector<16x128xbf16>
    %c0_1 = arith.constant 0 : index
    %c0_2 = arith.constant 0 : index
    %1 = vector.load %arg3[%c0_1, %c0_2] : memref<128x256xbf16, #tpu.memory_space<vmem>>, vector<128x256xbf16>
    %cst = arith.constant dense<0.000000e+00> : vector<16x256xf32>
    %2 = tpu.matmul %0, %1, %cst {dimension_numbers = #tpu.dot_dimension_numbers<[1], [0], [0], [1], [0, 0, 1, 1], [], []>} : vector<16x128xbf16>, vector<128x256xbf16>, vector<16x256xf32> -> vector<16x256xf32>
    %c0_3 = arith.constant 0 : index
    %c0_4 = arith.constant 0 : index
    %3 = vector.load %arg4[%c0_3, %c0_4] : memref<1x256xf32, #tpu.memory_space<vmem>>, vector<1x256xf32>
    %4 = vector.broadcast %3 : vector<1x256xf32> to vector<16x256xf32>
    %5 = arith.addf %2, %4 : vector<16x256xf32>
    %c0_5 = arith.constant 0 : index
    %c0_6 = arith.constant 0 : index
    %6 = vector.load %arg5[%c0_5, %c0_6] : memref<16x256xbf16, #tpu.memory_space<vmem>>, vector<16x256xbf16>
    %7 = arith.extf %6 : vector<16x256xbf16> to vector<16x256xf32>
    %8 = arith.addf %5, %7 : vector<16x256xf32>
    %cst_7 = arith.constant 0.000000e+00 : f32
    %9 = vector.broadcast %cst_7 : f32 to vector<16x256xf32>
    %10 = arith.maximumf %8, %9 : vector<16x256xf32>
    %11 = arith.truncf %10 : vector<16x256xf32> to vector<16x256xbf16>
    %c0_8 = arith.constant 0 : index
    %c0_9 = arith.constant 0 : index
    %12 = vector.load %arg6[%c0_8, %c0_9] : memref<16x256xbf16, #tpu.memory_space<vmem>>, vector<16x256xbf16>
    tpu.vector_store %arg6[%c0_8, %c0_9], %11 {strides = array<i32>} : memref<16x256xbf16, #tpu.memory_space<vmem>>, vector<16x256xbf16>,
    return
  }
  func.func @transform_0(%arg0: i32, %arg1: i32) -> (i32, i32) {
    %c0_i32 = arith.constant 0 : i32
    %c0_i32_0 = arith.constant 0 : i32
    return %arg0, %c0_i32 : i32, i32
  }
  func.func @transform_1(%arg0: i32, %arg1: i32) -> (i32, i32) {
    %c0_i32 = arith.constant 0 : i32
    %c0_i32_0 = arith.constant 0 : i32
    return %c0_i32, %arg1 : i32, i32
  }
  func.func @transform_2(%arg0: i32, %arg1: i32) -> (i32, i32) {
    %c0_i32 = arith.constant 0 : i32
    %c0_i32_0 = arith.constant 0 : i32
    return %c0_i32, %arg1 : i32, i32
  }
  func.func @transform_3(%arg0: i32, %arg1: i32) -> (i32, i32) {
    %c0_i32 = arith.constant 0 : i32
    return %arg0, %arg1 : i32, i32
  }
  func.func @transform_4(%arg0: i32, %arg1: i32) -> (i32, i32) {
    %c0_i32 = arith.constant 0 : i32
    return %arg0, %arg1 : i32, i32
  }
}

module attributes {stable_mosaic.version = 11 : i64} {
  func.func @_wide_conv_kernel(%arg0: i32, %arg1: memref<1x16x128xbf16, #tpu.memory_space<vmem>>, %arg2: memref<9x128x128xbf16, #tpu.memory_space<vmem>>, %arg3: memref<1x128xf32, #tpu.memory_space<vmem>>, %arg4: memref<1x8x128xbf16, #tpu.memory_space<vmem>>) attributes {dimension_semantics = [#tpu.dimension_semantics<parallel>], iteration_bounds = array<i64: 2>, scalar_prefetch = 0 : i64, scratch_operands = 0 : i64, tpu.core_type = #tpu.core_type<tc>, window_params = [{transform_indices = @transform_0, window_bounds = array<i64: 1, 16, 128>}, {pipeline_mode = #tpu.pipeline_mode<synchronous>, transform_indices = @transform_1, window_bounds = array<i64: 9, 128, 128>}, {pipeline_mode = #tpu.pipeline_mode<synchronous>, transform_indices = @transform_2, window_bounds = array<i64: 1, 128>}, {transform_indices = @transform_3, window_bounds = array<i64: 1, 8, 128>}]} {
    %cst = arith.constant 0.000000e+00 : f32
    %0 = vector.broadcast %cst : f32 to vector<8x128xf32>
    %c0 = arith.constant 0 : index
    %c0_0 = arith.constant 0 : index
    %c0_1 = arith.constant 0 : index
    %1 = vector.load %arg1[%c0, %c0_0, %c0_1] : memref<1x16x128xbf16, #tpu.memory_space<vmem>>, vector<1x8x128xbf16>
    %2 = vector.shape_cast %1 : vector<1x8x128xbf16> to vector<8x128xbf16>
    %c0_2 = arith.constant 0 : index
    %c0_3 = arith.constant 0 : index
    %c0_4 = arith.constant 0 : index
    %3 = vector.load %arg2[%c0_2, %c0_3, %c0_4] : memref<9x128x128xbf16, #tpu.memory_space<vmem>>, vector<1x128x128xbf16>
    %4 = vector.shape_cast %3 : vector<1x128x128xbf16> to vector<128x128xbf16>
    %cst_5 = arith.constant dense<0.000000e+00> : vector<8x128xf32>
    %5 = tpu.matmul %2, %4, %cst_5 {dimension_numbers = #tpu.dot_dimension_numbers<[1], [0], [0], [1], [0, 0, 1, 1], [], []>} : vector<8x128xbf16>, vector<128x128xbf16>, vector<8x128xf32> -> vector<8x128xf32>
    %6 = arith.addf %0, %5 : vector<8x128xf32>
    %c0_6 = arith.constant 0 : index
    %c1 = arith.constant 1 : index
    %c0_7 = arith.constant 0 : index
    %7 = vector.load %arg1[%c0_6, %c1, %c0_7] : memref<1x16x128xbf16, #tpu.memory_space<vmem>>, vector<1x8x128xbf16>
    %8 = vector.shape_cast %7 : vector<1x8x128xbf16> to vector<8x128xbf16>
    %c1_8 = arith.constant 1 : index
    %c0_9 = arith.constant 0 : index
    %c0_10 = arith.constant 0 : index
    %9 = vector.load %arg2[%c1_8, %c0_9, %c0_10] : memref<9x128x128xbf16, #tpu.memory_space<vmem>>, vector<1x128x128xbf16>
    %10 = vector.shape_cast %9 : vector<1x128x128xbf16> to vector<128x128xbf16>
    %cst_11 = arith.constant dense<0.000000e+00> : vector<8x128xf32>
    %11 = tpu.matmul %8, %10, %cst_11 {dimension_numbers = #tpu.dot_dimension_numbers<[1], [0], [0], [1], [0, 0, 1, 1], [], []>} : vector<8x128xbf16>, vector<128x128xbf16>, vector<8x128xf32> -> vector<8x128xf32>
    %12 = arith.addf %6, %11 : vector<8x128xf32>
    %c0_12 = arith.constant 0 : index
    %c2 = arith.constant 2 : index
    %c0_13 = arith.constant 0 : index
    %13 = vector.load %arg1[%c0_12, %c2, %c0_13] : memref<1x16x128xbf16, #tpu.memory_space<vmem>>, vector<1x8x128xbf16>
    %14 = vector.shape_cast %13 : vector<1x8x128xbf16> to vector<8x128xbf16>
    %c2_14 = arith.constant 2 : index
    %c0_15 = arith.constant 0 : index
    %c0_16 = arith.constant 0 : index
    %15 = vector.load %arg2[%c2_14, %c0_15, %c0_16] : memref<9x128x128xbf16, #tpu.memory_space<vmem>>, vector<1x128x128xbf16>
    %16 = vector.shape_cast %15 : vector<1x128x128xbf16> to vector<128x128xbf16>
    %cst_17 = arith.constant dense<0.000000e+00> : vector<8x128xf32>
    %17 = tpu.matmul %14, %16, %cst_17 {dimension_numbers = #tpu.dot_dimension_numbers<[1], [0], [0], [1], [0, 0, 1, 1], [], []>} : vector<8x128xbf16>, vector<128x128xbf16>, vector<8x128xf32> -> vector<8x128xf32>
    %18 = arith.addf %12, %17 : vector<8x128xf32>
    %c0_18 = arith.constant 0 : index
    %c3 = arith.constant 3 : index
    %c0_19 = arith.constant 0 : index
    %19 = vector.load %arg1[%c0_18, %c3, %c0_19] : memref<1x16x128xbf16, #tpu.memory_space<vmem>>, vector<1x8x128xbf16>
    %20 = vector.shape_cast %19 : vector<1x8x128xbf16> to vector<8x128xbf16>
    %c3_20 = arith.constant 3 : index
    %c0_21 = arith.constant 0 : index
    %c0_22 = arith.constant 0 : index
    %21 = vector.load %arg2[%c3_20, %c0_21, %c0_22] : memref<9x128x128xbf16, #tpu.memory_space<vmem>>, vector<1x128x128xbf16>
    %22 = vector.shape_cast %21 : vector<1x128x128xbf16> to vector<128x128xbf16>
    %cst_23 = arith.constant dense<0.000000e+00> : vector<8x128xf32>
    %23 = tpu.matmul %20, %22, %cst_23 {dimension_numbers = #tpu.dot_dimension_numbers<[1], [0], [0], [1], [0, 0, 1, 1], [], []>} : vector<8x128xbf16>, vector<128x128xbf16>, vector<8x128xf32> -> vector<8x128xf32>
    %24 = arith.addf %18, %23 : vector<8x128xf32>
    %c0_24 = arith.constant 0 : index
    %c4 = arith.constant 4 : index
    %c0_25 = arith.constant 0 : index
    %25 = vector.load %arg1[%c0_24, %c4, %c0_25] : memref<1x16x128xbf16, #tpu.memory_space<vmem>>, vector<1x8x128xbf16>
    %26 = vector.shape_cast %25 : vector<1x8x128xbf16> to vector<8x128xbf16>
    %c4_26 = arith.constant 4 : index
    %c0_27 = arith.constant 0 : index
    %c0_28 = arith.constant 0 : index
    %27 = vector.load %arg2[%c4_26, %c0_27, %c0_28] : memref<9x128x128xbf16, #tpu.memory_space<vmem>>, vector<1x128x128xbf16>
    %28 = vector.shape_cast %27 : vector<1x128x128xbf16> to vector<128x128xbf16>
    %cst_29 = arith.constant dense<0.000000e+00> : vector<8x128xf32>
    %29 = tpu.matmul %26, %28, %cst_29 {dimension_numbers = #tpu.dot_dimension_numbers<[1], [0], [0], [1], [0, 0, 1, 1], [], []>} : vector<8x128xbf16>, vector<128x128xbf16>, vector<8x128xf32> -> vector<8x128xf32>
    %30 = arith.addf %24, %29 : vector<8x128xf32>
    %c0_30 = arith.constant 0 : index
    %c5 = arith.constant 5 : index
    %c0_31 = arith.constant 0 : index
    %31 = vector.load %arg1[%c0_30, %c5, %c0_31] : memref<1x16x128xbf16, #tpu.memory_space<vmem>>, vector<1x8x128xbf16>
    %32 = vector.shape_cast %31 : vector<1x8x128xbf16> to vector<8x128xbf16>
    %c5_32 = arith.constant 5 : index
    %c0_33 = arith.constant 0 : index
    %c0_34 = arith.constant 0 : index
    %33 = vector.load %arg2[%c5_32, %c0_33, %c0_34] : memref<9x128x128xbf16, #tpu.memory_space<vmem>>, vector<1x128x128xbf16>
    %34 = vector.shape_cast %33 : vector<1x128x128xbf16> to vector<128x128xbf16>
    %cst_35 = arith.constant dense<0.000000e+00> : vector<8x128xf32>
    %35 = tpu.matmul %32, %34, %cst_35 {dimension_numbers = #tpu.dot_dimension_numbers<[1], [0], [0], [1], [0, 0, 1, 1], [], []>} : vector<8x128xbf16>, vector<128x128xbf16>, vector<8x128xf32> -> vector<8x128xf32>
    %36 = arith.addf %30, %35 : vector<8x128xf32>
    %c0_36 = arith.constant 0 : index
    %c6 = arith.constant 6 : index
    %c0_37 = arith.constant 0 : index
    %37 = vector.load %arg1[%c0_36, %c6, %c0_37] : memref<1x16x128xbf16, #tpu.memory_space<vmem>>, vector<1x8x128xbf16>
    %38 = vector.shape_cast %37 : vector<1x8x128xbf16> to vector<8x128xbf16>
    %c6_38 = arith.constant 6 : index
    %c0_39 = arith.constant 0 : index
    %c0_40 = arith.constant 0 : index
    %39 = vector.load %arg2[%c6_38, %c0_39, %c0_40] : memref<9x128x128xbf16, #tpu.memory_space<vmem>>, vector<1x128x128xbf16>
    %40 = vector.shape_cast %39 : vector<1x128x128xbf16> to vector<128x128xbf16>
    %cst_41 = arith.constant dense<0.000000e+00> : vector<8x128xf32>
    %41 = tpu.matmul %38, %40, %cst_41 {dimension_numbers = #tpu.dot_dimension_numbers<[1], [0], [0], [1], [0, 0, 1, 1], [], []>} : vector<8x128xbf16>, vector<128x128xbf16>, vector<8x128xf32> -> vector<8x128xf32>
    %42 = arith.addf %36, %41 : vector<8x128xf32>
    %c0_42 = arith.constant 0 : index
    %c7 = arith.constant 7 : index
    %c0_43 = arith.constant 0 : index
    %43 = vector.load %arg1[%c0_42, %c7, %c0_43] : memref<1x16x128xbf16, #tpu.memory_space<vmem>>, vector<1x8x128xbf16>
    %44 = vector.shape_cast %43 : vector<1x8x128xbf16> to vector<8x128xbf16>
    %c7_44 = arith.constant 7 : index
    %c0_45 = arith.constant 0 : index
    %c0_46 = arith.constant 0 : index
    %45 = vector.load %arg2[%c7_44, %c0_45, %c0_46] : memref<9x128x128xbf16, #tpu.memory_space<vmem>>, vector<1x128x128xbf16>
    %46 = vector.shape_cast %45 : vector<1x128x128xbf16> to vector<128x128xbf16>
    %cst_47 = arith.constant dense<0.000000e+00> : vector<8x128xf32>
    %47 = tpu.matmul %44, %46, %cst_47 {dimension_numbers = #tpu.dot_dimension_numbers<[1], [0], [0], [1], [0, 0, 1, 1], [], []>} : vector<8x128xbf16>, vector<128x128xbf16>, vector<8x128xf32> -> vector<8x128xf32>
    %48 = arith.addf %42, %47 : vector<8x128xf32>
    %c0_48 = arith.constant 0 : index
    %c8 = arith.constant 8 : index
    %c0_49 = arith.constant 0 : index
    %49 = vector.load %arg1[%c0_48, %c8, %c0_49] : memref<1x16x128xbf16, #tpu.memory_space<vmem>>, vector<1x8x128xbf16>
    %50 = vector.shape_cast %49 : vector<1x8x128xbf16> to vector<8x128xbf16>
    %c8_50 = arith.constant 8 : index
    %c0_51 = arith.constant 0 : index
    %c0_52 = arith.constant 0 : index
    %51 = vector.load %arg2[%c8_50, %c0_51, %c0_52] : memref<9x128x128xbf16, #tpu.memory_space<vmem>>, vector<1x128x128xbf16>
    %52 = vector.shape_cast %51 : vector<1x128x128xbf16> to vector<128x128xbf16>
    %cst_53 = arith.constant dense<0.000000e+00> : vector<8x128xf32>
    %53 = tpu.matmul %50, %52, %cst_53 {dimension_numbers = #tpu.dot_dimension_numbers<[1], [0], [0], [1], [0, 0, 1, 1], [], []>} : vector<8x128xbf16>, vector<128x128xbf16>, vector<8x128xf32> -> vector<8x128xf32>
    %54 = arith.addf %48, %53 : vector<8x128xf32>
    %c0_54 = arith.constant 0 : index
    %c0_55 = arith.constant 0 : index
    %55 = vector.load %arg3[%c0_54, %c0_55] : memref<1x128xf32, #tpu.memory_space<vmem>>, vector<1x128xf32>
    %56 = vector.broadcast %55 : vector<1x128xf32> to vector<8x128xf32>
    %57 = arith.addf %54, %56 : vector<8x128xf32>
    %cst_56 = arith.constant 0.000000e+00 : f32
    %58 = vector.broadcast %cst_56 : f32 to vector<8x128xf32>
    %59 = arith.maximumf %57, %58 : vector<8x128xf32>
    %60 = arith.truncf %59 : vector<8x128xf32> to vector<8x128xbf16>
    %c0_57 = arith.constant 0 : index
    %c0_58 = arith.constant 0 : index
    %c0_59 = arith.constant 0 : index
    %61 = vector.load %arg4[%c0_57, %c0_58, %c0_59] : memref<1x8x128xbf16, #tpu.memory_space<vmem>>, vector<1x8x128xbf16>
    %62 = vector.shape_cast %61 : vector<1x8x128xbf16> to vector<8x128xbf16>
    %63 = vector.shape_cast %60 : vector<8x128xbf16> to vector<1x8x128xbf16>
    tpu.vector_store %arg4[%c0_57, %c0_58, %c0_59], %63 {strides = array<i32>} : memref<1x8x128xbf16, #tpu.memory_space<vmem>>, vector<1x8x128xbf16>,
    return
  }
  func.func @transform_0(%arg0: i32) -> (i32, i32, i32) {
    %c0_i32 = arith.constant 0 : i32
    %c0_i32_0 = arith.constant 0 : i32
    %c0_i32_1 = arith.constant 0 : i32
    return %arg0, %c0_i32, %c0_i32_0 : i32, i32, i32
  }
  func.func @transform_1(%arg0: i32) -> (i32, i32, i32) {
    %c0_i32 = arith.constant 0 : i32
    %c0_i32_0 = arith.constant 0 : i32
    %c0_i32_1 = arith.constant 0 : i32
    %c0_i32_2 = arith.constant 0 : i32
    return %c0_i32, %c0_i32_0, %c0_i32_1 : i32, i32, i32
  }
  func.func @transform_2(%arg0: i32) -> (i32, i32) {
    %c0_i32 = arith.constant 0 : i32
    %c0_i32_0 = arith.constant 0 : i32
    %c0_i32_1 = arith.constant 0 : i32
    return %c0_i32, %c0_i32_0 : i32, i32
  }
  func.func @transform_3(%arg0: i32) -> (i32, i32, i32) {
    %c0_i32 = arith.constant 0 : i32
    %c0_i32_0 = arith.constant 0 : i32
    %c0_i32_1 = arith.constant 0 : i32
    return %arg0, %c0_i32, %c0_i32_0 : i32, i32, i32
  }
}

</mosaic_0001>

<bundles_post_ra>
// kernel: backbone_forward.53
= control target key start
LH: loop header
LB: loop body
LE: loop exit
PB: predicated region body
PF: predicated region fallthrough
CT: control target
= control target key end

     0   :  { %s1288_s12 = smov 0   ;;  %s1290_s13 = smov 0   ;;  %s1508_s0 = inlined_call_operand.vmem [shape: bf16[512,147], index: 0, kind: input, shape index: {}]   ;;  %s1509_s1 = inlined_call_operand.vmem [shape: bf16[147,64], index: 1, kind: input, shape index: {}]   ;;  %s1510_s2 = inlined_call_operand.vmem [shape: f32[1,64], index: 2, kind: input, shape index: {}]   ;;  %s1511_s3 = inlined_call_operand.vmem [shape: bf16[512,64], index: 3, kind: output, shape index: {}]  }
   0x1   :  { %s1292_s14 = smov 0  }
   0x2 LB: > { %s25_s15 = sadd.s32 1, %s1260_s13  ;;  %p1006_p0 = scmp.ge.s32.totalorder %s1264_s14, 1  ;;  %s1264_s14 = sphi %s1292_s14, %s13_s14   ;;  %s1260_s13 = sphi %s1290_s13, %s1513_s13   ;;  %s1256_s12 = sphi %s1288_s12, %s1512_s12  }
   0x3   : > { %p27_p1 = scmp.ge.s32.totalorder %s25_s15, 2  ;;  %p170_p2 = scmp.lt.s32.totalorder %s1264_s14, 3 }
   0x5   : > { %s1515_s15 = smov (%p27_p1, %s25_s15), 0  ;;  %p171_p3 = pnand %p1006_p0, %p170_p2 }
   0x6   : > { %v1184_v0 = vld [vmem:[%s1509_s1] sm:$0xff] (!%p171_p3)   ;;  %v1266_v1 = vmov (!%p171_p3), 0   ;;  %v1185_v2 = vld [vmem:[%s1509_s1 + $0x8] sm:$0xff] (!%p171_p3)   ;;  %v1186_v3 = vld [vmem:[%s1509_s1 + $0x10] sm:$0xff] (!%p171_p3)   ;;  %s1007_s22 = sshll.u32 (!%p171_p3), %s1256_s12, 5  ;;  %vm488_vm0 = vcmask (!%p171_p3), 154624  }
   0x7   : > { %174 = sbr.rel (%p171_p3) target bundleno = 324 (0x144), region = 32  ;;  %544 = vmatprep.subr.bf16.mxu0 (!%p171_p3), %v1266_v1  ;;  %1138 = vmatprep.subr.bf16.mxu1 (!%p171_p3), %v1266_v1  ;;  %p206_p4 = scmp.lt.s32.totalorder (!%p171_p3), %s1007_s22, 63  ;;  %v1187_v4 = vld [vmem:[%s1509_s1 + $0x18] sm:$0xff] (!%p171_p3)   ;;  %v1188_v5 = vld [vmem:[%s1509_s1 + $0x20] sm:$0xff] (!%p171_p3)   ;;  %v1189_v8 = vld [vmem:[%s1509_s1 + $0x28] sm:$0xff] (!%p171_p3)   ;;  %vm537_vm1 = vcmask (!%p171_p3), 1040384  }
   0x8   : > { %545 = vmatpush1.bf16.msra.mxu0 (!%p171_p3), %v1184_v0  ;;  %1148 = vmatpush1.bf16.msra.mxu1 (!%p171_p3), %v1184_v0  ;;  %v1190_v9 = vld [vmem:[%s1509_s1 + $0x30] sm:$0xff] (!%p171_p3)   ;;  %v1191_v10 = vld [vmem:[%s1509_s1 + $0x38] sm:$0xff] (!%p171_p3)   ;;  %vm538_vm2 = vcmask (!%p171_p3), 1041408   ;;  %v1267_v11 = vmov (!%p171_p3), 65535   ;;  %v1192_v13 = vld [vmem:[%s1509_s1 + $0x40] sm:$0xff] (!%p171_p3)   ;;  %vm865_vm3 = vcmask (!%p171_p3), 519168  }
   0x9   : > { %546 = vmatprep.subr.bf16.mxu0 (!%p171_p3), %v1266_v1  ;;  %1139 = vmatprep.subr.bf16.mxu1 (!%p171_p3), %v1266_v1  ;;  %v539_v12 = vsel (!%p171_p3), %vm537_vm1, 4294967295, %v1267_v11  ;;  %v1193_v14 = vld [vmem:[%s1509_s1 + $0x48] ss:$0 sps:$4 sm:$0x33] (!%p171_p3)   ;;  %v1395_v47 = vld [vmem:[%s1510_s2] ss:$0 sm:$0xff] (!%p171_p3) }
   0xa   : > { %v540_v15 = vsel (!%p171_p3), %vm538_vm2, %v539_v12, 0 }
   0xb   : > { %v542_v16 = vand.u32 (!%p171_p3), %v1193_v14, %v540_v15 }
   0xc   : > { %547 = vmatpush1.bf16.msra.mxu0 (!%p171_p3), %v1185_v2  ;;  %1149 = vmatpush1.bf16.msra.mxu1 (!%p171_p3), %v1185_v2 }
   0xd   : > { %548 = vmatprep.subr.bf16.mxu0 (!%p171_p3), %v1266_v1  ;;  %1140 = vmatprep.subr.bf16.mxu1 (!%p171_p3), %v1266_v1 }
   0xe   : > { %s1517_s22 = smov (!%p206_p4, %s1007_s22), 63 }
   0xf   : > { %s1105_s25 = sshll.u32 %s1517_s22, 3  ;;  %s1011_s19 = sshll.u32 %s1517_s22, 2 }
  0x10   : > { %549 = vmatpush1.bf16.msra.mxu0 %v1186_v3  ;;  %1150 = vmatpush1.bf16.msra.mxu1 %v1186_v3  ;;  %s1324_s28 = scalar_lea.vmem %s1508_s0, %s1105_s25  ;;  %s1405_s22 = scalar_lea.vmem %s1511_s3, %s1011_s19 }
  0x11   : > { %550 = vmatprep.subr.bf16.mxu0 %v1266_v1  ;;  %1141 = vmatprep.subr.bf16.mxu1 %v1266_v1  ;;  %v1196_v6 = vld [vmem:[%s1324_s28 + $0x4] ss:$8 sps:$4 sm:$0xff]   ;;  %v1194_v17 = vld [vmem:[%s1324_s28] ss:$8 sps:$4 sm:$0xff]   ;;  %v1200_v19 = vld [vmem:[%s1324_s28 + $0x14] ss:$8 sps:$4 sm:$0xff]  }
  0x12   : > { %v1199_v7 = vld [vmem:[%s1324_s28 + $0x84] ss:$8 sps:$4 sm:$0xff]   ;;  %1055 = vmatprep.mubr.msk.bf16.mxu0 %vm488_vm0, %v1196_v6  ;;  %v1197_v18 = vld [vmem:[%s1324_s28 + $0x80] ss:$8 sps:$4 sm:$0xff]   ;;  %v1202_v20 = vld [vmem:[%s1324_s28 + $0x94] ss:$8 sps:$4 sm:$0xff]  }
  0x13   : > { %1063 = vmatprep.mubr.msk.bf16.mxu1 %vm488_vm0, %v1199_v7  ;;  %v1204_v21 = vld [vmem:[%s1324_s28 + $0x10] ss:$8 sps:$4 sm:$0xff]   ;;  %v1206_v23 = vld [vmem:[%s1324_s28 + $0x24] ss:$8 sps:$4 sm:$0xff]   ;;  %v1210_v25 = vld [vmem:[%s1324_s28 + $0x20] ss:$8 sps:$4 sm:$0xff]  }
  0x14   : > { %551 = vmatpush1.bf16.msra.mxu0 %v1187_v4  ;;  %1151 = vmatpush1.bf16.msra.mxu1 %v1187_v4  ;;  %v1205_v22 = vld [vmem:[%s1324_s28 + $0x90] ss:$8 sps:$4 sm:$0xff]   ;;  %v1208_v24 = vld [vmem:[%s1324_s28 + $0xa4] ss:$8 sps:$4 sm:$0xff]   ;;  %v1211_v26 = vld [vmem:[%s1324_s28 + $0xa0] ss:$8 sps:$4 sm:$0xff]  }
  0x15   : > { %552 = vmatprep.subr.bf16.mxu0 %v1266_v1  ;;  %1142 = vmatprep.subr.bf16.mxu1 %v1266_v1  ;;  %v1212_v27 = vld [vmem:[%s1324_s28 + $0x34] ss:$8 sps:$4 sm:$0xff]   ;;  %v1216_v29 = vld [vmem:[%s1324_s28 + $0x30] ss:$8 sps:$4 sm:$0xff]   ;;  %v1218_v31 = vld [vmem:[%s1324_s28 + $0x44] ss:$8 sps:$4 sm:$0xff]  }
  0x16   : > { %v1214_v28 = vld [vmem:[%s1324_s28 + $0xb4] ss:$8 sps:$4 sm:$0xff]   ;;  %v1217_v30 = vld [vmem:[%s1324_s28 + $0xb0] ss:$8 sps:$4 sm:$0xff]   ;;  %v1220_v32 = vld [vmem:[%s1324_s28 + $0xc4] ss:$8 sps:$4 sm:$0xff]  }
  0x17   : > { %v1222_v33 = vld [vmem:[%s1324_s28 + $0x40] ss:$8 sps:$4 sm:$0xff]   ;;  %v1224_v35 = vld [vmem:[%s1324_s28 + $0x54] ss:$8 sps:$4 sm:$0xff]   ;;  %v1228_v37 = vld [vmem:[%s1324_s28 + $0x50] ss:$8 sps:$4 sm:$0xff]  }
  0x18   : > { %553 = vmatpush1.bf16.msra.mxu0 %v1188_v5  ;;  %1152 = vmatpush1.bf16.msra.mxu1 %v1188_v5  ;;  %v1223_v34 = vld [vmem:[%s1324_s28 + $0xc0] ss:$8 sps:$4 sm:$0xff]   ;;  %v1226_v36 = vld [vmem:[%s1324_s28 + $0xd4] ss:$8 sps:$4 sm:$0xff]   ;;  %v1229_v38 = vld [vmem:[%s1324_s28 + $0xd0] ss:$8 sps:$4 sm:$0xff]  }
  0x19   : > { %554 = vmatprep.subr.bf16.mxu0 %v1266_v1  ;;  %1143 = vmatprep.subr.bf16.mxu1 %v1266_v1  ;;  %v1230_v39 = vld [vmem:[%s1324_s28 + $0x64] ss:$8 sps:$4 sm:$0xff]   ;;  %v1234_v41 = vld [vmem:[%s1324_s28 + $0x60] ss:$8 sps:$4 sm:$0xff]   ;;  %v1236_v43 = vld [vmem:[%s1324_s28 + $0x74] ss:$8 sps:$4 sm:$0xff]  }
  0x1a   : > { %v1232_v40 = vld [vmem:[%s1324_s28 + $0xe4] ss:$8 sps:$4 sm:$0xff]   ;;  %v1235_v42 = vld [vmem:[%s1324_s28 + $0xe0] ss:$8 sps:$4 sm:$0xff]   ;;  %v1238_v44 = vld [vmem:[%s1324_s28 + $0xf4] ss:$8 sps:$4 sm:$0xff]  }
  0x1b   : > { %v1240_v45 = vld [vmem:[%s1324_s28 + $0x70] ss:$8 sps:$4 sm:$0xff]  }
  0x1c   : > { %555 = vmatpush1.bf16.msra.mxu0 %v1189_v8  ;;  %1153 = vmatpush1.bf16.msra.mxu1 %v1189_v8  ;;  %v1241_v46 = vld [vmem:[%s1324_s28 + $0xf0] ss:$8 sps:$4 sm:$0xff]  }
  0x1d   : > { %556 = vmatprep.subr.bf16.mxu0 %v1266_v1  ;;  %1144 = vmatprep.subr.bf16.mxu1 %v1266_v1 }
  0x20   : > { %557 = vmatpush1.bf16.msra.mxu0 %v1190_v9  ;;  %1154 = vmatpush1.bf16.msra.mxu1 %v1190_v9 }
  0x21   : > { %558 = vmatprep.subr.bf16.mxu0 %v1266_v1  ;;  %1145 = vmatprep.subr.bf16.mxu1 %v1266_v1 }
  0x24   : > { %559 = vmatpush1.bf16.msra.mxu0 %v1191_v10  ;;  %1155 = vmatpush1.bf16.msra.mxu1 %v1191_v10 }
  0x25   : > { %560 = vmatprep.subr.bf16.mxu0 %v1266_v1  ;;  %1146 = vmatprep.subr.bf16.mxu1 %v1266_v1 }
  0x28   : > { %561 = vmatpush1.bf16.msra.mxu0 %v1192_v13  ;;  %1156 = vmatpush1.bf16.msra.mxu1 %v1192_v13 }
  0x29   : > { %562 = vmatprep.subr.bf16.mxu0 %v1266_v1  ;;  %1147 = vmatprep.subr.bf16.mxu1 %v1266_v1 }
  0x2c   : > { %563 = vmatpush1.bf16.msra.mxu0 %v542_v16  ;;  %1157 = vmatpush1.bf16.msra.mxu1 %v542_v16 }
  0x2f   : > { %577 = vmatmul.mubr.bf16.vlgmr.msra.gmra.mrb[0].mxu0 %v1194_v17  ;;  %641 = vmatmul.mubr.bf16.vlgmr.msra.gmra.mrb[0].mxu1 %v1197_v18 }
  0x30   : > { %1056 = vmatprep.mubr.msk.bf16.mxu0 %vm488_vm0, %v1200_v19  ;;  %1064 = vmatprep.mubr.msk.bf16.mxu1 %vm488_vm0, %v1202_v20 }
  0x37   : > { %585 = vmatmul.mubr.bf16.gmra.mrb[4].mxu0 %v1204_v21  ;;  %649 = vmatmul.mubr.bf16.gmra.mrb[4].mxu1 %v1205_v22 }
  0x38   : > { %1057 = vmatprep.mubr.msk.bf16.mxu0 %vm488_vm0, %v1206_v23  ;;  %1065 = vmatprep.mubr.msk.bf16.mxu1 %vm488_vm0, %v1208_v24 }
  0x3f   : > { %593 = vmatmul.mubr.bf16.gmra.mrb[8].mxu0 %v1210_v25  ;;  %657 = vmatmul.mubr.bf16.gmra.mrb[8].mxu1 %v1211_v26 }
  0x40   : > { %1058 = vmatprep.mubr.msk.bf16.mxu0 %vm488_vm0, %v1212_v27  ;;  %1066 = vmatprep.mubr.msk.bf16.mxu1 %vm488_vm0, %v1214_v28 }
  0x47   : > { %601 = vmatmul.mubr.bf16.gmra.mrb[12].mxu0 %v1216_v29  ;;  %665 = vmatmul.mubr.bf16.gmra.mrb[12].mxu1 %v1217_v30 }
  0x48   : > { %1059 = vmatprep.mubr.msk.bf16.mxu0 %vm488_vm0, %v1218_v31  ;;  %1067 = vmatprep.mubr.msk.bf16.mxu1 %vm488_vm0, %v1220_v32 }
  0x4f   : > { %609 = vmatmul.mubr.bf16.gmra.mrb[16].mxu0 %v1222_v33  ;;  %673 = vmatmul.mubr.bf16.gmra.mrb[16].mxu1 %v1223_v34 }
  0x50   : > { %1060 = vmatprep.mubr.msk.bf16.mxu0 %vm488_vm0, %v1224_v35  ;;  %1068 = vmatprep.mubr.msk.bf16.mxu1 %vm488_vm0, %v1226_v36 }
  0x57   : > { %617 = vmatmul.mubr.bf16.gmra.mrb[20].mxu0 %v1228_v37  ;;  %681 = vmatmul.mubr.bf16.gmra.mrb[20].mxu1 %v1229_v38 }
  0x58   : > { %1061 = vmatprep.mubr.msk.bf16.mxu0 %vm488_vm0, %v1230_v39  ;;  %1069 = vmatprep.mubr.msk.bf16.mxu1 %vm488_vm0, %v1232_v40 }
  0x5f   : > { %625 = vmatmul.mubr.bf16.gmra.mrb[24].mxu0 %v1234_v41  ;;  %689 = vmatmul.mubr.bf16.gmra.mrb[24].mxu1 %v1235_v42 }
  0x60   : > { %1062 = vmatprep.mubr.msk.bf16.mxu0 %vm488_vm0, %v1236_v43  ;;  %1070 = vmatprep.mubr.msk.bf16.mxu1 %vm488_vm0, %v1238_v44 }
  0x67   : > { %633 = vmatmul.mubr.bf16.gmra.mrb[28].mxu0 %v1240_v45  ;;  %697 = vmatmul.mubr.bf16.gmra.mrb[28].mxu1 %v1241_v46 }
 0x102   : > { %v578_v48 = vpop.f32.mrb[0].mxu0  ;;  %v642_v49 = vpop.f32.mrb[0].mxu1 }
 0x103   : > { %v579_v50 = vadd.f32 %v1395_v47, %v578_v48  ;;  %v643_v51 = vadd.f32 %v1395_v47, %v642_v49  ;;  %v580_v52 = vpop.f32.mrb[1].mxu0  ;;  %v644_v53 = vpop.f32.mrb[1].mxu1 }
 0x104   : > { %v581_v54 = vpop.f32.mrb[2].mxu0  ;;  %v645_v55 = vpop.f32.mrb[2].mxu1 }
 0x105   : > { %v705_v56 = vmax.f32 %v579_v50, 0.0  ;;  %v721_v57 = vmax.f32 %v643_v51, 0.0  ;;  %v582_v58 = vadd.f32 %v1395_v47, %v581_v54  ;;  %v646_v59 = vadd.f32 %v1395_v47, %v645_v55  ;;  %v583_v60 = vpop.f32.mrb[3].mxu0  ;;  %v647_v61 = vpop.f32.mrb[3].mxu1 }
 0x107   : > { %v1106_v62 = vpack.c.bf16 %v705_v56, %v705_v56  ;;  %v1122_v63 = vpack.c.bf16 %v721_v57, %v721_v57  ;;  %v706_v0 = vmax.f32 %v582_v58, 0.0  ;;  %v722_v1 = vmax.f32 %v646_v59, 0.0 }
 0x109   : > { %866 = vst.msk [vmem:[%s1405_s22] sm:$0xf] %vm865_vm3, %v1106_v62  ;;  %882 = vst.msk [vmem:[%s1405_s22 + $0x40] sm:$0xf] %vm865_vm3, %v1122_v63  ;;  %v1107_v2 = vpack.c.bf16 %v706_v0, %v706_v0  ;;  %v1123_v3 = vpack.c.bf16 %v722_v1, %v722_v1 }
 0x10a   : > { %v586_v4 = vpop.f32.mrb[4].mxu0  ;;  %v650_v5 = vpop.f32.mrb[4].mxu1 }
 0x10b   : > { %867 = vst.msk [vmem:[%s1405_s22 + $0x4] sm:$0xf] %vm865_vm3, %v1107_v2  ;;  %883 = vst.msk [vmem:[%s1405_s22 + $0x44] sm:$0xf] %vm865_vm3, %v1123_v3  ;;  %v587_v6 = vadd.f32 %v1395_v47, %v586_v4  ;;  %v651_v7 = vadd.f32 %v1395_v47, %v650_v5  ;;  %v588_v8 = vpop.f32.mrb[5].mxu0  ;;  %v652_v9 = vpop.f32.mrb[5].mxu1 }
 0x10c   : > { %v589_v10 = vpop.f32.mrb[6].mxu0  ;;  %v653_v11 = vpop.f32.mrb[6].mxu1 }
 0x10d   : > { %v707_v12 = vmax.f32 %v587_v6, 0.0  ;;  %v723_v13 = vmax.f32 %v651_v7, 0.0  ;;  %v590_v14 = vadd.f32 %v1395_v47, %v589_v10  ;;  %v654_v15 = vadd.f32 %v1395_v47, %v653_v11  ;;  %v591_v16 = vpop.f32.mrb[7].mxu0  ;;  %v655_v17 = vpop.f32.mrb[7].mxu1 }
 0x10f   : > { %v1108_v18 = vpack.c.bf16 %v707_v12, %v707_v12  ;;  %v1124_v19 = vpack.c.bf16 %v723_v13, %v723_v13  ;;  %v708_v20 = vmax.f32 %v590_v14, 0.0  ;;  %v724_v21 = vmax.f32 %v654_v15, 0.0 }
 0x111   : > { %868 = vst.msk [vmem:[%s1405_s22 + $0x8] sm:$0xf] %vm865_vm3, %v1108_v18  ;;  %884 = vst.msk [vmem:[%s1405_s22 + $0x48] sm:$0xf] %vm865_vm3, %v1124_v19  ;;  %v1109_v22 = vpack.c.bf16 %v708_v20, %v708_v20  ;;  %v1125_v23 = vpack.c.bf16 %v724_v21, %v724_v21 }
 0x112   : > { %v594_v24 = vpop.f32.mrb[8].mxu0  ;;  %v658_v25 = vpop.f32.mrb[8].mxu1 }
 0x113   : > { %869 = vst.msk [vmem:[%s1405_s22 + $0xc] sm:$0xf] %vm865_vm3, %v1109_v22  ;;  %885 = vst.msk [vmem:[%s1405_s22 + $0x4c] sm:$0xf] %vm865_vm3, %v1125_v23  ;;  %v595_v26 = vadd.f32 %v1395_v47, %v594_v24  ;;  %v659_v27 = vadd.f32 %v1395_v47, %v658_v25  ;;  %v596_v28 = vpop.f32.mrb[9].mxu0  ;;  %v660_v29 = vpop.f32.mrb[9].mxu1 }
 0x114   : > { %v597_v30 = vpop.f32.mrb[10].mxu0  ;;  %v661_v31 = vpop.f32.mrb[10].mxu1 }
 0x115   : > { %v709_v32 = vmax.f32 %v595_v26, 0.0  ;;  %v725_v33 = vmax.f32 %v659_v27, 0.0  ;;  %v598_v34 = vadd.f32 %v1395_v47, %v597_v30  ;;  %v662_v35 = vadd.f32 %v1395_v47, %v661_v31  ;;  %v599_v36 = vpop.f32.mrb[11].mxu0  ;;  %v663_v37 = vpop.f32.mrb[11].mxu1 }
 0x117   : > { %v1110_v38 = vpack.c.bf16 %v709_v32, %v709_v32  ;;  %v1126_v39 = vpack.c.bf16 %v725_v33, %v725_v33  ;;  %v710_v40 = vmax.f32 %v598_v34, 0.0  ;;  %v726_v41 = vmax.f32 %v662_v35, 0.0 }
 0x119   : > { %870 = vst.msk [vmem:[%s1405_s22 + $0x10] sm:$0xf] %vm865_vm3, %v1110_v38  ;;  %886 = vst.msk [vmem:[%s1405_s22 + $0x50] sm:$0xf] %vm865_vm3, %v1126_v39  ;;  %v1111_v42 = vpack.c.bf16 %v710_v40, %v710_v40  ;;  %v1127_v43 = vpack.c.bf16 %v726_v41, %v726_v41 }
 0x11a   : > { %v602_v44 = vpop.f32.mrb[12].mxu0  ;;  %v666_v45 = vpop.f32.mrb[12].mxu1 }
 0x11b   : > { %871 = vst.msk [vmem:[%s1405_s22 + $0x14] sm:$0xf] %vm865_vm3, %v1111_v42  ;;  %887 = vst.msk [vmem:[%s1405_s22 + $0x54] sm:$0xf] %vm865_vm3, %v1127_v43  ;;  %v603_v46 = vadd.f32 %v1395_v47, %v602_v44  ;;  %v667_v48 = vadd.f32 %v1395_v47, %v666_v45  ;;  %v604_v49 = vpop.f32.mrb[13].mxu0  ;;  %v668_v50 = vpop.f32.mrb[13].mxu1 }
 0x11c   : > { %v605_v51 = vpop.f32.mrb[14].mxu0  ;;  %v669_v52 = vpop.f32.mrb[14].mxu1 }
 0x11d   : > { %v711_v53 = vmax.f32 %v603_v46, 0.0  ;;  %v727_v54 = vmax.f32 %v667_v48, 0.0  ;;  %v606_v55 = vadd.f32 %v1395_v47, %v605_v51  ;;  %v670_v56 = vadd.f32 %v1395_v47, %v669_v52  ;;  %v607_v57 = vpop.f32.mrb[15].mxu0  ;;  %v671_v58 = vpop.f32.mrb[15].mxu1 }
 0x11f   : > { %v1112_v59 = vpack.c.bf16 %v711_v53, %v711_v53  ;;  %v1128_v60 = vpack.c.bf16 %v727_v54, %v727_v54  ;;  %v712_v61 = vmax.f32 %v606_v55, 0.0  ;;  %v728_v62 = vmax.f32 %v670_v56, 0.0 }
 0x121   : > { %872 = vst.msk [vmem:[%s1405_s22 + $0x18] sm:$0xf] %vm865_vm3, %v1112_v59  ;;  %888 = vst.msk [vmem:[%s1405_s22 + $0x58] sm:$0xf] %vm865_vm3, %v1128_v60  ;;  %v1113_v63 = vpack.c.bf16 %v712_v61, %v712_v61  ;;  %v1129_v0 = vpack.c.bf16 %v728_v62, %v728_v62 }
 0x122   : > { %v610_v1 = vpop.f32.mrb[16].mxu0  ;;  %v674_v2 = vpop.f32.mrb[16].mxu1 }
 0x123   : > { %873 = vst.msk [vmem:[%s1405_s22 + $0x1c] sm:$0xf] %vm865_vm3, %v1113_v63  ;;  %889 = vst.msk [vmem:[%s1405_s22 + $0x5c] sm:$0xf] %vm865_vm3, %v1129_v0  ;;  %v611_v3 = vadd.f32 %v1395_v47, %v610_v1  ;;  %v675_v4 = vadd.f32 %v1395_v47, %v674_v2  ;;  %v612_v5 = vpop.f32.mrb[17].mxu0  ;;  %v676_v6 = vpop.f32.mrb[17].mxu1 }
 0x124   : > { %v613_v7 = vpop.f32.mrb[18].mxu0  ;;  %v677_v8 = vpop.f32.mrb[18].mxu1 }
 0x125   : > { %v713_v9 = vmax.f32 %v611_v3, 0.0  ;;  %v729_v10 = vmax.f32 %v675_v4, 0.0  ;;  %v614_v11 = vadd.f32 %v1395_v47, %v613_v7  ;;  %v678_v12 = vadd.f32 %v1395_v47, %v677_v8  ;;  %v615_v13 = vpop.f32.mrb[19].mxu0  ;;  %v679_v14 = vpop.f32.mrb[19].mxu1 }
 0x127   : > { %v1114_v15 = vpack.c.bf16 %v713_v9, %v713_v9  ;;  %v1130_v16 = vpack.c.bf16 %v729_v10, %v729_v10  ;;  %v714_v17 = vmax.f32 %v614_v11, 0.0  ;;  %v730_v18 = vmax.f32 %v678_v12, 0.0 }
 0x129   : > { %874 = vst.msk [vmem:[%s1405_s22 + $0x20] sm:$0xf] %vm865_vm3, %v1114_v15  ;;  %890 = vst.msk [vmem:[%s1405_s22 + $0x60] sm:$0xf] %vm865_vm3, %v1130_v16  ;;  %v1115_v19 = vpack.c.bf16 %v714_v17, %v714_v17  ;;  %v1131_v20 = vpack.c.bf16 %v730_v18, %v730_v18 }
 0x12a   : > { %v618_v21 = vpop.f32.mrb[20].mxu0  ;;  %v682_v22 = vpop.f32.mrb[20].mxu1 }
 0x12b   : > { %875 = vst.msk [vmem:[%s1405_s22 + $0x24] sm:$0xf] %vm865_vm3, %v1115_v19  ;;  %891 = vst.msk [vmem:[%s1405_s22 + $0x64] sm:$0xf] %vm865_vm3, %v1131_v20  ;;  %v619_v23 = vadd.f32 %v1395_v47, %v618_v21  ;;  %v683_v24 = vadd.f32 %v1395_v47, %v682_v22  ;;  %v620_v25 = vpop.f32.mrb[21].mxu0  ;;  %v684_v26 = vpop.f32.mrb[21].mxu1 }
 0x12c   : > { %v621_v27 = vpop.f32.mrb[22].mxu0  ;;  %v685_v28 = vpop.f32.mrb[22].mxu1 }
 0x12d   : > { %v715_v29 = vmax.f32 %v619_v23, 0.0  ;;  %v731_v30 = vmax.f32 %v683_v24, 0.0  ;;  %v622_v31 = vadd.f32 %v1395_v47, %v621_v27  ;;  %v686_v32 = vadd.f32 %v1395_v47, %v685_v28  ;;  %v623_v33 = vpop.f32.mrb[23].mxu0  ;;  %v687_v34 = vpop.f32.mrb[23].mxu1 }
 0x12f   : > { %v1116_v35 = vpack.c.bf16 %v715_v29, %v715_v29  ;;  %v1132_v36 = vpack.c.bf16 %v731_v30, %v731_v30  ;;  %v716_v37 = vmax.f32 %v622_v31, 0.0  ;;  %v732_v38 = vmax.f32 %v686_v32, 0.0 }
 0x131   : > { %876 = vst.msk [vmem:[%s1405_s22 + $0x28] sm:$0xf] %vm865_vm3, %v1116_v35  ;;  %892 = vst.msk [vmem:[%s1405_s22 + $0x68] sm:$0xf] %vm865_vm3, %v1132_v36  ;;  %v1117_v39 = vpack.c.bf16 %v716_v37, %v716_v37  ;;  %v1133_v40 = vpack.c.bf16 %v732_v38, %v732_v38 }
 0x132   : > { %v626_v41 = vpop.f32.mrb[24].mxu0  ;;  %v690_v42 = vpop.f32.mrb[24].mxu1 }
 0x133   : > { %877 = vst.msk [vmem:[%s1405_s22 + $0x2c] sm:$0xf] %vm865_vm3, %v1117_v39  ;;  %893 = vst.msk [vmem:[%s1405_s22 + $0x6c] sm:$0xf] %vm865_vm3, %v1133_v40  ;;  %v627_v43 = vadd.f32 %v1395_v47, %v626_v41  ;;  %v691_v44 = vadd.f32 %v1395_v47, %v690_v42  ;;  %v628_v45 = vpop.f32.mrb[25].mxu0  ;;  %v692_v46 = vpop.f32.mrb[25].mxu1 }
 0x134   : > { %v629_v48 = vpop.f32.mrb[26].mxu0  ;;  %v693_v49 = vpop.f32.mrb[26].mxu1 }
 0x135   : > { %v717_v50 = vmax.f32 %v627_v43, 0.0  ;;  %v733_v51 = vmax.f32 %v691_v44, 0.0  ;;  %v630_v52 = vadd.f32 %v1395_v47, %v629_v48  ;;  %v694_v53 = vadd.f32 %v1395_v47, %v693_v49  ;;  %v631_v54 = vpop.f32.mrb[27].mxu0  ;;  %v695_v55 = vpop.f32.mrb[27].mxu1 }
 0x137   : > { %v1118_v56 = vpack.c.bf16 %v717_v50, %v717_v50  ;;  %v1134_v57 = vpack.c.bf16 %v733_v51, %v733_v51  ;;  %v718_v58 = vmax.f32 %v630_v52, 0.0  ;;  %v734_v59 = vmax.f32 %v694_v53, 0.0 }
 0x139   : > { %878 = vst.msk [vmem:[%s1405_s22 + $0x30] sm:$0xf] %vm865_vm3, %v1118_v56  ;;  %894 = vst.msk [vmem:[%s1405_s22 + $0x70] sm:$0xf] %vm865_vm3, %v1134_v57  ;;  %v1119_v60 = vpack.c.bf16 %v718_v58, %v718_v58  ;;  %v1135_v61 = vpack.c.bf16 %v734_v59, %v734_v59 }
 0x13a   : > { %v634_v62 = vpop.f32.mrb[28].mxu0  ;;  %v698_v63 = vpop.f32.mrb[28].mxu1 }
 0x13b   : > { %879 = vst.msk [vmem:[%s1405_s22 + $0x34] sm:$0xf] %vm865_vm3, %v1119_v60  ;;  %895 = vst.msk [vmem:[%s1405_s22 + $0x74] sm:$0xf] %vm865_vm3, %v1135_v61  ;;  %v635_v0 = vadd.f32 %v1395_v47, %v634_v62  ;;  %v699_v1 = vadd.f32 %v1395_v47, %v698_v63  ;;  %v636_v2 = vpop.f32.mrb[29].mxu0  ;;  %v700_v3 = vpop.f32.mrb[29].mxu1 }
 0x13c   : > { %v637_v4 = vpop.f32.mrb[30].mxu0  ;;  %v701_v5 = vpop.f32.mrb[30].mxu1 }
 0x13d   : > { %v719_v6 = vmax.f32 %v635_v0, 0.0  ;;  %v735_v7 = vmax.f32 %v699_v1, 0.0  ;;  %v638_v8 = vadd.f32 %v1395_v47, %v637_v4  ;;  %v702_v9 = vadd.f32 %v1395_v47, %v701_v5  ;;  %v639_v10 = vpop.f32.mrb[31].mxu0  ;;  %v703_v11 = vpop.f32.mrb[31].mxu1 }
 0x13f   : > { %v1120_v12 = vpack.c.bf16 %v719_v6, %v719_v6  ;;  %v1136_v13 = vpack.c.bf16 %v735_v7, %v735_v7  ;;  %v720_v14 = vmax.f32 %v638_v8, 0.0  ;;  %v736_v15 = vmax.f32 %v702_v9, 0.0 }
 0x141   : > { %880 = vst.msk [vmem:[%s1405_s22 + $0x38] sm:$0xf] %vm865_vm3, %v1120_v12  ;;  %896 = vst.msk [vmem:[%s1405_s22 + $0x78] sm:$0xf] %vm865_vm3, %v1136_v13  ;;  %v1121_v16 = vpack.c.bf16 %v720_v14, %v720_v14  ;;  %v1137_v17 = vpack.c.bf16 %v736_v15, %v736_v15 }
 0x143   : > { %881 = vst.msk [vmem:[%s1405_s22 + $0x3c] sm:$0xf] %vm865_vm3, %v1121_v16  ;;  %897 = vst.msk [vmem:[%s1405_s22 + $0x7c] sm:$0xf] %vm865_vm3, %v1137_v17 }
 0x144 PF: > { %s13_s14 = sadd.s32 1, %s1264_s14   ;;  %s1512_s12 = smov %s1260_s13 }
 0x145   : > { %p10_p5 = scmp.ge.s32.totalorder %s13_s14, 4   ;;  %s1513_s13 = smov %s1515_s15 }
 0x147   :  { %12 = sbr.rel (!%p10_p5) target bundleno = 2 (0x2), region = 68 }

// kernel: backbone_forward.55
= control target key start
LH: loop header
LB: loop body
LE: loop exit
PB: predicated region body
PF: predicated region fallthrough
CT: control target
= control target key end

     0   :  { %vm110_vm0 = vcmask 523264   ;;  %vm312_vm1 = vcmask 125952   ;;  %s573_s1 = inlined_call_operand.vmem [shape: bf16[64,16], index: 1, kind: input, shape index: {}]   ;;  %s574_s0 = inlined_call_operand.vmem [shape: bf16[128,64], index: 0, kind: input, shape index: {}]   ;;  %s575_s2 = inlined_call_operand.vmem [shape: f32[1,16], index: 2, kind: input, shape index: {}]   ;;  %s576_s3 = inlined_call_operand.vmem [shape: bf16[128,16], index: 3, kind: output, shape index: {}]  }
   0x1   :  { %v430_v0 = vld [vmem:[%s573_s1] sm:$0xff]   ;;  %v431_v1 = vld [vmem:[%s573_s1 + $0x8] sm:$0xff]   ;;  %v432_v2 = vld [vmem:[%s573_s1 + $0x10] sm:$0xff]  }
   0x2   :  { %398 = vmatprep.subr.bf16.mxu0 %v430_v0  ;;  %422 = vmatprep.subr.bf16.mxu1 %v430_v0  ;;  %v434_v3 = vld [vmem:[%s574_s0] sm:$0xff]   ;;  %v433_v5 = vld [vmem:[%s573_s1 + $0x18] sm:$0xff]   ;;  %v436_v6 = vld [vmem:[%s574_s0 + $0x8] sm:$0xff]  }
   0x3   :  { %399 = vmatpush3.bf16.msra.mxu0 %v430_v0  ;;  %426 = vmatpush3.bf16.msra.mxu1 %v430_v0  ;;  %v435_v4 = vld [vmem:[%s574_s0 + $0x20] sm:$0xff]   ;;  %v437_v7 = vld [vmem:[%s574_s0 + $0x28] sm:$0xff]   ;;  %v438_v8 = vld [vmem:[%s574_s0 + $0x10] sm:$0xff]  }
   0x4   :  { %400 = vmatprep.subr.bf16.mxu0 %v431_v1  ;;  %423 = vmatprep.subr.bf16.mxu1 %v431_v1  ;;  %v439_v9 = vld [vmem:[%s574_s0 + $0x30] sm:$0xff]   ;;  %v440_v10 = vld [vmem:[%s574_s0 + $0x18] sm:$0xff]   ;;  %v333_v12 = vld [vmem:[%s575_s2] ss:$0 sm:$0xff] }
   0x5   :  { %406 = vmatprep.mubr.msk.bf16.mxu0 %vm110_vm0, %v434_v3  ;;  %414 = vmatprep.mubr.msk.bf16.mxu1 %vm110_vm0, %v435_v4  ;;  %v441_v11 = vld [vmem:[%s574_s0 + $0x38] sm:$0xff]  }
   0x7   :  { %401 = vmatpush3.bf16.msra.mxu0 %v431_v1  ;;  %427 = vmatpush3.bf16.msra.mxu1 %v431_v1 }
   0x8   :  { %402 = vmatprep.subr.bf16.mxu0 %v432_v2  ;;  %424 = vmatprep.subr.bf16.mxu1 %v432_v2 }
   0xb   :  { %403 = vmatpush3.bf16.msra.mxu0 %v432_v2  ;;  %428 = vmatpush3.bf16.msra.mxu1 %v432_v2 }
   0xc   :  { %404 = vmatprep.subr.bf16.mxu0 %v433_v5  ;;  %425 = vmatprep.subr.bf16.mxu1 %v433_v5 }
   0xf   :  { %405 = vmatpush3.bf16.msra.mxu0 %v433_v5  ;;  %429 = vmatpush3.bf16.msra.mxu1 %v433_v5 }
  0x12   :  { %407 = vmatmul.mubr.msk.bf16.vlgmr.msra.gmra.mrb[0].mxu0 %vm110_vm0, %v436_v6  ;;  %415 = vmatmul.mubr.msk.bf16.vlgmr.msra.gmra.mrb[0].mxu1 %vm110_vm0, %v437_v7 }
  0x13   :  { %410 = vmatprep.mubr.msk.bf16.mxu0 %vm110_vm0, %v438_v8  ;;  %418 = vmatprep.mubr.msk.bf16.mxu1 %vm110_vm0, %v439_v9 }
  0x1a   :  { %411 = vmatmul.mubr.msk.bf16.gmra.mrb[4].mxu0 %vm110_vm0, %v440_v10  ;;  %419 = vmatmul.mubr.msk.bf16.gmra.mrb[4].mxu1 %vm110_vm0, %v441_v11 }
  0xe5   :  { %v408_v13 = vpop.f32.mrb[0].mxu0  ;;  %v416_v14 = vpop.f32.mrb[0].mxu1 }
  0xe6   :  { %v178_v15 = vadd.f32 %v408_v13, %v333_v12  ;;  %v210_v16 = vadd.f32 %v416_v14, %v333_v12  ;;  %v169_v17 = vpop.f32.mrb[1].mxu0  ;;  %v201_v18 = vpop.f32.mrb[1].mxu1 }
  0xe7   :  { %v170_v19 = vadd.f32 %v333_v12, %v169_v17  ;;  %v202_v20 = vadd.f32 %v333_v12, %v201_v18  ;;  %v409_v21 = vpop.f32.mrb[2].mxu0  ;;  %v417_v22 = vpop.f32.mrb[2].mxu1 }
  0xe8   :  { %v234_v23 = vmax.f32 %v178_v15, 0.0  ;;  %v242_v24 = vmax.f32 %v210_v16, 0.0  ;;  %v181_v25 = vadd.f32 %v409_v21, %v333_v12  ;;  %v213_v26 = vadd.f32 %v417_v22, %v333_v12  ;;  %v172_v27 = vpop.f32.mrb[3].mxu0  ;;  %v204_v28 = vpop.f32.mrb[3].mxu1 }
  0xe9   :  { %v232_v29 = vmax.f32 %v170_v19, 0.0  ;;  %v240_v30 = vmax.f32 %v202_v20, 0.0  ;;  %v173_v31 = vadd.f32 %v333_v12, %v172_v27  ;;  %v205_v32 = vadd.f32 %v333_v12, %v204_v28 }
  0xea   :  { %v372_v33 = vpack.c.bf16 %v234_v23, %v234_v23  ;;  %v380_v34 = vpack.c.bf16 %v242_v24, %v242_v24  ;;  %v235_v35 = vmax.f32 %v181_v25, 0.0  ;;  %v243_v36 = vmax.f32 %v213_v26, 0.0 }
  0xeb   :  { %v370_v37 = vpack.c.bf16 %v232_v29, %v232_v29  ;;  %v378_v38 = vpack.c.bf16 %v240_v30, %v240_v30  ;;  %v233_v39 = vmax.f32 %v173_v31, 0.0  ;;  %v241_v40 = vmax.f32 %v205_v32, 0.0 }
  0xec   :  { %315 = vst.msk [vmem:[%s576_s3 + $0x8] sm:$0xf] %vm312_vm1, %v372_v33  ;;  %323 = vst.msk [vmem:[%s576_s3 + $0x28] sm:$0xf] %vm312_vm1, %v380_v34  ;;  %v373_v41 = vpack.c.bf16 %v235_v35, %v235_v35  ;;  %v381_v42 = vpack.c.bf16 %v243_v36, %v243_v36 }
  0xed   :  { %313 = vst.msk [vmem:[%s576_s3] sm:$0xf] %vm312_vm1, %v370_v37  ;;  %321 = vst.msk [vmem:[%s576_s3 + $0x20] sm:$0xf] %vm312_vm1, %v378_v38  ;;  %v371_v43 = vpack.c.bf16 %v233_v39, %v233_v39  ;;  %v379_v44 = vpack.c.bf16 %v241_v40, %v241_v40  ;;  %v412_v45 = vpop.f32.mrb[4].mxu0  ;;  %v420_v46 = vpop.f32.mrb[4].mxu1 }
  0xee   :  { %316 = vst.msk [vmem:[%s576_s3 + $0xc] sm:$0xf] %vm312_vm1, %v373_v41  ;;  %324 = vst.msk [vmem:[%s576_s3 + $0x2c] sm:$0xf] %vm312_vm1, %v381_v42  ;;  %v194_v47 = vadd.f32 %v412_v45, %v333_v12  ;;  %v226_v48 = vadd.f32 %v420_v46, %v333_v12  ;;  %v185_v49 = vpop.f32.mrb[5].mxu0  ;;  %v217_v50 = vpop.f32.mrb[5].mxu1 }
  0xef   :  { %314 = vst.msk [vmem:[%s576_s3 + $0x4] sm:$0xf] %vm312_vm1, %v371_v43  ;;  %322 = vst.msk [vmem:[%s576_s3 + $0x24] sm:$0xf] %vm312_vm1, %v379_v44  ;;  %v186_v51 = vadd.f32 %v333_v12, %v185_v49  ;;  %v218_v52 = vadd.f32 %v333_v12, %v217_v50  ;;  %v413_v53 = vpop.f32.mrb[6].mxu0  ;;  %v421_v54 = vpop.f32.mrb[6].mxu1 }
  0xf0   :  { %v238_v55 = vmax.f32 %v194_v47, 0.0  ;;  %v246_v56 = vmax.f32 %v226_v48, 0.0  ;;  %v197_v57 = vadd.f32 %v413_v53, %v333_v12  ;;  %v229_v58 = vadd.f32 %v421_v54, %v333_v12  ;;  %v188_v59 = vpop.f32.mrb[7].mxu0  ;;  %v220_v60 = vpop.f32.mrb[7].mxu1 }
  0xf1   :  { %v236_v61 = vmax.f32 %v186_v51, 0.0  ;;  %v244_v62 = vmax.f32 %v218_v52, 0.0  ;;  %v189_v63 = vadd.f32 %v333_v12, %v188_v59  ;;  %v221_v0 = vadd.f32 %v333_v12, %v220_v60 }
  0xf2   :  { %v376_v1 = vpack.c.bf16 %v238_v55, %v238_v55  ;;  %v384_v2 = vpack.c.bf16 %v246_v56, %v246_v56  ;;  %v239_v3 = vmax.f32 %v197_v57, 0.0  ;;  %v247_v4 = vmax.f32 %v229_v58, 0.0 }
  0xf3   :  { %v374_v5 = vpack.c.bf16 %v236_v61, %v236_v61  ;;  %v382_v6 = vpack.c.bf16 %v244_v62, %v244_v62  ;;  %v237_v7 = vmax.f32 %v189_v63, 0.0  ;;  %v245_v8 = vmax.f32 %v221_v0, 0.0 }
  0xf4   :  { %319 = vst.msk [vmem:[%s576_s3 + $0x18] sm:$0xf] %vm312_vm1, %v376_v1  ;;  %327 = vst.msk [vmem:[%s576_s3 + $0x38] sm:$0xf] %vm312_vm1, %v384_v2  ;;  %v377_v9 = vpack.c.bf16 %v239_v3, %v239_v3  ;;  %v385_v10 = vpack.c.bf16 %v247_v4, %v247_v4 }
  0xf5   :  { %317 = vst.msk [vmem:[%s576_s3 + $0x10] sm:$0xf] %vm312_vm1, %v374_v5  ;;  %325 = vst.msk [vmem:[%s576_s3 + $0x30] sm:$0xf] %vm312_vm1, %v382_v6  ;;  %v375_v11 = vpack.c.bf16 %v237_v7, %v237_v7  ;;  %v383_v12 = vpack.c.bf16 %v245_v8, %v245_v8 }
  0xf6   :  { %320 = vst.msk [vmem:[%s576_s3 + $0x1c] sm:$0xf] %vm312_vm1, %v377_v9  ;;  %328 = vst.msk [vmem:[%s576_s3 + $0x3c] sm:$0xf] %vm312_vm1, %v385_v10 }
  0xf7   :  { %318 = vst.msk [vmem:[%s576_s3 + $0x14] sm:$0xf] %vm312_vm1, %v375_v11  ;;  %326 = vst.msk [vmem:[%s576_s3 + $0x34] sm:$0xf] %vm312_vm1, %v383_v12 }

// kernel: backbone_forward.54
= control target key start
LH: loop header
LB: loop body
LE: loop exit
PB: predicated region body
PF: predicated region fallthrough
CT: control target
= control target key end

     0   :  { %s1999_s6 = smov 0   ;;  %s3720_s0 = inlined_call_operand.vmem [shape: bf16[2,328,64], index: 0, kind: input, shape index: {}]   ;;  %s3721_s1 = inlined_call_operand.vmem [shape: bf16[2,288,64], index: 1, kind: output, shape index: {}]  }
   0x1 LB: > { %s1957_s7 = sadd.s32 4294967295, %s1987_s6   ;;  %p1961_p0 = scmp.ge.s32.totalorder %s1987_s6, 1  ;;  %s1987_s6 = sphi %s1999_s6, %s11_s6  }
   0x2   : > { %p87_p1 = scmp.lt.s32.totalorder %s1987_s6, 3 }
   0x4   : > { %p88_p2 = pnand %p1961_p0, %p87_p1 }
   0x5   : > { %p107_p3 = scmp.lt.s32.totalorder (!%p88_p2), %s1957_s7, 1  ;;  %vm154_vm0 = vsmask.f32 (!%p88_p2), 3328  ;;  %vm155_vm1 = vsmask.f32 (!%p88_p2), 7440  ;;  %vm631_vm2 = vcmask (!%p88_p2), 1042432  }
   0x6   : > { %91 = sbr.rel (%p88_p2) target bundleno = 345 (0x159), region = 24  ;;  %vm632_vm3 = vcmask (!%p88_p2), 1046532   ;;  %vm1156_vm4 = vcmask (!%p88_p2), 1041408   ;;  %vm875_vm5 = vsmask.f32 (!%p88_p2), 2304  ;;  %vm1157_vm7 = vcmask (!%p88_p2), 1045508   ;;  %vm2051_vm13 = vmor (!%p88_p2), %vm154_vm0, %vm155_vm1 }
   0x7   : > { %vm876_vm6 = vsmask.f32 (!%p88_p2), 6416  ;;  %vm1681_vm8 = vcmask (!%p88_p2), 1040384   ;;  %vm1682_vm9 = vcmask (!%p88_p2), 1044484   ;;  %vm2042_vm10 = vmor (!%p88_p2), %vm631_vm2, %vm632_vm3  ;;  %vm1400_vm11 = vsmask.f32 (!%p88_p2), 1280 }
   0x8   : > { %vm1401_vm12 = vsmask.f32 (!%p88_p2), 5392  ;;  %vm2076_vm14 = vmor (!%p88_p2), %vm1156_vm4, %vm1157_vm7  ;;  %vm1865_vm2 = vcmask (!%p88_p2), 519168  }
   0x9   : > { %vm2088_vm15 = vmor (!%p88_p2), %vm875_vm5, %vm876_vm6 }
   0xa   : > { %vm2105_vm0 = vmor (!%p88_p2), %vm1681_vm8, %vm1682_vm9 }
   0xb   : > { %vm2119_vm1 = vmor (!%p88_p2), %vm1400_vm11, %vm1401_vm12 }
   0xd   : > { %s3735_s7 = smov (!%p107_p3, %s1957_s7), 1 }
   0xe   : > { %s1971_s8 = smul.u32 164, %s3735_s7 }
   0xf   : > { %s1972_s12 = smul.u32 144, %s3735_s7 }
  0x10   : > { %s2013_s11 = scalar_lea.vmem %s3720_s0, %s1971_s8 }
  0x11   : > { %v117_v0 = vld [vmem:[%s2013_s11] sm:$0xf]  ;;  %v2017_v1 = vld [vmem:[%s2013_s11 + $0x4] sm:$0xf]  ;;  %v2020_v2 = vld [vmem:[%s2013_s11 + $0xc] sm:$0xf]  ;;  %s2160_s15 = scalar_lea.vmem %s3721_s1, %s1972_s12 }
  0x12   : > { %v2023_v3 = vld [vmem:[%s2013_s11 + $0x14] sm:$0xf]  ;;  %v158_v4 = vshrl.u32 %v117_v0, 16  ;;  %v161_v5 = vshll.u32 %v117_v0, 16  ;;  %v167_v6 = vshll.u32 %v2017_v1, 16  ;;  %v191_v7 = vshrl.u32 %v2020_v2, 16 }
  0x13   : > { %v2028_v8 = vshll.u32 %v2023_v3, 16  ;;  %v593_v9 = vld [vmem:[%s2013_s11] sm:$0xe]  ;;  %v2032_v12 = vshrl.u32 %v2023_v3, 16  ;;  %v815_v14 = vld [vmem:[%s2013_s11 + $0x8] sm:$0xe] }
  0x14   : > { %v160_v10 = vrot.slane %v158_v4, 4  ;;  %v163_v11 = vrot.slane %v161_v5, 5  ;;  %v1964_v13 = vrot.slane %v593_v9, 9  ;;  %v2035_v15 = vrot.slane %v167_v6, 5  ;;  %v1153_v24 = vld [vmem:[%s2013_s11 + $0x8] sm:$0xc] }
  0x15   : > { %v187_v16 = vshll.u32 %v2020_v2, 16  ;;  %v2038_v17 = vrot.slane %v191_v7, 4  ;;  %v636_v19 = vrot.slane %v2017_v1, 5  ;;  %v209_v21 = vrot.slane %v2028_v8, 5  ;;  %v1340_v30 = vld [vmem:[%s2013_s11 + $0x10] sm:$0xc] }
  0x16   : > { %v164_v20 = vor.u32 %v163_v11, %v160_v10  ;;  %v1965_v22 = vrot.slane %v815_v14, 9  ;;  %v879_v23 = vshrl.u32 %v815_v14, 16  ;;  %v2056_v26 = vrot.slane %v2020_v2, 5  ;;  %v1678_v43 = vld [vmem:[%s2013_s11 + $0x10] sm:$0x8] }
  0x17   : > { %v882_v27 = vshll.u32 %v815_v14, 16  ;;  %v887_v28 = vrot.slane %v191_v7, 5  ;;  %v888_v29 = vrot.slane %v187_v16, 6  ;;  %v213_v32 = vrot.slane %v2032_v12, 4  ;;  %v2084_v49 = vld [vmem:[%s2013_s11 + $0x8] sm:$0xf] }
  0x18   : > { %v165_v31 = vrot.slane %v164_v20, 4  ;;  %v637_v33 = vsel %vm2042_vm10, %v1964_v13, %v636_v19  ;;  %v881_v34 = vrot.slane %v879_v23, 5  ;;  %v825_v35 = vsel %vm2042_vm10, %v1965_v22, %v2056_v26  ;;  %v2095_v58 = vld [vmem:[%s2013_s11 + $0x10] sm:$0xf]  ;;  %v2115_v7 = vld [vmem:[%s2013_s11 + $0x18] sm:$0xf] }
  0x19   : > { %v884_v36 = vrot.slane %v882_v27, 6  ;;  %v1966_v37 = vrot.slane %v1153_v24, 10  ;;  %v1161_v38 = vrot.slane %v2020_v2, 6  ;;  %v1967_v40 = vrot.slane %v1340_v30, 10 }
  0x1a   : > { %v170_v39 = vsel %vm2051_vm13, %v165_v31, %v2035_v15  ;;  %v1404_v41 = vshrl.u32 %v1340_v30, 16  ;;  %v1407_v42 = vshll.u32 %v1340_v30, 16  ;;  %v2072_v46 = vor.u32 %v888_v29, %v887_v28 }
  0x1b   : > { %v557_v44 = vmax.bf16 %v170_v39, %v117_v0  ;;  %v885_v45 = vor.u32 %v884_v36, %v881_v34  ;;  %v2081_v48 = vrot.slane %v2023_v3, 6  ;;  %v1412_v53 = vrot.slane %v2032_v12, 6 }
  0x1c   : > { %v1406_v51 = vrot.slane %v1404_v41, 6  ;;  %v1409_v52 = vrot.slane %v1407_v42, 7  ;;  %v1413_v54 = vrot.slane %v2028_v8, 7  ;;  %v1968_v57 = vrot.slane %v1678_v43, 11 }
  0x1d   : > { %v779_v55 = vmax.bf16 %v637_v33, %v557_v44  ;;  %v886_v56 = vrot.slane %v885_v45, 4  ;;  %v171_v59 = vshrl.u32 %v2017_v1, 16  ;;  %v1162_v60 = vsel %vm2076_vm14, %v1966_v37, %v1161_v38 }
  0x1e   : > { %v1350_v61 = vsel %vm2076_vm14, %v1967_v40, %v2081_v48  ;;  %v1410_v62 = vor.u32 %v1409_v52, %v1406_v51  ;;  %v177_v0 = vshll.u32 %v2084_v49, 16  ;;  %v1686_v6 = vrot.slane %v2023_v3, 7 }
  0x1f   : > { %v838_v4 = vmax.bf16 %v825_v35, %v779_v55  ;;  %v890_v5 = vsel %vm2088_vm15, %v886_v56, %v2072_v46  ;;  %v173_v9 = vrot.slane %v171_v59, 4  ;;  %v1414_v13 = vor.u32 %v1413_v54, %v1412_v53  ;;  %v2166_v59 = vld [vmem:[%s2013_s11 + $0x1c] sm:$0xf] }
  0x20   : > { %v1411_v11 = vrot.slane %v1410_v62, 4  ;;  %v197_v14 = vshll.u32 %v2095_v58, 16  ;;  %v201_v20 = vshrl.u32 %v2095_v58, 16  ;;  %v1687_v23 = vsel %vm2105_vm0, %v1968_v57, %v1686_v6 }
  0x21   : > { %v1117_v22 = vmax.bf16 %v890_v5, %v838_v4  ;;  %v174_v24 = vor.u32 %v173_v9, %v2035_v15  ;;  %v638_v27 = vrot.slane %v636_v19, 4  ;;  %v179_v28 = vrot.slane %v177_v0, 5 }
  0x22   : > { %v2129_v29 = vshll.u32 %v2115_v7, 16  ;;  %v2132_v30 = vshrl.u32 %v2115_v7, 16  ;;  %v639_v31 = vrot.slane %v2084_v49, 5  ;;  %v1415_v34 = vsel %vm2119_vm1, %v1411_v11, %v1414_v13 }
  0x23   : > { %v1304_v33 = vmax.bf16 %v1162_v60, %v1117_v22  ;;  %v175_v35 = vrot.slane %v174_v24, 4  ;;  %v644_v36 = vrot.slane %v2056_v26, 4  ;;  %v2139_v37 = vrot.slane %v201_v20, 4 }
  0x24   : > { %v640_v15 = vsel %vm2042_vm10, %v638_v27, %v639_v31  ;;  %v645_v19 = vrot.slane %v2095_v58, 5  ;;  %v892_v39 = vrot.slane %v201_v20, 5  ;;  %v891_v42 = vrot.slane %v2072_v46, 4 }
  0x25   : > { %v1363_v40 = vmax.bf16 %v1350_v61, %v1304_v33  ;;  %v180_v41 = vsel %vm2051_vm13, %v175_v35, %v179_v28  ;;  %v893_v43 = vrot.slane %v197_v14, 6  ;;  %v219_v44 = vrot.slane %v2129_v29, 5 }
  0x26   : > { %v223_v45 = vrot.slane %v2132_v30, 4  ;;  %v558_v51 = vmax.bf16 %v180_v41, %v2017_v1  ;;  %v1163_v52 = vrot.slane %v1161_v38, 4  ;;  %v2154_v54 = vsel %vm2042_vm10, %v644_v36, %v645_v19 }
  0x27   : > { %v1642_v53 = vmax.bf16 %v1415_v34, %v1363_v40  ;;  %v894_v55 = vor.u32 %v893_v43, %v892_v39  ;;  %v1164_v56 = vrot.slane %v2095_v58, 6  ;;  %v1169_v57 = vrot.slane %v2081_v48, 4 }
  0x28   : > { %v780_v46 = vmax.bf16 %v640_v15, %v558_v51  ;;  %v1417_v1 = vrot.slane %v2132_v30, 6  ;;  %v1418_v38 = vrot.slane %v2129_v29, 7  ;;  %v1416_v62 = vrot.slane %v1414_v13, 4 }
  0x29   : > { %v1829_v60 = vmax.bf16 %v1687_v23, %v1642_v53  ;;  %v895_v61 = vsel %vm2088_vm15, %v891_v42, %v894_v55  ;;  %v1688_v0 = vrot.slane %v1686_v6, 4  ;;  %v1165_v5 = vsel %vm2076_vm14, %v1163_v52, %v1164_v56 }
  0x2a   : > { %v839_v4 = vmax.bf16 %v780_v46, %v2154_v54  ;;  %v1170_v9 = vrot.slane %v2115_v7, 6  ;;  %v181_v11 = vshrl.u32 %v2084_v49, 16  ;;  %v1419_v20 = vor.u32 %v1418_v38, %v1417_v1 }
  0x2b   : > { %1866 = vst.msk [vmem:[%s2160_s15] sm:$0xf] %vm1865_vm2, %v1829_v60  ;;  %v1689_v22 = vrot.slane %v2115_v7, 7  ;;  %v2179_v23 = vshll.u32 %v2166_v59, 16  ;;  %v2182_v13 = vshrl.u32 %v2166_v59, 16  ;;  %v641_v33 = vrot.slane %v639_v31, 4 }
  0x2c   : > { %v1118_v6 = vmax.bf16 %v895_v61, %v839_v4  ;;  %v2186_v24 = vsel %vm2076_vm14, %v1169_v57, %v1170_v9  ;;  %v183_v27 = vrot.slane %v181_v11, 4  ;;  %v1420_v34 = vsel %vm2119_vm1, %v1416_v62, %v1419_v20 }
  0x2d   : > { %v1690_v35 = vsel %vm2105_vm0, %v1688_v0, %v1689_v22  ;;  %v189_v36 = vrot.slane %v187_v16, 5  ;;  %v647_v15 = vrot.slane %v645_v19, 4  ;;  %v229_v41 = vrot.slane %v2179_v23, 5  ;;  %v2213_v0 = vld [vmem:[%s2013_s11 + $0x20] sm:$0xf] }
  0x2e   : > { %v1305_v39 = vmax.bf16 %v1165_v5, %v1118_v6  ;;  %v184_v40 = vor.u32 %v183_v27, %v179_v28  ;;  %v233_v42 = vrot.slane %v2182_v13, 4  ;;  %v648_v43 = vrot.slane %v2023_v3, 5 }
  0x2f   : > { %v897_v31 = vrot.slane %v2032_v12, 5  ;;  %v898_v51 = vrot.slane %v2028_v8, 6  ;;  %v1166_v52 = vrot.slane %v1164_v56, 4  ;;  %v643_v16 = vsel %vm2042_vm10, %v641_v33, %v2056_v26 }
  0x30   : > { %v1364_v53 = vmax.bf16 %v1305_v39, %v2186_v24  ;;  %v185_v46 = vrot.slane %v184_v40, 4  ;;  %v1172_v28 = vrot.slane %v1170_v9, 4  ;;  %v2205_v19 = vsel %vm2042_vm10, %v647_v15, %v648_v43 }
  0x31   : > { %v896_v57 = vrot.slane %v894_v55, 4  ;;  %v1173_v1 = vrot.slane %v2166_v59, 6  ;;  %v1422_v38 = vrot.slane %v2182_v13, 6  ;;  %v899_v61 = vor.u32 %v898_v51, %v897_v31 }
  0x32   : > { %v1643_v60 = vmax.bf16 %v1420_v34, %v1364_v53  ;;  %v190_v56 = vsel %vm2051_vm13, %v185_v46, %v189_v36  ;;  %v1423_v62 = vrot.slane %v2179_v23, 7  ;;  %v1168_v55 = vsel %vm2076_vm14, %v1166_v52, %v2081_v48 }
  0x33   : > { %v559_v26 = vmax.bf16 %v190_v56, %v2084_v49  ;;  %v1421_v4 = vrot.slane %v1419_v20, 4  ;;  %v1691_v5 = vrot.slane %v1689_v22, 4  ;;  %v2221_v11 = vsel %vm2076_vm14, %v1172_v28, %v1173_v1 }
  0x34   : > { %v1830_v9 = vmax.bf16 %v1690_v35, %v1643_v60  ;;  %v1692_v6 = vrot.slane %v2166_v59, 7  ;;  %v194_v27 = vor.u32 %v2038_v17, %v189_v36  ;;  %v900_v34 = vsel %vm2088_vm15, %v896_v57, %v899_v61 }
  0x35   : > { %v781_v33 = vmax.bf16 %v643_v16, %v559_v26  ;;  %v1424_v49 = vor.u32 %v1423_v62, %v1422_v38  ;;  %v2228_v15 = vshll.u32 %v2213_v0, 16  ;;  %v199_v22 = vrot.slane %v197_v14, 5 }
  0x36   : > { %1867 = vst.msk [vmem:[%s2160_s15 + $0x4] sm:$0xf] %vm1865_vm2, %v1830_v9  ;;  %v1693_v48 = vsel %vm2105_vm0, %v1691_v5, %v1692_v6  ;;  %v195_v20 = vrot.slane %v194_v27, 4  ;;  %v2237_v35 = vshrl.u32 %v2213_v0, 16  ;;  %v650_v39 = vrot.slane %v648_v43, 4 }
  0x37   : > { %v840_v17 = vmax.bf16 %v781_v33, %v2205_v19  ;;  %v1425_v36 = vsel %vm2119_vm1, %v1421_v4, %v1424_v49  ;;  %v651_v40 = vrot.slane %v2115_v7, 5  ;;  %v901_v51 = vrot.slane %v899_v61, 4  ;;  %v2255_v4 = vld [vmem:[%s2013_s11 + $0x24] sm:$0xf] }
  0x38   : > { %v200_v31 = vsel %vm2051_vm13, %v195_v20, %v199_v22  ;;  %v902_v52 = vrot.slane %v2132_v30, 5  ;;  %v903_v14 = vrot.slane %v2129_v29, 6  ;;  %v239_v46 = vrot.slane %v2228_v15, 5 }
  0x39   : > { %v1119_v53 = vmax.bf16 %v900_v34, %v840_v17  ;;  %v560_v16 = vmax.bf16 %v200_v31, %v2020_v2  ;;  %v1175_v28 = vrot.slane %v1173_v1, 4  ;;  %v1176_v43 = vrot.slane %v2213_v0, 6 }
  0x3a   : > { %v904_v57 = vor.u32 %v903_v14, %v902_v52  ;;  %v1427_v38 = vrot.slane %v2237_v35, 6  ;;  %v1428_v60 = vrot.slane %v2228_v15, 7  ;;  %v243_v61 = vrot.slane %v2237_v35, 4 }
  0x3b   : > { %v1306_v56 = vmax.bf16 %v1168_v55, %v1119_v53  ;;  %v782_v62 = vmax.bf16 %v2154_v54, %v560_v16  ;;  %v1426_v26 = vrot.slane %v1424_v49, 4  ;;  %v2259_v5 = vsel %vm2042_vm10, %v650_v39, %v651_v40 }
  0x3c   : > { %v905_v2 = vsel %vm2088_vm15, %v901_v51, %v904_v57  ;;  %v2265_v1 = vsel %vm2076_vm14, %v1175_v28, %v1176_v43  ;;  %v204_v55 = vor.u32 %v2139_v37, %v199_v22  ;;  %v1429_v27 = vor.u32 %v1428_v60, %v1427_v38 }
  0x3d   : > { %v1365_v9 = vmax.bf16 %v1306_v56, %v2221_v11  ;;  %v841_v54 = vmax.bf16 %v782_v62, %v2259_v5  ;;  %v1694_v33 = vrot.slane %v1692_v6, 4  ;;  %v1695_v34 = vrot.slane %v2213_v0, 7  ;;  %v2301_v62 = vld [vmem:[%s2013_s11 + $0x28] sm:$0xf] }
  0x3e   : > { %v205_v49 = vrot.slane %v204_v55, 4  ;;  %v2272_v20 = vshll.u32 %v2255_v4, 16  ;;  %v653_v17 = vrot.slane %v651_v40, 4  ;;  %v1430_v51 = vsel %vm2119_vm1, %v1426_v26, %v1429_v27 }
  0x3f   : > { %v1644_v39 = vmax.bf16 %v1425_v36, %v1365_v9  ;;  %v1120_v31 = vmax.bf16 %v905_v2, %v841_v54  ;;  %v2277_v37 = vshrl.u32 %v2255_v4, 16  ;;  %v654_v22 = vrot.slane %v2166_v59, 5 }
  0x40   : > { %v210_v6 = vsel %vm2051_vm13, %v205_v49, %v209_v21  ;;  %v906_v52 = vrot.slane %v904_v57, 4  ;;  %v907_v40 = vrot.slane %v2182_v13, 5  ;;  %v908_v16 = vrot.slane %v2179_v23, 6 }
  0x41   : > { %v1831_v36 = vmax.bf16 %v1693_v48, %v1644_v39  ;;  %v1307_v14 = vmax.bf16 %v2186_v24, %v1120_v31  ;;  %v561_v53 = vmax.bf16 %v210_v6, %v2095_v58  ;;  %v1696_v28 = vsel %vm2105_vm0, %v1694_v33, %v1695_v34 }
  0x42   : > { %v249_v38 = vrot.slane %v2272_v20, 5  ;;  %v2293_v60 = vsel %vm2042_vm10, %v653_v17, %v654_v22  ;;  %v1178_v56 = vrot.slane %v1176_v43, 4  ;;  %v909_v57 = vor.u32 %v908_v16, %v907_v40 }
  0x43   : > { %1868 = vst.msk [vmem:[%s2160_s15 + $0x8] sm:$0xf] %vm1865_vm2, %v1831_v36  ;;  %v1366_v48 = vmax.bf16 %v1307_v14, %v2265_v1  ;;  %v783_v24 = vmax.bf16 %v2205_v19, %v561_v53  ;;  %v1432_v58 = vrot.slane %v2277_v37, 6  ;;  %v1179_v26 = vrot.slane %v2255_v4, 6 }
  0x44   : > { %v1431_v2 = vrot.slane %v1429_v27, 4  ;;  %v1433_v55 = vrot.slane %v2272_v20, 7  ;;  %v1697_v9 = vrot.slane %v1695_v34, 4  ;;  %v910_v33 = vsel %vm2088_vm15, %v906_v52, %v909_v57 }
  0x45   : > { %v1645_v54 = vmax.bf16 %v1430_v51, %v1366_v48  ;;  %v842_v43 = vmax.bf16 %v783_v24, %v2293_v60  ;;  %v214_v19 = vor.u32 %v213_v32, %v209_v21  ;;  %v1698_v17 = vrot.slane %v2255_v4, 7 }
  0x46   : > { %v1434_v49 = vor.u32 %v1433_v55, %v1432_v58  ;;  %v2314_v27 = vshll.u32 %v2301_v62, 16  ;;  %v2317_v34 = vshrl.u32 %v2301_v62, 16  ;;  %v253_v31 = vrot.slane %v2277_v37, 4 }
  0x47   : > { %v1832_v39 = vmax.bf16 %v1696_v28, %v1645_v54  ;;  %v1121_v51 = vmax.bf16 %v910_v33, %v842_v43  ;;  %v215_v6 = vrot.slane %v214_v19, 4  ;;  %v2322_v8 = vsel %vm2076_vm14, %v1178_v56, %v1179_v26  ;;  %v2346_v54 = vld [vmem:[%s2013_s11 + $0x2c] sm:$0xf] }
  0x48   : > { %v1435_v12 = vsel %vm2119_vm1, %v1431_v2, %v1434_v49  ;;  %v1699_v21 = vsel %vm2105_vm0, %v1697_v9, %v1698_v17  ;;  %v656_v32 = vrot.slane %v654_v22, 4  ;;  %v259_v36 = vrot.slane %v2314_v27, 5 }
  0x49   : > { %1869 = vst.msk [vmem:[%s2160_s15 + $0xc] sm:$0xf] %vm1865_vm2, %v1832_v39  ;;  %v1308_v52 = vmax.bf16 %v2221_v11, %v1121_v51  ;;  %v220_v40 = vsel %vm2051_vm13, %v215_v6, %v219_v44  ;;  %v912_v14 = vrot.slane %v2237_v35, 5  ;;  %v263_v53 = vrot.slane %v2317_v34, 4 }
  0x4a   : > { %v562_v16 = vmax.bf16 %v220_v40, %v2023_v3  ;;  %v911_v28 = vrot.slane %v909_v57, 4  ;;  %v913_v22 = vrot.slane %v2228_v15, 6  ;;  %v657_v11 = vrot.slane %v2213_v0, 5 }
  0x4b   : > { %v1367_v56 = vmax.bf16 %v1308_v52, %v2322_v8  ;;  %v1181_v48 = vrot.slane %v1179_v26, 4  ;;  %v1437_v24 = vrot.slane %v2317_v34, 6  ;;  %v1438_v55 = vrot.slane %v2314_v27, 7 }
  0x4c   : > { %v784_v58 = vmax.bf16 %v2259_v5, %v562_v16  ;;  %v914_v2 = vor.u32 %v913_v22, %v912_v14  ;;  %v1700_v9 = vrot.slane %v1698_v17, 4  ;;  %v2350_v3 = vsel %vm2042_vm10, %v656_v32, %v657_v11 }
  0x4d   : > { %v1646_v43 = vmax.bf16 %v1435_v12, %v1367_v56  ;;  %v1182_v57 = vrot.slane %v2301_v62, 6  ;;  %v224_v26 = vor.u32 %v223_v45, %v219_v44  ;;  %v1436_v19 = vrot.slane %v1434_v49, 4 }
  0x4e   : > { %v843_v5 = vmax.bf16 %v784_v58, %v2350_v3  ;;  %v915_v33 = vsel %vm2088_vm15, %v911_v28, %v914_v2  ;;  %v1701_v17 = vrot.slane %v2301_v62, 7  ;;  %v2366_v12 = vshll.u32 %v2346_v54, 16 }
  0x4f   : > { %v1833_v39 = vmax.bf16 %v1699_v21, %v1646_v43  ;;  %v2363_v51 = vsel %vm2076_vm14, %v1181_v48, %v1182_v57  ;;  %v225_v6 = vrot.slane %v224_v26, 4  ;;  %v1439_v30 = vor.u32 %v1438_v55, %v1437_v24 }
  0x50   : > { %v1122_v29 = vmax.bf16 %v915_v33, %v843_v5  ;;  %v1702_v44 = vsel %vm2105_vm0, %v1700_v9, %v1701_v17  ;;  %v659_v45 = vrot.slane %v657_v11, 4  ;;  %v2377_v21 = vshrl.u32 %v2346_v54, 16 }
  0x51   : > { %1870 = vst.msk [vmem:[%s2160_s15 + $0x10] sm:$0xf] %vm1865_vm2, %v1833_v39  ;;  %v230_v49 = vsel %vm2051_vm13, %v225_v6, %v229_v41  ;;  %v660_v32 = vrot.slane %v2255_v4, 5  ;;  %v916_v52 = vrot.slane %v914_v2, 4  ;;  %v917_v16 = vrot.slane %v2277_v37, 5 }
  0x52   : > { %v1309_v40 = vmax.bf16 %v2265_v1, %v1122_v29  ;;  %v563_v14 = vmax.bf16 %v230_v49, %v2115_v7  ;;  %v918_v28 = vrot.slane %v2272_v20, 6  ;;  %v1440_v22 = vsel %vm2119_vm1, %v1436_v19, %v1439_v30  ;;  %v2395_v2 = vld [vmem:[%s2013_s11 + $0x30] sm:$0xf] }
  0x53   : > { %v269_v56 = vrot.slane %v2366_v12, 5  ;;  %v2389_v11 = vsel %vm2042_vm10, %v659_v45, %v660_v32  ;;  %v1184_v48 = vrot.slane %v1182_v57, 4  ;;  %v1442_v7 = vrot.slane %v2377_v21, 6 }
  0x54   : > { %v1368_v24 = vmax.bf16 %v1309_v40, %v2363_v51  ;;  %v785_v1 = vmax.bf16 %v2293_v60, %v563_v14  ;;  %v919_v58 = vor.u32 %v918_v28, %v917_v16  ;;  %v1185_v55 = vrot.slane %v2346_v54, 6 }
  0x55   : > { %v1441_v9 = vrot.slane %v1439_v30, 4  ;;  %v1443_v43 = vrot.slane %v2366_v12, 7  ;;  %v1703_v26 = vrot.slane %v1701_v17, 4  ;;  %v234_v60 = vor.u32 %v233_v42, %v229_v41 }
  0x56   : > { %v1647_v5 = vmax.bf16 %v1440_v22, %v1368_v24  ;;  %v844_v33 = vmax.bf16 %v785_v1, %v2389_v11  ;;  %v920_v57 = vsel %vm2088_vm15, %v916_v52, %v919_v58  ;;  %v1704_v39 = vrot.slane %v2346_v54, 7 }
  0x57   : > { %v1444_v19 = vor.u32 %v1443_v43, %v1442_v7  ;;  %v2408_v6 = vshll.u32 %v2395_v2, 16  ;;  %v2411_v17 = vshrl.u32 %v2395_v2, 16  ;;  %v273_v30 = vrot.slane %v2377_v21, 4 }
  0x58   : > { %v1834_v29 = vmax.bf16 %v1702_v44, %v1647_v5  ;;  %v1123_v45 = vmax.bf16 %v920_v57, %v844_v33  ;;  %v235_v49 = vrot.slane %v234_v60, 4  ;;  %v2416_v23 = vsel %vm2076_vm14, %v1184_v48, %v1185_v55  ;;  %v2440_v5 = vld [vmem:[%s2013_s11 + $0x34] sm:$0xf] }
  0x59   : > { %v1445_v13 = vsel %vm2119_vm1, %v1441_v9, %v1444_v19  ;;  %v1705_v41 = vsel %vm2105_vm0, %v1703_v26, %v1704_v39  ;;  %v662_v42 = vrot.slane %v660_v32, 4  ;;  %v279_v40 = vrot.slane %v2408_v6, 5 }
  0x5a   : > { %1871 = vst.msk [vmem:[%s2160_s15 + $0x14] sm:$0xf] %vm1865_vm2, %v1834_v29  ;;  %v1310_v52 = vmax.bf16 %v2322_v8, %v1123_v45  ;;  %v240_v44 = vsel %vm2051_vm13, %v235_v49, %v239_v46  ;;  %v922_v14 = vrot.slane %v2317_v34, 5  ;;  %v283_v16 = vrot.slane %v2411_v17, 4 }
  0x5b   : > { %v564_v28 = vmax.bf16 %v240_v44, %v2166_v59  ;;  %v921_v22 = vrot.slane %v919_v58, 4  ;;  %v923_v32 = vrot.slane %v2314_v27, 6  ;;  %v663_v8 = vrot.slane %v2301_v62, 5 }
  0x5c   : > { %v1369_v48 = vmax.bf16 %v1310_v52, %v2416_v23  ;;  %v1187_v24 = vrot.slane %v1185_v55, 4  ;;  %v1447_v1 = vrot.slane %v2411_v17, 6  ;;  %v1448_v43 = vrot.slane %v2408_v6, 7 }
  0x5d   : > { %v786_v7 = vmax.bf16 %v2350_v3, %v564_v28  ;;  %v924_v9 = vor.u32 %v923_v32, %v922_v14  ;;  %v1706_v26 = vrot.slane %v1704_v39, 4  ;;  %v2444_v59 = vsel %vm2042_vm10, %v662_v42, %v663_v8 }
  0x5e   : > { %v1648_v33 = vmax.bf16 %v1445_v13, %v1369_v48  ;;  %v1188_v58 = vrot.slane %v2395_v2, 6  ;;  %v244_v55 = vor.u32 %v243_v61, %v239_v46  ;;  %v1446_v60 = vrot.slane %v1444_v19, 4 }
  0x5f   : > { %v845_v3 = vmax.bf16 %v786_v7, %v2444_v59  ;;  %v925_v57 = vsel %vm2088_vm15, %v921_v22, %v924_v9  ;;  %v1707_v39 = vrot.slane %v2395_v2, 7  ;;  %v2460_v13 = vshll.u32 %v2440_v5, 16 }
  0x60   : > { %v1835_v29 = vmax.bf16 %v1705_v41, %v1648_v33  ;;  %v2457_v45 = vsel %vm2076_vm14, %v1187_v24, %v1188_v58  ;;  %v245_v49 = vrot.slane %v244_v55, 4  ;;  %v1449_v35 = vor.u32 %v1448_v43, %v1447_v1 }
  0x61   : > { %v1124_v15 = vmax.bf16 %v925_v57, %v845_v3  ;;  %v1708_v46 = vsel %vm2105_vm0, %v1706_v26, %v1707_v39  ;;  %v665_v61 = vrot.slane %v663_v8, 4  ;;  %v2471_v41 = vshrl.u32 %v2440_v5, 16 }
  0x62   : > { %1872 = vst.msk [vmem:[%s2160_s15 + $0x18] sm:$0xf] %vm1865_vm2, %v1835_v29  ;;  %v250_v19 = vsel %vm2051_vm13, %v245_v49, %v249_v38  ;;  %v666_v42 = vrot.slane %v2346_v54, 5  ;;  %v926_v52 = vrot.slane %v924_v9, 4  ;;  %v927_v28 = vrot.slane %v2377_v21, 5 }
  0x63   : > { %v1311_v44 = vmax.bf16 %v2363_v51, %v1124_v15  ;;  %v565_v14 = vmax.bf16 %v250_v19, %v2213_v0  ;;  %v928_v22 = vrot.slane %v2366_v12, 6  ;;  %v1450_v32 = vsel %vm2119_vm1, %v1446_v60, %v1449_v35  ;;  %v2489_v9 = vld [vmem:[%s2013_s11 + $0x38] sm:$0xf] }
  0x64   : > { %v289_v48 = vrot.slane %v2460_v13, 5  ;;  %v2483_v8 = vsel %vm2042_vm10, %v665_v61, %v666_v42  ;;  %v1190_v24 = vrot.slane %v1188_v58, 4  ;;  %v1452_v0 = vrot.slane %v2471_v41, 6 }
  0x65   : > { %v1370_v1 = vmax.bf16 %v1311_v44, %v2457_v45  ;;  %v787_v51 = vmax.bf16 %v2389_v11, %v565_v14  ;;  %v929_v7 = vor.u32 %v928_v22, %v927_v28  ;;  %v1191_v43 = vrot.slane %v2440_v5, 6 }
  0x66   : > { %v1451_v26 = vrot.slane %v1449_v35, 4  ;;  %v1453_v33 = vrot.slane %v2460_v13, 7  ;;  %v1709_v55 = vrot.slane %v1707_v39, 4  ;;  %v254_v11 = vor.u32 %v253_v31, %v249_v38 }
  0x67   : > { %v1649_v3 = vmax.bf16 %v1450_v32, %v1370_v1  ;;  %v846_v57 = vmax.bf16 %v787_v51, %v2483_v8  ;;  %v930_v58 = vsel %vm2088_vm15, %v926_v52, %v929_v7  ;;  %v1710_v29 = vrot.slane %v2440_v5, 7 }
  0x68   : > { %v1454_v60 = vor.u32 %v1453_v33, %v1452_v0  ;;  %v2502_v49 = vshll.u32 %v2489_v9, 16  ;;  %v2505_v39 = vshrl.u32 %v2489_v9, 16  ;;  %v293_v35 = vrot.slane %v2471_v41, 4 }
  0x69   : > { %v1836_v15 = vmax.bf16 %v1708_v46, %v1649_v3  ;;  %v1125_v61 = vmax.bf16 %v930_v58, %v846_v57  ;;  %v255_v19 = vrot.slane %v254_v11, 4  ;;  %v2510_v20 = vsel %vm2076_vm14, %v1190_v24, %v1191_v43  ;;  %v2534_v3 = vld [vmem:[%s2013_s11 + $0x3c] sm:$0xf] }
  0x6a   : > { %v1455_v37 = vsel %vm2119_vm1, %v1451_v26, %v1454_v60  ;;  %v1711_v38 = vsel %vm2105_vm0, %v1709_v55, %v1710_v29  ;;  %v668_v31 = vrot.slane %v666_v42, 4  ;;  %v299_v44 = vrot.slane %v2502_v49, 5 }
  0x6b   : > { %1873 = vst.msk [vmem:[%s2160_s15 + $0x1c] sm:$0xf] %vm1865_vm2, %v1836_v15  ;;  %v1312_v52 = vmax.bf16 %v2416_v23, %v1125_v61  ;;  %v260_v46 = vsel %vm2051_vm13, %v255_v19, %v259_v36  ;;  %v932_v14 = vrot.slane %v2411_v17, 5  ;;  %v303_v28 = vrot.slane %v2505_v39, 4 }
  0x6c   : > { %v566_v22 = vmax.bf16 %v260_v46, %v2255_v4  ;;  %v931_v32 = vrot.slane %v929_v7, 4  ;;  %v933_v42 = vrot.slane %v2408_v6, 6  ;;  %v669_v23 = vrot.slane %v2395_v2, 5 }
  0x6d   : > { %v1371_v24 = vmax.bf16 %v1312_v52, %v2510_v20  ;;  %v1193_v1 = vrot.slane %v1191_v43, 4  ;;  %v1457_v51 = vrot.slane %v2505_v39, 6  ;;  %v1458_v33 = vrot.slane %v2502_v49, 7 }
  0x6e   : > { %v788_v0 = vmax.bf16 %v2444_v59, %v566_v22  ;;  %v934_v26 = vor.u32 %v933_v42, %v932_v14  ;;  %v1712_v55 = vrot.slane %v1710_v29, 4  ;;  %v2538_v4 = vsel %vm2042_vm10, %v668_v31, %v669_v23 }
  0x6f   : > { %v1650_v57 = vmax.bf16 %v1455_v37, %v1371_v24  ;;  %v1194_v7 = vrot.slane %v2489_v9, 6  ;;  %v264_v43 = vor.u32 %v263_v53, %v259_v36  ;;  %v1456_v11 = vrot.slane %v1454_v60, 4 }
  0x70   : > { %v847_v59 = vmax.bf16 %v788_v0, %v2538_v4  ;;  %v935_v58 = vsel %vm2088_vm15, %v931_v32, %v934_v26  ;;  %v1713_v29 = vrot.slane %v2489_v9, 7  ;;  %v2554_v37 = vshll.u32 %v2534_v3, 16 }
  0x71   : > { %v1837_v15 = vmax.bf16 %v1711_v38, %v1650_v57  ;;  %v2551_v61 = vsel %vm2076_vm14, %v1193_v1, %v1194_v7  ;;  %v265_v19 = vrot.slane %v264_v43, 4  ;;  %v1459_v34 = vor.u32 %v1458_v33, %v1457_v51 }
  0x72   : > { %v1126_v27 = vmax.bf16 %v935_v58, %v847_v59  ;;  %v1714_v36 = vsel %vm2105_vm0, %v1712_v55, %v1713_v29  ;;  %v671_v53 = vrot.slane %v669_v23, 4  ;;  %v2565_v38 = vshrl.u32 %v2534_v3, 16 }
  0x73   : > { %1874 = vst.msk [vmem:[%s2160_s15 + $0x20] sm:$0xf] %vm1865_vm2, %v1837_v15  ;;  %v270_v60 = vsel %vm2051_vm13, %v265_v19, %v269_v56  ;;  %v672_v31 = vrot.slane %v2440_v5, 5  ;;  %v936_v52 = vrot.slane %v934_v26, 4  ;;  %v937_v22 = vrot.slane %v2471_v41, 5 }
  0x74   : > { %v1313_v46 = vmax.bf16 %v2457_v45, %v1126_v27  ;;  %v567_v14 = vmax.bf16 %v270_v60, %v2301_v62  ;;  %v938_v32 = vrot.slane %v2460_v13, 6  ;;  %v1460_v42 = vsel %vm2119_vm1, %v1456_v11, %v1459_v34  ;;  %v2583_v26 = vld [vmem:[%s2013_s11 + $0x40] sm:$0xf] }
  0x75   : > { %v309_v24 = vrot.slane %v2554_v37, 5  ;;  %v2577_v23 = vsel %vm2042_vm10, %v671_v53, %v672_v31  ;;  %v1196_v1 = vrot.slane %v1194_v7, 4  ;;  %v1462_v62 = vrot.slane %v2565_v38, 6 }
  0x76   : > { %v1372_v51 = vmax.bf16 %v1313_v46, %v2551_v61  ;;  %v789_v45 = vmax.bf16 %v2483_v8, %v567_v14  ;;  %v939_v0 = vor.u32 %v938_v32, %v937_v22  ;;  %v1197_v33 = vrot.slane %v2534_v3, 6 }
  0x77   : > { %v1461_v55 = vrot.slane %v1459_v34, 4  ;;  %v1463_v57 = vrot.slane %v2554_v37, 7  ;;  %v1715_v43 = vrot.slane %v1713_v29, 4  ;;  %v274_v8 = vor.u32 %v273_v30, %v269_v56 }
  0x78   : > { %v1651_v59 = vmax.bf16 %v1460_v42, %v1372_v51  ;;  %v848_v58 = vmax.bf16 %v789_v45, %v2577_v23  ;;  %v940_v7 = vsel %vm2088_vm15, %v936_v52, %v939_v0  ;;  %v1716_v15 = vrot.slane %v2534_v3, 7 }
  0x79   : > { %v1464_v11 = vor.u32 %v1463_v57, %v1462_v62  ;;  %v2596_v19 = vshll.u32 %v2583_v26, 16  ;;  %v2599_v29 = vshrl.u32 %v2583_v26, 16  ;;  %v313_v34 = vrot.slane %v2565_v38, 4 }
  0x7a   : > { %v1838_v27 = vmax.bf16 %v1714_v36, %v1651_v59  ;;  %v1127_v53 = vmax.bf16 %v940_v7, %v848_v58  ;;  %v275_v60 = vrot.slane %v274_v8, 4  ;;  %v2604_v12 = vsel %vm2076_vm14, %v1196_v1, %v1197_v33  ;;  %v2628_v59 = vld [vmem:[%s2013_s11 + $0x44] sm:$0xf] }
  0x7b   : > { %v1465_v21 = vsel %vm2119_vm1, %v1461_v55, %v1464_v11  ;;  %v1717_v56 = vsel %vm2105_vm0, %v1715_v43, %v1716_v15  ;;  %v674_v30 = vrot.slane %v672_v31, 4  ;;  %v319_v46 = vrot.slane %v2596_v19, 5 }
  0x7c   : > { %1875 = vst.msk [vmem:[%s2160_s15 + $0x24] sm:$0xf] %vm1865_vm2, %v1838_v27  ;;  %v1314_v52 = vmax.bf16 %v2510_v20, %v1127_v53  ;;  %v280_v36 = vsel %vm2051_vm13, %v275_v60, %v279_v40  ;;  %v942_v14 = vrot.slane %v2505_v39, 5  ;;  %v323_v22 = vrot.slane %v2599_v29, 4 }
  0x7d   : > { %v568_v32 = vmax.bf16 %v280_v36, %v2346_v54  ;;  %v941_v42 = vrot.slane %v939_v0, 4  ;;  %v943_v31 = vrot.slane %v2502_v49, 6  ;;  %v675_v20 = vrot.slane %v2489_v9, 5 }
  0x7e   : > { %v1373_v1 = vmax.bf16 %v1314_v52, %v2604_v12  ;;  %v1199_v51 = vrot.slane %v1197_v33, 4  ;;  %v1467_v45 = vrot.slane %v2599_v29, 6  ;;  %v1468_v57 = vrot.slane %v2596_v19, 7 }
  0x7f   : > { %v790_v62 = vmax.bf16 %v2538_v4, %v568_v32  ;;  %v944_v55 = vor.u32 %v943_v31, %v942_v14  ;;  %v1718_v43 = vrot.slane %v1716_v15, 4  ;;  %v2632_v54 = vsel %vm2042_vm10, %v674_v30, %v675_v20 }
  0x80   : > { %v1652_v58 = vmax.bf16 %v1465_v21, %v1373_v1  ;;  %v1200_v0 = vrot.slane %v2583_v26, 6  ;;  %v284_v33 = vor.u32 %v283_v16, %v279_v40  ;;  %v1466_v8 = vrot.slane %v1464_v11, 4 }
  0x81   : > { %v849_v4 = vmax.bf16 %v790_v62, %v2632_v54  ;;  %v945_v7 = vsel %vm2088_vm15, %v941_v42, %v944_v55  ;;  %v1719_v15 = vrot.slane %v2583_v26, 7  ;;  %v2648_v21 = vshll.u32 %v2628_v59, 16 }
  0x82   : > { %v1839_v27 = vmax.bf16 %v1717_v56, %v1652_v58  ;;  %v2645_v53 = vsel %vm2076_vm14, %v1199_v51, %v1200_v0  ;;  %v285_v60 = vrot.slane %v284_v33, 4  ;;  %v1469_v17 = vor.u32 %v1468_v57, %v1467_v45 }
  0x83   : > { %v1128_v6 = vmax.bf16 %v945_v7, %v849_v4  ;;  %v1720_v40 = vsel %vm2105_vm0, %v1718_v43, %v1719_v15  ;;  %v677_v16 = vrot.slane %v675_v20, 4  ;;  %v2659_v56 = vshrl.u32 %v2628_v59, 16 }
  0x84   : > { %1876 = vst.msk [vmem:[%s2160_s15 + $0x28] sm:$0xf] %vm1865_vm2, %v1839_v27  ;;  %v290_v11 = vsel %vm2051_vm13, %v285_v60, %v289_v48  ;;  %v678_v30 = vrot.slane %v2534_v3, 5  ;;  %v946_v52 = vrot.slane %v944_v55, 4  ;;  %v947_v32 = vrot.slane %v2565_v38, 5 }
  0x85   : > { %v1315_v36 = vmax.bf16 %v2551_v61, %v1128_v6  ;;  %v569_v14 = vmax.bf16 %v290_v11, %v2395_v2  ;;  %v948_v42 = vrot.slane %v2554_v37, 6  ;;  %v1470_v31 = vsel %vm2119_vm1, %v1466_v8, %v1469_v17  ;;  %v2677_v55 = vld [vmem:[%s2013_s11 + $0x48] sm:$0xf] }
  0x86   : > { %v329_v1 = vrot.slane %v2648_v21, 5  ;;  %v2671_v20 = vsel %vm2042_vm10, %v677_v16, %v678_v30  ;;  %v1202_v51 = vrot.slane %v1200_v0, 4  ;;  %v1472_v2 = vrot.slane %v2659_v56, 6 }
  0x87   : > { %v1374_v45 = vmax.bf16 %v1315_v36, %v2645_v53  ;;  %v791_v61 = vmax.bf16 %v2577_v23, %v569_v14  ;;  %v949_v62 = vor.u32 %v948_v42, %v947_v32  ;;  %v1203_v57 = vrot.slane %v2628_v59, 6 }
  0x88   : > { %v1471_v43 = vrot.slane %v1469_v17, 4  ;;  %v1473_v58 = vrot.slane %v2648_v21, 7  ;;  %v1721_v33 = vrot.slane %v1719_v15, 4  ;;  %v294_v23 = vor.u32 %v293_v35, %v289_v48 }
  0x89   : > { %v1653_v4 = vmax.bf16 %v1470_v31, %v1374_v45  ;;  %v850_v7 = vmax.bf16 %v791_v61, %v2671_v20  ;;  %v950_v0 = vsel %vm2088_vm15, %v946_v52, %v949_v62  ;;  %v1722_v27 = vrot.slane %v2628_v59, 7 }
  0x8a   : > { %v1474_v8 = vor.u32 %v1473_v58, %v1472_v2  ;;  %v2690_v60 = vshll.u32 %v2677_v55, 16  ;;  %v2693_v15 = vshrl.u32 %v2677_v55, 16  ;;  %v333_v17 = vrot.slane %v2659_v56, 4 }
  0x8b   : > { %v1840_v6 = vmax.bf16 %v1720_v40, %v1653_v4  ;;  %v1129_v16 = vmax.bf16 %v950_v0, %v850_v7  ;;  %v295_v11 = vrot.slane %v294_v23, 4  ;;  %v2698_v13 = vsel %vm2076_vm14, %v1202_v51, %v1203_v57  ;;  %v2722_v4 = vld [vmem:[%s2013_s11 + $0x4c] sm:$0xf] }
  0x8c   : > { %v1475_v41 = vsel %vm2119_vm1, %v1471_v43, %v1474_v8  ;;  %v1723_v48 = vsel %vm2105_vm0, %v1721_v33, %v1722_v27  ;;  %v680_v35 = vrot.slane %v678_v30, 4  ;;  %v339_v36 = vrot.slane %v2690_v60, 5 }
  0x8d   : > { %1877 = vst.msk [vmem:[%s2160_s15 + $0x2c] sm:$0xf] %vm1865_vm2, %v1840_v6  ;;  %v1316_v52 = vmax.bf16 %v2604_v12, %v1129_v16  ;;  %v300_v40 = vsel %vm2051_vm13, %v295_v11, %v299_v44  ;;  %v952_v14 = vrot.slane %v2599_v29, 5  ;;  %v343_v32 = vrot.slane %v2693_v15, 4 }
  0x8e   : > { %v570_v42 = vmax.bf16 %v300_v40, %v2440_v5  ;;  %v951_v31 = vrot.slane %v949_v62, 4  ;;  %v953_v30 = vrot.slane %v2596_v19, 6  ;;  %v681_v12 = vrot.slane %v2583_v26, 5 }
  0x8f   : > { %v1375_v51 = vmax.bf16 %v1316_v52, %v2698_v13  ;;  %v1205_v45 = vrot.slane %v1203_v57, 4  ;;  %v1477_v61 = vrot.slane %v2693_v15, 6  ;;  %v1478_v58 = vrot.slane %v2690_v60, 7 }
  0x90   : > { %v792_v2 = vmax.bf16 %v2632_v54, %v570_v42  ;;  %v954_v43 = vor.u32 %v953_v30, %v952_v14  ;;  %v1724_v33 = vrot.slane %v1722_v27, 4  ;;  %v2726_v5 = vsel %vm2042_vm10, %v680_v35, %v681_v12 }
  0x91   : > { %v1654_v7 = vmax.bf16 %v1475_v41, %v1375_v51  ;;  %v1206_v62 = vrot.slane %v2677_v55, 6  ;;  %v304_v57 = vor.u32 %v303_v28, %v299_v44  ;;  %v1476_v23 = vrot.slane %v1474_v8, 4 }
  0x92   : > { %v851_v54 = vmax.bf16 %v792_v2, %v2726_v5  ;;  %v955_v0 = vsel %vm2088_vm15, %v951_v31, %v954_v43  ;;  %v1725_v27 = vrot.slane %v2677_v55, 7  ;;  %v2742_v41 = vshll.u32 %v2722_v4, 16 }
  0x93   : > { %v1841_v6 = vmax.bf16 %v1723_v48, %v1654_v7  ;;  %v2739_v16 = vsel %vm2076_vm14, %v1205_v45, %v1206_v62  ;;  %v305_v11 = vrot.slane %v304_v57, 4  ;;  %v1479_v39 = vor.u32 %v1478_v58, %v1477_v61 }
  0x94   : > { %v1130_v49 = vmax.bf16 %v955_v0, %v851_v54  ;;  %v1726_v44 = vsel %vm2105_vm0, %v1724_v33, %v1725_v27  ;;  %v683_v28 = vrot.slane %v681_v12, 4  ;;  %v2753_v48 = vshrl.u32 %v2722_v4, 16 }
  0x95   : > { %1878 = vst.msk [vmem:[%s2160_s15 + $0x30] sm:$0xf] %vm1865_vm2, %v1841_v6  ;;  %v310_v8 = vsel %vm2051_vm13, %v305_v11, %v309_v24  ;;  %v684_v35 = vrot.slane %v2628_v59, 5  ;;  %v956_v52 = vrot.slane %v954_v43, 4  ;;  %v957_v42 = vrot.slane %v2659_v56, 5 }
  0x96   : > { %v1317_v40 = vmax.bf16 %v2645_v53, %v1130_v49  ;;  %v571_v14 = vmax.bf16 %v310_v8, %v2489_v9  ;;  %v958_v31 = vrot.slane %v2648_v21, 6  ;;  %v1480_v30 = vsel %vm2119_vm1, %v1476_v23, %v1479_v39  ;;  %v2771_v43 = vld [vmem:[%s2013_s11 + $0x50] sm:$0xf] }
  0x97   : > { %v349_v51 = vrot.slane %v2742_v41, 5  ;;  %v2765_v12 = vsel %vm2042_vm10, %v683_v28, %v684_v35  ;;  %v1208_v45 = vrot.slane %v1206_v62, 4  ;;  %v1482_v9 = vrot.slane %v2753_v48, 6 }
  0x98   : > { %v1376_v61 = vmax.bf16 %v1317_v40, %v2739_v16  ;;  %v793_v53 = vmax.bf16 %v2671_v20, %v571_v14  ;;  %v959_v2 = vor.u32 %v958_v31, %v957_v42  ;;  %v1209_v58 = vrot.slane %v2722_v4, 6 }
  0x99   : > { %v1481_v33 = vrot.slane %v1479_v39, 4  ;;  %v1483_v7 = vrot.slane %v2742_v41, 7  ;;  %v1727_v57 = vrot.slane %v1725_v27, 4  ;;  %v314_v20 = vor.u32 %v313_v34, %v309_v24 }
  0x9a   : > { %v1655_v54 = vmax.bf16 %v1480_v30, %v1376_v61  ;;  %v852_v0 = vmax.bf16 %v793_v53, %v2765_v12  ;;  %v960_v62 = vsel %vm2088_vm15, %v956_v52, %v959_v2  ;;  %v1728_v6 = vrot.slane %v2722_v4, 7 }
  0x9b   : > { %v1484_v23 = vor.u32 %v1483_v7, %v1482_v9  ;;  %v2784_v11 = vshll.u32 %v2771_v43, 16  ;;  %v2787_v27 = vshrl.u32 %v2771_v43, 16  ;;  %v353_v39 = vrot.slane %v2753_v48, 4 }
  0x9c   : > { %v1842_v49 = vmax.bf16 %v1726_v44, %v1655_v54  ;;  %v1131_v28 = vmax.bf16 %v960_v62, %v852_v0  ;;  %v315_v8 = vrot.slane %v314_v20, 4  ;;  %v2792_v37 = vsel %vm2076_vm14, %v1208_v45, %v1209_v58  ;;  %v2816_v54 = vld [vmem:[%s2013_s11 + $0x54] sm:$0xf] }
  0x9d   : > { %v1485_v38 = vsel %vm2119_vm1, %v1481_v33, %v1484_v23  ;;  %v1729_v24 = vsel %vm2105_vm0, %v1727_v57, %v1728_v6  ;;  %v686_v34 = vrot.slane %v684_v35, 4  ;;  %v359_v40 = vrot.slane %v2784_v11, 5 }
  0x9e   : > { %1879 = vst.msk [vmem:[%s2160_s15 + $0x34] sm:$0xf] %vm1865_vm2, %v1842_v49  ;;  %v1318_v52 = vmax.bf16 %v2698_v13, %v1131_v28  ;;  %v320_v44 = vsel %vm2051_vm13, %v315_v8, %v319_v46  ;;  %v962_v14 = vrot.slane %v2693_v15, 5  ;;  %v363_v42 = vrot.slane %v2787_v27, 4 }
  0x9f   : > { %v572_v31 = vmax.bf16 %v320_v44, %v2534_v3  ;;  %v961_v30 = vrot.slane %v959_v2, 4  ;;  %v963_v35 = vrot.slane %v2690_v60, 6  ;;  %v687_v13 = vrot.slane %v2677_v55, 5 }
  0xa0   : > { %v1377_v45 = vmax.bf16 %v1318_v52, %v2792_v37  ;;  %v1211_v61 = vrot.slane %v1209_v58, 4  ;;  %v1487_v53 = vrot.slane %v2787_v27, 6  ;;  %v1488_v7 = vrot.slane %v2784_v11, 7 }
  0xa1   : > { %v794_v9 = vmax.bf16 %v2726_v5, %v572_v31  ;;  %v964_v33 = vor.u32 %v963_v35, %v962_v14  ;;  %v1730_v57 = vrot.slane %v1728_v6, 4  ;;  %v2820_v3 = vsel %vm2042_vm10, %v686_v34, %v687_v13 }
  0xa2   : > { %v1656_v0 = vmax.bf16 %v1485_v38, %v1377_v45  ;;  %v1212_v2 = vrot.slane %v2771_v43, 6  ;;  %v324_v58 = vor.u32 %v323_v22, %v319_v46  ;;  %v1486_v20 = vrot.slane %v1484_v23, 4 }
  0xa3   : > { %v853_v5 = vmax.bf16 %v794_v9, %v2820_v3  ;;  %v965_v62 = vsel %vm2088_vm15, %v961_v30, %v964_v33  ;;  %v1731_v6 = vrot.slane %v2771_v43, 7  ;;  %v2836_v38 = vshll.u32 %v2816_v54, 16 }
  0xa4   : > { %v1843_v49 = vmax.bf16 %v1729_v24, %v1656_v0  ;;  %v2833_v28 = vsel %vm2076_vm14, %v1211_v61, %v1212_v2  ;;  %v325_v8 = vrot.slane %v324_v58, 4  ;;  %v1489_v29 = vor.u32 %v1488_v7, %v1487_v53 }
  0xa5   : > { %v1132_v19 = vmax.bf16 %v965_v62, %v853_v5  ;;  %v1732_v46 = vsel %vm2105_vm0, %v1730_v57, %v1731_v6  ;;  %v689_v22 = vrot.slane %v687_v13, 4  ;;  %v2847_v24 = vshrl.u32 %v2816_v54, 16 }
  0xa6   : > { %1880 = vst.msk [vmem:[%s2160_s15 + $0x38] sm:$0xf] %vm1865_vm2, %v1843_v49  ;;  %v330_v23 = vsel %vm2051_vm13, %v325_v8, %v329_v1  ;;  %v690_v34 = vrot.slane %v2722_v4, 5  ;;  %v966_v52 = vrot.slane %v964_v33, 4  ;;  %v967_v31 = vrot.slane %v2753_v48, 5 }
  0xa7   : > { %v1319_v44 = vmax.bf16 %v2739_v16, %v1132_v19  ;;  %v573_v14 = vmax.bf16 %v330_v23, %v2583_v26  ;;  %v968_v30 = vrot.slane %v2742_v41, 6  ;;  %v1490_v35 = vsel %vm2119_vm1, %v1486_v20, %v1489_v29  ;;  %v2865_v33 = vld [vmem:[%s2013_s11 + $0x58] sm:$0xf] }
  0xa8   : > { %v369_v45 = vrot.slane %v2836_v38, 5  ;;  %v2859_v13 = vsel %vm2042_vm10, %v689_v22, %v690_v34  ;;  %v1214_v61 = vrot.slane %v1212_v2, 4  ;;  %v1492_v26 = vrot.slane %v2847_v24, 6 }
  0xa9   : > { %v1378_v53 = vmax.bf16 %v1319_v44, %v2833_v28  ;;  %v795_v16 = vmax.bf16 %v2765_v12, %v573_v14  ;;  %v969_v9 = vor.u32 %v968_v30, %v967_v31  ;;  %v1215_v7 = vrot.slane %v2816_v54, 6 }
  0xaa   : > { %v1491_v57 = vrot.slane %v1489_v29, 4  ;;  %v1493_v0 = vrot.slane %v2836_v38, 7  ;;  %v1733_v58 = vrot.slane %v1731_v6, 4  ;;  %v334_v12 = vor.u32 %v333_v17, %v329_v1 }
  0xab   : > { %v1657_v5 = vmax.bf16 %v1490_v35, %v1378_v53  ;;  %v854_v62 = vmax.bf16 %v795_v16, %v2859_v13  ;;  %v970_v2 = vsel %vm2088_vm15, %v966_v52, %v969_v9  ;;  %v1734_v49 = vrot.slane %v2816_v54, 7 }
  0xac   : > { %v1494_v20 = vor.u32 %v1493_v0, %v1492_v26  ;;  %v2878_v8 = vshll.u32 %v2865_v33, 16  ;;  %v2881_v6 = vshrl.u32 %v2865_v33, 16  ;;  %v373_v29 = vrot.slane %v2847_v24, 4 }
  0xad   : > { %v1844_v19 = vmax.bf16 %v1732_v46, %v1657_v5  ;;  %v1133_v22 = vmax.bf16 %v970_v2, %v854_v62  ;;  %v335_v23 = vrot.slane %v334_v12, 4  ;;  %v2886_v21 = vsel %vm2076_vm14, %v1214_v61, %v1215_v7  ;;  %v2910_v5 = vld [vmem:[%s2013_s11 + $0x5c] sm:$0xf] }
  0xae   : > { %v1495_v56 = vsel %vm2119_vm1, %v1491_v57, %v1494_v20  ;;  %v1735_v1 = vsel %vm2105_vm0, %v1733_v58, %v1734_v49  ;;  %v692_v17 = vrot.slane %v690_v34, 4  ;;  %v379_v44 = vrot.slane %v2878_v8, 5 }
  0xaf   : > { %1881 = vst.msk [vmem:[%s2160_s15 + $0x3c] sm:$0xf] %vm1865_vm2, %v1844_v19  ;;  %v1320_v52 = vmax.bf16 %v2792_v37, %v1133_v22  ;;  %v340_v46 = vsel %vm2051_vm13, %v335_v23, %v339_v36  ;;  %v972_v14 = vrot.slane %v2787_v27, 5  ;;  %v383_v31 = vrot.slane %v2881_v6, 4 }
  0xb0   : > { %v574_v30 = vmax.bf16 %v340_v46, %v2628_v59  ;;  %v971_v35 = vrot.slane %v969_v9, 4  ;;  %v973_v34 = vrot.slane %v2784_v11, 6  ;;  %v693_v37 = vrot.slane %v2771_v43, 5 }
  0xb1   : > { %v1379_v61 = vmax.bf16 %v1320_v52, %v2886_v21  ;;  %v1217_v53 = vrot.slane %v1215_v7, 4  ;;  %v1497_v16 = vrot.slane %v2881_v6, 6  ;;  %v1498_v0 = vrot.slane %v2878_v8, 7 }
  0xb2   : > { %v796_v26 = vmax.bf16 %v2820_v3, %v574_v30  ;;  %v974_v57 = vor.u32 %v973_v34, %v972_v14  ;;  %v1736_v58 = vrot.slane %v1734_v49, 4  ;;  %v2914_v59 = vsel %vm2042_vm10, %v692_v17, %v693_v37 }
  0xb3   : > { %v1658_v62 = vmax.bf16 %v1495_v56, %v1379_v61  ;;  %v1218_v9 = vrot.slane %v2865_v33, 6  ;;  %v344_v7 = vor.u32 %v343_v32, %v339_v36  ;;  %v1496_v12 = vrot.slane %v1494_v20, 4 }
  0xb4   : > { %v855_v3 = vmax.bf16 %v796_v26, %v2914_v59  ;;  %v975_v2 = vsel %vm2088_vm15, %v971_v35, %v974_v57  ;;  %v1737_v49 = vrot.slane %v2865_v33, 7  ;;  %v2930_v56 = vshll.u32 %v2910_v5, 16 }
  0xb5   : > { %v1845_v19 = vmax.bf16 %v1735_v1, %v1658_v62  ;;  %v2927_v22 = vsel %vm2076_vm14, %v1217_v53, %v1218_v9  ;;  %v345_v23 = vrot.slane %v344_v7, 4  ;;  %v1499_v15 = vor.u32 %v1498_v0, %v1497_v16 }
  0xb6   : > { %v1134_v60 = vmax.bf16 %v975_v2, %v855_v3  ;;  %v1738_v36 = vsel %vm2105_vm0, %v1736_v58, %v1737_v49  ;;  %v695_v32 = vrot.slane %v693_v37, 4  ;;  %v2941_v1 = vshrl.u32 %v2910_v5, 16 }
  0xb7   : > { %1882 = vst.msk [vmem:[%s2160_s15 + $0x40] sm:$0xf] %vm1865_vm2, %v1845_v19  ;;  %v350_v20 = vsel %vm2051_vm13, %v345_v23, %v349_v51  ;;  %v696_v17 = vrot.slane %v2816_v54, 5  ;;  %v976_v52 = vrot.slane %v974_v57, 4  ;;  %v977_v30 = vrot.slane %v2847_v24, 5 }
  0xb8   : > { %v1321_v46 = vmax.bf16 %v2833_v28, %v1134_v60  ;;  %v575_v14 = vmax.bf16 %v350_v20, %v2677_v55  ;;  %v978_v35 = vrot.slane %v2836_v38, 6  ;;  %v1500_v34 = vsel %vm2119_vm1, %v1496_v12, %v1499_v15  ;;  %v2959_v57 = vld [vmem:[%s2013_s11 + $0x60] sm:$0xf] }
  0xb9   : > { %v389_v61 = vrot.slane %v2930_v56, 5  ;;  %v2953_v37 = vsel %vm2042_vm10, %v695_v32, %v696_v17  ;;  %v1220_v53 = vrot.slane %v1218_v9, 4  ;;  %v1502_v55 = vrot.slane %v2941_v1, 6 }
  0xba   : > { %v1380_v16 = vmax.bf16 %v1321_v46, %v2927_v22  ;;  %v797_v28 = vmax.bf16 %v2859_v13, %v575_v14  ;;  %v979_v26 = vor.u32 %v978_v35, %v977_v30  ;;  %v1221_v0 = vrot.slane %v2910_v5, 6 }
  0xbb   : > { %v1501_v58 = vrot.slane %v1499_v15, 4  ;;  %v1503_v62 = vrot.slane %v2930_v56, 7  ;;  %v1739_v7 = vrot.slane %v1737_v49, 4  ;;  %v354_v13 = vor.u32 %v353_v39, %v349_v51 }
  0xbc   : > { %v1659_v3 = vmax.bf16 %v1500_v34, %v1380_v16  ;;  %v856_v2 = vmax.bf16 %v797_v28, %v2953_v37  ;;  %v980_v9 = vsel %vm2088_vm15, %v976_v52, %v979_v26  ;;  %v1740_v19 = vrot.slane %v2910_v5, 7 }
  0xbd   : > { %v1504_v12 = vor.u32 %v1503_v62, %v1502_v55  ;;  %v2972_v23 = vshll.u32 %v2959_v57, 16  ;;  %v2975_v49 = vshrl.u32 %v2959_v57, 16  ;;  %v393_v15 = vrot.slane %v2941_v1, 4 }
  0xbe   : > { %v1846_v60 = vmax.bf16 %v1738_v36, %v1659_v3  ;;  %v1135_v32 = vmax.bf16 %v980_v9, %v856_v2  ;;  %v355_v20 = vrot.slane %v354_v13, 4  ;;  %v2980_v41 = vsel %vm2076_vm14, %v1220_v53, %v1221_v0  ;;  %v3004_v3 = vld [vmem:[%s2013_s11 + $0x64] sm:$0xf] }
  0xbf   : > { %v1505_v48 = vsel %vm2119_vm1, %v1501_v58, %v1504_v12  ;;  %v1741_v51 = vsel %vm2105_vm0, %v1739_v7, %v1740_v19  ;;  %v698_v39 = vrot.slane %v696_v17, 4  ;;  %v399_v46 = vrot.slane %v2972_v23, 5 }
  0xc0   : > { %1883 = vst.msk [vmem:[%s2160_s15 + $0x44] sm:$0xf] %vm1865_vm2, %v1846_v60  ;;  %v1322_v52 = vmax.bf16 %v2886_v21, %v1135_v32  ;;  %v360_v36 = vsel %vm2051_vm13, %v355_v20, %v359_v40  ;;  %v982_v14 = vrot.slane %v2881_v6, 5  ;;  %v403_v30 = vrot.slane %v2975_v49, 4 }
  0xc1   : > { %v576_v35 = vmax.bf16 %v360_v36, %v2722_v4  ;;  %v981_v34 = vrot.slane %v979_v26, 4  ;;  %v983_v17 = vrot.slane %v2878_v8, 6  ;;  %v699_v21 = vrot.slane %v2865_v33, 5 }
  0xc2   : > { %v1381_v53 = vmax.bf16 %v1322_v52, %v2980_v41  ;;  %v1223_v16 = vrot.slane %v1221_v0, 4  ;;  %v1507_v28 = vrot.slane %v2975_v49, 6  ;;  %v1508_v62 = vrot.slane %v2972_v23, 7 }
  0xc3   : > { %v798_v55 = vmax.bf16 %v2914_v59, %v576_v35  ;;  %v984_v58 = vor.u32 %v983_v17, %v982_v14  ;;  %v1742_v7 = vrot.slane %v1740_v19, 4  ;;  %v3008_v4 = vsel %vm2042_vm10, %v698_v39, %v699_v21 }
  0xc4   : > { %v1660_v2 = vmax.bf16 %v1505_v48, %v1381_v53  ;;  %v1224_v26 = vrot.slane %v2959_v57, 6  ;;  %v364_v0 = vor.u32 %v363_v42, %v359_v40  ;;  %v1506_v13 = vrot.slane %v1504_v12, 4 }
  0xc5   : > { %v857_v59 = vmax.bf16 %v798_v55, %v3008_v4  ;;  %v985_v9 = vsel %vm2088_vm15, %v981_v34, %v984_v58  ;;  %v1743_v19 = vrot.slane %v2959_v57, 7  ;;  %v3024_v48 = vshll.u32 %v3004_v3, 16 }
  0xc6   : > { %v1847_v60 = vmax.bf16 %v1741_v51, %v1660_v2  ;;  %v3021_v32 = vsel %vm2076_vm14, %v1223_v16, %v1224_v26  ;;  %v365_v20 = vrot.slane %v364_v0, 4  ;;  %v1509_v27 = vor.u32 %v1508_v62, %v1507_v28 }
  0xc7   : > { %v1136_v11 = vmax.bf16 %v985_v9, %v857_v59  ;;  %v1744_v40 = vsel %vm2105_vm0, %v1742_v7, %v1743_v19  ;;  %v701_v42 = vrot.slane %v699_v21, 4  ;;  %v3035_v51 = vshrl.u32 %v3004_v3, 16 }
  0xc8   : > { %1884 = vst.msk [vmem:[%s2160_s15 + $0x48] sm:$0xf] %vm1865_vm2, %v1847_v60  ;;  %v370_v12 = vsel %vm2051_vm13, %v365_v20, %v369_v45  ;;  %v702_v39 = vrot.slane %v2910_v5, 5  ;;  %v986_v52 = vrot.slane %v984_v58, 4  ;;  %v987_v35 = vrot.slane %v2941_v1, 5 }
  0xc9   : > { %v1323_v36 = vmax.bf16 %v2927_v22, %v1136_v11  ;;  %v577_v14 = vmax.bf16 %v370_v12, %v2771_v43  ;;  %v988_v34 = vrot.slane %v2930_v56, 6  ;;  %v1510_v17 = vsel %vm2119_vm1, %v1506_v13, %v1509_v27  ;;  %v3053_v58 = vld [vmem:[%s2013_s11 + $0x68] sm:$0xf] }
  0xca   : > { %v409_v53 = vrot.slane %v3024_v48, 5  ;;  %v3047_v21 = vsel %vm2042_vm10, %v701_v42, %v702_v39  ;;  %v1226_v16 = vrot.slane %v1224_v26, 4  ;;  %v1512_v43 = vrot.slane %v3035_v51, 6 }
  0xcb   : > { %v1382_v28 = vmax.bf16 %v1323_v36, %v3021_v32  ;;  %v799_v22 = vmax.bf16 %v2953_v37, %v577_v14  ;;  %v989_v55 = vor.u32 %v988_v34, %v987_v35  ;;  %v1227_v62 = vrot.slane %v3004_v3, 6 }
  0xcc   : > { %v1511_v7 = vrot.slane %v1509_v27, 4  ;;  %v1513_v2 = vrot.slane %v3024_v48, 7  ;;  %v1745_v0 = vrot.slane %v1743_v19, 4  ;;  %v374_v37 = vor.u32 %v373_v29, %v369_v45 }
  0xcd   : > { %v1661_v59 = vmax.bf16 %v1510_v17, %v1382_v28  ;;  %v858_v9 = vmax.bf16 %v799_v22, %v3047_v21  ;;  %v990_v26 = vsel %vm2088_vm15, %v986_v52, %v989_v55  ;;  %v1746_v60 = vrot.slane %v3004_v3, 7 }
  0xce   : > { %v1514_v13 = vor.u32 %v1513_v2, %v1512_v43  ;;  %v3066_v20 = vshll.u32 %v3053_v58, 16  ;;  %v3069_v19 = vshrl.u32 %v3053_v58, 16  ;;  %v413_v27 = vrot.slane %v3035_v51, 4 }
  0xcf   : > { %v1848_v11 = vmax.bf16 %v1744_v40, %v1661_v59  ;;  %v1137_v42 = vmax.bf16 %v990_v26, %v858_v9  ;;  %v375_v12 = vrot.slane %v374_v37, 4  ;;  %v3074_v38 = vsel %vm2076_vm14, %v1226_v16, %v1227_v62  ;;  %v3098_v59 = vld [vmem:[%s2013_s11 + $0x6c] sm:$0xf] }
  0xd0   : > { %v1515_v24 = vsel %vm2119_vm1, %v1511_v7, %v1514_v13  ;;  %v1747_v45 = vsel %vm2105_vm0, %v1745_v0, %v1746_v60  ;;  %v704_v29 = vrot.slane %v702_v39, 4  ;;  %v419_v36 = vrot.slane %v3066_v20, 5 }
  0xd1   : > { %1885 = vst.msk [vmem:[%s2160_s15 + $0x4c] sm:$0xf] %vm1865_vm2, %v1848_v11  ;;  %v1324_v52 = vmax.bf16 %v2980_v41, %v1137_v42  ;;  %v380_v40 = vsel %vm2051_vm13, %v375_v12, %v379_v44  ;;  %v992_v14 = vrot.slane %v2975_v49, 5  ;;  %v423_v35 = vrot.slane %v3069_v19, 4 }
  0xd2   : > { %v578_v34 = vmax.bf16 %v380_v40, %v2816_v54  ;;  %v991_v17 = vrot.slane %v989_v55, 4  ;;  %v993_v39 = vrot.slane %v2972_v23, 6  ;;  %v705_v41 = vrot.slane %v2959_v57, 5 }
  0xd3   : > { %v1383_v16 = vmax.bf16 %v1324_v52, %v3074_v38  ;;  %v1229_v28 = vrot.slane %v1227_v62, 4  ;;  %v1517_v22 = vrot.slane %v3069_v19, 6  ;;  %v1518_v2 = vrot.slane %v3066_v20, 7 }
  0xd4   : > { %v800_v43 = vmax.bf16 %v3008_v4, %v578_v34  ;;  %v994_v7 = vor.u32 %v993_v39, %v992_v14  ;;  %v1748_v0 = vrot.slane %v1746_v60, 4  ;;  %v3102_v54 = vsel %vm2042_vm10, %v704_v29, %v705_v41 }
  0xd5   : > { %v1662_v9 = vmax.bf16 %v1515_v24, %v1383_v16  ;;  %v1230_v55 = vrot.slane %v3053_v58, 6  ;;  %v384_v62 = vor.u32 %v383_v31, %v379_v44  ;;  %v1516_v37 = vrot.slane %v1514_v13, 4 }
  0xd6   : > { %v859_v4 = vmax.bf16 %v800_v43, %v3102_v54  ;;  %v995_v26 = vsel %vm2088_vm15, %v991_v17, %v994_v7  ;;  %v1749_v60 = vrot.slane %v3053_v58, 7  ;;  %v3118_v24 = vshll.u32 %v3098_v59, 16 }
  0xd7   : > { %v1849_v11 = vmax.bf16 %v1747_v45, %v1662_v9  ;;  %v3115_v42 = vsel %vm2076_vm14, %v1229_v28, %v1230_v55  ;;  %v385_v12 = vrot.slane %v384_v62, 4  ;;  %v1519_v6 = vor.u32 %v1518_v2, %v1517_v22 }
  0xd8   : > { %v1138_v8 = vmax.bf16 %v995_v26, %v859_v4  ;;  %v1750_v44 = vsel %vm2105_vm0, %v1748_v0, %v1749_v60  ;;  %v707_v31 = vrot.slane %v705_v41, 4  ;;  %v3129_v45 = vshrl.u32 %v3098_v59, 16 }
  0xd9   : > { %1886 = vst.msk [vmem:[%s2160_s15 + $0x50] sm:$0xf] %vm1865_vm2, %v1849_v11  ;;  %v390_v13 = vsel %vm2051_vm13, %v385_v12, %v389_v61  ;;  %v708_v29 = vrot.slane %v3004_v3, 5  ;;  %v996_v52 = vrot.slane %v994_v7, 4  ;;  %v997_v34 = vrot.slane %v3035_v51, 5 }
  0xda   : > { %v1325_v40 = vmax.bf16 %v3021_v32, %v1138_v8  ;;  %v579_v14 = vmax.bf16 %v390_v13, %v2865_v33  ;;  %v998_v17 = vrot.slane %v3024_v48, 6  ;;  %v1520_v39 = vsel %vm2119_vm1, %v1516_v37, %v1519_v6  ;;  %v3147_v7 = vld [vmem:[%s2013_s11 + $0x70] sm:$0xf] }
  0xdb   : > { %v429_v16 = vrot.slane %v3118_v24, 5  ;;  %v3141_v41 = vsel %vm2042_vm10, %v707_v31, %v708_v29  ;;  %v1232_v28 = vrot.slane %v1230_v55, 4  ;;  %v1522_v33 = vrot.slane %v3129_v45, 6 }
  0xdc   : > { %v1384_v22 = vmax.bf16 %v1325_v40, %v3115_v42  ;;  %v801_v32 = vmax.bf16 %v3047_v21, %v579_v14  ;;  %v999_v43 = vor.u32 %v998_v17, %v997_v34  ;;  %v1233_v2 = vrot.slane %v3098_v59, 6 }
  0xdd   : > { %v1521_v0 = vrot.slane %v1519_v6, 4  ;;  %v1523_v9 = vrot.slane %v3118_v24, 7  ;;  %v1751_v62 = vrot.slane %v1749_v60, 4  ;;  %v394_v21 = vor.u32 %v393_v15, %v389_v61 }
  0xde   : > { %v1663_v4 = vmax.bf16 %v1520_v39, %v1384_v22  ;;  %v860_v26 = vmax.bf16 %v801_v32, %v3141_v41  ;;  %v1000_v55 = vsel %vm2088_vm15, %v996_v52, %v999_v43  ;;  %v1752_v11 = vrot.slane %v3098_v59, 7 }
  0xdf   : > { %v1524_v37 = vor.u32 %v1523_v9, %v1522_v33  ;;  %v3160_v12 = vshll.u32 %v3147_v7, 16  ;;  %v3163_v60 = vshrl.u32 %v3147_v7, 16  ;;  %v433_v6 = vrot.slane %v3129_v45, 4 }
  0xe0   : > { %v1850_v8 = vmax.bf16 %v1750_v44, %v1663_v4  ;;  %v1139_v31 = vmax.bf16 %v1000_v55, %v860_v26  ;;  %v395_v13 = vrot.slane %v394_v21, 4  ;;  %v3168_v56 = vsel %vm2076_vm14, %v1232_v28, %v1233_v2  ;;  %v3192_v4 = vld [vmem:[%s2013_s11 + $0x74] sm:$0xf] }
  0xe1   : > { %v1525_v1 = vsel %vm2119_vm1, %v1521_v0, %v1524_v37  ;;  %v1753_v61 = vsel %vm2105_vm0, %v1751_v62, %v1752_v11  ;;  %v710_v15 = vrot.slane %v708_v29, 4  ;;  %v439_v40 = vrot.slane %v3160_v12, 5 }
  0xe2   : > { %1887 = vst.msk [vmem:[%s2160_s15 + $0x54] sm:$0xf] %vm1865_vm2, %v1850_v8  ;;  %v1326_v52 = vmax.bf16 %v3074_v38, %v1139_v31  ;;  %v400_v44 = vsel %vm2051_vm13, %v395_v13, %v399_v46  ;;  %v1002_v14 = vrot.slane %v3069_v19, 5  ;;  %v443_v34 = vrot.slane %v3163_v60, 4 }
  0xe3   : > { %v580_v17 = vmax.bf16 %v400_v44, %v2910_v5  ;;  %v1001_v39 = vrot.slane %v999_v43, 4  ;;  %v1003_v29 = vrot.slane %v3066_v20, 6  ;;  %v711_v38 = vrot.slane %v3053_v58, 5 }
  0xe4   : > { %v1385_v28 = vmax.bf16 %v1326_v52, %v3168_v56  ;;  %v1235_v22 = vrot.slane %v1233_v2, 4  ;;  %v1527_v32 = vrot.slane %v3163_v60, 6  ;;  %v1528_v9 = vrot.slane %v3160_v12, 7 }
  0xe5   : > { %v802_v33 = vmax.bf16 %v3102_v54, %v580_v17  ;;  %v1004_v0 = vor.u32 %v1003_v29, %v1002_v14  ;;  %v1754_v62 = vrot.slane %v1752_v11, 4  ;;  %v3196_v5 = vsel %vm2042_vm10, %v710_v15, %v711_v38 }
  0xe6   : > { %v1664_v26 = vmax.bf16 %v1525_v1, %v1385_v28  ;;  %v1236_v43 = vrot.slane %v3147_v7, 6  ;;  %v404_v2 = vor.u32 %v403_v30, %v399_v46  ;;  %v1526_v21 = vrot.slane %v1524_v37, 4 }
  0xe7   : > { %v861_v54 = vmax.bf16 %v802_v33, %v3196_v5  ;;  %v1005_v55 = vsel %vm2088_vm15, %v1001_v39, %v1004_v0  ;;  %v1755_v11 = vrot.slane %v3147_v7, 7  ;;  %v3212_v1 = vshll.u32 %v3192_v4, 16 }
  0xe8   : > { %v1851_v8 = vmax.bf16 %v1753_v61, %v1664_v26  ;;  %v3209_v31 = vsel %vm2076_vm14, %v1235_v22, %v1236_v43  ;;  %v405_v13 = vrot.slane %v404_v2, 4  ;;  %v1529_v49 = vor.u32 %v1528_v9, %v1527_v32 }
  0xe9   : > { %v1140_v23 = vmax.bf16 %v1005_v55, %v861_v54  ;;  %v1756_v46 = vsel %vm2105_vm0, %v1754_v62, %v1755_v11  ;;  %v713_v30 = vrot.slane %v711_v38, 4  ;;  %v3223_v61 = vshrl.u32 %v3192_v4, 16 }
  0xea   : > { %1888 = vst.msk [vmem:[%s2160_s15 + $0x58] sm:$0xf] %vm1865_vm2, %v1851_v8  ;;  %v410_v37 = vsel %vm2051_vm13, %v405_v13, %v409_v53  ;;  %v714_v15 = vrot.slane %v3098_v59, 5  ;;  %v1006_v52 = vrot.slane %v1004_v0, 4  ;;  %v1007_v17 = vrot.slane %v3129_v45, 5 }
  0xeb   : > { %v1327_v44 = vmax.bf16 %v3115_v42, %v1140_v23  ;;  %v581_v14 = vmax.bf16 %v410_v37, %v2959_v57  ;;  %v1008_v39 = vrot.slane %v3118_v24, 6  ;;  %v1530_v29 = vsel %vm2119_vm1, %v1526_v21, %v1529_v49  ;;  %v3241_v0 = vld [vmem:[%s2013_s11 + $0x78] sm:$0xf] }
  0xec   : > { %v449_v28 = vrot.slane %v3212_v1, 5  ;;  %v3235_v38 = vsel %vm2042_vm10, %v713_v30, %v714_v15  ;;  %v1238_v22 = vrot.slane %v1236_v43, 4  ;;  %v1532_v57 = vrot.slane %v3223_v61, 6 }
  0xed   : > { %v1386_v32 = vmax.bf16 %v1327_v44, %v3209_v31  ;;  %v803_v42 = vmax.bf16 %v3141_v41, %v581_v14  ;;  %v1009_v33 = vor.u32 %v1008_v39, %v1007_v17  ;;  %v1239_v9 = vrot.slane %v3192_v4, 6 }
  0xee   : > { %v1531_v62 = vrot.slane %v1529_v49, 4  ;;  %v1533_v26 = vrot.slane %v3212_v1, 7  ;;  %v1757_v2 = vrot.slane %v1755_v11, 4  ;;  %v414_v41 = vor.u32 %v413_v27, %v409_v53 }
  0xef   : > { %v1665_v54 = vmax.bf16 %v1530_v29, %v1386_v32  ;;  %v862_v55 = vmax.bf16 %v803_v42, %v3235_v38  ;;  %v1010_v43 = vsel %vm2088_vm15, %v1006_v52, %v1009_v33  ;;  %v1758_v8 = vrot.slane %v3192_v4, 7 }
  0xf0   : > { %v1534_v21 = vor.u32 %v1533_v26, %v1532_v57  ;;  %v3254_v13 = vshll.u32 %v3241_v0, 16  ;;  %v3257_v11 = vshrl.u32 %v3241_v0, 16  ;;  %v453_v49 = vrot.slane %v3223_v61, 4 }
  0xf1   : > { %v1852_v23 = vmax.bf16 %v1756_v46, %v1665_v54  ;;  %v1141_v30 = vmax.bf16 %v1010_v43, %v862_v55  ;;  %v415_v37 = vrot.slane %v414_v41, 4  ;;  %v3262_v48 = vsel %vm2076_vm14, %v1238_v22, %v1239_v9  ;;  %v3286_v54 = vld [vmem:[%s2013_s11 + $0x7c] sm:$0xf] }
  0xf2   : > { %v1535_v51 = vsel %vm2119_vm1, %v1531_v62, %v1534_v21  ;;  %v1759_v53 = vsel %vm2105_vm0, %v1757_v2, %v1758_v8  ;;  %v716_v27 = vrot.slane %v714_v15, 4  ;;  %v459_v44 = vrot.slane %v3254_v13, 5 }
  0xf3   : > { %1889 = vst.msk [vmem:[%s2160_s15 + $0x5c] sm:$0xf] %vm1865_vm2, %v1852_v23  ;;  %v1328_v52 = vmax.bf16 %v3168_v56, %v1141_v30  ;;  %v420_v46 = vsel %vm2051_vm13, %v415_v37, %v419_v36  ;;  %v1012_v14 = vrot.slane %v3163_v60, 5  ;;  %v463_v17 = vrot.slane %v3257_v11, 4 }
  0xf4   : > { %v582_v39 = vmax.bf16 %v420_v46, %v3004_v3  ;;  %v1011_v29 = vrot.slane %v1009_v33, 4  ;;  %v1013_v15 = vrot.slane %v3160_v12, 6  ;;  %v717_v56 = vrot.slane %v3147_v7, 5 }
  0xf5   : > { %v1387_v22 = vmax.bf16 %v1328_v52, %v3262_v48  ;;  %v1241_v32 = vrot.slane %v1239_v9, 4  ;;  %v1537_v42 = vrot.slane %v3257_v11, 6  ;;  %v1538_v26 = vrot.slane %v3254_v13, 7 }
  0xf6   : > { %v804_v57 = vmax.bf16 %v3196_v5, %v582_v39  ;;  %v1014_v62 = vor.u32 %v1013_v15, %v1012_v14  ;;  %v1760_v2 = vrot.slane %v1758_v8, 4  ;;  %v3290_v3 = vsel %vm2042_vm10, %v716_v27, %v717_v56 }
  0xf7   : > { %v1666_v55 = vmax.bf16 %v1535_v51, %v1387_v22  ;;  %v1242_v33 = vrot.slane %v3241_v0, 6  ;;  %v424_v9 = vor.u32 %v423_v35, %v419_v36  ;;  %v1536_v41 = vrot.slane %v1534_v21, 4 }
  0xf8   : > { %v863_v5 = vmax.bf16 %v804_v57, %v3290_v3  ;;  %v1015_v43 = vsel %vm2088_vm15, %v1011_v29, %v1014_v62  ;;  %v1761_v8 = vrot.slane %v3241_v0, 7  ;;  %v3306_v51 = vshll.u32 %v3286_v54, 16 }
  0xf9   : > { %v1853_v23 = vmax.bf16 %v1759_v53, %v1666_v55  ;;  %v3303_v30 = vsel %vm2076_vm14, %v1241_v32, %v1242_v33  ;;  %v425_v37 = vrot.slane %v424_v9, 4  ;;  %v1539_v19 = vor.u32 %v1538_v26, %v1537_v42 }
  0xfa   : > { %v1142_v20 = vmax.bf16 %v1015_v43, %v863_v5  ;;  %v1762_v36 = vsel %vm2105_vm0, %v1760_v2, %v1761_v8  ;;  %v719_v35 = vrot.slane %v717_v56, 4  ;;  %v3317_v53 = vshrl.u32 %v3286_v54, 16 }
  0xfb   : > { %1890 = vst.msk [vmem:[%s2160_s15 + $0x60] sm:$0xf] %vm1865_vm2, %v1853_v23  ;;  %v430_v21 = vsel %vm2051_vm13, %v425_v37, %v429_v16  ;;  %v720_v27 = vrot.slane %v3192_v4, 5  ;;  %v1016_v52 = vrot.slane %v1014_v62, 4  ;;  %v1017_v39 = vrot.slane %v3223_v61, 5 }
  0xfc   : > { %v1329_v46 = vmax.bf16 %v3209_v31, %v1142_v20  ;;  %v583_v14 = vmax.bf16 %v430_v21, %v3053_v58  ;;  %v1018_v29 = vrot.slane %v3212_v1, 6  ;;  %v1540_v15 = vsel %vm2119_vm1, %v1536_v41, %v1539_v19  ;;  %v3335_v62 = vld [vmem:[%s2013_s11 + $0x80] sm:$0xf] }
  0xfd   : > { %v469_v22 = vrot.slane %v3306_v51, 5  ;;  %v3329_v56 = vsel %vm2042_vm10, %v719_v35, %v720_v27  ;;  %v1244_v32 = vrot.slane %v1242_v33, 4  ;;  %v1542_v58 = vrot.slane %v3317_v53, 6 }
  0xfe   : > { %v1388_v42 = vmax.bf16 %v1329_v46, %v3303_v30  ;;  %v805_v31 = vmax.bf16 %v3235_v38, %v583_v14  ;;  %v1019_v57 = vor.u32 %v1018_v29, %v1017_v39  ;;  %v1245_v26 = vrot.slane %v3286_v54, 6 }
  0xff   : > { %v1541_v2 = vrot.slane %v1539_v19, 4  ;;  %v1543_v55 = vrot.slane %v3306_v51, 7  ;;  %v1763_v9 = vrot.slane %v1761_v8, 4  ;;  %v434_v38 = vor.u32 %v433_v6, %v429_v16 }
 0x100   : > { %v1667_v5 = vmax.bf16 %v1540_v15, %v1388_v42  ;;  %v864_v43 = vmax.bf16 %v805_v31, %v3329_v56  ;;  %v1020_v33 = vsel %vm2088_vm15, %v1016_v52, %v1019_v57  ;;  %v1764_v23 = vrot.slane %v3286_v54, 7 }
 0x101   : > { %v1544_v41 = vor.u32 %v1543_v55, %v1542_v58  ;;  %v3348_v37 = vshll.u32 %v3335_v62, 16  ;;  %v3351_v8 = vshrl.u32 %v3335_v62, 16  ;;  %v435_v35 = vrot.slane %v434_v38, 4 }
 0x102   : > { %v1854_v20 = vmax.bf16 %v1762_v36, %v1667_v5  ;;  %v1143_v19 = vmax.bf16 %v1020_v33, %v864_v43  ;;  %v722_v21 = vrot.slane %v720_v27, 4  ;;  %v473_v52 = vrot.slane %v3317_v53, 4 }
 0x103   : > { %v3356_v24 = vsel %vm2076_vm14, %v1244_v32, %v1245_v26  ;;  %v1545_v45 = vsel %vm2119_vm1, %v1541_v2, %v1544_v41  ;;  %v1765_v16 = vsel %vm2105_vm0, %v1763_v9, %v1764_v23  ;;  %v440_v36 = vsel %vm2051_vm13, %v435_v35, %v439_v40 }
 0x104   : > { %1891 = vst.msk [vmem:[%s2160_s15 + $0x64] sm:$0xf] %vm1865_vm2, %v1854_v20  ;;  %v1330_v6 = vmax.bf16 %v3262_v48, %v1143_v19  ;;  %v723_v27 = vrot.slane %v3241_v0, 5  ;;  %v1022_v46 = vrot.slane %v3257_v11, 5  ;;  %v479_v14 = vrot.slane %v3348_v37, 5 }
 0x105   : > { %v584_v39 = vmax.bf16 %v440_v36, %v3098_v59  ;;  %v1021_v29 = vrot.slane %v1019_v57, 4  ;;  %v1023_v15 = vrot.slane %v3254_v13, 6  ;;  %v483_v48 = vrot.slane %v3351_v8, 4  ;;  %v3384_v59 = vld [vmem:[%s2013_s11 + $0x84] sm:$0xf] }
 0x106   : > { %v1389_v32 = vmax.bf16 %v1330_v6, %v3356_v24  ;;  %v3378_v42 = vsel %vm2042_vm10, %v722_v21, %v723_v27  ;;  %v1247_v31 = vrot.slane %v1245_v26, 4  ;;  %v1547_v55 = vrot.slane %v3351_v8, 6 }
 0x107   : > { %v806_v58 = vmax.bf16 %v3290_v3, %v584_v39  ;;  %v1024_v2 = vor.u32 %v1023_v15, %v1022_v46  ;;  %v1548_v9 = vrot.slane %v3348_v37, 7  ;;  %v1248_v5 = vrot.slane %v3335_v62, 6 }
 0x108   : > { %v1668_v57 = vmax.bf16 %v1545_v45, %v1389_v32  ;;  %v1766_v43 = vrot.slane %v1764_v23, 4  ;;  %v444_v33 = vor.u32 %v443_v34, %v439_v40  ;;  %v1546_v38 = vrot.slane %v1544_v41, 4 }
 0x109   : > { %v865_v26 = vmax.bf16 %v806_v58, %v3378_v42  ;;  %v1025_v3 = vsel %vm2088_vm15, %v1021_v29, %v1024_v2  ;;  %v1767_v20 = vrot.slane %v3335_v62, 7  ;;  %v3396_v21 = vshll.u32 %v3384_v59, 16 }
 0x10a   : > { %v1855_v19 = vmax.bf16 %v1765_v16, %v1668_v57  ;;  %v445_v35 = vrot.slane %v444_v33, 4  ;;  %v3399_v23 = vshrl.u32 %v3384_v59, 16  ;;  %v3403_v60 = vsel %vm2076_vm14, %v1247_v31, %v1248_v5 }
 0x10b   : > { %v1144_v12 = vmax.bf16 %v1025_v3, %v865_v26  ;;  %v1549_v40 = vor.u32 %v1548_v9, %v1547_v55  ;;  %v725_v34 = vrot.slane %v723_v27, 4  ;;  %v1768_v41 = vsel %vm2105_vm0, %v1766_v43, %v1767_v20  ;;  %v3430_v55 = vld [vmem:[%s2013_s11 + $0x88] sm:$0xf] }
 0x10c   : > { %1892 = vst.msk [vmem:[%s2160_s15 + $0x68] sm:$0xf] %vm1865_vm2, %v1855_v19  ;;  %v450_v45 = vsel %vm2051_vm13, %v445_v35, %v449_v28  ;;  %v726_v16 = vrot.slane %v3286_v54, 5  ;;  %v1026_v6 = vrot.slane %v1024_v2, 4  ;;  %v1027_v27 = vrot.slane %v3317_v53, 5 }
 0x10d   : > { %v1331_v36 = vmax.bf16 %v3303_v30, %v1144_v12  ;;  %v585_v46 = vmax.bf16 %v450_v45, %v3147_v7  ;;  %v1028_v39 = vrot.slane %v3306_v51, 6  ;;  %v1550_v29 = vsel %vm2119_vm1, %v1546_v38, %v1549_v40 }
 0x10e   : > { %v489_v15 = vrot.slane %v3396_v21, 5  ;;  %v493_v32 = vrot.slane %v3399_v23, 4  ;;  %v3424_v31 = vsel %vm2042_vm10, %v725_v34, %v726_v16  ;;  %v1552_v2 = vrot.slane %v3399_v23, 6 }
 0x10f   : > { %v1390_v58 = vmax.bf16 %v1331_v36, %v3403_v60  ;;  %v807_v30 = vmax.bf16 %v3329_v56, %v585_v46  ;;  %v1029_v7 = vor.u32 %v1028_v39, %v1027_v27  ;;  %v1250_v9 = vrot.slane %v1248_v5, 4 }
 0x110   : > { %v1551_v57 = vrot.slane %v1549_v40, 4  ;;  %v1553_v43 = vrot.slane %v3396_v21, 7  ;;  %v1769_v33 = vrot.slane %v1767_v20, 4  ;;  %v454_v56 = vor.u32 %v453_v49, %v449_v28 }
 0x111   : > { %v1669_v26 = vmax.bf16 %v1550_v29, %v1390_v58  ;;  %v866_v3 = vmax.bf16 %v807_v30, %v3424_v31  ;;  %v1030_v38 = vsel %vm2088_vm15, %v1026_v6, %v1029_v7  ;;  %v1251_v19 = vrot.slane %v3384_v59, 6 }
 0x112   : > { %v1554_v35 = vor.u32 %v1553_v43, %v1552_v2  ;;  %v1770_v5 = vrot.slane %v3384_v59, 7  ;;  %v3443_v12 = vshll.u32 %v3430_v55, 16  ;;  %v455_v34 = vrot.slane %v454_v56, 4 }
 0x113   : > { %v1856_v20 = vmax.bf16 %v1768_v41, %v1669_v26  ;;  %v1145_v40 = vmax.bf16 %v1030_v38, %v866_v3  ;;  %v728_v45 = vrot.slane %v726_v16, 4  ;;  %v3447_v6 = vsel %vm2076_vm14, %v1250_v9, %v1251_v19  ;;  %v3477_v26 = vld [vmem:[%s2013_s11 + $0x8c] sm:$0xf] }
 0x114   : > { %v1555_v1 = vsel %vm2119_vm1, %v1551_v57, %v1554_v35  ;;  %v1771_v61 = vsel %vm2105_vm0, %v1769_v33, %v1770_v5  ;;  %v3454_v28 = vshrl.u32 %v3430_v55, 16  ;;  %v460_v41 = vsel %vm2051_vm13, %v455_v34, %v459_v44 }
 0x115   : > { %1893 = vst.msk [vmem:[%s2160_s15 + $0x6c] sm:$0xf] %vm1865_vm2, %v1856_v20  ;;  %v1332_v49 = vmax.bf16 %v3356_v24, %v1145_v40  ;;  %v729_v16 = vrot.slane %v3335_v62, 5  ;;  %v1032_v36 = vrot.slane %v3351_v8, 5  ;;  %v499_v46 = vrot.slane %v3443_v12, 5 }
 0x116   : > { %v586_v27 = vmax.bf16 %v460_v41, %v3192_v4  ;;  %v1031_v39 = vrot.slane %v1029_v7, 4  ;;  %v1033_v29 = vrot.slane %v3348_v37, 6  ;;  %v1253_v30 = vrot.slane %v1251_v19, 4 }
 0x117   : > { %v1391_v58 = vmax.bf16 %v1332_v49, %v3447_v6  ;;  %v3471_v24 = vsel %vm2042_vm10, %v728_v45, %v729_v16  ;;  %v1557_v2 = vrot.slane %v3454_v28, 6  ;;  %v1558_v43 = vrot.slane %v3443_v12, 7 }
 0x118   : > { %v808_v9 = vmax.bf16 %v3378_v42, %v586_v27  ;;  %v1034_v57 = vor.u32 %v1033_v29, %v1032_v36  ;;  %v1772_v33 = vrot.slane %v1770_v5, 4  ;;  %v1254_v7 = vrot.slane %v3430_v55, 6 }
 0x119   : > { %v1670_v4 = vmax.bf16 %v1555_v1, %v1391_v58  ;;  %v1556_v3 = vrot.slane %v1554_v35, 4  ;;  %v464_v38 = vor.u32 %v463_v17, %v459_v44  ;;  %v1559_v19 = vor.u32 %v1558_v43, %v1557_v2 }
 0x11a   : > { %v867_v56 = vmax.bf16 %v808_v9, %v3471_v24  ;;  %v1035_v42 = vsel %vm2088_vm15, %v1031_v39, %v1034_v57  ;;  %v1773_v5 = vrot.slane %v3430_v55, 7  ;;  %v3489_v34 = vshll.u32 %v3477_v26, 16 }
 0x11b   : > { %v1857_v20 = vmax.bf16 %v1771_v61, %v1670_v4  ;;  %v465_v40 = vrot.slane %v464_v38, 4  ;;  %v3492_v35 = vshrl.u32 %v3477_v26, 16  ;;  %v503_v13 = vrot.slane %v3454_v28, 4 }
 0x11c   : > { %v1146_v11 = vmax.bf16 %v1035_v42, %v867_v56  ;;  %v3497_v44 = vsel %vm2076_vm14, %v1253_v30, %v1254_v7  ;;  %v1774_v17 = vsel %vm2105_vm0, %v1772_v33, %v1773_v5  ;;  %v1560_v45 = vsel %vm2119_vm1, %v1556_v3, %v1559_v19 }
 0x11d   : > { %1894 = vst.msk [vmem:[%s2160_s15 + $0x70] sm:$0xf] %vm1865_vm2, %v1857_v20  ;;  %v470_v1 = vsel %vm2051_vm13, %v465_v40, %v469_v22  ;;  %v731_v61 = vrot.slane %v729_v16, 4  ;;  %v1036_v49 = vrot.slane %v1034_v57, 4  ;;  %v1037_v27 = vrot.slane %v3399_v23, 5 }
 0x11e   : > { %v1333_v41 = vmax.bf16 %v3403_v60, %v1146_v11  ;;  %v587_v36 = vmax.bf16 %v470_v1, %v3241_v0  ;;  %v1038_v39 = vrot.slane %v3396_v21, 6  ;;  %v509_v29 = vrot.slane %v3489_v34, 5  ;;  %v3538_v40 = vld [vmem:[%s2013_s11 + $0x90] sm:$0xf] }
 0x11f   : > { %v513_v58 = vrot.slane %v3492_v35, 4  ;;  %v732_v30 = vrot.slane %v3384_v59, 5  ;;  %v1256_v2 = vrot.slane %v1254_v7, 4  ;;  %v1562_v60 = vrot.slane %v3492_v35, 6 }
 0x120   : > { %v1392_v9 = vmax.bf16 %v1333_v41, %v3497_v44  ;;  %v809_v16 = vmax.bf16 %v3424_v31, %v587_v36  ;;  %v1039_v57 = vor.u32 %v1038_v39, %v1037_v27  ;;  %v1257_v43 = vrot.slane %v3477_v26, 6 }
 0x121   : > { %v3521_v0 = vsel %vm2042_vm10, %v731_v61, %v732_v30  ;;  %v1561_v33 = vrot.slane %v1559_v19, 4  ;;  %v1563_v4 = vrot.slane %v3489_v34, 7  ;;  %v474_v31 = vor.u32 %v473_v52, %v469_v22 }
 0x122   : > { %v1671_v3 = vmax.bf16 %v1560_v45, %v1392_v9  ;;  %v868_v7 = vmax.bf16 %v809_v16, %v3521_v0  ;;  %v1040_v38 = vsel %vm2088_vm15, %v1036_v49, %v1039_v57  ;;  %v3534_v56 = vsel %vm2076_vm14, %v1256_v2, %v1257_v43 }
 0x123   : > { %v1775_v42 = vrot.slane %v1773_v5, 4  ;;  %v1776_v19 = vrot.slane %v3477_v26, 7  ;;  %v734_v20 = vrot.slane %v732_v30, 4  ;;  %v1564_v1 = vor.u32 %v1563_v4, %v1562_v60 }
 0x124   : > { %v1858_v11 = vmax.bf16 %v1774_v17, %v1671_v3  ;;  %v1147_v45 = vmax.bf16 %v1040_v38, %v868_v7  ;;  %v475_v61 = vrot.slane %v474_v31, 4  ;;  %v735_v49 = vrot.slane %v3430_v55, 5 }
 0x125   : > { %v1041_v51 = vrot.slane %v1039_v57, 4  ;;  %v1042_v53 = vrot.slane %v3454_v28, 5  ;;  %v1043_v22 = vrot.slane %v3443_v12, 6  ;;  %v1053_v17 = vshrl.u32 %v3538_v40, 16 }
 0x126   : > { %1895 = vst.msk [vmem:[%s2160_s15 + $0x74] sm:$0xf] %vm1865_vm2, %v1858_v11  ;;  %v1334_v52 = vmax.bf16 %v3447_v6, %v1147_v45  ;;  %v480_v5 = vsel %vm2051_vm13, %v475_v61, %v479_v14  ;;  %v1056_v41 = vshll.u32 %v3538_v40, 16  ;;  %v1565_v36 = vsel %vm2119_vm1, %v1561_v33, %v1564_v1 }
 0x127   : > { %v1777_v27 = vsel %vm2105_vm0, %v1775_v42, %v1776_v19  ;;  %v588_v39 = vmax.bf16 %v480_v5, %v3286_v54  ;;  %v3559_v6 = vsel %vm2042_vm10, %v734_v20, %v735_v49  ;;  %v1044_v2 = vor.u32 %v1043_v22, %v1042_v53 }
 0x128   : > { %v1393_v30 = vmax.bf16 %v1334_v52, %v3534_v56  ;;  %v1259_v9 = vrot.slane %v1257_v43, 4  ;;  %v1260_v16 = vrot.slane %v3538_v40, 6  ;;  %v1055_v60 = vrot.slane %v1053_v17, 5 }
 0x129   : > { %v810_v57 = vmax.bf16 %v3471_v24, %v588_v39  ;;  %v1058_v33 = vrot.slane %v1056_v41, 6  ;;  %v1567_v4 = vrot.slane %v1053_v17, 6  ;;  %v1045_v54 = vsel %vm2088_vm15, %v1041_v51, %v1044_v2  ;;  %v3572_v24 = vld [vmem:[%s2013_s11 + $0x94] sm:$0xf] }
 0x12a   : > { %v1672_v3 = vmax.bf16 %v1565_v36, %v1393_v30  ;;  %v1568_v7 = vrot.slane %v1056_v41, 7  ;;  %v1778_v38 = vrot.slane %v1776_v19, 4  ;;  %v1566_v42 = vrot.slane %v1564_v1, 4 }
 0x12b   : > { %v869_v31 = vmax.bf16 %v810_v57, %v3559_v6  ;;  %v484_v43 = vor.u32 %v483_v48, %v479_v14  ;;  %v737_v20 = vrot.slane %v735_v49, 4  ;;  %v3576_v45 = vsel %vm2076_vm14, %v1259_v9, %v1260_v16 }
 0x12c   : > { %v1859_v11 = vmax.bf16 %v1777_v27, %v1672_v3  ;;  %v1779_v61 = vrot.slane %v3538_v40, 7  ;;  %v738_v19 = vrot.slane %v3477_v26, 5  ;;  %v1569_v53 = vor.u32 %v1568_v7, %v1567_v4 }
 0x12d   : > { %v1148_v51 = vmax.bf16 %v1045_v54, %v869_v31  ;;  %v485_v1 = vrot.slane %v484_v43, 4  ;;  %v1047_v37 = vrot.slane %v3492_v35, 5  ;;  %v1048_v14 = vrot.slane %v3489_v34, 6 }
 0x12e   : > { %1896 = vst.msk [vmem:[%s2160_s15 + $0x78] sm:$0xf] %vm1865_vm2, %v1859_v11  ;;  %v1780_v8 = vsel %vm2105_vm0, %v1778_v38, %v1779_v61  ;;  %v1063_v48 = vshrl.u32 %v3572_v24, 16  ;;  %v1066_v49 = vshll.u32 %v3572_v24, 16  ;;  %v3595_v5 = vsel %vm2042_vm10, %v737_v20, %v738_v19 }
 0x12f   : > { %v1335_v22 = vmax.bf16 %v3497_v44, %v1148_v51  ;;  %v490_v52 = vsel %vm2051_vm13, %v485_v1, %v489_v15  ;;  %v1046_v17 = vrot.slane %v1044_v2, 4  ;;  %v1570_v41 = vsel %vm2119_vm1, %v1566_v42, %v1569_v53  ;;  %v1341_v1 = vld [vmem:[%s2013_s11 + $0x98] sm:$0xf] }
 0x130   : > { %v589_v36 = vmax.bf16 %v490_v52, %v3335_v62  ;;  %v1262_v27 = vrot.slane %v1260_v16, 4  ;;  %v1263_v39 = vrot.slane %v3572_v24, 6  ;;  %v1049_v30 = vor.u32 %v1048_v14, %v1047_v37 }
 0x131   : > { %v1394_v44 = vmax.bf16 %v1335_v22, %v3576_v45  ;;  %v1065_v9 = vrot.slane %v1063_v48, 5  ;;  %v1572_v57 = vrot.slane %v1063_v48, 6  ;;  %v1068_v3 = vrot.slane %v1066_v49, 6 }
 0x132   : > { %v811_v4 = vmax.bf16 %v3521_v0, %v589_v36  ;;  %v1573_v54 = vrot.slane %v1066_v49, 7  ;;  %v1781_v7 = vrot.slane %v1779_v61, 4  ;;  %v1050_v38 = vsel %vm2088_vm15, %v1046_v17, %v1049_v30 }
 0x133   : > { %v1673_v2 = vmax.bf16 %v1570_v41, %v1394_v44  ;;  %v1571_v62 = vrot.slane %v1569_v53, 4  ;;  %v494_v16 = vor.u32 %v493_v32, %v489_v15  ;;  %v1782_v0 = vrot.slane %v3572_v24, 7 }
 0x134   : > { %v870_v31 = vmax.bf16 %v811_v4, %v3595_v5  ;;  %v1574_v42 = vor.u32 %v1573_v54, %v1572_v57  ;;  %v3611_v43 = vrot.slane %v738_v19, 4  ;;  %v826_v61 = vrot.slane %v3538_v40, 5 }
 0x135   : > { %v1860_v20 = vmax.bf16 %v1780_v8, %v1673_v2  ;;  %v495_v11 = vrot.slane %v494_v16, 4  ;;  %v1051_v51 = vrot.slane %v1049_v30, 4  ;;  %v3617_v21 = vsel %vm2076_vm14, %v1262_v27, %v1263_v39 }
 0x136   : > { %v1149_v37 = vmax.bf16 %v1050_v38, %v870_v31  ;;  %v1783_v23 = vsel %vm2105_vm0, %v1781_v7, %v1782_v0  ;;  %v1059_v15 = vor.u32 %v1058_v33, %v1055_v60  ;;  %v1575_v32 = vsel %vm2119_vm1, %v1571_v62, %v1574_v42 }
 0x137   : > { %1897 = vst.msk [vmem:[%s2160_s15 + $0x7c] sm:$0xf] %vm1865_vm2, %v1860_v20  ;;  %v500_v40 = vsel %vm2051_vm13, %v495_v11, %v499_v46  ;;  %v827_v19 = vsel %vm2042_vm10, %v3611_v43, %v826_v61  ;;  %v3632_v53 = vrot.slane %v1263_v39, 4  ;;  %v1578_v33 = vshrl.u32 %v1341_v1, 16  ;;  %v153_v20 = vld [vmem:[%s2013_s11 + $0x90] sm:$0x1] }
 0x138   : > { %v1336_v8 = vmax.bf16 %v3534_v56, %v1149_v37  ;;  %v590_v60 = vmax.bf16 %v500_v40, %v3384_v59  ;;  %v1581_v14 = vshll.u32 %v1341_v1, 16  ;;  %v1060_v48 = vsel %vm2088_vm15, %v1051_v51, %v1059_v15 }
 0x139   : > { %v1351_v49 = vrot.slane %v1341_v1, 6  ;;  %v1784_v22 = vrot.slane %v1782_v0, 4  ;;  %v504_v52 = vor.u32 %v503_v13, %v499_v46  ;;  %v1580_v56 = vrot.slane %v1578_v33, 6  ;;  %v3648_v46 = vld [vmem:[%s2013_s11 + $0x9c] sm:$0xf] }
 0x13a   : > { %v1395_v17 = vmax.bf16 %v1336_v8, %v3617_v21  ;;  %v812_v41 = vmax.bf16 %v3559_v6, %v590_v60  ;;  %v1583_v36 = vrot.slane %v1581_v14, 7  ;;  %v1576_v59 = vrot.slane %v1574_v42, 4 }
 0x13b   : > { %v1785_v27 = vrot.slane %v1341_v1, 7  ;;  %v505_v39 = vrot.slane %v504_v52, 4  ;;  %v828_v44 = vrot.slane %v826_v61, 4  ;;  %v1352_v12 = vsel %vm2076_vm14, %v3632_v53, %v1351_v49 }
 0x13c   : > { %v1674_v30 = vmax.bf16 %v1575_v32, %v1395_v17  ;;  %v871_v57 = vmax.bf16 %v827_v19, %v812_v41  ;;  %v1061_v28 = vrot.slane %v1059_v15, 4  ;;  %v1584_v13 = vor.u32 %v1583_v36, %v1580_v56  ;;  %v874_v32 = vld [vmem:[%s2013_s11 + $0x98] sm:$0x3]  ;;  %v1399_v56 = vld [vmem:[%s2013_s11 + $0xa0] sm:$0x7] }
 0x13d   : > { %v1786_v6 = vsel %vm2105_vm0, %v1784_v22, %v1785_v27  ;;  %v510_v4 = vsel %vm2051_vm13, %v505_v39, %v509_v29  ;;  %v829_v54 = vrot.slane %v3572_v24, 5  ;;  %v3658_v62 = vor.u32 %v1068_v3, %v1065_v9 }
 0x13e   : > { %v1861_v7 = vmax.bf16 %v1783_v23, %v1674_v30  ;;  %v1150_v2 = vmax.bf16 %v1060_v48, %v871_v57  ;;  %v591_v38 = vmax.bf16 %v510_v4, %v3430_v55  ;;  %v1585_v16 = vsel %vm2119_vm1, %v1576_v59, %v1584_v13 }
 0x13f   : > { %v830_v31 = vsel %vm2042_vm10, %v828_v44, %v829_v54  ;;  %v1353_v42 = vrot.slane %v1351_v49, 4  ;;  %v1588_v0 = vshrl.u32 %v3648_v46, 16  ;;  %v1070_v9 = vsel %vm2088_vm15, %v1061_v28, %v3658_v62 }
 0x140   : > { %1898 = vst.msk [vmem:[%s2160_s15 + $0x80] sm:$0xf] %vm1865_vm2, %v1861_v7  ;;  %v1337_v24 = vmax.bf16 %v3576_v45, %v1150_v2  ;;  %v813_v55 = vmax.bf16 %v3595_v5, %v591_v38  ;;  %v1591_v3 = vshll.u32 %v3648_v46, 16  ;;  %v1354_v11 = vrot.slane %v3648_v46, 6  ;;  %v818_v5 = vld [vmem:[%s2013_s11 + $0x98] sm:$0x1] }
 0x141   : > { %v1586_v61 = vrot.slane %v1584_v13, 4  ;;  %v1590_v51 = vrot.slane %v1588_v0, 6  ;;  %v514_v1 = vor.u32 %v513_v58, %v509_v29  ;;  %v517_v15 = vshll.u32 %v153_v20, 16 }
 0x142   : > { %v1396_v37 = vmax.bf16 %v1352_v12, %v1337_v24  ;;  %v872_v23 = vmax.bf16 %v830_v31, %v813_v55  ;;  %v1593_v45 = vrot.slane %v1591_v3, 7  ;;  %v1355_v40 = vsel %vm2076_vm14, %v1353_v42, %v1354_v11 }
 0x143   : > { %v1787_v19 = vrot.slane %v1785_v27, 4  ;;  %v515_v8 = vrot.slane %v514_v1, 4  ;;  %v741_v60 = vrot.slane %v153_v20, 5  ;;  %v519_v34 = vrot.slane %v517_v15, 5 }
 0x144   : > { %v1675_v33 = vmax.bf16 %v1585_v16, %v1396_v37  ;;  %v1151_v14 = vmax.bf16 %v1070_v9, %v872_v23  ;;  %v831_v48 = vrot.slane %v829_v54, 4  ;;  %v1594_v35 = vor.u32 %v1593_v45, %v1590_v51 }
 0x145   : > { %v1788_v29 = vrot.slane %v3648_v46, 7  ;;  %v832_v58 = vrot.slane %v818_v5, 5  ;;  %v1073_v49 = vshrl.u32 %v874_v32, 16  ;;  %v520_v17 = vsel %vm2051_vm13, %v515_v8, %v519_v34 }
 0x146   : > { %v1862_v22 = vmax.bf16 %v1786_v6, %v1675_v33  ;;  %v1338_v52 = vmax.bf16 %v3617_v21, %v1151_v14  ;;  %v742_v41 = vsel %vm2042_vm10, %v3611_v43, %v741_v60  ;;  %v1595_v36 = vsel %vm2119_vm1, %v1586_v61, %v1594_v35  ;;  %v1343_v43 = vld [vmem:[%s2013_s11 + $0xa0] sm:$0x3] }
 0x147   : > { %v592_v59 = vmax.bf16 %v520_v17, %v3477_v26  ;;  %v1075_v27 = vrot.slane %v1073_v49, 5  ;;  %v1076_v39 = vshll.u32 %v874_v32, 16  ;;  %v1789_v21 = vsel %vm2105_vm0, %v1787_v19, %v1788_v29 }
 0x148   : > { %1899 = vst.msk [vmem:[%s2160_s15 + $0x84] sm:$0xf] %vm1865_vm2, %v1862_v22  ;;  %v1397_v44 = vmax.bf16 %v1355_v40, %v1338_v52  ;;  %v833_v25 = vsel %vm2042_vm10, %v831_v48, %v832_v58  ;;  %v1071_v30 = vrot.slane %v3658_v62, 4  ;;  %v1266_v28 = vrot.slane %v874_v32, 6 }
 0x149   : > { %v814_v57 = vmax.bf16 %v742_v41, %v592_v59  ;;  %v1078_v12 = vrot.slane %v1076_v39, 6  ;;  %v1598_v46 = vshrl.u32 %v1399_v56, 16  ;;  %v1356_v13 = vrot.slane %v1354_v11, 4 }
 0x14a   : > { %v1676_v26 = vmax.bf16 %v1595_v36, %v1397_v44  ;;  %v1601_v6 = vshll.u32 %v1399_v56, 16  ;;  %v1357_v7 = vrot.slane %v1343_v43, 6  ;;  %v1267_v62 = vsel %vm2076_vm14, %v3632_v53, %v1266_v28 }
 0x14b   : > { %v873_v4 = vmax.bf16 %v833_v25, %v814_v57  ;;  %v1079_v54 = vor.u32 %v1078_v12, %v1075_v27  ;;  %v1600_v2 = vrot.slane %v1598_v46, 6  ;;  %v1596_v31 = vrot.slane %v1594_v35, 4 }
 0x14c   : > { %v1863_v38 = vmax.bf16 %v1789_v21, %v1676_v26  ;;  %v1603_v16 = vrot.slane %v1601_v6, 7  ;;  %v1358_v20 = vsel %vm2076_vm14, %v1356_v13, %v1357_v7  ;;  %v1790_v24 = vrot.slane %v1788_v29, 4 }
 0x14d   : > { %v1080_v18 = vsel %vm2088_vm15, %v1071_v30, %v1079_v54  ;;  %v1791_v55 = vrot.slane %v1399_v56, 7 }
 0x14e   : > { %1900 = vst.msk [vmem:[%s2160_s15 + $0x88] sm:$0xf] %vm1865_vm2, %v1863_v38  ;;  %v1152_v42 = vmax.bf16 %v1080_v18, %v873_v4  ;;  %v1604_v0 = vor.u32 %v1603_v16, %v1600_v2 }
 0x14f   : > { %v1792_v11 = vsel %vm2105_vm0, %v1790_v24, %v1791_v55 }
 0x150   : > { %v1339_v9 = vmax.bf16 %v1267_v62, %v1152_v42  ;;  %v1605_v50 = vsel %vm2119_vm1, %v1596_v31, %v1604_v0 }
 0x152   : > { %v1398_v3 = vmax.bf16 %v1358_v20, %v1339_v9 }
 0x154   : > { %v1677_v61 = vmax.bf16 %v1605_v50, %v1398_v3 }
 0x156   : > { %v1864_v53 = vmax.bf16 %v1792_v11, %v1677_v61 }
 0x158   : > { %1901 = vst.msk [vmem:[%s2160_s15 + $0x8c] sm:$0xf] %vm1865_vm2, %v1864_v53 }
 0x159 PF: > { %s11_s6 = sadd.s32 1, %s1987_s6  }
 0x15a   : > { %p8_p4 = scmp.ge.s32.totalorder %s11_s6, 4  }
 0x15c   :  { %10 = sbr.rel (!%p8_p4) target bundleno = 1 (0x1), region = 54 }

// kernel: backbone_forward.57
= control target key start
LH: loop header
LB: loop body
LE: loop exit
PB: predicated region body
PF: predicated region fallthrough
CT: control target
= control target key end

     0   :  { %vm89_vm0 = vcmask 130048   ;;  %vm339_vm1 = vcmask 519168   ;;  %s688_s1 = inlined_call_operand.vmem [shape: bf16[16,64], index: 1, kind: input, shape index: {}]   ;;  %s689_s0 = inlined_call_operand.vmem [shape: bf16[128,16], index: 0, kind: input, shape index: {}]   ;;  %s690_s3 = inlined_call_operand.vmem [shape: bf16[128,64], index: 3, kind: input, shape index: {}]   ;;  %s691_s2 = inlined_call_operand.vmem [shape: f32[1,64], index: 2, kind: input, shape index: {}]   ;;  %s692_s4 = inlined_call_operand.vmem [shape: bf16[128,64], index: 4, kind: output, shape index: {}]  }
   0x1   :  { %v478_v0 = vld [vmem:[%s688_s1] sm:$0xff]   ;;  %v481_v3 = vld [vmem:[%s689_s0 + $0x8] sm:$0xff]   ;;  %v483_v5 = vld [vmem:[%s689_s0 + $0x10] sm:$0xff]  }
   0x2   :  { %v479_v1 = vld [vmem:[%s689_s0] sm:$0xff]   ;;  %458 = vmatprep.subr.bf16.mxu0 %v478_v0  ;;  %476 = vmatprep.subr.bf16.mxu1 %v478_v0  ;;  %v482_v4 = vld [vmem:[%s689_s0 + $0x28] sm:$0xff]   ;;  %v484_v6 = vld [vmem:[%s689_s0 + $0x30] sm:$0xff]  }
   0x3   :  { %v480_v2 = vld [vmem:[%s689_s0 + $0x20] sm:$0xff]   ;;  %459 = vmatpush3.bf16.msra.mxu0 %v478_v0  ;;  %477 = vmatpush3.bf16.msra.mxu1 %v478_v0  ;;  %v485_v7 = vld [vmem:[%s689_s0 + $0x18] sm:$0xff]   ;;  %v442_v9 = vld [vmem:[%s690_s3 + $0x8] sm:$0xff]  }
   0x4   :  { %460 = vmatprep.mubr.msk.bf16.mxu0 %vm89_vm0, %v479_v1  ;;  %468 = vmatprep.mubr.msk.bf16.mxu1 %vm89_vm0, %v480_v2  ;;  %v486_v8 = vld [vmem:[%s689_s0 + $0x38] sm:$0xff]   ;;  %v446_v10 = vld [vmem:[%s690_s3 + $0x28] sm:$0xff]   ;;  %v411_v11 = vld [vmem:[%s690_s3] sm:$0xff]   ;;  %v416_v14 = vunpack.c.l.bf16 %v442_v9  ;;  %v417_v22 = vunpack.c.h.bf16 %v442_v9 }
   0x5   :  { %v445_v12 = vld [vmem:[%s690_s3 + $0x20] sm:$0xff]   ;;  %v562_v13 = vld [vmem:[%s690_s3 + $0x18] sm:$0xff]   ;;  %v572_v16 = vld [vmem:[%s690_s3 + $0x10] sm:$0xff]   ;;  %v432_v19 = vunpack.c.l.bf16 %v446_v10  ;;  %v412_v20 = vunpack.c.l.bf16 %v411_v11  ;;  %v433_v23 = vunpack.c.h.bf16 %v446_v10  ;;  %v413_v24 = vunpack.c.h.bf16 %v411_v11 }
   0x6   :  { %461 = vmatmul.mubr.msk.bf16.vlgmr.msra.gmra.mrb[0].mxu0 %vm89_vm0, %v481_v3  ;;  %469 = vmatmul.mubr.msk.bf16.vlgmr.msra.gmra.mrb[0].mxu1 %vm89_vm0, %v482_v4  ;;  %v567_v15 = vld [vmem:[%s690_s3 + $0x38] sm:$0xff]   ;;  %v577_v17 = vld [vmem:[%s690_s3 + $0x30] sm:$0xff]   ;;  %v582_v18 = vld [vmem:[%s691_s2] ss:$0 sm:$0xff]  ;;  %v428_v21 = vunpack.c.l.bf16 %v445_v12  ;;  %v429_v25 = vunpack.c.h.bf16 %v445_v12  ;;  %v424_v28 = vunpack.c.l.bf16 %v562_v13  ;;  %v420_v30 = vunpack.c.l.bf16 %v572_v16 }
   0x7   :  { %464 = vmatprep.mubr.msk.bf16.mxu0 %vm89_vm0, %v483_v5  ;;  %472 = vmatprep.mubr.msk.bf16.mxu1 %vm89_vm0, %v484_v6  ;;  %v440_v29 = vunpack.c.l.bf16 %v567_v15  ;;  %v436_v31 = vunpack.c.l.bf16 %v577_v17  ;;  %v425_v36 = vunpack.c.h.bf16 %v562_v13  ;;  %v441_v37 = vunpack.c.h.bf16 %v567_v15 }
   0x8   :  { %v421_v42 = vunpack.c.h.bf16 %v572_v16  ;;  %v437_v43 = vunpack.c.h.bf16 %v577_v17 }
   0xe   :  { %465 = vmatmul.mubr.msk.bf16.gmra.mrb[4].mxu0 %vm89_vm0, %v485_v7  ;;  %473 = vmatmul.mubr.msk.bf16.gmra.mrb[4].mxu1 %vm89_vm0, %v486_v8 }
  0xd9   :  { %v462_v26 = vpop.f32.mrb[0].mxu0  ;;  %v470_v27 = vpop.f32.mrb[0].mxu1 }
  0xda   :  { %v157_v32 = vadd.f32 %v462_v26, %v582_v18  ;;  %v189_v33 = vadd.f32 %v470_v27, %v582_v18  ;;  %v148_v34 = vpop.f32.mrb[1].mxu0  ;;  %v180_v35 = vpop.f32.mrb[1].mxu1 }
  0xdb   :  { %v149_v38 = vadd.f32 %v582_v18, %v148_v34  ;;  %v181_v39 = vadd.f32 %v582_v18, %v180_v35  ;;  %v463_v40 = vpop.f32.mrb[2].mxu0  ;;  %v471_v41 = vpop.f32.mrb[2].mxu1 }
  0xdc   :  { %v245_v44 = vadd.f32 %v416_v14, %v157_v32  ;;  %v253_v45 = vadd.f32 %v432_v19, %v189_v33  ;;  %v160_v46 = vadd.f32 %v463_v40, %v582_v18  ;;  %v192_v47 = vadd.f32 %v471_v41, %v582_v18  ;;  %v151_v48 = vpop.f32.mrb[3].mxu0  ;;  %v183_v49 = vpop.f32.mrb[3].mxu1 }
  0xdd   :  { %v243_v50 = vadd.f32 %v412_v20, %v149_v38  ;;  %v251_v51 = vadd.f32 %v428_v21, %v181_v39  ;;  %v152_v52 = vadd.f32 %v582_v18, %v151_v48  ;;  %v184_v53 = vadd.f32 %v582_v18, %v183_v49 }
  0xde   :  { %v261_v54 = vmax.f32 %v245_v44, 0.0  ;;  %v269_v55 = vmax.f32 %v253_v45, 0.0  ;;  %v246_v56 = vadd.f32 %v417_v22, %v160_v46  ;;  %v254_v57 = vadd.f32 %v433_v23, %v192_v47 }
  0xdf   :  { %v259_v58 = vmax.f32 %v243_v50, 0.0  ;;  %v267_v59 = vmax.f32 %v251_v51, 0.0  ;;  %v244_v60 = vadd.f32 %v413_v24, %v152_v52  ;;  %v252_v61 = vadd.f32 %v429_v25, %v184_v53 }
  0xe0   :  { %v396_v62 = vpack.c.bf16 %v261_v54, %v261_v54  ;;  %v404_v63 = vpack.c.bf16 %v269_v55, %v269_v55  ;;  %v262_v0 = vmax.f32 %v246_v56, 0.0  ;;  %v270_v1 = vmax.f32 %v254_v57, 0.0 }
  0xe1   :  { %v394_v2 = vpack.c.bf16 %v259_v58, %v259_v58  ;;  %v402_v3 = vpack.c.bf16 %v267_v59, %v267_v59  ;;  %v260_v4 = vmax.f32 %v244_v60, 0.0  ;;  %v268_v5 = vmax.f32 %v252_v61, 0.0  ;;  %v466_v6 = vpop.f32.mrb[4].mxu0  ;;  %v474_v7 = vpop.f32.mrb[4].mxu1 }
  0xe2   :  { %342 = vst.msk [vmem:[%s692_s4 + $0x8] sm:$0xf] %vm339_vm1, %v396_v62  ;;  %350 = vst.msk [vmem:[%s692_s4 + $0x28] sm:$0xf] %vm339_vm1, %v404_v63  ;;  %v397_v8 = vpack.c.bf16 %v262_v0, %v262_v0  ;;  %v405_v9 = vpack.c.bf16 %v270_v1, %v270_v1  ;;  %v173_v10 = vadd.f32 %v466_v6, %v582_v18  ;;  %v164_v12 = vpop.f32.mrb[5].mxu0  ;;  %v196_v14 = vpop.f32.mrb[5].mxu1 }
  0xe3   :  { %v205_v11 = vadd.f32 %v474_v7, %v582_v18  ;;  %340 = vst.msk [vmem:[%s692_s4] sm:$0xf] %vm339_vm1, %v394_v2  ;;  %348 = vst.msk [vmem:[%s692_s4 + $0x20] sm:$0xf] %vm339_vm1, %v402_v3  ;;  %v395_v19 = vpack.c.bf16 %v260_v4, %v260_v4  ;;  %v403_v20 = vpack.c.bf16 %v268_v5, %v268_v5  ;;  %v467_v23 = vpop.f32.mrb[6].mxu0  ;;  %v475_v24 = vpop.f32.mrb[6].mxu1 }
  0xe4   :  { %v165_v21 = vadd.f32 %v582_v18, %v164_v12  ;;  %v197_v22 = vadd.f32 %v582_v18, %v196_v14  ;;  %343 = vst.msk [vmem:[%s692_s4 + $0xc] sm:$0xf] %vm339_vm1, %v397_v8  ;;  %351 = vst.msk [vmem:[%s692_s4 + $0x2c] sm:$0xf] %vm339_vm1, %v405_v9  ;;  %v249_v25 = vadd.f32 %v424_v28, %v173_v10  ;;  %v167_v33 = vpop.f32.mrb[7].mxu0  ;;  %v199_v34 = vpop.f32.mrb[7].mxu1 }
  0xe5   :  { %v257_v26 = vadd.f32 %v440_v29, %v205_v11  ;;  %v176_v27 = vadd.f32 %v467_v23, %v582_v18  ;;  %v208_v32 = vadd.f32 %v475_v24, %v582_v18  ;;  %341 = vst.msk [vmem:[%s692_s4 + $0x4] sm:$0xf] %vm339_vm1, %v395_v19  ;;  %349 = vst.msk [vmem:[%s692_s4 + $0x24] sm:$0xf] %vm339_vm1, %v403_v20 }
  0xe6   :  { %v247_v28 = vadd.f32 %v420_v30, %v165_v21  ;;  %v255_v29 = vadd.f32 %v436_v31, %v197_v22  ;;  %v168_v35 = vadd.f32 %v582_v18, %v167_v33  ;;  %v200_v38 = vadd.f32 %v582_v18, %v199_v34 }
  0xe7   :  { %v265_v39 = vmax.f32 %v249_v25, 0.0  ;;  %v273_v40 = vmax.f32 %v257_v26, 0.0  ;;  %v250_v41 = vadd.f32 %v425_v36, %v176_v27  ;;  %v258_v44 = vadd.f32 %v441_v37, %v208_v32 }
  0xe8   :  { %v263_v45 = vmax.f32 %v247_v28, 0.0  ;;  %v271_v46 = vmax.f32 %v255_v29, 0.0  ;;  %v248_v30 = vadd.f32 %v421_v42, %v168_v35  ;;  %v256_v31 = vadd.f32 %v437_v43, %v200_v38 }
  0xe9   :  { %v400_v47 = vpack.c.bf16 %v265_v39, %v265_v39  ;;  %v408_v48 = vpack.c.bf16 %v273_v40, %v273_v40  ;;  %v266_v49 = vmax.f32 %v250_v41, 0.0  ;;  %v274_v18 = vmax.f32 %v258_v44, 0.0 }
  0xea   :  { %v398_v50 = vpack.c.bf16 %v263_v45, %v263_v45  ;;  %v406_v51 = vpack.c.bf16 %v271_v46, %v271_v46  ;;  %v264_v52 = vmax.f32 %v248_v30, 0.0  ;;  %v272_v13 = vmax.f32 %v256_v31, 0.0 }
  0xeb   :  { %346 = vst.msk [vmem:[%s692_s4 + $0x18] sm:$0xf] %vm339_vm1, %v400_v47  ;;  %354 = vst.msk [vmem:[%s692_s4 + $0x38] sm:$0xf] %vm339_vm1, %v408_v48  ;;  %v401_v15 = vpack.c.bf16 %v266_v49, %v266_v49  ;;  %v409_v16 = vpack.c.bf16 %v274_v18, %v274_v18 }
  0xec   :  { %344 = vst.msk [vmem:[%s692_s4 + $0x10] sm:$0xf] %vm339_vm1, %v398_v50  ;;  %352 = vst.msk [vmem:[%s692_s4 + $0x30] sm:$0xf] %vm339_vm1, %v406_v51  ;;  %v399_v17 = vpack.c.bf16 %v264_v52, %v264_v52  ;;  %v407_v36 = vpack.c.bf16 %v272_v13, %v272_v13 }
  0xed   :  { %347 = vst.msk [vmem:[%s692_s4 + $0x1c] sm:$0xf] %vm339_vm1, %v401_v15  ;;  %355 = vst.msk [vmem:[%s692_s4 + $0x3c] sm:$0xf] %vm339_vm1, %v409_v16 }
  0xee   :  { %345 = vst.msk [vmem:[%s692_s4 + $0x14] sm:$0xf] %vm339_vm1, %v399_v17  ;;  %353 = vst.msk [vmem:[%s692_s4 + $0x34] sm:$0xf] %vm339_vm1, %v407_v36 }

// kernel: backbone_forward.56
= control target key start
LH: loop header
LB: loop body
LE: loop exit
PB: predicated region body
PF: predicated region fallthrough
CT: control target
= control target key end

     0   :  { %s2042_s12 = smov 0   ;;  %s2454_s0 = inlined_call_operand.vmem [shape: bf16[2,104,16], index: 0, kind: input, shape index: {}]   ;;  %s2455_s1 = inlined_call_operand.vmem [shape: bf16[9,16,16], index: 1, kind: input, shape index: {}]   ;;  %s2456_s2 = inlined_call_operand.vmem [shape: f32[1,16], index: 2, kind: input, shape index: {}]   ;;  %s2457_s3 = inlined_call_operand.vmem [shape: bf16[2,80,16], index: 3, kind: output, shape index: {}]  }
   0x1 LB: > { %s1591_s13 = sadd.s32 4294967295, %s2018_s12   ;;  %p1595_p0 = scmp.ge.s32.totalorder %s2018_s12, 1  ;;  %s2018_s12 = sphi %s2042_s12, %s13_s12  }
   0x2   : > { %p137_p1 = scmp.lt.s32.totalorder %s2018_s12, 3 }
   0x4   : > { %p138_p2 = pnand %p1595_p0, %p137_p1 }
   0x5   : > { %v1980_v0 = vld [vmem:[%s2455_s1 + $0x8] sm:$0xff] (!%p138_p2)   ;;  %v2020_v1 = vmov (!%p138_p2), 0.0   ;;  %p161_p3 = scmp.lt.s32.totalorder (!%p138_p2), %s1591_s13, 1  ;;  %vm2021_vm0 = vmmov (!%p138_p2), 0   ;;  %vm216_vm1 = vsmask.f32 (!%p138_p2), 7424 }
   0x6   : > { %141 = sbr.rel (%p138_p2) target bundleno = 426 (0x1aa), region = 32  ;;  %1768 = vmatprep.subr.bf16.mxu0 (!%p138_p2), %v2020_v1  ;;  %1966 = vmatprep.subr.bf16.mxu1 (!%p138_p2), %v2020_v1  ;;  %vm267_vm2 = vcmask (!%p138_p2), 130048   ;;  %v1985_v20 = vld [vmem:[%s2455_s1 + $0x10] sm:$0xff] (!%p138_p2)   ;;  %v1986_v24 = vld [vmem:[%s2455_s1] sm:$0xff] (!%p138_p2)   ;;  %vm452_vm3 = vcmask (!%p138_p2), 1046528   ;;  %v1989_v46 = vld [vmem:[%s2455_s1 + $0x18] sm:$0xff] (!%p138_p2)  }
   0x7   : > { %1769 = vmatpush3.bf16.msra.mxu0 (!%p138_p2), %v1980_v0  ;;  %1967 = vmatpush3.bf16.msra.mxu1 (!%p138_p2), %v1980_v0  ;;  %v1991_v50 = vld [vmem:[%s2455_s1 + $0x20] sm:$0xff] (!%p138_p2)   ;;  %vm732_vm4 = vsmask.f32 (!%p138_p2), 6400  ;;  %vm897_vm5 = vcmask (!%p138_p2), 1045504   ;;  %vm1177_vm6 = vsmask.f32 (!%p138_p2), 5376 }
   0x8   : > { %1770 = vmatprep.mubr.msk.bf16.mxu0 (!%p138_p2), %vm2021_vm0, %v2020_v1  ;;  %1782 = vmatprep.mubr.msk.bf16.mxu1 (!%p138_p2), %vm2021_vm0, %v2020_v1  ;;  %vm1342_vm7 = vcmask (!%p138_p2), 1044480   ;;  %vm1525_vm8 = vcmask (!%p138_p2), 125952  }
   0x9   : > { %1812 = vmatprep.subr.bf16.mxu0 (!%p138_p2), %v2020_v1  ;;  %1790 = vmatprep.subr.bf16.mxu1 (!%p138_p2), %v2020_v1 }
   0xd   : > { %s2459_s13 = smov (!%p161_p3, %s1591_s13), 1 }
   0xe   : > { %s1968_s16 = smul.u32 52, %s2459_s13 }
   0xf   : > { %s1969_s11 = smul.u32 40, %s2459_s13 }
  0x10   : > { %s2067_s19 = scalar_lea.vmem %s2454_s0, %s1968_s16 }
  0x11   : > { %v172_v2 = vld [vmem:[%s2067_s19] sm:$0xf]  ;;  %v173_v3 = vld [vmem:[%s2067_s19 + $0x4] sm:$0xf]  ;;  %v2072_v5 = vld [vmem:[%s2067_s19 + $0x8] sm:$0xff]   ;;  %s2415_s16 = scalar_lea.vmem %s2457_s3, %s1969_s11 }
  0x12   : > { %v1600_v4 = vcombine.low %v172_v2, %v173_v3  ;;  %v225_v8 = vshll.u32 %v2072_v5, 16  ;;  %v2076_v9 = vld [vmem:[%s2067_s19 + $0x18] sm:$0xff]   ;;  %v2079_v10 = vld [vmem:[%s2067_s19 + $0x20] sm:$0xff]   ;;  %v2082_v11 = vld [vmem:[%s2067_s19 + $0x10] sm:$0xff]   ;;  %v229_v21 = vshrl.u32 %v2072_v5, 16  ;;  %v454_v48 = vrot.slane %v2072_v5, 1 }
  0x13   : > { %v241_v14 = vshll.u32 %v2076_v9, 16  ;;  %v245_v15 = vshrl.u32 %v2076_v9, 16  ;;  %v249_v16 = vshll.u32 %v2079_v10, 16  ;;  %v2088_v17 = vld [vmem:[%s2067_s19 + $0x28] ss:$0 sps:$4 sm:$0x11]  }
  0x14   : > { %v218_v6 = vshrl.u32 %v1600_v4, 16  ;;  %v220_v7 = vshll.u32 %v1600_v4, 16  ;;  %v227_v13 = vrot.slane %v225_v8, 1  ;;  %v233_v22 = vshll.u32 %v2082_v11, 16  ;;  %v2113_v36 = vld [vmem:[%s2067_s19 + $0x24] sm:$0xff]   ;;  %v2180_v60 = vld [vmem:[%s2067_s19 + $0xc] sm:$0xff]  }
  0x15   : > { %v243_v19 = vrot.slane %v241_v14, 1  ;;  %v251_v23 = vrot.slane %v249_v16, 1  ;;  %v253_v27 = vshrl.u32 %v2079_v10, 16  ;;  %v257_v28 = vshll.u32 %v2088_v17, 16  ;;  %v445_v40 = vld [vmem:[%s2067_s19] sm:$0xe] }
  0x16   : > { %v222_v12 = vrot.slane %v220_v7, 1  ;;  %v231_v30 = vor.u32 %v229_v21, %v227_v13  ;;  %v235_v31 = vrot.slane %v233_v22, 1  ;;  %v237_v35 = vshrl.u32 %v2082_v11, 16  ;;  %v1999_v37 = vld [vmem:[%s2067_s19 + $0x2c] ss:$0 sps:$4 sm:$0x11]  }
  0x17   : > { %v247_v26 = vor.u32 %v245_v15, %v243_v19  ;;  %v255_v32 = vor.u32 %v253_v27, %v251_v23  ;;  %v259_v33 = vrot.slane %v257_v28, 1  ;;  %v617_v41 = vrot.slane %v2113_v36, 1  ;;  %v568_v56 = vld [vmem:[%s2067_s19 + $0x4] sm:$0xe]  ;;  %v2175_v57 = vld [vmem:[%s2067_s19 + $0x8] sm:$0xf] }
  0x18   : > { %v223_v18 = vor.u32 %v222_v12, %v218_v6  ;;  %v236_v34 = vsel %vm216_vm1, %v231_v30, %v235_v31  ;;  %v239_v39 = vor.u32 %v237_v35, %v235_v31  ;;  %v619_v42 = vrot.slane %v1999_v37, 1  ;;  %v1994_v12 = vld [vmem:[%s2455_s1 + $0x28] sm:$0xff]  }
  0x19   : > { %v252_v29 = vsel %vm216_vm1, %v247_v26, %v251_v23  ;;  %v260_v38 = vsel %vm216_vm1, %v255_v32, %v259_v33  ;;  %v1620_v45 = vcombine.low %v445_v40, %v173_v3  ;;  %v456_v51 = vrot.slane %v2082_v11, 1  ;;  %v2217_v23 = vld [vmem:[%s2067_s19 + $0x1c] sm:$0xff]  }
  0x1a   : > { %v228_v25 = vsel %vm216_vm1, %v223_v18, %v227_v13  ;;  %1783 = vmatmul.mubr.msk.bf16.vlgmr.msra.gmra.mrb[0].mxu1 %vm267_vm2, %v252_v29  ;;  %v2128_v43 = vsel %vm452_vm3, %v617_v41, %v619_v42  ;;  %v244_v44 = vsel %vm216_vm1, %v239_v39, %v243_v19  ;;  %v458_v53 = vrot.slane %v2076_v9, 1  ;;  %v2199_v13 = vld [vmem:[%s2067_s19 + $0x14] sm:$0xff]   ;;  %v2241_v39 = vld [vmem:[%s2067_s19 + $0x2c] ss:$0 sps:$4 sm:$0x33]  }
  0x1b   : > { %1771 = vmatmul.mubr.msk.bf16.vlgmr.msra.gmra.mrb[0].mxu0 %vm267_vm2, %v228_v25  ;;  %1791 = vmatpush3.bf16.msra.mxu1 %v1986_v24  ;;  %v453_v47 = vrot.slane %v1620_v45, 1  ;;  %v457_v52 = vsel %vm452_vm3, %v454_v48, %v456_v51  ;;  %v460_v55 = vrot.slane %v2079_v10, 1  ;;  %v1629_v59 = vcombine.low %v568_v56, %v2175_v57  ;;  %v1996_v19 = vld [vmem:[%s2455_s1 + $0x30] sm:$0xff]  }
  0x1c   : > { %1813 = vmatpush3.bf16.msra.mxu0 %v1985_v20  ;;  %1774 = vmatprep.mubr.msk.bf16.mxu0 %vm2021_vm0, %v2020_v1  ;;  %v459_v54 = vsel %vm452_vm3, %v456_v51, %v458_v53  ;;  %v462_v61 = vrot.slane %v2088_v17, 1  ;;  %v742_v0 = vshrl.u32 %v2180_v60, 16  ;;  %v745_v2 = vshll.u32 %v2180_v60, 16  ;;  %v1013_v51 = vld [vmem:[%s2067_s19 + $0x8] sm:$0xc] }
  0x1d   : > { %1856 = vmatprep.subr.bf16.mxu0 %v2020_v1  ;;  %1786 = vmatprep.mubr.msk.bf16.mxu1 %vm2021_vm0, %v2020_v1  ;;  %v455_v49 = vsel %vm452_vm3, %v453_v47, %v454_v48  ;;  %v461_v58 = vsel %vm452_vm3, %v458_v53, %v460_v55  ;;  %v734_v62 = vshrl.u32 %v1629_v59, 16  ;;  %v737_v63 = vshll.u32 %v1629_v59, 16 }
  0x1e   : > { %1834 = vmatprep.subr.bf16.mxu1 %v2020_v1  ;;  %v610_v3 = vrot.slane %v1629_v59, 1  ;;  %v744_v8 = vrot.slane %v742_v0, 1  ;;  %v751_v15 = vshrl.u32 %v2199_v13, 16  ;;  %v754_v16 = vshll.u32 %v2199_v13, 16  ;;  %v2291_v0 = vld [vmem:[%s2067_s19 + $0x18] sm:$0xff]  }
  0x1f   : > { %v736_v6 = vrot.slane %v734_v62, 1  ;;  %v739_v7 = vrot.slane %v737_v63, 2  ;;  %v613_v17 = vrot.slane %v2199_v13, 1  ;;  %v760_v25 = vshrl.u32 %v2217_v23, 16  ;;  %v2005_v63 = vld [vmem:[%s2455_s1 + $0x40] sm:$0xff]  }
  0x20   : > { %v753_v20 = vrot.slane %v751_v15, 1  ;;  %v756_v21 = vrot.slane %v754_v16, 2  ;;  %v763_v26 = vshll.u32 %v2217_v23, 16  ;;  %v615_v27 = vrot.slane %v2217_v23, 1 }
  0x21   : > { %v762_v29 = vrot.slane %v760_v25, 1  ;;  %v769_v33 = vshrl.u32 %v2113_v36, 16  ;;  %v781_v45 = vshll.u32 %v2241_v39, 16 }
  0x22   : > { %1787 = vmatmul.mubr.msk.bf16.gmra.mrb[4].mxu1 %vm267_vm2, %v260_v38  ;;  %v757_v24 = vor.u32 %v756_v21, %v753_v20  ;;  %v765_v30 = vrot.slane %v763_v26, 2  ;;  %v616_v31 = vsel %vm452_vm3, %v613_v17, %v615_v27  ;;  %v618_v40 = vsel %vm452_vm3, %v615_v27, %v617_v41  ;;  %v1335_v26 = vld [vmem:[%s2067_s19 + $0x8] sm:$0x8] }
  0x23   : > { %1775 = vmatmul.mubr.msk.bf16.gmra.mrb[4].mxu0 %vm267_vm2, %v236_v34  ;;  %1792 = vmatprep.mubr.msk.bf16.mxu1 %vm2021_vm0, %v2020_v1  ;;  %v772_v34 = vshll.u32 %v2113_v36, 16  ;;  %v771_v37 = vrot.slane %v769_v33, 1  ;;  %v783_v48 = vrot.slane %v781_v45, 2 }
  0x24   : > { %1778 = vmatprep.mubr.msk.bf16.mxu0 %vm2021_vm0, %v2020_v1  ;;  %v766_v32 = vor.u32 %v765_v30, %v762_v29  ;;  %v1196_v29 = vshrl.u32 %v2291_v0, 16  ;;  %v1199_v30 = vshll.u32 %v2291_v0, 16 }
  0x25   : > { %v774_v38 = vrot.slane %v772_v34, 2 }
  0x26   : > { %v767_v35 = vsel %vm732_vm4, %v757_v24, %v766_v32  ;;  %v1198_v34 = vrot.slane %v1196_v29, 2 }
  0x27   : > { %v775_v42 = vor.u32 %v774_v38, %v771_v37 }
  0x29   : > { %v776_v41 = vsel %vm732_vm4, %v766_v32, %v775_v42 }
  0x2a   : > { %1793 = vmatmul.mubr.msk.bf16.vlgmr.msra.gmra.mrb[8].mxu1 %vm267_vm2, %v1600_v4  ;;  %v611_v4 = vrot.slane %v2180_v60, 1 }
  0x2b   : > { %1779 = vmatmul.mubr.msk.bf16.gmra.mrb[8].mxu0 %vm267_vm2, %v244_v44  ;;  %1835 = vmatpush3.bf16.msra.mxu1 %v1989_v46  ;;  %v778_v44 = vshrl.u32 %v2241_v39, 16  ;;  %v890_v46 = vld [vmem:[%s2067_s19 + $0x4] sm:$0xc] }
  0x2c   : > { %1814 = vmatprep.mubr.msk.bf16.mxu0 %vm2021_vm0, %v2020_v1  ;;  %1796 = vmatprep.mubr.msk.bf16.mxu1 %vm2021_vm0, %v2020_v1  ;;  %v614_v22 = vsel %vm452_vm3, %v611_v4, %v613_v17 }
  0x2d   : > { %1878 = vmatprep.subr.bf16.mxu1 %v2020_v1  ;;  %v780_v47 = vrot.slane %v778_v44, 1 }
  0x32   : > { %1797 = vmatmul.mubr.msk.bf16.gmra.mrb[12].mxu1 %vm267_vm2, %v2072_v5  ;;  %v463_v5 = vsel %vm452_vm3, %v460_v55, %v462_v61  ;;  %v901_v61 = vrot.slane %v2199_v13, 2 }
  0x33   : > { %1815 = vmatmul.mubr.msk.bf16.vlgmr.msra.gmra.mrb[12].mxu0 %vm267_vm2, %v455_v49  ;;  %1800 = vmatprep.mubr.msk.bf16.mxu1 %vm2021_vm0, %v2020_v1  ;;  %v1652_v49 = vcombine.low %v890_v46, %v2175_v57  ;;  %v2272_v57 = vld [vmem:[%s2067_s19 + $0x10] sm:$0xff]  }
  0x34   : > { %1857 = vmatpush3.bf16.msra.mxu0 %v1991_v50  ;;  %1818 = vmatprep.mubr.msk.bf16.mxu0 %vm2021_vm0, %v2020_v1  ;;  %v784_v50 = vor.u32 %v783_v48, %v780_v47  ;;  %v1187_v16 = vshrl.u32 %v2272_v57, 16  ;;  %v1190_v17 = vshll.u32 %v2272_v57, 16  ;;  %v1344_v38 = vrot.slane %v2272_v57, 3 }
  0x35   : > { %1900 = vmatprep.subr.bf16.mxu0 %v2020_v1  ;;  %v898_v53 = vrot.slane %v1652_v49, 2  ;;  %v1346_v47 = vrot.slane %v2291_v0, 3 }
  0x36   : > { %v785_v55 = vsel %vm732_vm4, %v775_v42, %v784_v50 }
  0x3a   : > { %1801 = vmatmul.mubr.msk.bf16.gmra.mrb[16].mxu1 %vm267_vm2, %v2082_v11  ;;  %v612_v11 = vsel %vm452_vm3, %v610_v3, %v611_v4  ;;  %v1058_v3 = vrot.slane %v2291_v0, 2  ;;  %v903_v4 = vrot.slane %v2217_v23, 2  ;;  %v1189_v23 = vrot.slane %v1187_v16, 2 }
  0x3b   : > { %1819 = vmatmul.mubr.msk.bf16.gmra.mrb[16].mxu0 %vm267_vm2, %v457_v52  ;;  %1804 = vmatprep.mubr.msk.bf16.mxu1 %vm2021_vm0, %v2020_v1  ;;  %v2264_v52 = vld [vmem:[%s2067_s19 + $0xc] sm:$0xf] }
  0x3c   : > { %1822 = vmatprep.mubr.msk.bf16.mxu0 %vm2021_vm0, %v2020_v1  ;;  %v1661_v56 = vcombine.low %v1013_v51, %v2264_v52  ;;  %v1684_v32 = vcombine.low %v1335_v26, %v2264_v52  ;;  %v1347_v51 = vsel %vm1342_vm7, %v1344_v38, %v1346_v47 }
  0x3e   : > { %v1055_v59 = vrot.slane %v1661_v56, 2  ;;  %v1182_v15 = vshll.u32 %v1661_v56, 16  ;;  %v1343_v37 = vrot.slane %v1684_v32, 3 }
  0x40   : > { %v1345_v44 = vsel %vm1342_vm7, %v1343_v37, %v1344_v38 }
  0x42   : > { %1805 = vmatmul.mubr.msk.bf16.gmra.mrb[20].mxu1 %vm267_vm2, %v2076_v9  ;;  %v747_v9 = vrot.slane %v745_v2, 2 }
  0x43   : > { %1823 = vmatmul.mubr.msk.bf16.gmra.mrb[20].mxu0 %vm267_vm2, %v459_v54  ;;  %1808 = vmatprep.mubr.msk.bf16.mxu1 %vm2021_vm0, %v2020_v1  ;;  %v899_v54 = vrot.slane %v2180_v60, 2  ;;  %v1056_v60 = vrot.slane %v2272_v57, 2 }
  0x44   : > { %1826 = vmatprep.mubr.msk.bf16.mxu0 %vm2021_vm0, %v2020_v1  ;;  %v748_v14 = vor.u32 %v747_v9, %v744_v8  ;;  %v905_v9 = vrot.slane %v2113_v36, 2  ;;  %v1179_v36 = vshrl.u32 %v1661_v56, 16 }
  0x45   : > { %v1057_v62 = vsel %vm897_vm5, %v1055_v59, %v1056_v60  ;;  %v902_v2 = vsel %vm897_vm5, %v899_v54, %v901_v61 }
  0x46   : > { %v758_v28 = vsel %vm732_vm4, %v748_v14, %v757_v24  ;;  %v906_v13 = vsel %vm897_vm5, %v903_v4, %v905_v9  ;;  %v1181_v21 = vrot.slane %v1179_v36, 2  ;;  %v1192_v24 = vrot.slane %v1190_v17, 3 }
  0x4a   : > { %1809 = vmatmul.mubr.msk.bf16.gmra.mrb[24].mxu1 %vm267_vm2, %v2079_v10  ;;  %v740_v10 = vor.u32 %v739_v7, %v736_v6  ;;  %v2304_v6 = vld [vmem:[%s2067_s19 + $0x20] sm:$0xff]   ;;  %v904_v7 = vsel %vm897_vm5, %v901_v61, %v903_v4 }
  0x4b   : > { %1827 = vmatmul.mubr.msk.bf16.gmra.mrb[24].mxu0 %vm267_vm2, %v461_v58  ;;  %1836 = vmatprep.mubr.msk.bf16.mxu1 %vm2021_vm0, %v2020_v1  ;;  %v900_v58 = vsel %vm897_vm5, %v898_v53, %v899_v54  ;;  %v1060_v8 = vrot.slane %v2304_v6, 2  ;;  %v1208_v42 = vshll.u32 %v2304_v6, 16  ;;  %v1348_v56 = vrot.slane %v2304_v6, 3 }
  0x4c   : > { %1830 = vmatprep.mubr.msk.bf16.mxu0 %vm2021_vm0, %v2020_v1  ;;  %v749_v18 = vsel %vm732_vm4, %v740_v10, %v748_v14  ;;  %v907_v14 = vrot.slane %v2241_v39, 2 }
  0x4d   : > { %v1349_v59 = vsel %vm1342_vm7, %v1346_v47, %v1348_v56 }
  0x4e   : > { %v908_v20 = vsel %vm897_vm5, %v905_v9, %v907_v14 }
  0x52   : > { %1837 = vmatmul.mubr.msk.bf16.vlgmr.msra.gmra.mrb[28].mxu1 %vm267_vm2, %v612_v11  ;;  %v1061_v11 = vsel %vm897_vm5, %v1058_v3, %v1060_v8 }
  0x53   : > { %1831 = vmatmul.mubr.msk.bf16.gmra.mrb[28].mxu0 %vm267_vm2, %v463_v5  ;;  %1879 = vmatpush3.bf16.msra.mxu1 %v1994_v12  ;;  %v1059_v5 = vsel %vm897_vm5, %v1056_v60, %v1058_v3  ;;  %v2317_v12 = vld [vmem:[%s2067_s19 + $0x28] sm:$0xff]  }
  0x54   : > { %1858 = vmatprep.mubr.msk.bf16.mxu0 %vm2021_vm0, %v2020_v1  ;;  %1840 = vmatprep.mubr.msk.bf16.mxu1 %vm2021_vm0, %v2020_v1  ;;  %v1062_v10 = vrot.slane %v2317_v12, 2  ;;  %v1214_v49 = vshrl.u32 %v2317_v12, 16  ;;  %v1217_v50 = vshll.u32 %v2317_v12, 16 }
  0x55   : > { %1922 = vmatprep.subr.bf16.mxu1 %v2020_v1 }
  0x56   : > { %v1216_v53 = vrot.slane %v1214_v49, 2  ;;  %v1219_v54 = vrot.slane %v1217_v50, 3 }
  0x58   : > { %v1220_v57 = vor.u32 %v1219_v54, %v1216_v53 }
  0x5a   : > { %1841 = vmatmul.mubr.msk.bf16.gmra.mrb[32].mxu1 %vm267_vm2, %v614_v22  ;;  %v1184_v22 = vrot.slane %v1182_v15, 3 }
  0x5b   : > { %1859 = vmatmul.mubr.msk.bf16.vlgmr.msra.gmra.mrb[32].mxu0 %vm267_vm2, %v749_v18  ;;  %1844 = vmatprep.mubr.msk.bf16.mxu1 %vm2021_vm0, %v2020_v1  ;;  %v1063_v18 = vsel %vm897_vm5, %v1060_v8, %v1062_v10 }
  0x5c   : > { %1901 = vmatpush3.bf16.msra.mxu0 %v1996_v19  ;;  %1862 = vmatprep.mubr.msk.bf16.mxu0 %vm2021_vm0, %v2020_v1  ;;  %v2009_v19 = vld [vmem:[%s2067_s19 + $0x30] ss:$0 sps:$4 sm:$0x33]   ;;  %v1185_v27 = vor.u32 %v1184_v22, %v1181_v21 }
  0x5d   : > { %1944 = vmatprep.subr.bf16.mxu0 %v2020_v1  ;;  %v1064_v25 = vrot.slane %v2009_v19, 2 }
  0x62   : > { %1845 = vmatmul.mubr.msk.bf16.gmra.mrb[36].mxu1 %vm267_vm2, %v616_v31  ;;  %v1065_v31 = vsel %vm897_vm5, %v1062_v10, %v1064_v25 }
  0x63   : > { %1863 = vmatmul.mubr.msk.bf16.gmra.mrb[36].mxu0 %vm267_vm2, %v758_v28  ;;  %1848 = vmatprep.mubr.msk.bf16.mxu1 %vm2021_vm0, %v2020_v1  ;;  %v1193_v28 = vor.u32 %v1192_v24, %v1189_v23 }
  0x64   : > { %1866 = vmatprep.mubr.msk.bf16.mxu0 %vm2021_vm0, %v2020_v1 }
  0x65   : > { %v1194_v33 = vsel %vm1177_vm6, %v1185_v27, %v1193_v28 }
  0x6a   : > { %1849 = vmatmul.mubr.msk.bf16.gmra.mrb[40].mxu1 %vm267_vm2, %v618_v40  ;;  %v1205_v40 = vshrl.u32 %v2304_v6, 16 }
  0x6b   : > { %1867 = vmatmul.mubr.msk.bf16.gmra.mrb[40].mxu0 %vm267_vm2, %v767_v35  ;;  %1852 = vmatprep.mubr.msk.bf16.mxu1 %vm2021_vm0, %v2020_v1  ;;  %v1201_v35 = vrot.slane %v1199_v30, 3 }
  0x6c   : > { %1870 = vmatprep.mubr.msk.bf16.mxu0 %vm2021_vm0, %v2020_v1  ;;  %v1207_v46 = vrot.slane %v1205_v40, 2 }
  0x6d   : > { %v1202_v39 = vor.u32 %v1201_v35, %v1198_v34 }
  0x6f   : > { %v1203_v45 = vsel %vm1177_vm6, %v1193_v28, %v1202_v39 }
  0x72   : > { %1853 = vmatmul.mubr.msk.bf16.gmra.mrb[44].mxu1 %vm267_vm2, %v2128_v43  ;;  %v2002_v43 = vld [vmem:[%s2455_s1 + $0x38] sm:$0xff]  }
  0x73   : > { %1871 = vmatmul.mubr.msk.bf16.gmra.mrb[44].mxu0 %vm267_vm2, %v776_v41  ;;  %1880 = vmatprep.mubr.msk.bf16.mxu1 %vm2021_vm0, %v2020_v1  ;;  %v1210_v41 = vrot.slane %v1208_v42, 3 }
  0x74   : > { %1874 = vmatprep.mubr.msk.bf16.mxu0 %vm2021_vm0, %v2020_v1 }
  0x75   : > { %v1211_v48 = vor.u32 %v1210_v41, %v1207_v46 }
  0x77   : > { %v1212_v52 = vsel %vm1177_vm6, %v1202_v39, %v1211_v48  ;;  %v1221_v60 = vsel %vm1177_vm6, %v1211_v48, %v1220_v57 }
  0x7a   : > { %1881 = vmatmul.mubr.msk.bf16.vlgmr.msra.gmra.mrb[48].mxu1 %vm267_vm2, %v900_v58 }
  0x7b   : > { %1875 = vmatmul.mubr.msk.bf16.gmra.mrb[48].mxu0 %vm267_vm2, %v785_v55  ;;  %1923 = vmatpush3.bf16.msra.mxu1 %v2002_v43  ;;  %v2011_v55 = vld [vmem:[%s2067_s19 + $0x30] ss:$0 sps:$4 sm:$0x77]  }
  0x7c   : > { %1902 = vmatprep.mubr.msk.bf16.mxu0 %vm2021_vm0, %v2020_v1  ;;  %1884 = vmatprep.mubr.msk.bf16.mxu1 %vm2021_vm0, %v2020_v1  ;;  %v1223_v58 = vshrl.u32 %v2011_v55, 16  ;;  %v1226_v43 = vshll.u32 %v2011_v55, 16  ;;  %v1352_v4 = vrot.slane %v2011_v55, 3 }
  0x7e   : > { %v1225_v61 = vrot.slane %v1223_v58, 2 }
  0x82   : > { %1885 = vmatmul.mubr.msk.bf16.gmra.mrb[52].mxu1 %vm267_vm2, %v902_v2 }
  0x83   : > { %1903 = vmatmul.mubr.msk.bf16.vlgmr.msra.gmra.mrb[52].mxu0 %vm267_vm2, %v1057_v62  ;;  %1888 = vmatprep.mubr.msk.bf16.mxu1 %vm2021_vm0, %v2020_v1  ;;  %v1228_v62 = vrot.slane %v1226_v43, 3 }
  0x84   : > { %1945 = vmatpush3.bf16.msra.mxu0 %v2005_v63  ;;  %1906 = vmatprep.mubr.msk.bf16.mxu0 %vm2021_vm0, %v2020_v1  ;;  %v1350_v63 = vrot.slane %v2317_v12, 3 }
  0x85   : > { %v1229_v0 = vor.u32 %v1228_v62, %v1225_v61 }
  0x86   : > { %v1351_v2 = vsel %vm1342_vm7, %v1348_v56, %v1350_v63 }
  0x87   : > { %v1230_v3 = vsel %vm1177_vm6, %v1220_v57, %v1229_v0 }
  0x8a   : > { %1889 = vmatmul.mubr.msk.bf16.gmra.mrb[56].mxu1 %vm267_vm2, %v904_v7 }
  0x8b   : > { %1907 = vmatmul.mubr.msk.bf16.gmra.mrb[56].mxu0 %vm267_vm2, %v1059_v5  ;;  %1892 = vmatprep.mubr.msk.bf16.mxu1 %vm2021_vm0, %v2020_v1  ;;  %v1353_v5 = vsel %vm1342_vm7, %v1350_v63, %v1352_v4 }
  0x8c   : > { %1910 = vmatprep.mubr.msk.bf16.mxu0 %vm2021_vm0, %v2020_v1 }
  0x92   : > { %1893 = vmatmul.mubr.msk.bf16.gmra.mrb[60].mxu1 %vm267_vm2, %v906_v13 }
  0x93   : > { %1911 = vmatmul.mubr.msk.bf16.gmra.mrb[60].mxu0 %vm267_vm2, %v1061_v11  ;;  %1896 = vmatprep.mubr.msk.bf16.mxu1 %vm2021_vm0, %v2020_v1 }
  0x94   : > { %1914 = vmatprep.mubr.msk.bf16.mxu0 %vm2021_vm0, %v2020_v1 }
  0x9a   : > { %1897 = vmatmul.mubr.msk.bf16.gmra.mrb[64].mxu1 %vm267_vm2, %v908_v20 }
  0x9b   : > { %1915 = vmatmul.mubr.msk.bf16.gmra.mrb[64].mxu0 %vm267_vm2, %v1063_v18  ;;  %1924 = vmatprep.mubr.msk.bf16.mxu1 %vm2021_vm0, %v2020_v1 }
  0x9c   : > { %1918 = vmatprep.mubr.msk.bf16.mxu0 %vm2021_vm0, %v2020_v1 }
  0xa2   : > { %1925 = vmatmul.mubr.msk.bf16.vlgmr.msra.gmra.mrb[68].mxu1 %vm267_vm2, %v1194_v33 }
  0xa3   : > { %1919 = vmatmul.mubr.msk.bf16.gmra.mrb[68].mxu0 %vm267_vm2, %v1065_v31  ;;  %1928 = vmatprep.mubr.msk.bf16.mxu1 %vm2021_vm0, %v2020_v1 }
  0xa4   : > { %1946 = vmatprep.mubr.msk.bf16.mxu0 %vm2021_vm0, %v2020_v1 }
  0xaa   : > { %1929 = vmatmul.mubr.msk.bf16.gmra.mrb[72].mxu1 %vm267_vm2, %v1203_v45 }
  0xab   : > { %1947 = vmatmul.mubr.msk.bf16.vlgmr.msra.gmra.mrb[72].mxu0 %vm267_vm2, %v1345_v44  ;;  %1932 = vmatprep.mubr.msk.bf16.mxu1 %vm2021_vm0, %v2020_v1 }
  0xac   : > { %1950 = vmatprep.mubr.msk.bf16.mxu0 %vm2021_vm0, %v2020_v1 }
  0xb2   : > { %1933 = vmatmul.mubr.msk.bf16.gmra.mrb[76].mxu1 %vm267_vm2, %v1212_v52 }
  0xb3   : > { %1951 = vmatmul.mubr.msk.bf16.gmra.mrb[76].mxu0 %vm267_vm2, %v1347_v51  ;;  %1936 = vmatprep.mubr.msk.bf16.mxu1 %vm2021_vm0, %v2020_v1 }
  0xb4   : > { %1954 = vmatprep.mubr.msk.bf16.mxu0 %vm2021_vm0, %v2020_v1 }
  0xba   : > { %1937 = vmatmul.mubr.msk.bf16.gmra.mrb[80].mxu1 %vm267_vm2, %v1221_v60 }
  0xbb   : > { %1955 = vmatmul.mubr.msk.bf16.gmra.mrb[80].mxu0 %vm267_vm2, %v1349_v59  ;;  %1940 = vmatprep.mubr.msk.bf16.mxu1 %vm2021_vm0, %v2020_v1 }
  0xbc   : > { %1958 = vmatprep.mubr.msk.bf16.mxu0 %vm2021_vm0, %v2020_v1 }
  0xc2   : > { %1941 = vmatmul.mubr.msk.bf16.gmra.mrb[84].mxu1 %vm267_vm2, %v1230_v3 }
  0xc3   : > { %1959 = vmatmul.mubr.msk.bf16.gmra.mrb[84].mxu0 %vm267_vm2, %v1351_v2 }
  0xc4   : > { %1962 = vmatprep.mubr.msk.bf16.mxu0 %vm2021_vm0, %v2020_v1 }
  0xcb   : > { %1963 = vmatmul.mubr.msk.bf16.gmra.mrb[88].mxu0 %vm267_vm2, %v1353_v5 }
  0xed   : > { %v341_v9 = vpop.f32.mrb[0].mxu1 }
  0xee   : > { %v317_v6 = vpop.f32.mrb[0].mxu0  ;;  %v1784_v12 = vpop.f32.mrb[1].mxu1 }
  0xef   : > { %v1772_v7 = vpop.f32.mrb[1].mxu0  ;;  %v344_v13 = vpop.f32.mrb[2].mxu1 }
  0xf0   : > { %v320_v8 = vpop.f32.mrb[2].mxu0  ;;  %v1785_v10 = vpop.f32.mrb[3].mxu1 }
  0xf1   : > { %v1773_v11 = vpop.f32.mrb[3].mxu0 }
  0xf5   : > { %v349_v16 = vpop.f32.mrb[4].mxu1 }
  0xf6   : > { %v325_v14 = vpop.f32.mrb[4].mxu0  ;;  %v1788_v17 = vpop.f32.mrb[5].mxu1 }
  0xf7   : > { %v1776_v36 = vpop.f32.mrb[5].mxu0  ;;  %v352_v18 = vpop.f32.mrb[6].mxu1 }
  0xf8   : > { %v328_v15 = vpop.f32.mrb[6].mxu0  ;;  %v1789_v19 = vpop.f32.mrb[7].mxu1 }
  0xf9   : > { %v1777_v1 = vpop.f32.mrb[7].mxu0 }
  0xfd   : > { %v406_v22 = vpop.f32.mrb[8].mxu1 }
  0xfe   : > { %v333_v20 = vpop.f32.mrb[8].mxu0  ;;  %v407_v24 = vadd.f32 %v406_v22, %v317_v6  ;;  %v1794_v25 = vpop.f32.mrb[9].mxu1 }
  0xff   : > { %v1780_v21 = vpop.f32.mrb[9].mxu0  ;;  %v409_v27 = vpop.f32.mrb[10].mxu1 }
 0x100   : > { %v336_v23 = vpop.f32.mrb[10].mxu0  ;;  %v410_v28 = vadd.f32 %v409_v27, %v320_v8  ;;  %v1795_v29 = vpop.f32.mrb[11].mxu1 }
 0x101   : > { %v1781_v26 = vpop.f32.mrb[11].mxu0 }
 0x105   : > { %v414_v33 = vpop.f32.mrb[12].mxu1 }
 0x106   : > { %v519_v30 = vpop.f32.mrb[12].mxu0  ;;  %v415_v35 = vadd.f32 %v414_v33, %v325_v14  ;;  %v1798_v37 = vpop.f32.mrb[13].mxu1 }
 0x107   : > { %v558_v31 = vadd.f32 %v519_v30, %v407_v24  ;;  %v1816_v32 = vpop.f32.mrb[13].mxu0  ;;  %v417_v40 = vpop.f32.mrb[14].mxu1 }
 0x108   : > { %v522_v34 = vpop.f32.mrb[14].mxu0  ;;  %v418_v42 = vadd.f32 %v417_v40, %v328_v15  ;;  %v1799_v44 = vpop.f32.mrb[15].mxu1 }
 0x109   : > { %v559_v38 = vadd.f32 %v522_v34, %v410_v28  ;;  %v1817_v39 = vpop.f32.mrb[15].mxu0 }
 0x10d   : > { %v422_v47 = vpop.f32.mrb[16].mxu1 }
 0x10e   : > { %v527_v45 = vpop.f32.mrb[16].mxu0  ;;  %v423_v49 = vadd.f32 %v422_v47, %v333_v20  ;;  %v1802_v50 = vpop.f32.mrb[17].mxu1 }
 0x10f   : > { %v560_v46 = vadd.f32 %v527_v45, %v415_v35  ;;  %v1820_v41 = vpop.f32.mrb[17].mxu0  ;;  %v425_v53 = vpop.f32.mrb[18].mxu1 }
 0x110   : > { %v530_v48 = vpop.f32.mrb[18].mxu0  ;;  %v426_v54 = vadd.f32 %v425_v53, %v336_v23  ;;  %v1803_v55 = vpop.f32.mrb[19].mxu1 }
 0x111   : > { %v561_v51 = vadd.f32 %v530_v48, %v418_v42  ;;  %v1821_v52 = vpop.f32.mrb[19].mxu0 }
 0x115   : > { %v430_v43 = vpop.f32.mrb[20].mxu1 }
 0x116   : > { %v535_v56 = vpop.f32.mrb[20].mxu0  ;;  %v431_v60 = vadd.f32 %v430_v43, %v341_v9  ;;  %v1806_v61 = vpop.f32.mrb[21].mxu1 }
 0x117   : > { %v562_v57 = vadd.f32 %v535_v56, %v423_v49  ;;  %v1824_v58 = vpop.f32.mrb[21].mxu0  ;;  %v433_v0 = vpop.f32.mrb[22].mxu1 }
 0x118   : > { %v538_v59 = vpop.f32.mrb[22].mxu0  ;;  %v434_v2 = vadd.f32 %v433_v0, %v344_v13  ;;  %v1807_v3 = vpop.f32.mrb[23].mxu1 }
 0x119   : > { %v563_v62 = vadd.f32 %v538_v59, %v426_v54  ;;  %v1825_v63 = vpop.f32.mrb[23].mxu0 }
 0x11d   : > { %v438_v7 = vpop.f32.mrb[24].mxu1 }
 0x11e   : > { %v543_v4 = vpop.f32.mrb[24].mxu0  ;;  %v439_v11 = vadd.f32 %v438_v7, %v349_v16  ;;  %v1810_v12 = vpop.f32.mrb[25].mxu1 }
 0x11f   : > { %v564_v5 = vadd.f32 %v543_v4, %v431_v60  ;;  %v1828_v6 = vpop.f32.mrb[25].mxu0  ;;  %v441_v36 = vpop.f32.mrb[26].mxu1 }
 0x120   : > { %v546_v8 = vpop.f32.mrb[26].mxu0  ;;  %v442_v15 = vadd.f32 %v441_v36, %v352_v18  ;;  %v1811_v1 = vpop.f32.mrb[27].mxu1 }
 0x121   : > { %v565_v10 = vadd.f32 %v546_v8, %v434_v2  ;;  %v1829_v14 = vpop.f32.mrb[27].mxu0 }
 0x125   : > { %v676_v20 = vpop.f32.mrb[28].mxu1 }
 0x126   : > { %v551_v17 = vpop.f32.mrb[28].mxu0  ;;  %v715_v22 = vadd.f32 %v676_v20, %v558_v31  ;;  %v1838_v13 = vpop.f32.mrb[29].mxu1 }
 0x127   : > { %v566_v9 = vadd.f32 %v551_v17, %v439_v11  ;;  %v1832_v19 = vpop.f32.mrb[29].mxu0  ;;  %v679_v25 = vpop.f32.mrb[30].mxu1 }
 0x128   : > { %v554_v21 = vpop.f32.mrb[30].mxu0  ;;  %v716_v26 = vadd.f32 %v679_v25, %v559_v38  ;;  %v1839_v27 = vpop.f32.mrb[31].mxu1 }
 0x129   : > { %v567_v23 = vadd.f32 %v554_v21, %v442_v15  ;;  %v1833_v24 = vpop.f32.mrb[31].mxu0 }
 0x12d   : > { %v684_v30 = vpop.f32.mrb[32].mxu1 }
 0x12e   : > { %v841_v28 = vpop.f32.mrb[32].mxu0  ;;  %v717_v33 = vadd.f32 %v684_v30, %v560_v46  ;;  %v1842_v18 = vpop.f32.mrb[33].mxu1 }
 0x12f   : > { %v880_v16 = vadd.f32 %v841_v28, %v715_v22  ;;  %v1860_v29 = vpop.f32.mrb[33].mxu0  ;;  %v687_v37 = vpop.f32.mrb[34].mxu1 }
 0x130   : > { %v844_v32 = vpop.f32.mrb[34].mxu0  ;;  %v718_v39 = vadd.f32 %v687_v37, %v561_v51  ;;  %v1843_v40 = vpop.f32.mrb[35].mxu1 }
 0x131   : > { %v881_v34 = vadd.f32 %v844_v32, %v716_v26  ;;  %v1861_v35 = vpop.f32.mrb[35].mxu0 }
 0x135   : > { %v692_v45 = vpop.f32.mrb[36].mxu1 }
 0x136   : > { %v849_v42 = vpop.f32.mrb[36].mxu0  ;;  %v719_v47 = vadd.f32 %v692_v45, %v562_v57  ;;  %v1846_v38 = vpop.f32.mrb[37].mxu1 }
 0x137   : > { %v882_v31 = vadd.f32 %v849_v42, %v717_v33  ;;  %v1864_v44 = vpop.f32.mrb[37].mxu0  ;;  %v695_v50 = vpop.f32.mrb[38].mxu1 }
 0x138   : > { %v852_v41 = vpop.f32.mrb[38].mxu0  ;;  %v720_v52 = vadd.f32 %v695_v50, %v563_v62  ;;  %v1847_v53 = vpop.f32.mrb[39].mxu1 }
 0x139   : > { %v883_v48 = vadd.f32 %v852_v41, %v718_v39  ;;  %v1865_v49 = vpop.f32.mrb[39].mxu0 }
 0x13d   : > { %v700_v56 = vpop.f32.mrb[40].mxu1 }
 0x13e   : > { %v857_v54 = vpop.f32.mrb[40].mxu0  ;;  %v721_v43 = vadd.f32 %v700_v56, %v564_v5  ;;  %v1850_v51 = vpop.f32.mrb[41].mxu1 }
 0x13f   : > { %v884_v46 = vadd.f32 %v857_v54, %v719_v47  ;;  %v1868_v55 = vpop.f32.mrb[41].mxu0  ;;  %v703_v61 = vpop.f32.mrb[42].mxu1 }
 0x140   : > { %v860_v58 = vpop.f32.mrb[42].mxu0  ;;  %v722_v63 = vadd.f32 %v703_v61, %v565_v10  ;;  %v1851_v0 = vpop.f32.mrb[43].mxu1 }
 0x141   : > { %v885_v59 = vadd.f32 %v860_v58, %v720_v52  ;;  %v1869_v60 = vpop.f32.mrb[43].mxu0 }
 0x145   : > { %v708_v4 = vpop.f32.mrb[44].mxu1 }
 0x146   : > { %v865_v2 = vpop.f32.mrb[44].mxu0  ;;  %v723_v7 = vadd.f32 %v708_v4, %v566_v9  ;;  %v1854_v62 = vpop.f32.mrb[45].mxu1 }
 0x147   : > { %v886_v57 = vadd.f32 %v865_v2, %v721_v43  ;;  %v1872_v3 = vpop.f32.mrb[45].mxu0  ;;  %v711_v12 = vpop.f32.mrb[46].mxu1 }
 0x148   : > { %v868_v6 = vpop.f32.mrb[46].mxu0  ;;  %v724_v14 = vadd.f32 %v711_v12, %v567_v23  ;;  %v1855_v36 = vpop.f32.mrb[47].mxu1 }
 0x149   : > { %v887_v8 = vadd.f32 %v868_v6, %v722_v63  ;;  %v1873_v11 = vpop.f32.mrb[47].mxu0 }
 0x14d   : > { %v964_v17 = vpop.f32.mrb[48].mxu1 }
 0x14e   : > { %v873_v15 = vpop.f32.mrb[48].mxu0  ;;  %v1003_v20 = vadd.f32 %v964_v17, %v880_v16  ;;  %v1882_v10 = vpop.f32.mrb[49].mxu1 }
 0x14f   : > { %v888_v5 = vadd.f32 %v873_v15, %v723_v7  ;;  %v1876_v1 = vpop.f32.mrb[49].mxu0  ;;  %v967_v13 = vpop.f32.mrb[50].mxu1 }
 0x150   : > { %v876_v19 = vpop.f32.mrb[50].mxu0  ;;  %v1004_v24 = vadd.f32 %v967_v13, %v881_v34  ;;  %v1883_v25 = vpop.f32.mrb[51].mxu1 }
 0x151   : > { %v889_v21 = vadd.f32 %v876_v19, %v724_v14  ;;  %v1877_v22 = vpop.f32.mrb[51].mxu0 }
 0x155   : > { %v972_v28 = vpop.f32.mrb[52].mxu1 }
 0x156   : > { %v1121_v26 = vpop.f32.mrb[52].mxu0  ;;  %v1005_v30 = vadd.f32 %v972_v28, %v882_v31  ;;  %v1886_v23 = vpop.f32.mrb[53].mxu1 }
 0x157   : > { %v1160_v9 = vadd.f32 %v1121_v26, %v1003_v20  ;;  %v1904_v27 = vpop.f32.mrb[53].mxu0  ;;  %v975_v18 = vpop.f32.mrb[54].mxu1 }
 0x158   : > { %v1124_v29 = vpop.f32.mrb[54].mxu0  ;;  %v1006_v35 = vadd.f32 %v975_v18, %v883_v48  ;;  %v1887_v37 = vpop.f32.mrb[55].mxu1 }
 0x159   : > { %v1161_v32 = vadd.f32 %v1124_v29, %v1004_v24  ;;  %v1905_v33 = vpop.f32.mrb[55].mxu0 }
 0x15d   : > { %v980_v42 = vpop.f32.mrb[56].mxu1 }
 0x15e   : > { %v1129_v39 = vpop.f32.mrb[56].mxu0  ;;  %v1007_v45 = vadd.f32 %v980_v42, %v884_v46  ;;  %v1890_v34 = vpop.f32.mrb[57].mxu1 }
 0x15f   : > { %v1162_v16 = vadd.f32 %v1129_v39, %v1005_v30  ;;  %v1908_v40 = vpop.f32.mrb[57].mxu0  ;;  %v983_v38 = vpop.f32.mrb[58].mxu1 }
 0x160   : > { %v1132_v44 = vpop.f32.mrb[58].mxu0  ;;  %v1008_v49 = vadd.f32 %v983_v38, %v885_v59  ;;  %v1891_v50 = vpop.f32.mrb[59].mxu1 }
 0x161   : > { %v1163_v41 = vadd.f32 %v1132_v44, %v1006_v35  ;;  %v1909_v47 = vpop.f32.mrb[59].mxu0 }
 0x165   : > { %v988_v54 = vpop.f32.mrb[60].mxu1 }
 0x166   : > { %v1137_v52 = vpop.f32.mrb[60].mxu0  ;;  %v1009_v48 = vadd.f32 %v988_v54, %v886_v57  ;;  %v1894_v56 = vpop.f32.mrb[61].mxu1 }
 0x167   : > { %v2392_v31 = vadd.f32 %v1137_v52, %v1007_v45  ;;  %v1912_v53 = vpop.f32.mrb[61].mxu0  ;;  %v991_v51 = vpop.f32.mrb[62].mxu1 }
 0x168   : > { %v1140_v55 = vpop.f32.mrb[62].mxu0  ;;  %v1010_v60 = vadd.f32 %v991_v51, %v887_v8  ;;  %v1895_v46 = vpop.f32.mrb[63].mxu1 }
 0x169   : > { %v2394_v58 = vadd.f32 %v1140_v55, %v1008_v49  ;;  %v1913_v43 = vpop.f32.mrb[63].mxu0 }
 0x16d   : > { %v996_v59 = vpop.f32.mrb[64].mxu1 }
 0x16e   : > { %v1145_v61 = vpop.f32.mrb[64].mxu0  ;;  %v1011_v3 = vadd.f32 %v996_v59, %v888_v5  ;;  %v1898_v4 = vpop.f32.mrb[65].mxu1 }
 0x16f   : > { %v2396_v63 = vadd.f32 %v1145_v61, %v1009_v48  ;;  %v1916_v0 = vpop.f32.mrb[65].mxu0  ;;  %v999_v62 = vpop.f32.mrb[66].mxu1 }
 0x170   : > { %v1148_v2 = vpop.f32.mrb[66].mxu0  ;;  %v1012_v57 = vadd.f32 %v999_v62, %v889_v21  ;;  %v1899_v11 = vpop.f32.mrb[67].mxu1  ;;  %v2407_v21 = vld [vmem:[%s2456_s2] ss:$0 sm:$0xff] }
 0x171   : > { %v2398_v6 = vadd.f32 %v1148_v2, %v1010_v60  ;;  %v1917_v7 = vpop.f32.mrb[67].mxu0 }
 0x175   : > { %v1286_v36 = vpop.f32.mrb[68].mxu1 }
 0x176   : > { %v1153_v12 = vpop.f32.mrb[68].mxu0  ;;  %v1325_v1 = vadd.f32 %v1286_v36, %v1160_v9  ;;  %v1926_v17 = vpop.f32.mrb[69].mxu1 }
 0x177   : > { %v2400_v14 = vadd.f32 %v1153_v12, %v1011_v3  ;;  %v1920_v8 = vpop.f32.mrb[69].mxu0  ;;  %v1289_v5 = vpop.f32.mrb[70].mxu1 }
 0x178   : > { %v1156_v15 = vpop.f32.mrb[70].mxu0  ;;  %v1326_v10 = vadd.f32 %v1289_v5, %v1161_v32  ;;  %v1927_v22 = vpop.f32.mrb[71].mxu1 }
 0x179   : > { %v2402_v19 = vadd.f32 %v1156_v15, %v1012_v57  ;;  %v1921_v20 = vpop.f32.mrb[71].mxu0 }
 0x17d   : > { %v1294_v26 = vpop.f32.mrb[72].mxu1 }
 0x17e   : > { %v1409_v13 = vpop.f32.mrb[72].mxu0  ;;  %v1327_v28 = vadd.f32 %v1294_v26, %v1162_v16  ;;  %v1930_v29 = vpop.f32.mrb[73].mxu1 }
 0x17f   : > { %v1448_v24 = vadd.f32 %v1409_v13, %v1325_v1  ;;  %v1948_v25 = vpop.f32.mrb[73].mxu0  ;;  %v1297_v33 = vpop.f32.mrb[74].mxu1 }
 0x180   : > { %v1412_v27 = vpop.f32.mrb[74].mxu0  ;;  %v1328_v18 = vadd.f32 %v1297_v33, %v1163_v41  ;;  %v1931_v37 = vpop.f32.mrb[75].mxu1 }
 0x181   : > { %v1465_v9 = vadd.f32 %v2407_v21, %v1448_v24  ;;  %v1449_v30 = vadd.f32 %v1412_v27, %v1326_v10  ;;  %v1949_v23 = vpop.f32.mrb[75].mxu0 }
 0x183   : > { %v1475_v32 = vmax.f32 %v1465_v9, 0.0  ;;  %v1466_v35 = vadd.f32 %v2407_v21, %v1449_v30 }
 0x185   : > { %v1704_v39 = vpack.c.bf16 %v1475_v32, %v1475_v32  ;;  %v1476_v16 = vmax.f32 %v1466_v35, 0.0  ;;  %v1302_v34 = vpop.f32.mrb[76].mxu1 }
 0x186   : > { %v1417_v40 = vpop.f32.mrb[76].mxu0  ;;  %v1329_v47 = vadd.f32 %v1302_v34, %v2392_v31  ;;  %v1934_v49 = vpop.f32.mrb[77].mxu1 }
 0x187   : > { %1526 = vst.msk [vmem:[%s2415_s16] sm:$0xf] %vm1525_vm8, %v1704_v39  ;;  %v1705_v42 = vpack.c.bf16 %v1476_v16, %v1476_v16  ;;  %v1450_v44 = vadd.f32 %v1417_v40, %v1327_v28  ;;  %v1952_v45 = vpop.f32.mrb[77].mxu0  ;;  %v1305_v53 = vpop.f32.mrb[78].mxu1 }
 0x188   : > { %v1420_v41 = vpop.f32.mrb[78].mxu0  ;;  %v1330_v55 = vadd.f32 %v1305_v53, %v2394_v58  ;;  %v1935_v56 = vpop.f32.mrb[79].mxu1 }
 0x189   : > { %1527 = vst.msk [vmem:[%s2415_s16 + $0x4] sm:$0xf] %vm1525_vm8, %v1705_v42  ;;  %v1467_v38 = vadd.f32 %v2407_v21, %v1450_v44  ;;  %v1451_v50 = vadd.f32 %v1420_v41, %v1328_v18  ;;  %v1953_v52 = vpop.f32.mrb[79].mxu0 }
 0x18b   : > { %v1477_v54 = vmax.f32 %v1467_v38, 0.0  ;;  %v1468_v48 = vadd.f32 %v2407_v21, %v1451_v50 }
 0x18d   : > { %v1706_v43 = vpack.c.bf16 %v1477_v54, %v1477_v54  ;;  %v1478_v51 = vmax.f32 %v1468_v48, 0.0  ;;  %v1310_v0 = vpop.f32.mrb[80].mxu1 }
 0x18e   : > { %v1425_v60 = vpop.f32.mrb[80].mxu0  ;;  %v1331_v2 = vadd.f32 %v1310_v0, %v2396_v63  ;;  %v1938_v3 = vpop.f32.mrb[81].mxu1 }
 0x18f   : > { %1528 = vst.msk [vmem:[%s2415_s16 + $0x8] sm:$0xf] %vm1525_vm8, %v1706_v43  ;;  %v1707_v46 = vpack.c.bf16 %v1478_v51, %v1478_v51  ;;  %v1452_v31 = vadd.f32 %v1425_v60, %v1329_v47  ;;  %v1956_v61 = vpop.f32.mrb[81].mxu0  ;;  %v1313_v62 = vpop.f32.mrb[82].mxu1 }
 0x190   : > { %v1428_v59 = vpop.f32.mrb[82].mxu0  ;;  %v1332_v11 = vadd.f32 %v1313_v62, %v2398_v6  ;;  %v1939_v8 = vpop.f32.mrb[83].mxu1 }
 0x191   : > { %1529 = vst.msk [vmem:[%s2415_s16 + $0xc] sm:$0xf] %vm1525_vm8, %v1707_v46  ;;  %v1469_v58 = vadd.f32 %v2407_v21, %v1452_v31  ;;  %v1453_v4 = vadd.f32 %v1428_v59, %v1330_v55  ;;  %v1957_v7 = vpop.f32.mrb[83].mxu0 }
 0x193   : > { %v1479_v57 = vmax.f32 %v1469_v58, 0.0  ;;  %v1470_v12 = vadd.f32 %v2407_v21, %v1453_v4 }
 0x195   : > { %v1708_v36 = vpack.c.bf16 %v1479_v57, %v1479_v57  ;;  %v1480_v15 = vmax.f32 %v1470_v12, 0.0  ;;  %v1318_v5 = vpop.f32.mrb[84].mxu1 }
 0x196   : > { %v1433_v1 = vpop.f32.mrb[84].mxu0  ;;  %v1333_v22 = vadd.f32 %v1318_v5, %v2400_v14  ;;  %v1942_v13 = vpop.f32.mrb[85].mxu1 }
 0x197   : > { %1530 = vst.msk [vmem:[%s2415_s16 + $0x10] sm:$0xf] %vm1525_vm8, %v1708_v36  ;;  %v1709_v17 = vpack.c.bf16 %v1480_v15, %v1480_v15  ;;  %v1454_v63 = vadd.f32 %v1433_v1, %v1331_v2  ;;  %v1960_v20 = vpop.f32.mrb[85].mxu0  ;;  %v1321_v26 = vpop.f32.mrb[86].mxu1 }
 0x198   : > { %v1436_v10 = vpop.f32.mrb[86].mxu0  ;;  %v1334_v28 = vadd.f32 %v1321_v26, %v2402_v19  ;;  %v1943_v29 = vpop.f32.mrb[87].mxu1 }
 0x199   : > { %1531 = vst.msk [vmem:[%s2415_s16 + $0x14] sm:$0xf] %vm1525_vm8, %v1709_v17  ;;  %v1471_v6 = vadd.f32 %v2407_v21, %v1454_v63  ;;  %v1455_v24 = vadd.f32 %v1436_v10, %v1332_v11  ;;  %v1961_v25 = vpop.f32.mrb[87].mxu0 }
 0x19b   : > { %v1481_v27 = vmax.f32 %v1471_v6, 0.0  ;;  %v1472_v9 = vadd.f32 %v2407_v21, %v1455_v24 }
 0x19d   : > { %v1710_v30 = vpack.c.bf16 %v1481_v27, %v1481_v27  ;;  %v1482_v23 = vmax.f32 %v1472_v9, 0.0 }
 0x19e   : > { %v1441_v33 = vpop.f32.mrb[88].mxu0 }
 0x19f   : > { %1532 = vst.msk [vmem:[%s2415_s16 + $0x18] sm:$0xf] %vm1525_vm8, %v1710_v30  ;;  %v1711_v14 = vpack.c.bf16 %v1482_v23, %v1482_v23  ;;  %v1456_v32 = vadd.f32 %v1441_v33, %v1333_v22  ;;  %v1964_v18 = vpop.f32.mrb[89].mxu0 }
 0x1a0   : > { %v1444_v35 = vpop.f32.mrb[90].mxu0 }
 0x1a1   : > { %1533 = vst.msk [vmem:[%s2415_s16 + $0x1c] sm:$0xf] %vm1525_vm8, %v1711_v14  ;;  %v1473_v37 = vadd.f32 %v2407_v21, %v1456_v32  ;;  %v1457_v39 = vadd.f32 %v1444_v35, %v1334_v28  ;;  %v1965_v19 = vpop.f32.mrb[91].mxu0 }
 0x1a3   : > { %v1483_v16 = vmax.f32 %v1473_v37, 0.0  ;;  %v1474_v40 = vadd.f32 %v2407_v21, %v1457_v39 }
 0x1a5   : > { %v1712_v42 = vpack.c.bf16 %v1483_v16, %v1483_v16  ;;  %v1484_v44 = vmax.f32 %v1474_v40, 0.0 }
 0x1a7   : > { %1534 = vst.msk [vmem:[%s2415_s16 + $0x20] sm:$0xf] %vm1525_vm8, %v1712_v42  ;;  %v1713_v45 = vpack.c.bf16 %v1484_v44, %v1484_v44 }
 0x1a9   : > { %1535 = vst.msk [vmem:[%s2415_s16 + $0x24] sm:$0xf] %vm1525_vm8, %v1713_v45 }
 0x1aa PF: > { %s13_s12 = sadd.s32 1, %s2018_s12  }
 0x1ab   : > { %p10_p4 = scmp.ge.s32.totalorder %s13_s12, 4  }
 0x1ad   :  { %12 = sbr.rel (!%p10_p4) target bundleno = 1 (0x1), region = 70 }

// kernel: backbone_forward.64
= control target key start
LH: loop header
LB: loop body
LE: loop exit
PB: predicated region body
PF: predicated region fallthrough
CT: control target
= control target key end

     0   :  { %vm110_vm0 = vcmask 523264   ;;  %vm312_vm1 = vcmask 257024   ;;  %s573_s1 = inlined_call_operand.vmem [shape: bf16[64,32], index: 1, kind: input, shape index: {}]   ;;  %s574_s0 = inlined_call_operand.vmem [shape: bf16[128,64], index: 0, kind: input, shape index: {}]   ;;  %s575_s2 = inlined_call_operand.vmem [shape: f32[1,32], index: 2, kind: input, shape index: {}]   ;;  %s576_s3 = inlined_call_operand.vmem [shape: bf16[128,32], index: 3, kind: output, shape index: {}]  }
   0x1   :  { %v430_v0 = vld [vmem:[%s573_s1] sm:$0xff]   ;;  %v431_v1 = vld [vmem:[%s573_s1 + $0x8] sm:$0xff]   ;;  %v432_v2 = vld [vmem:[%s573_s1 + $0x10] sm:$0xff]  }
   0x2   :  { %398 = vmatprep.subr.bf16.mxu0 %v430_v0  ;;  %422 = vmatprep.subr.bf16.mxu1 %v430_v0  ;;  %v434_v3 = vld [vmem:[%s574_s0] sm:$0xff]   ;;  %v433_v5 = vld [vmem:[%s573_s1 + $0x18] sm:$0xff]   ;;  %v436_v6 = vld [vmem:[%s574_s0 + $0x8] sm:$0xff]  }
   0x3   :  { %399 = vmatpush3.bf16.msra.mxu0 %v430_v0  ;;  %426 = vmatpush3.bf16.msra.mxu1 %v430_v0  ;;  %v435_v4 = vld [vmem:[%s574_s0 + $0x20] sm:$0xff]   ;;  %v437_v7 = vld [vmem:[%s574_s0 + $0x28] sm:$0xff]   ;;  %v438_v8 = vld [vmem:[%s574_s0 + $0x10] sm:$0xff]  }
   0x4   :  { %400 = vmatprep.subr.bf16.mxu0 %v431_v1  ;;  %423 = vmatprep.subr.bf16.mxu1 %v431_v1  ;;  %v439_v9 = vld [vmem:[%s574_s0 + $0x30] sm:$0xff]   ;;  %v440_v10 = vld [vmem:[%s574_s0 + $0x18] sm:$0xff]   ;;  %v333_v12 = vld [vmem:[%s575_s2] ss:$0 sm:$0xff] }
   0x5   :  { %406 = vmatprep.mubr.msk.bf16.mxu0 %vm110_vm0, %v434_v3  ;;  %414 = vmatprep.mubr.msk.bf16.mxu1 %vm110_vm0, %v435_v4  ;;  %v441_v11 = vld [vmem:[%s574_s0 + $0x38] sm:$0xff]  }
   0x7   :  { %401 = vmatpush3.bf16.msra.mxu0 %v431_v1  ;;  %427 = vmatpush3.bf16.msra.mxu1 %v431_v1 }
   0x8   :  { %402 = vmatprep.subr.bf16.mxu0 %v432_v2  ;;  %424 = vmatprep.subr.bf16.mxu1 %v432_v2 }
   0xb   :  { %403 = vmatpush3.bf16.msra.mxu0 %v432_v2  ;;  %428 = vmatpush3.bf16.msra.mxu1 %v432_v2 }
   0xc   :  { %404 = vmatprep.subr.bf16.mxu0 %v433_v5  ;;  %425 = vmatprep.subr.bf16.mxu1 %v433_v5 }
   0xf   :  { %405 = vmatpush3.bf16.msra.mxu0 %v433_v5  ;;  %429 = vmatpush3.bf16.msra.mxu1 %v433_v5 }
  0x12   :  { %407 = vmatmul.mubr.msk.bf16.vlgmr.msra.gmra.mrb[0].mxu0 %vm110_vm0, %v436_v6  ;;  %415 = vmatmul.mubr.msk.bf16.vlgmr.msra.gmra.mrb[0].mxu1 %vm110_vm0, %v437_v7 }
  0x13   :  { %410 = vmatprep.mubr.msk.bf16.mxu0 %vm110_vm0, %v438_v8  ;;  %418 = vmatprep.mubr.msk.bf16.mxu1 %vm110_vm0, %v439_v9 }
  0x1a   :  { %411 = vmatmul.mubr.msk.bf16.gmra.mrb[4].mxu0 %vm110_vm0, %v440_v10  ;;  %419 = vmatmul.mubr.msk.bf16.gmra.mrb[4].mxu1 %vm110_vm0, %v441_v11 }
  0xe5   :  { %v408_v13 = vpop.f32.mrb[0].mxu0  ;;  %v416_v14 = vpop.f32.mrb[0].mxu1 }
  0xe6   :  { %v178_v15 = vadd.f32 %v408_v13, %v333_v12  ;;  %v210_v16 = vadd.f32 %v416_v14, %v333_v12  ;;  %v169_v17 = vpop.f32.mrb[1].mxu0  ;;  %v201_v18 = vpop.f32.mrb[1].mxu1 }
  0xe7   :  { %v170_v19 = vadd.f32 %v333_v12, %v169_v17  ;;  %v202_v20 = vadd.f32 %v333_v12, %v201_v18  ;;  %v409_v21 = vpop.f32.mrb[2].mxu0  ;;  %v417_v22 = vpop.f32.mrb[2].mxu1 }
  0xe8   :  { %v234_v23 = vmax.f32 %v178_v15, 0.0  ;;  %v242_v24 = vmax.f32 %v210_v16, 0.0  ;;  %v181_v25 = vadd.f32 %v409_v21, %v333_v12  ;;  %v213_v26 = vadd.f32 %v417_v22, %v333_v12  ;;  %v172_v27 = vpop.f32.mrb[3].mxu0  ;;  %v204_v28 = vpop.f32.mrb[3].mxu1 }
  0xe9   :  { %v232_v29 = vmax.f32 %v170_v19, 0.0  ;;  %v240_v30 = vmax.f32 %v202_v20, 0.0  ;;  %v173_v31 = vadd.f32 %v333_v12, %v172_v27  ;;  %v205_v32 = vadd.f32 %v333_v12, %v204_v28 }
  0xea   :  { %v372_v33 = vpack.c.bf16 %v234_v23, %v234_v23  ;;  %v380_v34 = vpack.c.bf16 %v242_v24, %v242_v24  ;;  %v235_v35 = vmax.f32 %v181_v25, 0.0  ;;  %v243_v36 = vmax.f32 %v213_v26, 0.0 }
  0xeb   :  { %v370_v37 = vpack.c.bf16 %v232_v29, %v232_v29  ;;  %v378_v38 = vpack.c.bf16 %v240_v30, %v240_v30  ;;  %v233_v39 = vmax.f32 %v173_v31, 0.0  ;;  %v241_v40 = vmax.f32 %v205_v32, 0.0 }
  0xec   :  { %315 = vst.msk [vmem:[%s576_s3 + $0x8] sm:$0xf] %vm312_vm1, %v372_v33  ;;  %323 = vst.msk [vmem:[%s576_s3 + $0x28] sm:$0xf] %vm312_vm1, %v380_v34  ;;  %v373_v41 = vpack.c.bf16 %v235_v35, %v235_v35  ;;  %v381_v42 = vpack.c.bf16 %v243_v36, %v243_v36 }
  0xed   :  { %313 = vst.msk [vmem:[%s576_s3] sm:$0xf] %vm312_vm1, %v370_v37  ;;  %321 = vst.msk [vmem:[%s576_s3 + $0x20] sm:$0xf] %vm312_vm1, %v378_v38  ;;  %v371_v43 = vpack.c.bf16 %v233_v39, %v233_v39  ;;  %v379_v44 = vpack.c.bf16 %v241_v40, %v241_v40  ;;  %v412_v45 = vpop.f32.mrb[4].mxu0  ;;  %v420_v46 = vpop.f32.mrb[4].mxu1 }
  0xee   :  { %316 = vst.msk [vmem:[%s576_s3 + $0xc] sm:$0xf] %vm312_vm1, %v373_v41  ;;  %324 = vst.msk [vmem:[%s576_s3 + $0x2c] sm:$0xf] %vm312_vm1, %v381_v42  ;;  %v194_v47 = vadd.f32 %v412_v45, %v333_v12  ;;  %v226_v48 = vadd.f32 %v420_v46, %v333_v12  ;;  %v185_v49 = vpop.f32.mrb[5].mxu0  ;;  %v217_v50 = vpop.f32.mrb[5].mxu1 }
  0xef   :  { %314 = vst.msk [vmem:[%s576_s3 + $0x4] sm:$0xf] %vm312_vm1, %v371_v43  ;;  %322 = vst.msk [vmem:[%s576_s3 + $0x24] sm:$0xf] %vm312_vm1, %v379_v44  ;;  %v186_v51 = vadd.f32 %v333_v12, %v185_v49  ;;  %v218_v52 = vadd.f32 %v333_v12, %v217_v50  ;;  %v413_v53 = vpop.f32.mrb[6].mxu0  ;;  %v421_v54 = vpop.f32.mrb[6].mxu1 }
  0xf0   :  { %v238_v55 = vmax.f32 %v194_v47, 0.0  ;;  %v246_v56 = vmax.f32 %v226_v48, 0.0  ;;  %v197_v57 = vadd.f32 %v413_v53, %v333_v12  ;;  %v229_v58 = vadd.f32 %v421_v54, %v333_v12  ;;  %v188_v59 = vpop.f32.mrb[7].mxu0  ;;  %v220_v60 = vpop.f32.mrb[7].mxu1 }
  0xf1   :  { %v236_v61 = vmax.f32 %v186_v51, 0.0  ;;  %v244_v62 = vmax.f32 %v218_v52, 0.0  ;;  %v189_v63 = vadd.f32 %v333_v12, %v188_v59  ;;  %v221_v0 = vadd.f32 %v333_v12, %v220_v60 }
  0xf2   :  { %v376_v1 = vpack.c.bf16 %v238_v55, %v238_v55  ;;  %v384_v2 = vpack.c.bf16 %v246_v56, %v246_v56  ;;  %v239_v3 = vmax.f32 %v197_v57, 0.0  ;;  %v247_v4 = vmax.f32 %v229_v58, 0.0 }
  0xf3   :  { %v374_v5 = vpack.c.bf16 %v236_v61, %v236_v61  ;;  %v382_v6 = vpack.c.bf16 %v244_v62, %v244_v62  ;;  %v237_v7 = vmax.f32 %v189_v63, 0.0  ;;  %v245_v8 = vmax.f32 %v221_v0, 0.0 }
  0xf4   :  { %319 = vst.msk [vmem:[%s576_s3 + $0x18] sm:$0xf] %vm312_vm1, %v376_v1  ;;  %327 = vst.msk [vmem:[%s576_s3 + $0x38] sm:$0xf] %vm312_vm1, %v384_v2  ;;  %v377_v9 = vpack.c.bf16 %v239_v3, %v239_v3  ;;  %v385_v10 = vpack.c.bf16 %v247_v4, %v247_v4 }
  0xf5   :  { %317 = vst.msk [vmem:[%s576_s3 + $0x10] sm:$0xf] %vm312_vm1, %v374_v5  ;;  %325 = vst.msk [vmem:[%s576_s3 + $0x30] sm:$0xf] %vm312_vm1, %v382_v6  ;;  %v375_v11 = vpack.c.bf16 %v237_v7, %v237_v7  ;;  %v383_v12 = vpack.c.bf16 %v245_v8, %v245_v8 }
  0xf6   :  { %320 = vst.msk [vmem:[%s576_s3 + $0x1c] sm:$0xf] %vm312_vm1, %v377_v9  ;;  %328 = vst.msk [vmem:[%s576_s3 + $0x3c] sm:$0xf] %vm312_vm1, %v385_v10 }
  0xf7   :  { %318 = vst.msk [vmem:[%s576_s3 + $0x14] sm:$0xf] %vm312_vm1, %v375_v11  ;;  %326 = vst.msk [vmem:[%s576_s3 + $0x34] sm:$0xf] %vm312_vm1, %v383_v12 }

// kernel: backbone_forward.67
= control target key start
LH: loop header
LB: loop body
LE: loop exit
PB: predicated region body
PF: predicated region fallthrough
CT: control target
= control target key end

     0   :  { %vm55_vm0 = vcmask 261120   ;;  %s254_s1 = inlined_call_operand.vmem [shape: bf16[32,128], index: 1, kind: input, shape index: {}]   ;;  %s255_s0 = inlined_call_operand.vmem [shape: bf16[32,32], index: 0, kind: input, shape index: {}]   ;;  %s256_s3 = inlined_call_operand.vmem [shape: bf16[32,128], index: 3, kind: input, shape index: {}]   ;;  %s257_s2 = inlined_call_operand.vmem [shape: f32[1,128], index: 2, kind: input, shape index: {}]   ;;  %s258_s4 = inlined_call_operand.vmem [shape: bf16[32,128], index: 4, kind: output, shape index: {}]  }
   0x1   :  { %v198_v0 = vld [vmem:[%s254_s1] sm:$0xff]   ;;  %v199_v1 = vld [vmem:[%s254_s1 + $0x8] sm:$0xff]  }
   0x2   :  { %190 = vmatprep.subr.bf16.mxu0 %v198_v0  ;;  %v200_v2 = vld [vmem:[%s255_s0] sm:$0xff]   ;;  %v201_v3 = vld [vmem:[%s255_s0 + $0x8] sm:$0xff]  }
   0x3   :  { %191 = vmatpush3.bf16.msra.mxu0 %v198_v0  ;;  %194 = vmatprep.mubr.msk.bf16.mxu0 %vm55_vm0, %v200_v2  ;;  %v184_v4 = vld [vmem:[%s256_s3 + $0x8] sm:$0xff]   ;;  %v167_v5 = vld [vmem:[%s256_s3] sm:$0xff]  }
   0x4   :  { %192 = vmatprep.subr.bf16.mxu0 %v199_v1  ;;  %v151_v6 = vld [vmem:[%s257_s2] ss:$0 sm:$0xff]  ;;  %v172_v7 = vunpack.c.l.bf16 %v184_v4  ;;  %v168_v9 = vunpack.c.l.bf16 %v167_v5  ;;  %v173_v12 = vunpack.c.h.bf16 %v184_v4  ;;  %v169_v15 = vunpack.c.h.bf16 %v167_v5 }
   0x7   :  { %193 = vmatpush3.bf16.msra.mxu0 %v199_v1 }
   0xa   :  { %195 = vmatmul.mubr.msk.bf16.vlgmr.msra.gmra.mrb[0].mxu0 %vm55_vm0, %v201_v3 }
  0xdd   :  { %v196_v8 = vpop.f32.mrb[0].mxu0 }
  0xde   :  { %v105_v10 = vadd.f32 %v196_v8, %v151_v6  ;;  %v96_v11 = vpop.f32.mrb[1].mxu0 }
  0xdf   :  { %v97_v13 = vadd.f32 %v151_v6, %v96_v11  ;;  %v197_v14 = vpop.f32.mrb[2].mxu0 }
  0xe0   :  { %v121_v16 = vadd.f32 %v172_v7, %v105_v10  ;;  %v108_v17 = vadd.f32 %v197_v14, %v151_v6  ;;  %v99_v18 = vpop.f32.mrb[3].mxu0 }
  0xe1   :  { %v119_v19 = vadd.f32 %v168_v9, %v97_v13  ;;  %v100_v20 = vadd.f32 %v151_v6, %v99_v18 }
  0xe2   :  { %v122_v21 = vadd.f32 %v173_v12, %v108_v17  ;;  %v125_v23 = vmax.f32 %v121_v16, 0.0 }
  0xe3   :  { %v120_v22 = vadd.f32 %v169_v15, %v100_v20  ;;  %v123_v25 = vmax.f32 %v119_v19, 0.0 }
  0xe4   :  { %v126_v24 = vmax.f32 %v122_v21, 0.0 }
  0xe5   :  { %v124_v26 = vmax.f32 %v120_v22, 0.0 }
  0xe6   :  { %v182_v27 = vpack.c.bf16 %v126_v24, %v125_v23 }
  0xe7   :  { %v177_v28 = vpack.c.bf16 %v124_v26, %v123_v25 }
  0xe8   :  { %185 = vst [vmem:[%s258_s4 + $0x8] sm:$0xff] %v182_v27  }
  0xe9   :  { %178 = vst [vmem:[%s258_s4] sm:$0xff] %v177_v28  }

// kernel: backbone_forward.65
= control target key start
LH: loop header
LB: loop body
LE: loop exit
PB: predicated region body
PF: predicated region fallthrough
CT: control target
= control target key end

     0   :  { %vm204_vm0 = vcmask 261120   ;;  %vm329_vm1 = vcmask 257024   ;;  %s550_s1 = inlined_call_operand.vmem [shape: bf16[288,32], index: 1, kind: input, shape index: {}]   ;;  %s551_s0 = inlined_call_operand.vmem [shape: bf16[32,288], index: 0, kind: input, shape index: {}]   ;;  %s552_s2 = inlined_call_operand.vmem [shape: f32[1,32], index: 2, kind: input, shape index: {}]   ;;  %s553_s3 = inlined_call_operand.vmem [shape: bf16[32,32], index: 3, kind: output, shape index: {}]  }
   0x1   :  { %v413_v0 = vld [vmem:[%s550_s1 + $0x40] sm:$0xff]   ;;  %v415_v2 = vld [vmem:[%s550_s1 + $0x48] sm:$0xff]   ;;  %v417_v4 = vld [vmem:[%s550_s1 + $0x50] sm:$0xff]  }
   0x2   :  { %v414_v1 = vld [vmem:[%s550_s1] sm:$0xff]   ;;  %373 = vmatprep.subr.bf16.mxu0 %v413_v0  ;;  %v416_v3 = vld [vmem:[%s550_s1 + $0x8] sm:$0xff]   ;;  %v418_v5 = vld [vmem:[%s550_s1 + $0x10] sm:$0xff]  }
   0x3   :  { %374 = vmatpush3.bf16.msra.mxu0 %v414_v1  ;;  %v419_v6 = vld [vmem:[%s550_s1 + $0x58] sm:$0xff]   ;;  %v421_v8 = vld [vmem:[%s550_s1 + $0x60] sm:$0xff]   ;;  %v423_v11 = vld [vmem:[%s550_s1 + $0x68] sm:$0xff]  }
   0x4   :  { %375 = vmatprep.subr.bf16.mxu0 %v415_v2  ;;  %v420_v7 = vld [vmem:[%s550_s1 + $0x18] sm:$0xff]   ;;  %v422_v9 = vld [vmem:[%s550_s1 + $0x20] sm:$0xff]   ;;  %v424_v12 = vld [vmem:[%s550_s1 + $0x28] sm:$0xff]  }
   0x5   :  { %v428_v10 = vld [vmem:[%s550_s1 + $0x80] sm:$0xff]   ;;  %v425_v13 = vld [vmem:[%s550_s1 + $0x70] sm:$0xff]   ;;  %v433_v15 = vld [vmem:[%s550_s1 + $0x88] sm:$0xff]  }
   0x6   :  { %405 = vmatprep.subr.bf16.mxu1 %v428_v10  ;;  %v432_v14 = vld [vmem:[%s551_s0 + $0x4] ss:$12 sps:$4 sm:$0xff]   ;;  %v434_v16 = vld [vmem:[%s551_s0 + $0x8] ss:$12 sps:$4 sm:$0xff]   ;;  %v435_v17 = vld [vmem:[%s551_s0 + $0x20] ss:$12 sps:$4 sm:$0xff]  }
   0x7   :  { %376 = vmatpush3.bf16.msra.mxu0 %v416_v3  ;;  %406 = vmatpush3.bf16.msra.mxu1 %v428_v10  ;;  %v426_v18 = vld [vmem:[%s550_s1 + $0x30] sm:$0xff]   ;;  %v427_v19 = vld [vmem:[%s550_s1 + $0x78] sm:$0xff]   ;;  %v430_v21 = vld [vmem:[%s551_s0] ss:$12 sps:$4 sm:$0xff]  }
   0x8   :  { %377 = vmatprep.subr.bf16.mxu0 %v417_v4  ;;  %243 = vmatprep.mubr.bf16.mxu0 %v432_v14  ;;  %v429_v20 = vld [vmem:[%s550_s1 + $0x38] sm:$0xff]   ;;  %v338_v30 = vld [vmem:[%s552_s2] ss:$0 sm:$0xff] }
   0x9   :  { %407 = vmatprep.subr.bf16.mxu1 %v433_v15  ;;  %409 = vmatprep.mubr.msk.bf16.mxu1 %vm204_vm0, %v434_v16  ;;  %v436_v22 = vld [vmem:[%s551_s0 + $0x1c] ss:$12 sps:$4 sm:$0xff]   ;;  %v438_v23 = vld [vmem:[%s551_s0 + $0x18] ss:$12 sps:$4 sm:$0xff]  }
   0xb   :  { %378 = vmatpush3.bf16.msra.mxu0 %v418_v5  ;;  %408 = vmatpush3.bf16.msra.mxu1 %v433_v15 }
   0xc   :  { %379 = vmatprep.subr.bf16.mxu0 %v419_v6 }
   0xe   :  { %410 = vmatmul.mubr.msk.bf16.vlgmr.msra.gmra.mrb[0].mxu1 %vm204_vm0, %v435_v17 }
   0xf   :  { %380 = vmatpush3.bf16.msra.mxu0 %v420_v7 }
  0x10   :  { %381 = vmatprep.subr.bf16.mxu0 %v421_v8 }
  0x13   :  { %382 = vmatpush3.bf16.msra.mxu0 %v422_v9 }
  0x14   :  { %383 = vmatprep.subr.bf16.mxu0 %v423_v11 }
  0x17   :  { %384 = vmatpush3.bf16.msra.mxu0 %v424_v12 }
  0x18   :  { %385 = vmatprep.subr.bf16.mxu0 %v425_v13 }
  0x1b   :  { %386 = vmatpush3.bf16.msra.mxu0 %v426_v18 }
  0x1c   :  { %387 = vmatprep.subr.bf16.mxu0 %v427_v19 }
  0x1f   :  { %388 = vmatpush3.bf16.msra.mxu0 %v429_v20 }
  0x22   :  { %244 = vmatmul.mubr.bf16.vlgmr.msra.gmra.mrb[0].mxu0 %v430_v21 }
  0x23   :  { %251 = vmatprep.mubr.bf16.mxu0 %v436_v22 }
  0x2a   :  { %252 = vmatmul.mubr.bf16.gmra.mrb[4].mxu0 %v438_v23 }
  0xe1   :  { %v411_v24 = vpop.f32.mrb[0].mxu1 }
  0xe2   :  { %v294_v25 = vpop.f32.mrb[1].mxu1 }
  0xe3   :  { %v412_v26 = vpop.f32.mrb[2].mxu1 }
  0xe4   :  { %v297_v27 = vpop.f32.mrb[3].mxu1 }
  0xf5   :  { %v389_v28 = vpop.f32.mrb[0].mxu0 }
  0xf6   :  { %v390_v29 = vpop.f32.mrb[1].mxu0 }
  0xf7   :  { %v391_v31 = vadd.f32 %v390_v29, %v389_v28  ;;  %v392_v32 = vpop.f32.mrb[2].mxu0 }
  0xf8   :  { %v393_v33 = vpop.f32.mrb[3].mxu0 }
  0xf9   :  { %v394_v34 = vadd.f32 %v393_v33, %v392_v32  ;;  %v246_v35 = vadd.f32 %v391_v31, %v338_v30 }
  0xfb   :  { %v295_v36 = vadd.f32 %v294_v25, %v246_v35  ;;  %v249_v37 = vadd.f32 %v394_v34, %v338_v30 }
  0xfd   :  { %v309_v38 = vmax.f32 %v295_v36, 0.0  ;;  %v298_v39 = vadd.f32 %v297_v27, %v249_v37  ;;  %v395_v40 = vpop.f32.mrb[4].mxu0 }
  0xfe   :  { %v396_v41 = vpop.f32.mrb[5].mxu0 }
  0xff   :  { %v369_v42 = vpack.c.bf16 %v309_v38, %v309_v38  ;;  %v310_v43 = vmax.f32 %v298_v39, 0.0  ;;  %v397_v44 = vadd.f32 %v396_v41, %v395_v40  ;;  %v398_v45 = vpop.f32.mrb[6].mxu0 }
 0x100   :  { %v399_v46 = vpop.f32.mrb[7].mxu0 }
 0x101   :  { %330 = vst.msk [vmem:[%s553_s3] sm:$0xf] %vm329_vm1, %v369_v42  ;;  %v370_v47 = vpack.c.bf16 %v310_v43, %v310_v43  ;;  %v254_v48 = vadd.f32 %v397_v44, %v338_v30  ;;  %v400_v49 = vadd.f32 %v399_v46, %v398_v45 }
 0x103   :  { %331 = vst.msk [vmem:[%s553_s3 + $0x4] sm:$0xf] %vm329_vm1, %v370_v47  ;;  %v303_v50 = vadd.f32 %v411_v24, %v254_v48  ;;  %v257_v51 = vadd.f32 %v400_v49, %v338_v30 }
 0x105   :  { %v311_v52 = vmax.f32 %v303_v50, 0.0  ;;  %v306_v53 = vadd.f32 %v412_v26, %v257_v51 }
 0x107   :  { %v371_v54 = vpack.c.bf16 %v311_v52, %v311_v52  ;;  %v312_v55 = vmax.f32 %v306_v53, 0.0 }
 0x109   :  { %332 = vst.msk [vmem:[%s553_s3 + $0x8] sm:$0xf] %vm329_vm1, %v371_v54  ;;  %v372_v56 = vpack.c.bf16 %v312_v55, %v312_v55 }
 0x10b   :  { %333 = vst.msk [vmem:[%s553_s3 + $0xc] sm:$0xf] %vm329_vm1, %v372_v56 }

// kernel: backbone_forward.66
= control target key start
LH: loop header
LB: loop body
LE: loop exit
PB: predicated region body
PF: predicated region fallthrough
CT: control target
= control target key end

     0   :  { %vm68_vm0 = vcmask 523264   ;;  %s247_s1 = inlined_call_operand.vmem [shape: bf16[64,128], index: 1, kind: input, shape index: {}]   ;;  %s248_s0 = inlined_call_operand.vmem [shape: bf16[32,64], index: 0, kind: input, shape index: {}]   ;;  %s249_s2 = inlined_call_operand.vmem [shape: f32[1,128], index: 2, kind: input, shape index: {}]   ;;  %s250_s3 = inlined_call_operand.vmem [shape: bf16[32,128], index: 3, kind: output, shape index: {}]  }
   0x1   :  { %v194_v0 = vld [vmem:[%s247_s1] sm:$0xff]   ;;  %v195_v1 = vld [vmem:[%s247_s1 + $0x8] sm:$0xff]   ;;  %v196_v2 = vld [vmem:[%s247_s1 + $0x10] sm:$0xff]  }
   0x2   :  { %182 = vmatprep.subr.bf16.mxu0 %v194_v0  ;;  %v198_v3 = vld [vmem:[%s248_s0] sm:$0xff]   ;;  %v197_v4 = vld [vmem:[%s247_s1 + $0x18] sm:$0xff]   ;;  %v199_v5 = vld [vmem:[%s248_s0 + $0x8] sm:$0xff]  }
   0x3   :  { %183 = vmatpush3.bf16.msra.mxu0 %v194_v0  ;;  %190 = vmatprep.mubr.msk.bf16.mxu0 %vm68_vm0, %v198_v3  ;;  %v148_v7 = vld [vmem:[%s249_s2] ss:$0 sm:$0xff] }
   0x4   :  { %184 = vmatprep.subr.bf16.mxu0 %v195_v1 }
   0x7   :  { %185 = vmatpush3.bf16.msra.mxu0 %v195_v1 }
   0x8   :  { %186 = vmatprep.subr.bf16.mxu0 %v196_v2 }
   0xb   :  { %187 = vmatpush3.bf16.msra.mxu0 %v196_v2 }
   0xc   :  { %188 = vmatprep.subr.bf16.mxu0 %v197_v4 }
   0xf   :  { %189 = vmatpush3.bf16.msra.mxu0 %v197_v4 }
  0x12   :  { %191 = vmatmul.mubr.msk.bf16.vlgmr.msra.gmra.mrb[0].mxu0 %vm68_vm0, %v199_v5 }
  0xe5   :  { %v192_v6 = vpop.f32.mrb[0].mxu0 }
  0xe6   :  { %v109_v8 = vpop.f32.mrb[1].mxu0  ;;  %v118_v10 = vadd.f32 %v192_v6, %v148_v7 }
  0xe7   :  { %v193_v9 = vpop.f32.mrb[2].mxu0  ;;  %v110_v13 = vadd.f32 %v148_v7, %v109_v8 }
  0xe8   :  { %v121_v11 = vadd.f32 %v193_v9, %v148_v7  ;;  %v112_v12 = vpop.f32.mrb[3].mxu0 }
  0xe9   :  { %v113_v14 = vadd.f32 %v148_v7, %v112_v12 }
  0xea   :  { %v173_v15 = vpack.c.bf16 %v121_v11, %v118_v10 }
  0xeb   :  { %v168_v16 = vpack.c.bf16 %v113_v14, %v110_v13 }
  0xec   :  { %175 = vst [vmem:[%s250_s3 + $0x8] sm:$0xff] %v173_v15  }
  0xed   :  { %169 = vst [vmem:[%s250_s3] sm:$0xff] %v168_v16  }

// kernel: backbone_forward.68
= control target key start
LH: loop header
LB: loop body
LE: loop exit
PB: predicated region body
PF: predicated region fallthrough
CT: control target
= control target key end

     0   :  { %vm171_vm0 = vcmask 257024   ;;  %s304_s1 = inlined_call_operand.vmem [shape: bf16[128,32], index: 1, kind: input, shape index: {}]   ;;  %s305_s0 = inlined_call_operand.vmem [shape: bf16[32,128], index: 0, kind: input, shape index: {}]   ;;  %s306_s2 = inlined_call_operand.vmem [shape: f32[1,32], index: 2, kind: input, shape index: {}]   ;;  %s307_s3 = inlined_call_operand.vmem [shape: bf16[32,32], index: 3, kind: output, shape index: {}]  }
   0x1   :  { %v229_v0 = vld [vmem:[%s304_s1] sm:$0xff]   ;;  %v230_v1 = vld [vmem:[%s304_s1 + $0x8] sm:$0xff]   ;;  %v231_v2 = vld [vmem:[%s304_s1 + $0x10] sm:$0xff]  }
   0x2   :  { %209 = vmatprep.subr.bf16.mxu0 %v229_v0  ;;  %v232_v3 = vld [vmem:[%s304_s1 + $0x18] sm:$0xff]   ;;  %v237_v4 = vld [vmem:[%s305_s0] sm:$0xff]   ;;  %v234_v6 = vld [vmem:[%s304_s1 + $0x28] sm:$0xff]  }
   0x3   :  { %210 = vmatpush3.bf16.msra.mxu0 %v229_v0  ;;  %225 = vmatprep.mubr.bf16.mxu0 %v237_v4  ;;  %v233_v5 = vld [vmem:[%s304_s1 + $0x20] sm:$0xff]   ;;  %v235_v7 = vld [vmem:[%s304_s1 + $0x30] sm:$0xff]   ;;  %v236_v8 = vld [vmem:[%s304_s1 + $0x38] sm:$0xff]  }
   0x4   :  { %211 = vmatprep.subr.bf16.mxu0 %v230_v1  ;;  %v238_v9 = vld [vmem:[%s305_s0 + $0x8] sm:$0xff]   ;;  %v180_v10 = vld [vmem:[%s306_s2] ss:$0 sm:$0xff] }
   0x7   :  { %212 = vmatpush3.bf16.msra.mxu0 %v230_v1 }
   0x8   :  { %213 = vmatprep.subr.bf16.mxu0 %v231_v2 }
   0xb   :  { %214 = vmatpush3.bf16.msra.mxu0 %v231_v2 }
   0xc   :  { %215 = vmatprep.subr.bf16.mxu0 %v232_v3 }
   0xf   :  { %216 = vmatpush3.bf16.msra.mxu0 %v232_v3 }
  0x10   :  { %217 = vmatprep.subr.bf16.mxu0 %v233_v5 }
  0x13   :  { %218 = vmatpush3.bf16.msra.mxu0 %v233_v5 }
  0x14   :  { %219 = vmatprep.subr.bf16.mxu0 %v234_v6 }
  0x17   :  { %220 = vmatpush3.bf16.msra.mxu0 %v234_v6 }
  0x18   :  { %221 = vmatprep.subr.bf16.mxu0 %v235_v7 }
  0x1b   :  { %222 = vmatpush3.bf16.msra.mxu0 %v235_v7 }
  0x1c   :  { %223 = vmatprep.subr.bf16.mxu0 %v236_v8 }
  0x1f   :  { %224 = vmatpush3.bf16.msra.mxu0 %v236_v8 }
  0x22   :  { %226 = vmatmul.mubr.bf16.vlgmr.msra.gmra.mrb[0].mxu0 %v238_v9 }
  0xf5   :  { %v227_v11 = vpop.f32.mrb[0].mxu0 }
  0xf6   :  { %v145_v12 = vadd.f32 %v227_v11, %v180_v10  ;;  %v136_v13 = vpop.f32.mrb[1].mxu0 }
  0xf7   :  { %v137_v14 = vadd.f32 %v180_v10, %v136_v13  ;;  %v228_v15 = vpop.f32.mrb[2].mxu0 }
  0xf8   :  { %v153_v16 = vmax.f32 %v145_v12, 0.0  ;;  %v148_v17 = vadd.f32 %v228_v15, %v180_v10  ;;  %v139_v18 = vpop.f32.mrb[3].mxu0 }
  0xf9   :  { %v151_v19 = vmax.f32 %v137_v14, 0.0  ;;  %v140_v20 = vadd.f32 %v180_v10, %v139_v18 }
  0xfa   :  { %v197_v21 = vpack.c.bf16 %v153_v16, %v153_v16  ;;  %v154_v22 = vmax.f32 %v148_v17, 0.0 }
  0xfb   :  { %v195_v23 = vpack.c.bf16 %v151_v19, %v151_v19  ;;  %v152_v24 = vmax.f32 %v140_v20, 0.0 }
  0xfc   :  { %174 = vst.msk [vmem:[%s307_s3 + $0x8] sm:$0xf] %vm171_vm0, %v197_v21  ;;  %v198_v25 = vpack.c.bf16 %v154_v22, %v154_v22 }
  0xfd   :  { %172 = vst.msk [vmem:[%s307_s3] sm:$0xf] %vm171_vm0, %v195_v23  ;;  %v196_v26 = vpack.c.bf16 %v152_v24, %v152_v24 }
  0xfe   :  { %175 = vst.msk [vmem:[%s307_s3 + $0xc] sm:$0xf] %vm171_vm0, %v198_v25 }
  0xff   :  { %173 = vst.msk [vmem:[%s307_s3 + $0x4] sm:$0xf] %vm171_vm0, %v196_v26 }

// kernel: backbone_forward.77
= control target key start
LH: loop header
LB: loop body
LE: loop exit
PB: predicated region body
PF: predicated region fallthrough
CT: control target
= control target key end

     0   :  { %vm171_vm0 = vcmask 519168   ;;  %s304_s1 = inlined_call_operand.vmem [shape: bf16[128,64], index: 1, kind: input, shape index: {}]   ;;  %s305_s0 = inlined_call_operand.vmem [shape: bf16[32,128], index: 0, kind: input, shape index: {}]   ;;  %s306_s2 = inlined_call_operand.vmem [shape: f32[1,64], index: 2, kind: input, shape index: {}]   ;;  %s307_s3 = inlined_call_operand.vmem [shape: bf16[32,64], index: 3, kind: output, shape index: {}]  }
   0x1   :  { %v229_v0 = vld [vmem:[%s304_s1] sm:$0xff]   ;;  %v230_v1 = vld [vmem:[%s304_s1 + $0x8] sm:$0xff]   ;;  %v231_v2 = vld [vmem:[%s304_s1 + $0x10] sm:$0xff]  }
   0x2   :  { %209 = vmatprep.subr.bf16.mxu0 %v229_v0  ;;  %v232_v3 = vld [vmem:[%s304_s1 + $0x18] sm:$0xff]   ;;  %v237_v4 = vld [vmem:[%s305_s0] sm:$0xff]   ;;  %v234_v6 = vld [vmem:[%s304_s1 + $0x28] sm:$0xff]  }
   0x3   :  { %210 = vmatpush3.bf16.msra.mxu0 %v229_v0  ;;  %225 = vmatprep.mubr.bf16.mxu0 %v237_v4  ;;  %v233_v5 = vld [vmem:[%s304_s1 + $0x20] sm:$0xff]   ;;  %v235_v7 = vld [vmem:[%s304_s1 + $0x30] sm:$0xff]   ;;  %v236_v8 = vld [vmem:[%s304_s1 + $0x38] sm:$0xff]  }
   0x4   :  { %211 = vmatprep.subr.bf16.mxu0 %v230_v1  ;;  %v238_v9 = vld [vmem:[%s305_s0 + $0x8] sm:$0xff]   ;;  %v180_v10 = vld [vmem:[%s306_s2] ss:$0 sm:$0xff] }
   0x7   :  { %212 = vmatpush3.bf16.msra.mxu0 %v230_v1 }
   0x8   :  { %213 = vmatprep.subr.bf16.mxu0 %v231_v2 }
   0xb   :  { %214 = vmatpush3.bf16.msra.mxu0 %v231_v2 }
   0xc   :  { %215 = vmatprep.subr.bf16.mxu0 %v232_v3 }
   0xf   :  { %216 = vmatpush3.bf16.msra.mxu0 %v232_v3 }
  0x10   :  { %217 = vmatprep.subr.bf16.mxu0 %v233_v5 }
  0x13   :  { %218 = vmatpush3.bf16.msra.mxu0 %v233_v5 }
  0x14   :  { %219 = vmatprep.subr.bf16.mxu0 %v234_v6 }
  0x17   :  { %220 = vmatpush3.bf16.msra.mxu0 %v234_v6 }
  0x18   :  { %221 = vmatprep.subr.bf16.mxu0 %v235_v7 }
  0x1b   :  { %222 = vmatpush3.bf16.msra.mxu0 %v235_v7 }
  0x1c   :  { %223 = vmatprep.subr.bf16.mxu0 %v236_v8 }
  0x1f   :  { %224 = vmatpush3.bf16.msra.mxu0 %v236_v8 }
  0x22   :  { %226 = vmatmul.mubr.bf16.vlgmr.msra.gmra.mrb[0].mxu0 %v238_v9 }
  0xf5   :  { %v227_v11 = vpop.f32.mrb[0].mxu0 }
  0xf6   :  { %v145_v12 = vadd.f32 %v227_v11, %v180_v10  ;;  %v136_v13 = vpop.f32.mrb[1].mxu0 }
  0xf7   :  { %v137_v14 = vadd.f32 %v180_v10, %v136_v13  ;;  %v228_v15 = vpop.f32.mrb[2].mxu0 }
  0xf8   :  { %v153_v16 = vmax.f32 %v145_v12, 0.0  ;;  %v148_v17 = vadd.f32 %v228_v15, %v180_v10  ;;  %v139_v18 = vpop.f32.mrb[3].mxu0 }
  0xf9   :  { %v151_v19 = vmax.f32 %v137_v14, 0.0  ;;  %v140_v20 = vadd.f32 %v180_v10, %v139_v18 }
  0xfa   :  { %v197_v21 = vpack.c.bf16 %v153_v16, %v153_v16  ;;  %v154_v22 = vmax.f32 %v148_v17, 0.0 }
  0xfb   :  { %v195_v23 = vpack.c.bf16 %v151_v19, %v151_v19  ;;  %v152_v24 = vmax.f32 %v140_v20, 0.0 }
  0xfc   :  { %174 = vst.msk [vmem:[%s307_s3 + $0x8] sm:$0xf] %vm171_vm0, %v197_v21  ;;  %v198_v25 = vpack.c.bf16 %v154_v22, %v154_v22 }
  0xfd   :  { %172 = vst.msk [vmem:[%s307_s3] sm:$0xf] %vm171_vm0, %v195_v23  ;;  %v196_v26 = vpack.c.bf16 %v152_v24, %v152_v24 }
  0xfe   :  { %175 = vst.msk [vmem:[%s307_s3 + $0xc] sm:$0xf] %vm171_vm0, %v198_v25 }
  0xff   :  { %173 = vst.msk [vmem:[%s307_s3 + $0x4] sm:$0xf] %vm171_vm0, %v196_v26 }

// kernel: backbone_forward.69
= control target key start
LH: loop header
LB: loop body
LE: loop exit
PB: predicated region body
PF: predicated region fallthrough
CT: control target
= control target key end

     0   :  { %s1312_s12 = smov 0   ;;  %s1452_s0 = inlined_call_operand.vmem [shape: bf16[2,40,32], index: 0, kind: input, shape index: {}]   ;;  %s1453_s1 = inlined_call_operand.vmem [shape: bf16[9,32,32], index: 1, kind: input, shape index: {}]   ;;  %s1454_s2 = inlined_call_operand.vmem [shape: f32[1,32], index: 2, kind: input, shape index: {}]   ;;  %s1455_s3 = inlined_call_operand.vmem [shape: bf16[2,24,32], index: 3, kind: output, shape index: {}]  }
   0x1 LB: > { %s1038_s13 = sadd.s32 4294967295, %s1290_s12   ;;  %p1042_p0 = scmp.ge.s32.totalorder %s1290_s12, 1  ;;  %s1290_s12 = sphi %s1312_s12, %s13_s12  }
   0x2   : > { %p137_p1 = scmp.lt.s32.totalorder %s1290_s12, 3 }
   0x4   : > { %p138_p2 = pnand %p1042_p0, %p137_p1 }
   0x5   : > { %v1253_v0 = vld [vmem:[%s1453_s1 + $0x10] sm:$0xff] (!%p138_p2)   ;;  %p161_p3 = scmp.lt.s32.totalorder (!%p138_p2), %s1038_s13, 1  ;;  %v1254_v1 = vld [vmem:[%s1453_s1] sm:$0xff] (!%p138_p2)   ;;  %v1255_v2 = vld [vmem:[%s1453_s1 + $0x18] sm:$0xff] (!%p138_p2)   ;;  %vm223_vm0 = vcmask (!%p138_p2), 261120   ;;  %vm353_vm2 = vcmask (!%p138_p2), 1046528  }
   0x6   : > { %141 = sbr.rel (%p138_p2) target bundleno = 284 (0x11c), region = 32  ;;  %1171 = vmatprep.subr.bf16.mxu0 (!%p138_p2), %v1253_v0  ;;  %1179 = vmatprep.subr.bf16.mxu1 (!%p138_p2), %v1254_v1  ;;  %v1256_v3 = vld [vmem:[%s1453_s1 + $0x8] sm:$0xff] (!%p138_p2)   ;;  %v1259_v4 = vld [vmem:[%s1453_s1 + $0x20] sm:$0xff] (!%p138_p2)   ;;  %v1261_v5 = vld [vmem:[%s1453_s1 + $0x30] sm:$0xff] (!%p138_p2)   ;;  %vm195_vm1 = vsmask.f32 (!%p138_p2), 7424 }
   0x7   : > { %1172 = vmatpush3.bf16.msra.mxu0 (!%p138_p2), %v1253_v0  ;;  %1180 = vmatpush3.bf16.msra.mxu1 (!%p138_p2), %v1254_v1  ;;  %v1263_v13 = vld [vmem:[%s1453_s1 + $0x38] sm:$0xff] (!%p138_p2)   ;;  %v1268_v28 = vld [vmem:[%s1453_s1 + $0x50] sm:$0xff] (!%p138_p2)   ;;  %vm439_vm3 = vcmask (!%p138_p2), 1044480   ;;  %v1262_v36 = vld [vmem:[%s1453_s1 + $0x28] sm:$0xff] (!%p138_p2)   ;;  %vm521_vm4 = vsmask.f32 (!%p138_p2), 4352 }
   0x8   : > { %1173 = vmatprep.subr.bf16.mxu0 (!%p138_p2), %v1255_v2  ;;  %1181 = vmatprep.subr.bf16.mxu1 (!%p138_p2), %v1256_v3  ;;  %v1270_v42 = vld [vmem:[%s1453_s1 + $0x58] sm:$0xff] (!%p138_p2)   ;;  %v1265_v46 = vld [vmem:[%s1453_s1 + $0x40] sm:$0xff] (!%p138_p2)   ;;  %v1275_v50 = vld [vmem:[%s1453_s1 + $0x70] sm:$0xff] (!%p138_p2)   ;;  %vm785_vm5 = vsmask.f32 (!%p138_p2), 5376  ;;  %vm703_vm6 = vcmask (!%p138_p2), 1045504  }
   0x9   : > { %v1269_v61 = vld [vmem:[%s1453_s1 + $0x48] sm:$0xff] (!%p138_p2)   ;;  %vm979_vm7 = vcmask (!%p138_p2), 257024  }
   0xb   : > { %1174 = vmatpush3.bf16.msra.mxu0 (!%p138_p2), %v1255_v2  ;;  %1182 = vmatpush3.bf16.msra.mxu1 (!%p138_p2), %v1256_v3 }
   0xc   : > { %1187 = vmatprep.subr.bf16.mxu0 (!%p138_p2), %v1259_v4  ;;  %1195 = vmatprep.subr.bf16.mxu1 (!%p138_p2), %v1261_v5 }
   0xd   : > { %s1457_s13 = smov (!%p161_p3, %s1038_s13), 1 }
   0xe   : > { %s1243_s22 = smul.u32 20, %s1457_s13 }
   0xf   : > { %s1244_s4 = smul.u32 12, %s1457_s13 }
  0x10   : > { %s1341_s27 = scalar_lea.vmem %s1452_s0, %s1243_s22 }
  0x11   : > { %v172_v6 = vld [vmem:[%s1341_s27] sm:$0xf]  ;;  %v1348_v7 = vld [vmem:[%s1341_s27 + $0x4] sm:$0xf]  ;;  %v1351_v8 = vld [vmem:[%s1341_s27 + $0x8] sm:$0xf]  ;;  %s170_s7 = scalar_lea.vmem %s1455_s3, %s1244_s4 }
  0x12   : > { %v179_v9 = vld [vmem:[%s1341_s27 + $0xc] sm:$0x1]  ;;  %v1049_v10 = vcombine.low %v172_v6, %v1348_v7  ;;  %v1055_v11 = vcombine.low %v1351_v8, %v1351_v8  ;;  %v344_v14 = vld [vmem:[%s1341_s27] sm:$0xe]  ;;  %v1092_v41 = vcombine.low %v1348_v7, %v1351_v8  ;;  %v684_v52 = vld [vmem:[%s1341_s27 + $0x4] sm:$0xc] }
  0x13   : > { %v1358_v12 = vcombine.low %v1351_v8, %v179_v9  ;;  %v1064_v17 = vcombine.low %v344_v14, %v1348_v7  ;;  %v426_v21 = vld [vmem:[%s1341_s27] sm:$0x8]  ;;  %v427_v24 = vld [vmem:[%s1341_s27 + $0xc] sm:$0x7]  ;;  %v685_v53 = vld [vmem:[%s1341_s27 + $0x8] sm:$0xf] }
  0x14   : > { %v197_v15 = vshrl.u32 %v1049_v10, 16  ;;  %v199_v16 = vshll.u32 %v1049_v10, 16  ;;  %1183 = vmatprep.mubr.msk.bf16.mxu1 %vm223_vm0, %v1049_v10  ;;  %v1073_v25 = vcombine.low %v426_v21, %v1348_v7  ;;  %v1074_v27 = vcombine.low %v1351_v8, %v427_v24  ;;  %v512_v34 = vld [vmem:[%s1341_s27 + $0xc] sm:$0xf]  ;;  %v687_v56 = vld [vmem:[%s1341_s27 + $0x10] sm:$0x3] }
  0x15   : > { %v204_v18 = vshll.u32 %v1358_v12, 16  ;;  %v208_v19 = vshrl.u32 %v1358_v12, 16  ;;  %1184 = vmatmul.mubr.msk.bf16.vlgmr.msra.gmra.mrb[0].mxu1 %vm223_vm0, %v1055_v11  ;;  %v355_v20 = vrot.slane %v1358_v12, 1  ;;  %v354_v23 = vrot.slane %v1064_v17, 1  ;;  %v686_v54 = vld [vmem:[%s1341_s27 + $0xc] sm:$0xf] }
  0x16   : > { %v201_v22 = vrot.slane %v199_v16, 1  ;;  %1196 = vmatpush3.bf16.msra.mxu1 %v1261_v5  ;;  %v440_v30 = vrot.slane %v1073_v25, 3  ;;  %v441_v33 = vrot.slane %v1074_v27, 3  ;;  %v1083_v37 = vcombine.low %v1351_v8, %v512_v34  ;;  %v776_v58 = vld [vmem:[%s1341_s27 + $0x10] sm:$0x7]  ;;  %v1272_v9 = vld [vmem:[%s1453_s1 + $0x60] sm:$0xff]  }
  0x17   : > { %v206_v26 = vrot.slane %v204_v18, 1  ;;  %1197 = vmatprep.subr.bf16.mxu1 %v1263_v13  ;;  %v356_v32 = vsel %vm353_vm2, %v354_v23, %v355_v20  ;;  %v523_v38 = vshrl.u32 %v1073_v25, 16  ;;  %v526_v40 = vshll.u32 %v1073_v25, 16  ;;  %v872_v14 = vld [vmem:[%s1341_s27 + $0x4] sm:$0x8]  ;;  %v1276_v16 = vld [vmem:[%s1453_s1 + $0x68] sm:$0xff]  }
  0x18   : > { %v202_v29 = vor.u32 %v201_v22, %v197_v15  ;;  %v442_v39 = vsel %vm439_vm3, %v440_v30, %v441_v33  ;;  %v531_v44 = vshrl.u32 %v1083_v37, 16  ;;  %v534_v45 = vshll.u32 %v1083_v37, 16  ;;  %v1282_v22 = vld [vmem:[%s1453_s1 + $0x88] sm:$0xff]  }
  0x19   : > { %v210_v31 = vor.u32 %v208_v19, %v206_v26  ;;  %1199 = vmatprep.mubr.msk.bf16.mxu1 %vm223_vm0, %v442_v39  ;;  %v525_v43 = vrot.slane %v523_v38, 3  ;;  %v528_v47 = vrot.slane %v526_v40, 4  ;;  %v1102_v57 = vcombine.low %v684_v52, %v685_v53  ;;  %v1281_v19 = vld [vmem:[%s1453_s1 + $0x80] sm:$0xff]  }
  0x1a   : > { %v207_v35 = vsel %vm195_vm1, %v202_v29, %v206_v26  ;;  %1198 = vmatpush3.bf16.msra.mxu1 %v1263_v13  ;;  %v533_v48 = vrot.slane %v531_v44, 3  ;;  %v536_v49 = vrot.slane %v534_v45, 4  ;;  %v1093_v59 = vcombine.low %v512_v34, %v512_v34 }
  0x1b   : > { %1175 = vmatprep.mubr.msk.bf16.mxu0 %vm223_vm0, %v207_v35  ;;  %1211 = vmatprep.subr.bf16.mxu1 %v1268_v28  ;;  %v529_v51 = vor.u32 %v528_v47, %v525_v43  ;;  %v1112_v60 = vcombine.low %v686_v54, %v776_v58  ;;  %v1103_v63 = vcombine.low %v686_v54, %v687_v56  ;;  %v787_v0 = vshrl.u32 %v1102_v57, 16 }
  0x1c   : > { %1176 = vmatmul.mubr.msk.bf16.vlgmr.msra.gmra.mrb[0].mxu0 %vm223_vm0, %v210_v31  ;;  %v537_v55 = vor.u32 %v536_v49, %v533_v48  ;;  %v790_v1 = vshll.u32 %v1102_v57, 16  ;;  %v704_v10 = vrot.slane %v1102_v57, 2  ;;  %v1121_v18 = vcombine.low %v872_v14, %v685_v53  ;;  %v1126_v14 = vld [vmem:[%s1454_s2] ss:$0 sm:$0xff] }
  0x1d   : > { %1188 = vmatpush3.bf16.msra.mxu0 %v1259_v4  ;;  %1191 = vmatprep.mubr.msk.bf16.mxu0 %vm223_vm0, %v356_v32  ;;  %v795_v2 = vshrl.u32 %v1112_v60, 16  ;;  %v798_v3 = vshll.u32 %v1112_v60, 16  ;;  %v1277_v4 = vld [vmem:[%s1453_s1 + $0x78] sm:$0xff]   ;;  %v789_v5 = vrot.slane %v787_v0, 2  ;;  %v705_v11 = vrot.slane %v1103_v63, 2 }
  0x1e   : > { %1189 = vmatprep.subr.bf16.mxu0 %v1262_v36  ;;  %1200 = vmatmul.mubr.msk.bf16.vlgmr.msra.gmra.mrb[4].mxu1 %vm223_vm0, %v441_v33  ;;  %v538_v62 = vsel %vm521_vm4, %v529_v51, %v537_v55  ;;  %v792_v6 = vrot.slane %v790_v1, 3  ;;  %v882_v21 = vrot.slane %v1112_v60, 3 }
  0x1f   : > { %1212 = vmatpush3.bf16.msra.mxu1 %v1268_v28  ;;  %1215 = vmatprep.mubr.msk.bf16.mxu1 %vm223_vm0, %v1092_v41  ;;  %v797_v7 = vrot.slane %v795_v2, 2  ;;  %v800_v8 = vrot.slane %v798_v3, 3  ;;  %v706_v17 = vsel %vm703_vm6, %v704_v10, %v705_v11 }
  0x20   : > { %1213 = vmatprep.subr.bf16.mxu1 %v1270_v42  ;;  %v793_v12 = vor.u32 %v792_v6, %v789_v5 }
  0x21   : > { %1190 = vmatpush3.bf16.msra.mxu0 %v1262_v36  ;;  %v801_v13 = vor.u32 %v800_v8, %v797_v7 }
  0x22   : > { %1203 = vmatprep.subr.bf16.mxu0 %v1265_v46 }
  0x23   : > { %1214 = vmatpush3.bf16.msra.mxu1 %v1270_v42  ;;  %v802_v15 = vsel %vm785_vm5, %v793_v12, %v801_v13 }
  0x24   : > { %1192 = vmatmul.mubr.msk.bf16.vlgmr.msra.gmra.mrb[4].mxu0 %vm223_vm0, %v355_v20  ;;  %1227 = vmatprep.subr.bf16.mxu1 %v1275_v50  ;;  %v881_v20 = vrot.slane %v1121_v18, 3 }
  0x25   : > { %1204 = vmatpush3.bf16.msra.mxu0 %v1265_v46  ;;  %1207 = vmatprep.mubr.msk.bf16.mxu0 %vm223_vm0, %v538_v62 }
  0x26   : > { %1205 = vmatprep.subr.bf16.mxu0 %v1269_v61  ;;  %1216 = vmatmul.mubr.msk.bf16.vlgmr.msra.gmra.mrb[8].mxu1 %vm223_vm0, %v1093_v59  ;;  %v883_v23 = vsel %vm439_vm3, %v881_v20, %v882_v21 }
  0x27   : > { %1228 = vmatpush3.bf16.msra.mxu1 %v1275_v50  ;;  %1231 = vmatprep.mubr.msk.bf16.mxu1 %vm223_vm0, %v802_v15 }
  0x28   : > { %1229 = vmatprep.subr.bf16.mxu1 %v1277_v4 }
  0x29   : > { %1206 = vmatpush3.bf16.msra.mxu0 %v1269_v61 }
  0x2a   : > { %1219 = vmatprep.subr.bf16.mxu0 %v1272_v9 }
  0x2b   : > { %1230 = vmatpush3.bf16.msra.mxu1 %v1277_v4 }
  0x2c   : > { %1208 = vmatmul.mubr.msk.bf16.vlgmr.msra.gmra.mrb[8].mxu0 %vm223_vm0, %v537_v55 }
  0x2d   : > { %1220 = vmatpush3.bf16.msra.mxu0 %v1272_v9  ;;  %1223 = vmatprep.mubr.msk.bf16.mxu0 %vm223_vm0, %v706_v17 }
  0x2e   : > { %1221 = vmatprep.subr.bf16.mxu0 %v1276_v16  ;;  %1232 = vmatmul.mubr.msk.bf16.vlgmr.msra.gmra.mrb[12].mxu1 %vm223_vm0, %v801_v13 }
  0x31   : > { %1222 = vmatpush3.bf16.msra.mxu0 %v1276_v16 }
  0x32   : > { %1235 = vmatprep.subr.bf16.mxu0 %v1281_v19 }
  0x34   : > { %1224 = vmatmul.mubr.msk.bf16.vlgmr.msra.gmra.mrb[12].mxu0 %vm223_vm0, %v705_v11 }
  0x35   : > { %1236 = vmatpush3.bf16.msra.mxu0 %v1281_v19  ;;  %1239 = vmatprep.mubr.msk.bf16.mxu0 %vm223_vm0, %v883_v23 }
  0x36   : > { %1237 = vmatprep.subr.bf16.mxu0 %v1282_v22 }
  0x39   : > { %1238 = vmatpush3.bf16.msra.mxu0 %v1282_v22 }
  0x3c   : > { %1240 = vmatmul.mubr.msk.bf16.vlgmr.msra.gmra.mrb[16].mxu0 %vm223_vm0, %v882_v21 }
  0xe8   : > { %v1185_v24 = vpop.f32.mrb[0].mxu1 }
  0xe9   : > { %v330_v25 = vpop.f32.mrb[1].mxu1 }
  0xea   : > { %v1186_v26 = vpop.f32.mrb[2].mxu1 }
  0xeb   : > { %v333_v27 = vpop.f32.mrb[3].mxu1 }
  0xef   : > { %v1177_v28 = vpop.f32.mrb[0].mxu0 }
  0xf0   : > { %v339_v29 = vadd.f32 %v1185_v24, %v1177_v28  ;;  %v264_v30 = vpop.f32.mrb[1].mxu0 }
  0xf1   : > { %v331_v31 = vadd.f32 %v330_v25, %v264_v30  ;;  %v1178_v32 = vpop.f32.mrb[2].mxu0  ;;  %v1201_v33 = vpop.f32.mrb[4].mxu1 }
  0xf2   : > { %v267_v34 = vpop.f32.mrb[3].mxu0  ;;  %v495_v35 = vpop.f32.mrb[5].mxu1 }
  0xf3   : > { %v334_v36 = vadd.f32 %v333_v27, %v267_v34  ;;  %v1202_v37 = vpop.f32.mrb[6].mxu1 }
  0xf4   : > { %v498_v38 = vpop.f32.mrb[7].mxu1 }
  0xf7   : > { %v1193_v39 = vpop.f32.mrb[4].mxu0 }
  0xf8   : > { %v425_v40 = vadd.f32 %v1193_v39, %v339_v29  ;;  %v409_v41 = vpop.f32.mrb[5].mxu0 }
  0xf9   : > { %v423_v42 = vadd.f32 %v409_v41, %v331_v31  ;;  %v1194_v43 = vpop.f32.mrb[6].mxu0  ;;  %v1217_v44 = vpop.f32.mrb[8].mxu1 }
  0xfa   : > { %v511_v45 = vadd.f32 %v1201_v33, %v425_v40  ;;  %v412_v46 = vpop.f32.mrb[7].mxu0  ;;  %v667_v47 = vpop.f32.mrb[9].mxu1 }
  0xfb   : > { %v424_v48 = vadd.f32 %v412_v46, %v334_v36  ;;  %v509_v49 = vadd.f32 %v495_v35, %v423_v42  ;;  %v1218_v50 = vpop.f32.mrb[10].mxu1 }
  0xfc   : > { %v670_v51 = vpop.f32.mrb[11].mxu1 }
  0xfd   : > { %v510_v52 = vadd.f32 %v498_v38, %v424_v48 }
  0xff   : > { %v1209_v53 = vpop.f32.mrb[8].mxu0 }
 0x100   : > { %v607_v54 = vadd.f32 %v1209_v53, %v511_v45  ;;  %v591_v55 = vpop.f32.mrb[9].mxu0 }
 0x101   : > { %v605_v56 = vadd.f32 %v591_v55, %v509_v49  ;;  %v1210_v57 = vpop.f32.mrb[10].mxu0  ;;  %v1233_v58 = vpop.f32.mrb[12].mxu1 }
 0x102   : > { %v683_v59 = vadd.f32 %v1217_v44, %v607_v54  ;;  %v594_v60 = vpop.f32.mrb[11].mxu0  ;;  %v855_v61 = vpop.f32.mrb[13].mxu1 }
 0x103   : > { %v606_v62 = vadd.f32 %v594_v60, %v510_v52  ;;  %v681_v63 = vadd.f32 %v667_v47, %v605_v56  ;;  %v1234_v0 = vpop.f32.mrb[14].mxu1 }
 0x104   : > { %v858_v1 = vpop.f32.mrb[15].mxu1 }
 0x105   : > { %v682_v2 = vadd.f32 %v670_v51, %v606_v62 }
 0x107   : > { %v1225_v3 = vpop.f32.mrb[12].mxu0 }
 0x108   : > { %v775_v4 = vadd.f32 %v1225_v3, %v683_v59  ;;  %v759_v5 = vpop.f32.mrb[13].mxu0 }
 0x109   : > { %v773_v6 = vadd.f32 %v759_v5, %v681_v63  ;;  %v1226_v7 = vpop.f32.mrb[14].mxu0 }
 0x10a   : > { %v871_v8 = vadd.f32 %v1233_v58, %v775_v4  ;;  %v762_v9 = vpop.f32.mrb[15].mxu0 }
 0x10b   : > { %v774_v10 = vadd.f32 %v762_v9, %v682_v2  ;;  %v869_v11 = vadd.f32 %v855_v61, %v773_v6 }
 0x10d   : > { %v870_v12 = vadd.f32 %v858_v1, %v774_v10 }
 0x10f   : > { %v1241_v13 = vpop.f32.mrb[16].mxu0 }
 0x110   : > { %v952_v15 = vadd.f32 %v1241_v13, %v871_v8  ;;  %v936_v16 = vpop.f32.mrb[17].mxu0 }
 0x111   : > { %v950_v17 = vadd.f32 %v936_v16, %v869_v11  ;;  %v1242_v18 = vpop.f32.mrb[18].mxu0 }
 0x112   : > { %v962_v19 = vadd.f32 %v1126_v14, %v952_v15  ;;  %v939_v20 = vpop.f32.mrb[19].mxu0 }
 0x113   : > { %v960_v21 = vadd.f32 %v1126_v14, %v950_v17  ;;  %v951_v22 = vadd.f32 %v939_v20, %v870_v12 }
 0x114   : > { %v965_v23 = vmax.f32 %v962_v19, 0.0 }
 0x115   : > { %v963_v24 = vmax.f32 %v960_v21, 0.0  ;;  %v961_v25 = vadd.f32 %v1126_v14, %v951_v22 }
 0x116   : > { %v1134_v26 = vpack.c.bf16 %v965_v23, %v965_v23 }
 0x117   : > { %v1132_v27 = vpack.c.bf16 %v963_v24, %v963_v24  ;;  %v964_v28 = vmax.f32 %v961_v25, 0.0 }
 0x118   : > { %982 = vst.msk [vmem:[%s170_s7 + $0x8] sm:$0xf] %vm979_vm7, %v1134_v26 }
 0x119   : > { %980 = vst.msk [vmem:[%s170_s7] sm:$0xf] %vm979_vm7, %v1132_v27  ;;  %v1133_v29 = vpack.c.bf16 %v964_v28, %v964_v28 }
 0x11b   : > { %981 = vst.msk [vmem:[%s170_s7 + $0x4] sm:$0xf] %vm979_vm7, %v1133_v29 }
 0x11c PF: > { %s13_s12 = sadd.s32 1, %s1290_s12  }
 0x11d   : > { %p10_p4 = scmp.ge.s32.totalorder %s13_s12, 4  }
 0x11f   :  { %12 = sbr.rel (!%p10_p4) target bundleno = 1 (0x1), region = 70 }

// kernel: backbone_forward.78
= control target key start
LH: loop header
LB: loop body
LE: loop exit
PB: predicated region body
PF: predicated region fallthrough
CT: control target
= control target key end

     0   :  { %v638_v33 = vmov 0.0   ;;  %vm639_vm0 = vmmov 0   ;;  %vm341_vm1 = vcmask 523264   ;;  %vm478_vm2 = vcmask 519168   ;;  %s792_s1 = inlined_call_operand.vmem [shape: bf16[576,64], index: 1, kind: input, shape index: {}]   ;;  %s793_s0 = inlined_call_operand.vmem [shape: bf16[16,576], index: 0, kind: input, shape index: {}]   ;;  %s794_s2 = inlined_call_operand.vmem [shape: f32[1,64], index: 2, kind: input, shape index: {}]   ;;  %s795_s3 = inlined_call_operand.vmem [shape: bf16[16,64], index: 3, kind: output, shape index: {}]  }
   0x1   :  { %v595_v0 = vld [vmem:[%s792_s1 + $0x40] sm:$0xff]   ;;  %v599_v4 = vld [vmem:[%s792_s1 + $0x48] sm:$0xff]   ;;  %v603_v8 = vld [vmem:[%s792_s1 + $0x50] sm:$0xff]  }
   0x2   :  { %v596_v1 = vld [vmem:[%s792_s1] sm:$0xff]   ;;  %532 = vmatprep.subr.bf16.mxu0 %v595_v0  ;;  %v600_v5 = vld [vmem:[%s792_s1 + $0x8] sm:$0xff]   ;;  %v604_v9 = vld [vmem:[%s792_s1 + $0x10] sm:$0xff]  }
   0x3   :  { %v597_v2 = vld [vmem:[%s792_s1 + $0xc0] sm:$0xff]   ;;  %533 = vmatpush3.bf16.msra.mxu0 %v596_v1  ;;  %v601_v6 = vld [vmem:[%s792_s1 + $0xc8] sm:$0xff]   ;;  %v605_v10 = vld [vmem:[%s792_s1 + $0xd0] sm:$0xff]  }
   0x4   :  { %v598_v3 = vld [vmem:[%s792_s1 + $0x80] sm:$0xff]   ;;  %554 = vmatprep.subr.bf16.mxu1 %v597_v2  ;;  %534 = vmatprep.subr.bf16.mxu0 %v599_v4  ;;  %v602_v7 = vld [vmem:[%s792_s1 + $0x88] sm:$0xff]   ;;  %v606_v11 = vld [vmem:[%s792_s1 + $0x90] sm:$0xff]  }
   0x5   :  { %555 = vmatpush3.bf16.msra.mxu1 %v598_v3  ;;  %v607_v12 = vld [vmem:[%s792_s1 + $0x58] sm:$0xff]   ;;  %v611_v16 = vld [vmem:[%s792_s1 + $0x60] sm:$0xff]   ;;  %v615_v20 = vld [vmem:[%s792_s1 + $0x68] sm:$0xff]  }
   0x6   :  { %556 = vmatprep.subr.bf16.mxu1 %v601_v6  ;;  %v608_v13 = vld [vmem:[%s792_s1 + $0x18] sm:$0xff]   ;;  %v612_v17 = vld [vmem:[%s792_s1 + $0x20] sm:$0xff]   ;;  %v616_v21 = vld [vmem:[%s792_s1 + $0x28] sm:$0xff]  }
   0x7   :  { %535 = vmatpush3.bf16.msra.mxu0 %v600_v5  ;;  %v609_v14 = vld [vmem:[%s792_s1 + $0xd8] sm:$0xff]   ;;  %v613_v18 = vld [vmem:[%s792_s1 + $0xe0] sm:$0xff]   ;;  %v617_v22 = vld [vmem:[%s792_s1 + $0xe8] sm:$0xff]  }
   0x8   :  { %536 = vmatprep.subr.bf16.mxu0 %v603_v8  ;;  %v610_v15 = vld [vmem:[%s792_s1 + $0x98] sm:$0xff]   ;;  %v614_v19 = vld [vmem:[%s792_s1 + $0xa0] sm:$0xff]   ;;  %v618_v23 = vld [vmem:[%s792_s1 + $0xa8] sm:$0xff]  }
   0x9   :  { %557 = vmatpush3.bf16.msra.mxu1 %v602_v7  ;;  %v619_v24 = vld [vmem:[%s792_s1 + $0x70] sm:$0xff]   ;;  %v623_v28 = vld [vmem:[%s792_s1 + $0x78] sm:$0xff]   ;;  %v632_v36 = vld [vmem:[%s793_s0 + $0xc] ss:$20 sps:$4 sm:$0xff]  }
   0xa   :  { %558 = vmatprep.subr.bf16.mxu1 %v605_v10  ;;  %v620_v25 = vld [vmem:[%s792_s1 + $0x30] sm:$0xff]   ;;  %v624_v29 = vld [vmem:[%s792_s1 + $0x38] sm:$0xff]   ;;  %v633_v37 = vld [vmem:[%s792_s1 + $0x100] sm:$0xff]   ;;  %418 = vmatprep.mubr.bf16.mxu1 %v632_v36 }
   0xb   :  { %537 = vmatpush3.bf16.msra.mxu0 %v604_v9  ;;  %v621_v26 = vld [vmem:[%s792_s1 + $0xf0] sm:$0xff]   ;;  %v625_v30 = vld [vmem:[%s792_s1 + $0xf8] sm:$0xff]   ;;  %v634_v38 = vld [vmem:[%s792_s1 + $0x108] sm:$0xff]  }
   0xc   :  { %538 = vmatprep.subr.bf16.mxu0 %v607_v12  ;;  %v622_v27 = vld [vmem:[%s792_s1 + $0xb0] sm:$0xff]   ;;  %v628_v32 = vld [vmem:[%s793_s0 + $0x4] ss:$20 sps:$4 sm:$0xff]   ;;  %v630_v35 = vld [vmem:[%s793_s0 + $0x8] ss:$20 sps:$4 sm:$0xff]  }
   0xd   :  { %559 = vmatpush3.bf16.msra.mxu1 %v606_v11  ;;  %v626_v31 = vld [vmem:[%s793_s0] ss:$20 sps:$4 sm:$0xff]   ;;  %v629_v34 = vld [vmem:[%s792_s1 + $0xb8] sm:$0xff]   ;;  %377 = vmatprep.mubr.bf16.mxu0 %v628_v32  ;;  %v637_v41 = vld [vmem:[%s793_s0 + $0x10] ss:$20 sps:$4 sm:$0xff]  }
   0xe   :  { %560 = vmatprep.subr.bf16.mxu1 %v609_v14  ;;  %v635_v39 = vld [vmem:[%s792_s1 + $0x110] sm:$0xff]   ;;  %v636_v40 = vld [vmem:[%s792_s1 + $0x118] sm:$0xff]   ;;  %v485_v43 = vld [vmem:[%s794_s2] ss:$0 sm:$0xff] }
   0xf   :  { %539 = vmatpush3.bf16.msra.mxu0 %v608_v13 }
  0x10   :  { %540 = vmatprep.subr.bf16.mxu0 %v611_v16 }
  0x11   :  { %561 = vmatpush3.bf16.msra.mxu1 %v610_v15 }
  0x12   :  { %562 = vmatprep.subr.bf16.mxu1 %v613_v18 }
  0x13   :  { %541 = vmatpush3.bf16.msra.mxu0 %v612_v17 }
  0x14   :  { %542 = vmatprep.subr.bf16.mxu0 %v615_v20 }
  0x15   :  { %563 = vmatpush3.bf16.msra.mxu1 %v614_v19 }
  0x16   :  { %564 = vmatprep.subr.bf16.mxu1 %v617_v22 }
  0x17   :  { %543 = vmatpush3.bf16.msra.mxu0 %v616_v21 }
  0x18   :  { %544 = vmatprep.subr.bf16.mxu0 %v619_v24 }
  0x19   :  { %565 = vmatpush3.bf16.msra.mxu1 %v618_v23 }
  0x1a   :  { %566 = vmatprep.subr.bf16.mxu1 %v621_v26 }
  0x1b   :  { %545 = vmatpush3.bf16.msra.mxu0 %v620_v25 }
  0x1c   :  { %546 = vmatprep.subr.bf16.mxu0 %v623_v28 }
  0x1d   :  { %567 = vmatpush3.bf16.msra.mxu1 %v622_v27 }
  0x1e   :  { %568 = vmatprep.subr.bf16.mxu1 %v625_v30 }
  0x1f   :  { %547 = vmatpush3.bf16.msra.mxu0 %v624_v29 }
  0x20   :  { %581 = vmatprep.subr.bf16.mxu0 %v638_v33 }
  0x21   :  { %569 = vmatpush3.bf16.msra.mxu1 %v629_v34 }
  0x22   :  { %378 = vmatmul.mubr.bf16.vlgmr.msra.gmra.mrb[0].mxu0 %v626_v31 }
  0x23   :  { %589 = vmatprep.mubr.msk.bf16.mxu0 %vm639_vm0, %v638_v33  ;;  %582 = vmatpush3.bf16.msra.mxu0 %v633_v37 }
  0x24   :  { %419 = vmatmul.mubr.bf16.vlgmr.msra.gmra.mrb[0].mxu1 %v630_v35  ;;  %583 = vmatprep.subr.bf16.mxu0 %v638_v33 }
  0x27   :  { %584 = vmatpush3.bf16.msra.mxu0 %v634_v38 }
  0x28   :  { %585 = vmatprep.subr.bf16.mxu0 %v638_v33 }
  0x2b   :  { %586 = vmatpush3.bf16.msra.mxu0 %v635_v39 }
  0x2c   :  { %587 = vmatprep.subr.bf16.mxu0 %v638_v33 }
  0x2f   :  { %588 = vmatpush3.bf16.msra.mxu0 %v636_v40 }
  0x32   :  { %590 = vmatmul.mubr.msk.bf16.vlgmr.msra.gmra.mrb[4].mxu0 %vm341_vm1, %v637_v41 }
  0xf5   :  { %v548_v42 = vpop.f32.mrb[0].mxu0 }
  0xf6   :  { %v549_v44 = vpop.f32.mrb[1].mxu0 }
  0xf7   :  { %v550_v45 = vadd.f32 %v549_v44, %v548_v42  ;;  %v551_v46 = vpop.f32.mrb[2].mxu0  ;;  %v570_v47 = vpop.f32.mrb[0].mxu1 }
  0xf8   :  { %v552_v48 = vpop.f32.mrb[3].mxu0  ;;  %v571_v51 = vpop.f32.mrb[1].mxu1 }
  0xf9   :  { %v380_v49 = vadd.f32 %v550_v45, %v485_v43  ;;  %v553_v50 = vadd.f32 %v552_v48, %v551_v46  ;;  %v572_v52 = vadd.f32 %v571_v51, %v570_v47  ;;  %v573_v53 = vpop.f32.mrb[2].mxu1 }
  0xfa   :  { %v574_v55 = vpop.f32.mrb[3].mxu1 }
  0xfb   :  { %v383_v54 = vadd.f32 %v553_v50, %v485_v43  ;;  %v575_v56 = vadd.f32 %v574_v55, %v573_v53  ;;  %v421_v57 = vadd.f32 %v572_v52, %v380_v49 }
  0xfd   :  { %v424_v58 = vadd.f32 %v575_v56, %v383_v54 }
 0x105   :  { %v461_v59 = vpop.f32.mrb[4].mxu0 }
 0x106   :  { %v462_v60 = vadd.f32 %v461_v59, %v421_v57  ;;  %v591_v61 = vpop.f32.mrb[5].mxu0 }
 0x107   :  { %v464_v62 = vpop.f32.mrb[6].mxu0 }
 0x108   :  { %v468_v63 = vmax.f32 %v462_v60, 0.0  ;;  %v465_v0 = vadd.f32 %v464_v62, %v424_v58  ;;  %v592_v1 = vpop.f32.mrb[7].mxu0 }
 0x10a   :  { %v530_v2 = vpack.c.bf16 %v468_v63, %v468_v63  ;;  %v469_v3 = vmax.f32 %v465_v0, 0.0 }
 0x10c   :  { %479 = vst.msk [vmem:[%s795_s3] sm:$0xf] %vm478_vm2, %v530_v2  ;;  %v531_v4 = vpack.c.bf16 %v469_v3, %v469_v3 }
 0x10e   :  { %480 = vst.msk [vmem:[%s795_s3 + $0x4] sm:$0xf] %vm478_vm2, %v531_v4 }

// kernel: backbone_forward.79
= control target key start
LH: loop header
LB: loop body
LE: loop exit
PB: predicated region body
PF: predicated region fallthrough
CT: control target
= control target key end

     0   :  { %s769_s12 = smov 0   ;;  %s771_s13 = smov 0   ;;  %s871_s0 = inlined_call_operand.vmem [shape: bf16[16,128], index: 0, kind: input, shape index: {}]   ;;  %s872_s1 = inlined_call_operand.vmem [shape: bf16[128,256], index: 1, kind: input, shape index: {}]   ;;  %s873_s2 = inlined_call_operand.vmem [shape: f32[1,256], index: 2, kind: input, shape index: {}]   ;;  %s874_s3 = inlined_call_operand.vmem [shape: bf16[16,256], index: 3, kind: output, shape index: {}]  }
   0x1   :  { %s773_s14 = smov 0   ;;  %s775_s15 = smov 0  }
   0x2   :  { %s777_s16 = smov 0  }
   0x3 LB: > { %s22_s17 = sadd.s32 1, %s741_s15  ;;  %s594_s18 = sadd.s32 4294967295, %s745_s16   ;;  %s745_s16 = sphi %s777_s16, %s13_s16   ;;  %s741_s15 = sphi %s775_s15, %s879_s15   ;;  %s737_s14 = sphi %s773_s14, %s878_s14   ;;  %s733_s13 = sphi %s771_s13, %s877_s13   ;;  %s729_s12 = sphi %s769_s12, %s876_s12  }
   0x4   : > { %p23_p0 = scmp.ge.s32.totalorder %s22_s17, 2  ;;  %p65_p1 = scmp.ne.s32.totalorder %s733_s13, %s729_s12 }
   0x5   : > { %p66_p2 = scmp.eq.s32.totalorder %s745_s16, 0  ;;  %p123_p4 = scmp.eq.s32.totalorder %s594_s18, 1 }
   0x6   : > { %s881_s17 = smov (%p23_p0, %s22_s17), 0  ;;  %s58_s20 = sadd.s32 1, %s733_s13 }
   0x7   : > { %p67_p3 = por %p66_p2, %p65_p1  ;;  %s55_s19 = ssub.s32 %s741_s15, %s881_s17 }
   0x8   : > { %p56_p5 = scmp.eq.s32.totalorder %s55_s19, 0  ;;  %p804_p6 = por %p123_p4, %p65_p1 }
   0x9   : > { %p598_p7 = scmp.ge.s32.totalorder %s745_s16, 2 }
   0xa   : > { %s809_s22 = scalar_select %p56_p5, %s733_s13, %s58_s20  }
   0xb   : > { %154 = sbr.rel (%p598_p7) target bundleno = 32 (0x20), region = 20 }
  0x12   : > { %157 = sbr.rel (!%p67_p3) target bundleno = 32 (0x20), region = 24  ;;  %s159_s23 = sand.u32 (%p67_p3), 1, %s733_s13  }
  0x13   : > { %s600_s24 = sshll.u32 (%p67_p3), %s741_s15, 2  ;;  %s599_s25 = sshll.u32 (%p67_p3), %s159_s23, 6 }
  0x14   : > { %s817_s28 = scalar_lea.vmem (%p67_p3), %s872_s1, %s600_s24  ;;  %s161_s29 = scalar_lea.vmem (%p67_p3), [#allocation2], %s599_s25 }
  0x15   : > { %v179_v0 = vld [vmem:[%s817_s28] sm:$0xf] (%p67_p3)  ;;  %v181_v1 = vld [vmem:[%s817_s28 + $0x8] sm:$0xf] (%p67_p3)  ;;  %v183_v2 = vld [vmem:[%s817_s28 + $0x10] sm:$0xf] (%p67_p3) }
  0x16   : > { %180 = vst [vmem:[%s161_s29] sm:$0xf] (%p67_p3), %v179_v0  ;;  %182 = vst [vmem:[%s161_s29 + $0x4] sm:$0xf] (%p67_p3), %v181_v1  ;;  %v185_v3 = vld [vmem:[%s817_s28 + $0x18] sm:$0xf] (%p67_p3) }
  0x17   : > { %v187_v4 = vld [vmem:[%s817_s28 + $0x20] sm:$0xf] (%p67_p3)  ;;  %184 = vst [vmem:[%s161_s29 + $0x8] sm:$0xf] (%p67_p3), %v183_v2  ;;  %186 = vst [vmem:[%s161_s29 + $0xc] sm:$0xf] (%p67_p3), %v185_v3 }
  0x18   : > { %188 = vst [vmem:[%s161_s29 + $0x10] sm:$0xf] (%p67_p3), %v187_v4  ;;  %v189_v5 = vld [vmem:[%s817_s28 + $0x28] sm:$0xf] (%p67_p3)  ;;  %v191_v6 = vld [vmem:[%s817_s28 + $0x30] sm:$0xf] (%p67_p3) }
  0x19   : > { %v193_v7 = vld [vmem:[%s817_s28 + $0x38] sm:$0xf]  ;;  %190 = vst [vmem:[%s161_s29 + $0x14] sm:$0xf] %v189_v5  ;;  %192 = vst [vmem:[%s161_s29 + $0x18] sm:$0xf] %v191_v6 }
  0x1a   : > { %194 = vst [vmem:[%s161_s29 + $0x1c] sm:$0xf] %v193_v7  ;;  %v195_v8 = vld [vmem:[%s817_s28 + $0x40] sm:$0xf]  ;;  %v197_v9 = vld [vmem:[%s817_s28 + $0x48] sm:$0xf] }
  0x1b   : > { %v199_v10 = vld [vmem:[%s817_s28 + $0x50] sm:$0xf]  ;;  %196 = vst [vmem:[%s161_s29 + $0x20] sm:$0xf] %v195_v8  ;;  %198 = vst [vmem:[%s161_s29 + $0x24] sm:$0xf] %v197_v9 }
  0x1c   : > { %200 = vst [vmem:[%s161_s29 + $0x28] sm:$0xf] %v199_v10  ;;  %v201_v11 = vld [vmem:[%s817_s28 + $0x58] sm:$0xf]  ;;  %v203_v12 = vld [vmem:[%s817_s28 + $0x60] sm:$0xf] }
  0x1d   : > { %v205_v13 = vld [vmem:[%s817_s28 + $0x68] sm:$0xf]  ;;  %202 = vst [vmem:[%s161_s29 + $0x2c] sm:$0xf] %v201_v11  ;;  %204 = vst [vmem:[%s161_s29 + $0x30] sm:$0xf] %v203_v12 }
  0x1e   : > { %206 = vst [vmem:[%s161_s29 + $0x34] sm:$0xf] %v205_v13  ;;  %v207_v14 = vld [vmem:[%s817_s28 + $0x70] sm:$0xf]  ;;  %v209_v15 = vld [vmem:[%s817_s28 + $0x78] sm:$0xf] }
  0x1f   : > { %208 = vst [vmem:[%s161_s29 + $0x38] sm:$0xf] %v207_v14  ;;  %210 = vst [vmem:[%s161_s29 + $0x3c] sm:$0xf] %v209_v15 }
  0x20 PF: > { %p601_p8 = scmp.ge.s32.totalorder %s745_s16, 1  ;;  %p270_p9 = scmp.lt.s32.totalorder %s745_s16, 3 }
  0x22   : > { %p271_p10 = pnand %p601_p8, %p270_p9 }
  0x23   : > { %s277_s30 = sand.u32 (!%p271_p10), 1, %s729_s12   ;;  %v747_v16 = vmov (!%p271_p10), 0.0   ;;  %vm748_vm0 = vmmov (!%p271_p10), 0   ;;  %v706_v25 = vld [vmem:[%s871_s0] sm:$0xff] (!%p271_p10)   ;;  %p313_p11 = scmp.lt.s32.totalorder (!%p271_p10), %s737_s14, 1 }
  0x24   : > { %274 = sbr.rel (%p271_p10) target bundleno = 297 (0x129), region = 69  ;;  %636 = vmatprep.subr.bf16.mxu0 (!%p271_p10), %v747_v16  ;;  %s602_s4 = sshll.u32 (!%p271_p10), %s277_s30, 6  ;;  %652 = vmatprep.mubr.msk.bf16.mxu0 (!%p271_p10), %vm748_vm0, %v747_v16 }
  0x25   : > { %s279_s5 = scalar_lea.vmem (!%p271_p10), [#allocation2], %s602_s4  ;;  %s603_s18 = sshll.u32 (!%p271_p10), %s277_s30, 3 }
  0x26   : > { %v698_v17 = vld [vmem:[%s279_s5] sm:$0xff] (!%p271_p10)   ;;  %v699_v18 = vld [vmem:[%s279_s5 + $0x8] sm:$0xff] (!%p271_p10)   ;;  %v700_v19 = vld [vmem:[%s279_s5 + $0x10] sm:$0xff] (!%p271_p10)   ;;  %s306_s19 = scalar_lea.vmem (!%p271_p10), [#allocation3], %s603_s18 }
  0x27   : > { %637 = vmatpush3.bf16.msra.mxu0 (!%p271_p10), %v698_v17  ;;  %v701_v20 = vld [vmem:[%s279_s5 + $0x18] sm:$0xff] (!%p271_p10)   ;;  %v702_v21 = vld [vmem:[%s279_s5 + $0x20] sm:$0xff] (!%p271_p10)   ;;  %v703_v22 = vld [vmem:[%s279_s5 + $0x28] sm:$0xff] (!%p271_p10)  }
  0x28   : > { %638 = vmatprep.subr.bf16.mxu0 (!%p271_p10), %v747_v16  ;;  %v704_v23 = vld [vmem:[%s279_s5 + $0x30] sm:$0xff] (!%p271_p10)   ;;  %v705_v24 = vld [vmem:[%s279_s5 + $0x38] sm:$0xff] (!%p271_p10)  }
  0x2b   : > { %639 = vmatpush3.bf16.msra.mxu0 %v699_v18  ;;  %s314_s8 = scalar_select %p313_p11, %s737_s14, 1 }
  0x2c   : > { %640 = vmatprep.subr.bf16.mxu0 %v747_v16  ;;  %s617_s20 = sshll.u32 (%p804_p6), %s737_s14, 2 }
  0x2d   : > { %s315_s11 = scalar_lea.vmem %s873_s2, %s314_s8  ;;  %s459_s25 = scalar_lea.vmem (%p804_p6), %s874_s3, %s617_s20 }
  0x2e   : > { %v604_v26 = vld [vmem:[%s315_s11] ss:$0 sm:$0xff] }
  0x2f   : > { %641 = vmatpush3.bf16.msra.mxu0 %v700_v19 }
  0x30   : > { %642 = vmatprep.subr.bf16.mxu0 %v747_v16 }
  0x33   : > { %643 = vmatpush3.bf16.msra.mxu0 %v701_v20 }
  0x34   : > { %644 = vmatprep.subr.bf16.mxu0 %v747_v16 }
  0x37   : > { %645 = vmatpush3.bf16.msra.mxu0 %v702_v21 }
  0x38   : > { %646 = vmatprep.subr.bf16.mxu0 %v747_v16 }
  0x3b   : > { %647 = vmatpush3.bf16.msra.mxu0 %v703_v22 }
  0x3c   : > { %648 = vmatprep.subr.bf16.mxu0 %v747_v16 }
  0x3f   : > { %649 = vmatpush3.bf16.msra.mxu0 %v704_v23 }
  0x40   : > { %650 = vmatprep.subr.bf16.mxu0 %v747_v16 }
  0x43   : > { %651 = vmatpush3.bf16.msra.mxu0 %v705_v24 }
  0x46   : > { %653 = vmatmul.mubr.bf16.vlgmr.msra.gmra.mrb[0].mxu0 %v706_v25 }
 0x119   : > { %v431_v27 = vpop.f32.mrb[0].mxu0 }
 0x11a   : > { %v654_v28 = vpop.f32.mrb[1].mxu0  ;;  %v432_v30 = vadd.f32 %v604_v26, %v431_v27  ;;  %454 = sbr.rel (!%p804_p6) target bundleno = 297 (0x129), region = 77 }
 0x11b   : > { %v434_v29 = vpop.f32.mrb[2].mxu0 }
 0x11c   : > { %v435_v31 = vadd.f32 %v604_v26, %v434_v29  ;;  %v655_v32 = vpop.f32.mrb[3].mxu0 }
 0x11e   : > { %v625_v33 = vpack.c.bf16 %v435_v31, %v432_v30 }
 0x120   : > { %626 = vst [vmem:[%s306_s19] sm:$0xff] %v625_v33  }
 0x127   : > { %v475_v34 = vld [vmem:[%s306_s19] sm:$0xf]  ;;  %v477_v35 = vld [vmem:[%s306_s19 + $0x4] sm:$0xf] }
 0x128   : > { %476 = vst [vmem:[%s459_s25] sm:$0xf] %v475_v34  ;;  %478 = vst [vmem:[%s459_s25 + $0x8] sm:$0xf] %v477_v35 }
 0x129 PF: > { %s13_s16 = sadd.s32 1, %s745_s16   ;;  %s876_s12 = smov %s733_s13 }
 0x12a   : > { %p10_p12 = scmp.ge.s32.totalorder %s13_s16, 4   ;;  %s877_s13 = smov %s809_s22 }
 0x12b   : > { %s878_s14 = smov %s741_s15  ;;  %s879_s15 = smov %s881_s17 }
 0x12c   :  { %12 = sbr.rel (!%p10_p12) target bundleno = 3 (0x3), region = 155 }

// kernel: backbone_forward.80
= control target key start
LH: loop header
LB: loop body
LE: loop exit
PB: predicated region body
PF: predicated region fallthrough
CT: control target
= control target key end

     0   :  { %s827_s15 = smov 0   ;;  %s829_s16 = smov 0   ;;  %s920_s0 = inlined_call_operand.vmem [shape: bf16[16,64], index: 0, kind: input, shape index: {}]   ;;  %s921_s1 = inlined_call_operand.vmem [shape: bf16[64,256], index: 1, kind: input, shape index: {}]   ;;  %s922_s2 = inlined_call_operand.vmem [shape: f32[1,256], index: 2, kind: input, shape index: {}]   ;;  %s923_s3 = inlined_call_operand.vmem [shape: bf16[16,256], index: 3, kind: input, shape index: {}]   ;;  %s924_s4 = inlined_call_operand.vmem [shape: bf16[16,256], index: 4, kind: output, shape index: {}]  }
   0x1   :  { %s831_s17 = smov 0   ;;  %s833_s18 = smov 0  }
   0x2   :  { %s835_s19 = smov 0  }
   0x3 LB: > { %s23_s20 = sadd.s32 1, %s794_s18  ;;  %s659_s21 = sadd.s32 4294967295, %s798_s19   ;;  %s798_s19 = sphi %s835_s19, %s14_s19   ;;  %s794_s18 = sphi %s833_s18, %s930_s18   ;;  %s790_s17 = sphi %s831_s17, %s929_s17   ;;  %s786_s16 = sphi %s829_s16, %s928_s16   ;;  %s782_s15 = sphi %s827_s15, %s927_s15  }
   0x4   : > { %p24_p0 = scmp.ge.s32.totalorder %s23_s20, 2  ;;  %p66_p1 = scmp.ne.s32.totalorder %s786_s16, %s782_s15 }
   0x5   : > { %p67_p2 = scmp.eq.s32.totalorder %s798_s19, 0  ;;  %p152_p4 = scmp.eq.s32.totalorder %s659_s21, 1 }
   0x6   : > { %s932_s20 = smov (%p24_p0, %s23_s20), 0  ;;  %s59_s24 = sadd.s32 1, %s786_s16 }
   0x7   : > { %p859_p3 = por %p67_p2, %p66_p1  ;;  %s56_s23 = ssub.s32 %s794_s18, %s932_s20 }
   0x8   : > { %p57_p5 = scmp.eq.s32.totalorder %s56_s23, 0  ;;  %p866_p6 = por %p152_p4, %p66_p1 }
   0x9   : > { %p663_p7 = scmp.ge.s32.totalorder %s798_s19, 2 }
   0xa   : > { %s871_s26 = scalar_select %p57_p5, %s786_s16, %s59_s24  }
   0xb   : > { %183 = sbr.rel (%p663_p7) target bundleno = 34 (0x22), region = 20 }
  0x12   : > { %186 = sbr.rel (!%p859_p3) target bundleno = 27 (0x1b), region = 24  ;;  %s188_s27 = sand.u32 (%p859_p3), 1, %s786_s16  }
  0x13   : > { %s665_s28 = sshll.u32 (%p859_p3), %s794_s18, 2  ;;  %s664_s29 = sshll.u32 (%p859_p3), %s188_s27, 5 }
  0x14   : > { %s192_s6 = scalar_lea.vmem (%p859_p3), %s921_s1, %s665_s28  ;;  %s190_s7 = scalar_lea.vmem (%p859_p3), [#allocation2], %s664_s29 }
  0x15   : > { %v208_v0 = vld [vmem:[%s192_s6] sm:$0xf] (%p859_p3)  ;;  %v210_v1 = vld [vmem:[%s192_s6 + $0x8] sm:$0xf] (%p859_p3)  ;;  %v212_v2 = vld [vmem:[%s192_s6 + $0x10] sm:$0xf] (%p859_p3) }
  0x16   : > { %209 = vst [vmem:[%s190_s7] sm:$0xf] (%p859_p3), %v208_v0  ;;  %211 = vst [vmem:[%s190_s7 + $0x4] sm:$0xf] (%p859_p3), %v210_v1  ;;  %v214_v3 = vld [vmem:[%s192_s6 + $0x18] sm:$0xf] (%p859_p3) }
  0x17   : > { %v216_v4 = vld [vmem:[%s192_s6 + $0x20] sm:$0xf] (%p859_p3)  ;;  %213 = vst [vmem:[%s190_s7 + $0x8] sm:$0xf] (%p859_p3), %v212_v2  ;;  %215 = vst [vmem:[%s190_s7 + $0xc] sm:$0xf] (%p859_p3), %v214_v3 }
  0x18   : > { %217 = vst [vmem:[%s190_s7 + $0x10] sm:$0xf] (%p859_p3), %v216_v4  ;;  %v218_v5 = vld [vmem:[%s192_s6 + $0x28] sm:$0xf] (%p859_p3)  ;;  %v220_v6 = vld [vmem:[%s192_s6 + $0x30] sm:$0xf] (%p859_p3) }
  0x19   : > { %v222_v7 = vld [vmem:[%s192_s6 + $0x38] sm:$0xf]  ;;  %219 = vst [vmem:[%s190_s7 + $0x14] sm:$0xf] %v218_v5  ;;  %221 = vst [vmem:[%s190_s7 + $0x18] sm:$0xf] %v220_v6 }
  0x1a   : > { %223 = vst [vmem:[%s190_s7 + $0x1c] sm:$0xf] %v222_v7 }
  0x1b PF: > { %268 = sbr.rel (!%p859_p3) target bundleno = 34 (0x22), region = 69  ;;  %s270_s8 = sand.u32 (%p859_p3), 1, %s786_s16  }
  0x1c   : > { %s667_s9 = sshll.u32 (%p859_p3), %s794_s18, 2  ;;  %s666_s10 = sshll.u32 (%p859_p3), %s270_s8, 3 }
  0x1d   : > { %s277_s13 = scalar_lea.vmem (%p859_p3), %s923_s3, %s667_s9  ;;  %s272_s14 = scalar_lea.vmem (%p859_p3), [#allocation3], %s666_s10 }
  0x1e   : > { %v293_v8 = vld [vmem:[%s277_s13] sm:$0xf] (%p859_p3)  ;;  %v295_v9 = vld [vmem:[%s277_s13 + $0x8] sm:$0xf] (%p859_p3) }
  0x1f   : > { %294 = vst [vmem:[%s272_s14] sm:$0xf] (%p859_p3), %v293_v8  ;;  %296 = vst [vmem:[%s272_s14 + $0x4] sm:$0xf] (%p859_p3), %v295_v9 }
  0x22 PF: > { %p668_p8 = scmp.ge.s32.totalorder %s798_s19, 1  ;;  %p322_p9 = scmp.lt.s32.totalorder %s798_s19, 3 }
  0x24   : > { %p323_p10 = pnand %p668_p8, %p322_p9 }
  0x25   : > { %s329_s21 = sand.u32 (!%p323_p10), 1, %s782_s15   ;;  %v800_v10 = vmov (!%p323_p10), 0.0   ;;  %vm801_vm0 = vmmov (!%p323_p10), 0   ;;  %v759_v15 = vld [vmem:[%s920_s0] sm:$0xff] (!%p323_p10)   ;;  %vm430_vm1 = vcmask (!%p323_p10), 523264   ;;  %p378_p11 = scmp.lt.s32.totalorder (!%p323_p10), %s790_s17, 1 }
  0x26   : > { %326 = sbr.rel (%p323_p10) target bundleno = 287 (0x11f), region = 110  ;;  %701 = vmatprep.subr.bf16.mxu0 (!%p323_p10), %v800_v10  ;;  %s669_s22 = sshll.u32 (!%p323_p10), %s329_s21, 5  ;;  %709 = vmatprep.mubr.msk.bf16.mxu0 (!%p323_p10), %vm801_vm0, %v800_v10 }
  0x27   : > { %s331_s23 = scalar_lea.vmem (!%p323_p10), [#allocation2], %s669_s22  ;;  %s670_s27 = sshll.u32 (!%p323_p10), %s329_s21, 3 }
  0x28   : > { %v755_v11 = vld [vmem:[%s331_s23] sm:$0xff] (!%p323_p10)   ;;  %v756_v12 = vld [vmem:[%s331_s23 + $0x8] sm:$0xff] (!%p323_p10)   ;;  %v757_v13 = vld [vmem:[%s331_s23 + $0x10] sm:$0xff] (!%p323_p10)   ;;  %s338_s6 = scalar_lea.vmem (!%p323_p10), [#allocation3], %s670_s27  ;;  %s371_s7 = scalar_lea.vmem (!%p323_p10), [#allocation4], %s670_s27 }
  0x29   : > { %702 = vmatpush3.bf16.msra.mxu0 (!%p323_p10), %v755_v11  ;;  %v758_v14 = vld [vmem:[%s331_s23 + $0x18] sm:$0xff] (!%p323_p10)   ;;  %v688_v16 = vld [vmem:[%s338_s6] sm:$0xff] (!%p323_p10)  }
  0x2a   : > { %703 = vmatprep.subr.bf16.mxu0 (!%p323_p10), %v800_v10  ;;  %v689_v18 = vunpack.c.l.bf16 (!%p323_p10), %v688_v16  ;;  %v690_v22 = vunpack.c.h.bf16 (!%p323_p10), %v688_v16 }
  0x2d   : > { %704 = vmatpush3.bf16.msra.mxu0 %v756_v12  ;;  %s379_s28 = scalar_select %p378_p11, %s790_s17, 1 }
  0x2e   : > { %705 = vmatprep.subr.bf16.mxu0 %v800_v10  ;;  %s682_s8 = sshll.u32 (%p866_p6), %s790_s17, 2 }
  0x2f   : > { %s380_s5 = scalar_lea.vmem %s922_s2, %s379_s28  ;;  %s504_s11 = scalar_lea.vmem (%p866_p6), %s924_s4, %s682_s8 }
  0x30   : > { %v672_v17 = vld [vmem:[%s380_s5] ss:$0 sm:$0xff] }
  0x31   : > { %706 = vmatpush3.bf16.msra.mxu0 %v757_v13 }
  0x32   : > { %707 = vmatprep.subr.bf16.mxu0 %v800_v10 }
  0x35   : > { %708 = vmatpush3.bf16.msra.mxu0 %v758_v14 }
  0x38   : > { %710 = vmatmul.mubr.msk.bf16.vlgmr.msra.gmra.mrb[0].mxu0 %vm430_vm1, %v759_v15 }
 0x10b   : > { %v468_v19 = vpop.f32.mrb[0].mxu0 }
 0x10c   : > { %v469_v20 = vadd.f32 %v672_v17, %v468_v19  ;;  %v711_v21 = vpop.f32.mrb[1].mxu0 }
 0x10d   : > { %v471_v23 = vpop.f32.mrb[2].mxu0 }
 0x10e   : > { %v479_v24 = vadd.f32 %v689_v18, %v469_v20  ;;  %v472_v25 = vadd.f32 %v672_v17, %v471_v23  ;;  %v712_v26 = vpop.f32.mrb[3].mxu0 }
 0x110   : > { %v480_v27 = vadd.f32 %v690_v22, %v472_v25  ;;  %v481_v28 = vmax.f32 %v479_v24, 0.0  ;;  %499 = sbr.rel (!%p866_p6) target bundleno = 287 (0x11f), region = 122 }
 0x112   : > { %v482_v29 = vmax.f32 %v480_v27, 0.0 }
 0x114   : > { %v694_v30 = vpack.c.bf16 %v482_v29, %v481_v28 }
 0x116   : > { %695 = vst [vmem:[%s371_s7] sm:$0xff] %v694_v30  }
 0x11d   : > { %v520_v31 = vld [vmem:[%s371_s7] sm:$0xf]  ;;  %v522_v32 = vld [vmem:[%s371_s7 + $0x4] sm:$0xf] }
 0x11e   : > { %521 = vst [vmem:[%s504_s11] sm:$0xf] %v520_v31  ;;  %523 = vst [vmem:[%s504_s11 + $0x8] sm:$0xf] %v522_v32 }
 0x11f PF: > { %s14_s19 = sadd.s32 1, %s798_s19   ;;  %s927_s15 = smov %s786_s16 }
 0x120   : > { %p11_p12 = scmp.ge.s32.totalorder %s14_s19, 4   ;;  %s928_s16 = smov %s871_s26 }
 0x121   : > { %s929_s17 = smov %s794_s18  ;;  %s930_s18 = smov %s932_s20 }
 0x122   :  { %13 = sbr.rel (!%p11_p12) target bundleno = 3 (0x3), region = 208 }

// kernel: backbone_forward.81
= control target key start
LH: loop header
LB: loop body
LE: loop exit
PB: predicated region body
PF: predicated region fallthrough
CT: control target
= control target key end

     0   :  { %vm213_vm0 = vcmask 519168   ;;  %s367_s1 = inlined_call_operand.vmem [shape: bf16[256,64], index: 1, kind: input, shape index: {}]   ;;  %s368_s0 = inlined_call_operand.vmem [shape: bf16[16,256], index: 0, kind: input, shape index: {}]   ;;  %s369_s2 = inlined_call_operand.vmem [shape: f32[1,64], index: 2, kind: input, shape index: {}]   ;;  %s370_s3 = inlined_call_operand.vmem [shape: bf16[16,64], index: 3, kind: output, shape index: {}]  }
   0x1   :  { %v265_v0 = vld [vmem:[%s367_s1 + $0x40] sm:$0xff]   ;;  %v267_v2 = vld [vmem:[%s367_s1 + $0x48] sm:$0xff]   ;;  %v269_v4 = vld [vmem:[%s367_s1 + $0x50] sm:$0xff]  }
   0x2   :  { %v266_v1 = vld [vmem:[%s367_s1] sm:$0xff]   ;;  %243 = vmatprep.subr.bf16.mxu0 %v265_v0  ;;  %v268_v3 = vld [vmem:[%s367_s1 + $0x8] sm:$0xff]   ;;  %v270_v5 = vld [vmem:[%s367_s1 + $0x10] sm:$0xff]  }
   0x3   :  { %244 = vmatpush3.bf16.msra.mxu0 %v266_v1  ;;  %v271_v6 = vld [vmem:[%s367_s1 + $0x58] sm:$0xff]   ;;  %v273_v8 = vld [vmem:[%s367_s1 + $0x60] sm:$0xff]   ;;  %v275_v10 = vld [vmem:[%s367_s1 + $0x68] sm:$0xff]  }
   0x4   :  { %245 = vmatprep.subr.bf16.mxu0 %v267_v2  ;;  %v272_v7 = vld [vmem:[%s367_s1 + $0x18] sm:$0xff]   ;;  %v274_v9 = vld [vmem:[%s367_s1 + $0x20] sm:$0xff]   ;;  %v276_v12 = vld [vmem:[%s367_s1 + $0x28] sm:$0xff]  }
   0x5   :  { %v283_v11 = vld [vmem:[%s368_s0 + $0x4] ss:$8 sps:$4 sm:$0xff]   ;;  %v277_v13 = vld [vmem:[%s367_s1 + $0x70] sm:$0xff]   ;;  %v279_v15 = vld [vmem:[%s367_s1 + $0x78] sm:$0xff]  }
   0x6   :  { %194 = vmatprep.mubr.bf16.mxu0 %v283_v11  ;;  %v278_v14 = vld [vmem:[%s367_s1 + $0x30] sm:$0xff]   ;;  %v280_v16 = vld [vmem:[%s367_s1 + $0x38] sm:$0xff]   ;;  %v281_v17 = vld [vmem:[%s368_s0] ss:$8 sps:$4 sm:$0xff]  }
   0x7   :  { %246 = vmatpush3.bf16.msra.mxu0 %v268_v3  ;;  %v220_v19 = vld [vmem:[%s369_s2] ss:$0 sm:$0xff] }
   0x8   :  { %247 = vmatprep.subr.bf16.mxu0 %v269_v4 }
   0xb   :  { %248 = vmatpush3.bf16.msra.mxu0 %v270_v5 }
   0xc   :  { %249 = vmatprep.subr.bf16.mxu0 %v271_v6 }
   0xf   :  { %250 = vmatpush3.bf16.msra.mxu0 %v272_v7 }
  0x10   :  { %251 = vmatprep.subr.bf16.mxu0 %v273_v8 }
  0x13   :  { %252 = vmatpush3.bf16.msra.mxu0 %v274_v9 }
  0x14   :  { %253 = vmatprep.subr.bf16.mxu0 %v275_v10 }
  0x17   :  { %254 = vmatpush3.bf16.msra.mxu0 %v276_v12 }
  0x18   :  { %255 = vmatprep.subr.bf16.mxu0 %v277_v13 }
  0x1b   :  { %256 = vmatpush3.bf16.msra.mxu0 %v278_v14 }
  0x1c   :  { %257 = vmatprep.subr.bf16.mxu0 %v279_v15 }
  0x1f   :  { %258 = vmatpush3.bf16.msra.mxu0 %v280_v16 }
  0x22   :  { %195 = vmatmul.mubr.bf16.vlgmr.msra.gmra.mrb[0].mxu0 %v281_v17 }
  0xf5   :  { %v259_v18 = vpop.f32.mrb[0].mxu0 }
  0xf6   :  { %v260_v20 = vpop.f32.mrb[1].mxu0 }
  0xf7   :  { %v261_v21 = vadd.f32 %v260_v20, %v259_v18  ;;  %v262_v22 = vpop.f32.mrb[2].mxu0 }
  0xf8   :  { %v263_v23 = vpop.f32.mrb[3].mxu0 }
  0xf9   :  { %v197_v24 = vadd.f32 %v261_v21, %v220_v19  ;;  %v264_v25 = vadd.f32 %v263_v23, %v262_v22 }
  0xfb   :  { %v203_v26 = vmax.f32 %v197_v24, 0.0  ;;  %v200_v27 = vadd.f32 %v264_v25, %v220_v19 }
  0xfd   :  { %v241_v28 = vpack.c.bf16 %v203_v26, %v203_v26  ;;  %v204_v29 = vmax.f32 %v200_v27, 0.0 }
  0xff   :  { %214 = vst.msk [vmem:[%s370_s3] sm:$0xf] %vm213_vm0, %v241_v28  ;;  %v242_v30 = vpack.c.bf16 %v204_v29, %v204_v29 }
 0x101   :  { %215 = vst.msk [vmem:[%s370_s3 + $0x4] sm:$0xf] %vm213_vm0, %v242_v30 }

// kernel: backbone_forward.98
= control target key start
LH: loop header
LB: loop body
LE: loop exit
PB: predicated region body
PF: predicated region fallthrough
CT: control target
= control target key end

     0   :  { %s1007_s12 = smov 0   ;;  %s1009_s13 = smov 0   ;;  %s1195_s0 = inlined_call_operand.vmem [shape: bf16[16,256], index: 0, kind: input, shape index: {}]   ;;  %s1196_s1 = inlined_call_operand.vmem [shape: bf16[256,512], index: 1, kind: input, shape index: {}]   ;;  %s1197_s2 = inlined_call_operand.vmem [shape: f32[1,512], index: 2, kind: input, shape index: {}]   ;;  %s1198_s3 = inlined_call_operand.vmem [shape: bf16[16,512], index: 3, kind: output, shape index: {}]  }
   0x1   :  { %s1011_s14 = smov 0   ;;  %s1013_s15 = smov 0  }
   0x2   :  { %s1015_s16 = smov 0  }
   0x3 LB: > { %s22_s17 = sadd.s32 1, %s981_s15  ;;  %s799_s18 = sadd.s32 4294967295, %s985_s16   ;;  %s985_s16 = sphi %s1015_s16, %s13_s16   ;;  %s981_s15 = sphi %s1013_s15, %s1203_s15   ;;  %s977_s14 = sphi %s1011_s14, %s1202_s14   ;;  %s973_s13 = sphi %s1009_s13, %s1201_s13   ;;  %s969_s12 = sphi %s1007_s12, %s1200_s12  }
   0x4   : > { %p23_p0 = scmp.ge.s32.totalorder %s22_s17, 2  ;;  %p65_p1 = scmp.ne.s32.totalorder %s973_s13, %s969_s12 }
   0x5   : > { %p66_p2 = scmp.eq.s32.totalorder %s985_s16, 0  ;;  %p123_p4 = scmp.eq.s32.totalorder %s799_s18, 1 }
   0x6   : > { %s1205_s17 = smov (%p23_p0, %s22_s17), 0  ;;  %s58_s20 = sadd.s32 1, %s973_s13 }
   0x7   : > { %p67_p3 = por %p66_p2, %p65_p1  ;;  %s55_s19 = ssub.s32 %s981_s15, %s1205_s17 }
   0x8   : > { %p56_p5 = scmp.eq.s32.totalorder %s55_s19, 0  ;;  %p1042_p6 = por %p123_p4, %p65_p1 }
   0x9   : > { %p803_p7 = scmp.ge.s32.totalorder %s985_s16, 2 }
   0xa   : > { %s1047_s22 = scalar_select %p56_p5, %s973_s13, %s58_s20  }
   0xb   : > { %155 = sbr.rel (%p803_p7) target bundleno = 38 (0x26), region = 20 }
  0x12   : > { %158 = sbr.rel (!%p67_p3) target bundleno = 38 (0x26), region = 24  ;;  %s160_s23 = sand.u32 (%p67_p3), 1, %s973_s13  }
  0x13   : > { %s852_s24 = sshll.u32 (%p67_p3), %s981_s15, 3  ;;  %s804_s25 = sshll.u32 (%p67_p3), %s160_s23, 8 }
  0x14   : > { %s1055_s28 = scalar_lea.vmem (%p67_p3), %s1196_s1, %s852_s24  ;;  %s1060_s29 = scalar_lea.vmem (%p67_p3), [#allocation2], %s804_s25 }
  0x15   : > { %v255_v0 = vld [vmem:[%s1055_s28] sm:$0xff] (%p67_p3)  ;;  %v257_v1 = vld [vmem:[%s1055_s28 + $0x10] sm:$0xff] (%p67_p3) }
  0x16   : > { %v259_v2 = vld [vmem:[%s1055_s28 + $0x20] sm:$0xff] (%p67_p3)  ;;  %256 = vst [vmem:[%s1060_s29] sm:$0xff] (%p67_p3), %v255_v0  ;;  %258 = vst [vmem:[%s1060_s29 + $0x8] sm:$0xff] (%p67_p3), %v257_v1  ;;  %v261_v3 = vld [vmem:[%s1055_s28 + $0x30] sm:$0xff] (%p67_p3) }
  0x17   : > { %260 = vst [vmem:[%s1060_s29 + $0x10] sm:$0xff] (%p67_p3), %v259_v2  ;;  %v263_v4 = vld [vmem:[%s1055_s28 + $0x40] sm:$0xff] (%p67_p3)  ;;  %v265_v5 = vld [vmem:[%s1055_s28 + $0x50] sm:$0xff] (%p67_p3)  ;;  %262 = vst [vmem:[%s1060_s29 + $0x18] sm:$0xff] (%p67_p3), %v261_v3 }
  0x18   : > { %264 = vst [vmem:[%s1060_s29 + $0x20] sm:$0xff] (%p67_p3), %v263_v4  ;;  %266 = vst [vmem:[%s1060_s29 + $0x28] sm:$0xff] (%p67_p3), %v265_v5  ;;  %v267_v6 = vld [vmem:[%s1055_s28 + $0x60] sm:$0xff] (%p67_p3)  ;;  %v269_v7 = vld [vmem:[%s1055_s28 + $0x70] sm:$0xff] (%p67_p3) }
  0x19   : > { %v271_v8 = vld [vmem:[%s1055_s28 + $0x80] sm:$0xff]  ;;  %268 = vst [vmem:[%s1060_s29 + $0x30] sm:$0xff] %v267_v6  ;;  %270 = vst [vmem:[%s1060_s29 + $0x38] sm:$0xff] %v269_v7  ;;  %v273_v9 = vld [vmem:[%s1055_s28 + $0x90] sm:$0xff] }
  0x1a   : > { %272 = vst [vmem:[%s1060_s29 + $0x40] sm:$0xff] %v271_v8  ;;  %v275_v10 = vld [vmem:[%s1055_s28 + $0xa0] sm:$0xff]  ;;  %v277_v11 = vld [vmem:[%s1055_s28 + $0xb0] sm:$0xff]  ;;  %274 = vst [vmem:[%s1060_s29 + $0x48] sm:$0xff] %v273_v9 }
  0x1b   : > { %276 = vst [vmem:[%s1060_s29 + $0x50] sm:$0xff] %v275_v10  ;;  %278 = vst [vmem:[%s1060_s29 + $0x58] sm:$0xff] %v277_v11  ;;  %v279_v12 = vld [vmem:[%s1055_s28 + $0xc0] sm:$0xff]  ;;  %v281_v13 = vld [vmem:[%s1055_s28 + $0xd0] sm:$0xff] }
  0x1c   : > { %v283_v14 = vld [vmem:[%s1055_s28 + $0xe0] sm:$0xff]  ;;  %280 = vst [vmem:[%s1060_s29 + $0x60] sm:$0xff] %v279_v12  ;;  %282 = vst [vmem:[%s1060_s29 + $0x68] sm:$0xff] %v281_v13  ;;  %v285_v15 = vld [vmem:[%s1055_s28 + $0xf0] sm:$0xff] }
  0x1d   : > { %284 = vst [vmem:[%s1060_s29 + $0x70] sm:$0xff] %v283_v14  ;;  %v287_v16 = vld [vmem:[%s1055_s28 + $0x100] sm:$0xff]  ;;  %v289_v17 = vld [vmem:[%s1055_s28 + $0x110] sm:$0xff]  ;;  %286 = vst [vmem:[%s1060_s29 + $0x78] sm:$0xff] %v285_v15 }
  0x1e   : > { %288 = vst [vmem:[%s1060_s29 + $0x80] sm:$0xff] %v287_v16  ;;  %290 = vst [vmem:[%s1060_s29 + $0x88] sm:$0xff] %v289_v17  ;;  %v291_v18 = vld [vmem:[%s1055_s28 + $0x120] sm:$0xff]  ;;  %v293_v19 = vld [vmem:[%s1055_s28 + $0x130] sm:$0xff] }
  0x1f   : > { %v295_v20 = vld [vmem:[%s1055_s28 + $0x140] sm:$0xff]  ;;  %292 = vst [vmem:[%s1060_s29 + $0x90] sm:$0xff] %v291_v18  ;;  %294 = vst [vmem:[%s1060_s29 + $0x98] sm:$0xff] %v293_v19  ;;  %v297_v21 = vld [vmem:[%s1055_s28 + $0x150] sm:$0xff] }
  0x20   : > { %296 = vst [vmem:[%s1060_s29 + $0xa0] sm:$0xff] %v295_v20  ;;  %v299_v22 = vld [vmem:[%s1055_s28 + $0x160] sm:$0xff]  ;;  %v301_v23 = vld [vmem:[%s1055_s28 + $0x170] sm:$0xff]  ;;  %298 = vst [vmem:[%s1060_s29 + $0xa8] sm:$0xff] %v297_v21 }
  0x21   : > { %300 = vst [vmem:[%s1060_s29 + $0xb0] sm:$0xff] %v299_v22  ;;  %302 = vst [vmem:[%s1060_s29 + $0xb8] sm:$0xff] %v301_v23  ;;  %v303_v24 = vld [vmem:[%s1055_s28 + $0x180] sm:$0xff]  ;;  %v305_v25 = vld [vmem:[%s1055_s28 + $0x190] sm:$0xff] }
  0x22   : > { %v307_v26 = vld [vmem:[%s1055_s28 + $0x1a0] sm:$0xff]  ;;  %304 = vst [vmem:[%s1060_s29 + $0xc0] sm:$0xff] %v303_v24  ;;  %306 = vst [vmem:[%s1060_s29 + $0xc8] sm:$0xff] %v305_v25  ;;  %v309_v27 = vld [vmem:[%s1055_s28 + $0x1b0] sm:$0xff] }
  0x23   : > { %308 = vst [vmem:[%s1060_s29 + $0xd0] sm:$0xff] %v307_v26  ;;  %v311_v28 = vld [vmem:[%s1055_s28 + $0x1c0] sm:$0xff]  ;;  %v313_v29 = vld [vmem:[%s1055_s28 + $0x1d0] sm:$0xff]  ;;  %310 = vst [vmem:[%s1060_s29 + $0xd8] sm:$0xff] %v309_v27 }
  0x24   : > { %312 = vst [vmem:[%s1060_s29 + $0xe0] sm:$0xff] %v311_v28  ;;  %314 = vst [vmem:[%s1060_s29 + $0xe8] sm:$0xff] %v313_v29  ;;  %v315_v30 = vld [vmem:[%s1055_s28 + $0x1e0] sm:$0xff]  ;;  %v317_v31 = vld [vmem:[%s1055_s28 + $0x1f0] sm:$0xff] }
  0x25   : > { %316 = vst [vmem:[%s1060_s29 + $0xf0] sm:$0xff] %v315_v30  ;;  %318 = vst [vmem:[%s1060_s29 + $0xf8] sm:$0xff] %v317_v31 }
  0x26 PF: > { %p807_p8 = scmp.ge.s32.totalorder %s985_s16, 1  ;;  %p331_p9 = scmp.lt.s32.totalorder %s985_s16, 3 }
  0x28   : > { %p332_p10 = pnand %p807_p8, %p331_p9 }
  0x29   : > { %s338_s30 = sand.u32 (!%p332_p10), 1, %s969_s12   ;;  %v946_v32 = vld [vmem:[%s1195_s0 + $0x4] ss:$8 sps:$4 sm:$0xff] (!%p332_p10)   ;;  %v944_v1 = vld [vmem:[%s1195_s0] ss:$8 sps:$4 sm:$0xff] (!%p332_p10)   ;;  %s810_s10 = sshll.u32 (!%p332_p10), %s977_s14, 1  ;;  %v421_v2 = vlaneseq (!%p332_p10) }
  0x2a   : > { %335 = sbr.rel (%p332_p10) target bundleno = 337 (0x151), region = 66  ;;  %s808_s4 = sshll.u32 (!%p332_p10), %s338_s30, 8  ;;  %633 = vmatprep.mubr.bf16.mxu0 (!%p332_p10), %v946_v32 }
  0x2b   : > { %s1131_s7 = scalar_lea.vmem (!%p332_p10), [#allocation2], %s808_s4  ;;  %p379_p11 = scmp.lt.s32.totalorder (!%p332_p10), %s810_s10, 3  ;;  %v422_v3 = vshrl.u32 (!%p332_p10), %v421_v2, 7 }
  0x2c   : > { %v896_v33 = vld [vmem:[%s1131_s7 + $0x4] ss:$8 sps:$4 sm:$0xff] (!%p332_p10)   ;;  %v898_v34 = vld [vmem:[%s1131_s7] ss:$8 sps:$4 sm:$0xff] (!%p332_p10)   ;;  %v899_v35 = vld [vmem:[%s1131_s7 + $0x14] ss:$8 sps:$4 sm:$0xff] (!%p332_p10)  }
  0x2d   : > { %601 = vmatprep.subr.bf16.mxu0 (!%p332_p10), %v896_v33  ;;  %v901_v36 = vld [vmem:[%s1131_s7 + $0x10] ss:$8 sps:$4 sm:$0xff] (!%p332_p10)   ;;  %v902_v37 = vld [vmem:[%s1131_s7 + $0x24] ss:$8 sps:$4 sm:$0xff] (!%p332_p10)   ;;  %v904_v38 = vld [vmem:[%s1131_s7 + $0x20] ss:$8 sps:$4 sm:$0xff] (!%p332_p10)  }
  0x2e   : > { %602 = vmatpush1.bf16.msra.mxu0 (!%p332_p10), %v898_v34  ;;  %v905_v39 = vld [vmem:[%s1131_s7 + $0x34] ss:$8 sps:$4 sm:$0xff] (!%p332_p10)   ;;  %v907_v40 = vld [vmem:[%s1131_s7 + $0x30] ss:$8 sps:$4 sm:$0xff] (!%p332_p10)   ;;  %v908_v41 = vld [vmem:[%s1131_s7 + $0x44] ss:$8 sps:$4 sm:$0xff] (!%p332_p10)  }
  0x2f   : > { %603 = vmatprep.subr.bf16.mxu0 (!%p332_p10), %v899_v35  ;;  %v910_v42 = vld [vmem:[%s1131_s7 + $0x40] ss:$8 sps:$4 sm:$0xff] (!%p332_p10)   ;;  %v911_v43 = vld [vmem:[%s1131_s7 + $0x54] ss:$8 sps:$4 sm:$0xff] (!%p332_p10)   ;;  %v913_v44 = vld [vmem:[%s1131_s7 + $0x50] ss:$8 sps:$4 sm:$0xff] (!%p332_p10)  }
  0x30   : > { %v914_v45 = vld [vmem:[%s1131_s7 + $0x64] ss:$8 sps:$4 sm:$0xff] (!%p332_p10)   ;;  %v916_v46 = vld [vmem:[%s1131_s7 + $0x60] ss:$8 sps:$4 sm:$0xff] (!%p332_p10)   ;;  %v917_v47 = vld [vmem:[%s1131_s7 + $0x74] ss:$8 sps:$4 sm:$0xff] (!%p332_p10)  }
  0x31   : > { %v919_v48 = vld [vmem:[%s1131_s7 + $0x70] ss:$8 sps:$4 sm:$0xff]   ;;  %v920_v49 = vld [vmem:[%s1131_s7 + $0x84] ss:$8 sps:$4 sm:$0xff]   ;;  %v922_v50 = vld [vmem:[%s1131_s7 + $0x80] ss:$8 sps:$4 sm:$0xff]  }
  0x32   : > { %604 = vmatpush1.bf16.msra.mxu0 %v901_v36  ;;  %v923_v51 = vld [vmem:[%s1131_s7 + $0x94] ss:$8 sps:$4 sm:$0xff]   ;;  %v925_v52 = vld [vmem:[%s1131_s7 + $0x90] ss:$8 sps:$4 sm:$0xff]   ;;  %v926_v53 = vld [vmem:[%s1131_s7 + $0xa4] ss:$8 sps:$4 sm:$0xff]  }
  0x33   : > { %605 = vmatprep.subr.bf16.mxu0 %v902_v37  ;;  %v928_v54 = vld [vmem:[%s1131_s7 + $0xa0] ss:$8 sps:$4 sm:$0xff]   ;;  %v929_v55 = vld [vmem:[%s1131_s7 + $0xb4] ss:$8 sps:$4 sm:$0xff]   ;;  %v931_v56 = vld [vmem:[%s1131_s7 + $0xb0] ss:$8 sps:$4 sm:$0xff]  }
  0x34   : > { %v932_v57 = vld [vmem:[%s1131_s7 + $0xc4] ss:$8 sps:$4 sm:$0xff]   ;;  %v934_v58 = vld [vmem:[%s1131_s7 + $0xc0] ss:$8 sps:$4 sm:$0xff]   ;;  %v935_v59 = vld [vmem:[%s1131_s7 + $0xd4] ss:$8 sps:$4 sm:$0xff]  }
  0x35   : > { %v937_v60 = vld [vmem:[%s1131_s7 + $0xd0] ss:$8 sps:$4 sm:$0xff]   ;;  %v938_v61 = vld [vmem:[%s1131_s7 + $0xe4] ss:$8 sps:$4 sm:$0xff]   ;;  %v940_v62 = vld [vmem:[%s1131_s7 + $0xe0] ss:$8 sps:$4 sm:$0xff]  }
  0x36   : > { %606 = vmatpush1.bf16.msra.mxu0 %v904_v38  ;;  %v941_v63 = vld [vmem:[%s1131_s7 + $0xf4] ss:$8 sps:$4 sm:$0xff]   ;;  %v943_v0 = vld [vmem:[%s1131_s7 + $0xf0] ss:$8 sps:$4 sm:$0xff]   ;;  %s1207_s10 = smov (!%p379_p11, %s810_s10), 3  ;;  %v423_v4 = vsub.s32 0, %v422_v3 }
  0x37   : > { %607 = vmatprep.subr.bf16.mxu0 %v905_v39  ;;  %s381_s19 = scalar_lea.vmem %s1197_s2, %s1207_s10  ;;  %v427_v6 = vsub.s32 1, %v422_v3  ;;  %s809_s20 = sshll.u32 %s338_s30, 4 }
  0x38   : > { %v419_v5 = vld [vmem:[%s381_s19] sm:$0x3]  ;;  %s369_s23 = scalar_lea.vmem [#allocation3], %s809_s20  ;;  %s855_s24 = sshll.u32 (%p1042_p6), %s977_s14, 3 }
  0x39   : > { %v424_v7 = vrot.slane %v419_v5, %v423_v4  ;;  %v428_v8 = vrot.slane %v419_v5, %v427_v6  ;;  %s670_s26 = scalar_lea.vmem (%p1042_p6), %s1198_s3, %s855_s24 }
  0x3a   : > { %608 = vmatpush1.bf16.msra.mxu0 %v907_v40 }
  0x3b   : > { %609 = vmatprep.subr.bf16.mxu0 %v908_v41 }
  0x3e   : > { %610 = vmatpush1.bf16.msra.mxu0 %v910_v42 }
  0x3f   : > { %611 = vmatprep.subr.bf16.mxu0 %v911_v43 }
  0x42   : > { %612 = vmatpush1.bf16.msra.mxu0 %v913_v44 }
  0x43   : > { %613 = vmatprep.subr.bf16.mxu0 %v914_v45 }
  0x46   : > { %614 = vmatpush1.bf16.msra.mxu0 %v916_v46 }
  0x47   : > { %615 = vmatprep.subr.bf16.mxu0 %v917_v47 }
  0x4a   : > { %616 = vmatpush1.bf16.msra.mxu0 %v919_v48 }
  0x4b   : > { %617 = vmatprep.subr.bf16.mxu0 %v920_v49 }
  0x4e   : > { %618 = vmatpush1.bf16.msra.mxu0 %v922_v50 }
  0x4f   : > { %619 = vmatprep.subr.bf16.mxu0 %v923_v51 }
  0x52   : > { %620 = vmatpush1.bf16.msra.mxu0 %v925_v52 }
  0x53   : > { %621 = vmatprep.subr.bf16.mxu0 %v926_v53 }
  0x56   : > { %622 = vmatpush1.bf16.msra.mxu0 %v928_v54 }
  0x57   : > { %623 = vmatprep.subr.bf16.mxu0 %v929_v55 }
  0x5a   : > { %624 = vmatpush1.bf16.msra.mxu0 %v931_v56 }
  0x5b   : > { %625 = vmatprep.subr.bf16.mxu0 %v932_v57 }
  0x5e   : > { %626 = vmatpush1.bf16.msra.mxu0 %v934_v58 }
  0x5f   : > { %627 = vmatprep.subr.bf16.mxu0 %v935_v59 }
  0x62   : > { %628 = vmatpush1.bf16.msra.mxu0 %v937_v60 }
  0x63   : > { %629 = vmatprep.subr.bf16.mxu0 %v938_v61 }
  0x66   : > { %630 = vmatpush1.bf16.msra.mxu0 %v940_v62 }
  0x67   : > { %631 = vmatprep.subr.bf16.mxu0 %v941_v63 }
  0x6a   : > { %632 = vmatpush1.bf16.msra.mxu0 %v943_v0 }
  0x6d   : > { %634 = vmatmul.mubr.bf16.vlgmr.msra.gmra.mrb[0].mxu0 %v944_v1 }
 0x140   : > { %v635_v9 = vpop.f32.mrb[0].mxu0 }
 0x141   : > { %v636_v10 = vadd.f32 %v635_v9, %v424_v7  ;;  %v637_v11 = vpop.f32.mrb[1].mxu0 }
 0x142   : > { %v638_v12 = vadd.f32 %v637_v11, %v428_v8  ;;  %v639_v13 = vpop.f32.mrb[2].mxu0  ;;  %664 = sbr.rel (!%p1042_p6) target bundleno = 337 (0x151), region = 74 }
 0x143   : > { %v640_v14 = vadd.f32 %v639_v13, %v424_v7  ;;  %v641_v15 = vpop.f32.mrb[3].mxu0 }
 0x144   : > { %v853_v16 = vpack.c.bf16 %v638_v12, %v636_v10  ;;  %v642_v17 = vadd.f32 %v641_v15, %v428_v8 }
 0x146   : > { %656 = vst [vmem:[%s369_s23] sm:$0xff] %v853_v16  ;;  %v854_v18 = vpack.c.bf16 %v642_v17, %v640_v14 }
 0x148   : > { %657 = vst [vmem:[%s369_s23 + $0x8] sm:$0xff] %v854_v18 }
 0x14d   : > { %v700_v19 = vld [vmem:[%s369_s23] sm:$0xff] }
 0x14e   : > { %701 = vst [vmem:[%s670_s26] sm:$0xff] %v700_v19 }
 0x14f   : > { %v702_v20 = vld [vmem:[%s369_s23 + $0x8] sm:$0xff] }
 0x150   : > { %703 = vst [vmem:[%s670_s26 + $0x10] sm:$0xff] %v702_v20 }
 0x151 PF: > { %s13_s16 = sadd.s32 1, %s985_s16   ;;  %s1200_s12 = smov %s973_s13 }
 0x152   : > { %p10_p12 = scmp.ge.s32.totalorder %s13_s16, 4   ;;  %s1201_s13 = smov %s1047_s22 }
 0x153   : > { %s1202_s14 = smov %s981_s15  ;;  %s1203_s15 = smov %s1205_s17 }
 0x154   :  { %12 = sbr.rel (!%p10_p12) target bundleno = 3 (0x3), region = 149 }

// kernel: backbone_forward.82
= control target key start
LH: loop header
LB: loop body
LE: loop exit
PB: predicated region body
PF: predicated region fallthrough
CT: control target
= control target key end

     0   :  { %s1353_s12 = smov 0   ;;  %s1561_s0 = inlined_call_operand.vmem [shape: bf16[2,24,64], index: 0, kind: input, shape index: {}]   ;;  %s1562_s1 = inlined_call_operand.vmem [shape: bf16[9,64,64], index: 1, kind: input, shape index: {}]   ;;  %s1563_s2 = inlined_call_operand.vmem [shape: f32[1,64], index: 2, kind: input, shape index: {}]   ;;  %s1564_s3 = inlined_call_operand.vmem [shape: bf16[2,8,64], index: 3, kind: output, shape index: {}]  }
   0x1 LB: > { %s990_s13 = sadd.s32 4294967295, %s1329_s12   ;;  %p994_p0 = scmp.ge.s32.totalorder %s1329_s12, 1  ;;  %s1329_s12 = sphi %s1353_s12, %s13_s12  }
   0x2   : > { %p137_p1 = scmp.lt.s32.totalorder %s1329_s12, 3 }
   0x4   : > { %p138_p2 = pnand %p994_p0, %p137_p1 }
   0x5   : > { %v1280_v0 = vld [vmem:[%s1562_s1 + $0x20] sm:$0xff] (!%p138_p2)   ;;  %v1331_v1 = vmov (!%p138_p2), 0.0   ;;  %v1282_v3 = vld [vmem:[%s1562_s1 + $0x28] sm:$0xff] (!%p138_p2)   ;;  %vm1332_vm0 = vmmov (!%p138_p2), 0   ;;  %p160_p3 = scmp.lt.s32.totalorder (!%p138_p2), %s990_s13, 1  ;;  %v1284_v5 = vld [vmem:[%s1562_s1 + $0x30] sm:$0xff] (!%p138_p2)  }
   0x6   : > { %141 = sbr.rel (%p138_p2) target bundleno = 311 (0x137), region = 32  ;;  %1161 = vmatprep.subr.bf16.mxu0 (!%p138_p2), %v1331_v1  ;;  %1173 = vmatprep.subr.bf16.mxu1 (!%p138_p2), %v1331_v1  ;;  %v1281_v2 = vld [vmem:[%s1562_s1] sm:$0xff] (!%p138_p2)   ;;  %v1283_v4 = vld [vmem:[%s1562_s1 + $0x8] sm:$0xff] (!%p138_p2)   ;;  %v1285_v6 = vld [vmem:[%s1562_s1 + $0x10] sm:$0xff] (!%p138_p2)   ;;  %vm225_vm1 = vcmask (!%p138_p2), 523264   ;;  %vm935_vm2 = vcmask (!%p138_p2), 519168  }
   0x7   : > { %1162 = vmatpush3.bf16.msra.mxu0 (!%p138_p2), %v1280_v0  ;;  %1169 = vmatprep.mubr.msk.bf16.mxu0 (!%p138_p2), %vm1332_vm0, %v1331_v1  ;;  %v1286_v9 = vld [vmem:[%s1562_s1 + $0x38] sm:$0xff] (!%p138_p2)   ;;  %v1289_v15 = vld [vmem:[%s1562_s1 + $0x40] sm:$0xff] (!%p138_p2)   ;;  %v1291_v18 = vld [vmem:[%s1562_s1 + $0x48] sm:$0xff] (!%p138_p2)  }
   0x8   : > { %1174 = vmatpush3.bf16.msra.mxu1 (!%p138_p2), %v1281_v2  ;;  %1163 = vmatprep.subr.bf16.mxu0 (!%p138_p2), %v1331_v1  ;;  %v1287_v11 = vld [vmem:[%s1562_s1 + $0x18] sm:$0xff] (!%p138_p2)   ;;  %v1290_v16 = vld [vmem:[%s1562_s1 + $0x60] sm:$0xff] (!%p138_p2)   ;;  %v1292_v19 = vld [vmem:[%s1562_s1 + $0x68] sm:$0xff] (!%p138_p2)  }
   0x9   : > { %1175 = vmatprep.subr.bf16.mxu1 (!%p138_p2), %v1331_v1  ;;  %1181 = vmatprep.mubr.msk.bf16.mxu1 (!%p138_p2), %vm1332_vm0, %v1331_v1  ;;  %v1293_v20 = vld [vmem:[%s1562_s1 + $0x50] sm:$0xff] (!%p138_p2)   ;;  %v1295_v25 = vld [vmem:[%s1562_s1 + $0x58] sm:$0xff] (!%p138_p2)   ;;  %v1298_v29 = vld [vmem:[%s1562_s1 + $0x80] sm:$0xff] (!%p138_p2)  }
   0xa   : > { %v1294_v21 = vld [vmem:[%s1562_s1 + $0x70] sm:$0xff] (!%p138_p2)   ;;  %v1296_v28 = vld [vmem:[%s1562_s1 + $0x78] sm:$0xff] (!%p138_p2)   ;;  %v1301_v33 = vld [vmem:[%s1562_s1 + $0xa0] sm:$0xff] (!%p138_p2)  }
   0xb   : > { %1164 = vmatpush3.bf16.msra.mxu0 (!%p138_p2), %v1282_v3  ;;  %v1302_v35 = vld [vmem:[%s1562_s1 + $0x88] sm:$0xff] (!%p138_p2)   ;;  %v1304_v39 = vld [vmem:[%s1562_s1 + $0x90] sm:$0xff] (!%p138_p2)   ;;  %v1306_v45 = vld [vmem:[%s1562_s1 + $0x98] sm:$0xff] (!%p138_p2)  }
   0xc   : > { %1176 = vmatpush3.bf16.msra.mxu1 (!%p138_p2), %v1283_v4  ;;  %1165 = vmatprep.subr.bf16.mxu0 (!%p138_p2), %v1331_v1  ;;  %v1303_v36 = vld [vmem:[%s1562_s1 + $0xa8] sm:$0xff] (!%p138_p2)   ;;  %v1305_v40 = vld [vmem:[%s1562_s1 + $0xb0] sm:$0xff] (!%p138_p2)   ;;  %v1307_v46 = vld [vmem:[%s1562_s1 + $0xb8] sm:$0xff] (!%p138_p2)  }
   0xd   : > { %s1566_s13 = smov (!%p160_p3, %s990_s13), 1  ;;  %1177 = vmatprep.subr.bf16.mxu1 %v1331_v1  ;;  %v1308_v48 = vld [vmem:[%s1562_s1 + $0xc0] sm:$0xff]   ;;  %v1311_v54 = vld [vmem:[%s1562_s1 + $0xc8] sm:$0xff]   ;;  %v1313_v57 = vld [vmem:[%s1562_s1 + $0xd0] sm:$0xff]  }
   0xe   : > { %s1269_s24 = smul.u32 12, %s1566_s13  ;;  %v1310_v50 = vld [vmem:[%s1562_s1 + $0xe0] sm:$0xff]   ;;  %v1312_v55 = vld [vmem:[%s1562_s1 + $0xe8] sm:$0xff]   ;;  %v1314_v58 = vld [vmem:[%s1562_s1 + $0xf0] sm:$0xff]   ;;  %s996_s18 = sshll.u32 %s1566_s13, 2 }
   0xf   : > { %1166 = vmatpush3.bf16.msra.mxu0 %v1284_v5  ;;  %v1315_v61 = vld [vmem:[%s1562_s1 + $0xd8] sm:$0xff]   ;;  %v1317_v2 = vld [vmem:[%s1562_s1 + $0x100] sm:$0xff]   ;;  %v1319_v3 = vld [vmem:[%s1562_s1 + $0x108] sm:$0xff]   ;;  %s168_s21 = scalar_lea.vmem %s1564_s3, %s996_s18 }
  0x10   : > { %s1395_s29 = scalar_lea.vmem %s1561_s0, %s1269_s24  ;;  %1178 = vmatpush3.bf16.msra.mxu1 %v1285_v6  ;;  %1167 = vmatprep.subr.bf16.mxu0 %v1331_v1  ;;  %v1316_v62 = vld [vmem:[%s1562_s1 + $0xf8] sm:$0xff]   ;;  %v1320_v4 = vld [vmem:[%s1562_s1 + $0x110] sm:$0xff]  }
  0x11   : > { %v170_v7 = vld [vmem:[%s1395_s29] sm:$0xf]  ;;  %v179_v8 = vld [vmem:[%s1395_s29 + $0x4] sm:$0x1]  ;;  %1179 = vmatprep.subr.bf16.mxu1 %v1331_v1  ;;  %v753_v52 = vld [vmem:[%s1395_s29 + $0x8] sm:$0x1] }
  0x12   : > { %v1005_v10 = vcombine.low %v170_v7, %v179_v8  ;;  %v336_v22 = vld [vmem:[%s1395_s29] sm:$0xe]  ;;  %v419_v24 = vld [vmem:[%s1395_s29 + $0x4] sm:$0x3] }
  0x13   : > { %1168 = vmatpush3.bf16.msra.mxu0 %v1286_v9  ;;  %v418_v23 = vld [vmem:[%s1395_s29] sm:$0xc]  ;;  %v1024_v26 = vcombine.low %v336_v22, %v179_v8  ;;  %v503_v30 = vld [vmem:[%s1395_s29 + $0x4] sm:$0x7] }
  0x14   : > { %v195_v12 = vshrl.u32 %v1005_v10, 16  ;;  %v197_v13 = vshll.u32 %v1005_v10, 16  ;;  %1180 = vmatpush3.bf16.msra.mxu1 %v1287_v11  ;;  %1185 = vmatprep.subr.bf16.mxu0 %v1331_v1  ;;  %v1038_v27 = vcombine.low %v418_v23, %v419_v24  ;;  %v1052_v34 = vcombine.low %v418_v23, %v503_v30  ;;  %v592_v41 = vld [vmem:[%s1395_s29] sm:$0x8]  ;;  %v752_v51 = vld [vmem:[%s1395_s29 + $0x4] sm:$0xf] }
  0x15   : > { %1197 = vmatprep.subr.bf16.mxu1 %v1331_v1  ;;  %v349_v31 = vrot.slane %v1024_v26, 1  ;;  %v1066_v44 = vcombine.low %v592_v41, %v503_v30  ;;  %v1093_v53 = vcombine.low %v752_v51, %v753_v52  ;;  %v674_v0 = vld [vmem:[%s1395_s29 + $0x4] sm:$0xf] }
  0x16   : > { %v199_v14 = vrot.slane %v197_v13, 1  ;;  %v434_v32 = vrot.slane %v1038_v27, 2  ;;  %v517_v37 = vshrl.u32 %v1052_v34, 16  ;;  %v520_v38 = vshll.u32 %v1052_v34, 16  ;;  %v843_v5 = vld [vmem:[%s1395_s29 + $0x4] sm:$0xe] }
  0x17   : > { %1182 = vmatmul.mubr.msk.bf16.vlgmr.msra.gmra.mrb[0].mxu1 %vm225_vm1, %v170_v7  ;;  %v605_v49 = vrot.slane %v1066_v44, 3  ;;  %v771_v56 = vshll.u32 %v1093_v53, 16  ;;  %v769_v59 = vshrl.u32 %v1093_v53, 16  ;;  %v1107_v6 = vcombine.low %v843_v5, %v753_v52  ;;  %v1321_v7 = vld [vmem:[%s1562_s1 + $0x118] sm:$0xff]  }
  0x18   : > { %v200_v17 = vor.u32 %v199_v14, %v195_v12  ;;  %1198 = vmatpush3.bf16.msra.mxu1 %v1290_v16  ;;  %1205 = vmatprep.mubr.msk.bf16.mxu1 %vm1332_vm0, %v1331_v1  ;;  %v519_v42 = vrot.slane %v517_v37, 2  ;;  %v522_v43 = vrot.slane %v520_v38, 3 }
  0x19   : > { %1199 = vmatprep.subr.bf16.mxu1 %v1331_v1  ;;  %v773_v60 = vrot.slane %v771_v56, 1  ;;  %v856_v8 = vrot.slane %v1107_v6, 1 }
  0x1a   : > { %1170 = vmatmul.mubr.msk.bf16.vlgmr.msra.gmra.mrb[0].mxu0 %vm225_vm1, %v200_v17  ;;  %v523_v47 = vor.u32 %v522_v43, %v519_v42 }
  0x1b   : > { %1186 = vmatpush3.bf16.msra.mxu0 %v1289_v15  ;;  %1193 = vmatprep.mubr.msk.bf16.mxu0 %vm1332_vm0, %v1331_v1  ;;  %v774_v63 = vor.u32 %v773_v60, %v769_v59 }
  0x1c   : > { %1187 = vmatprep.subr.bf16.mxu0 %v1331_v1  ;;  %1200 = vmatpush3.bf16.msra.mxu1 %v1292_v19 }
  0x1d   : > { %1201 = vmatprep.subr.bf16.mxu1 %v1331_v1 }
  0x1f   : > { %1188 = vmatpush3.bf16.msra.mxu0 %v1291_v18 }
  0x20   : > { %1189 = vmatprep.subr.bf16.mxu0 %v1331_v1  ;;  %1202 = vmatpush3.bf16.msra.mxu1 %v1294_v21 }
  0x21   : > { %1203 = vmatprep.subr.bf16.mxu1 %v1331_v1 }
  0x23   : > { %1190 = vmatpush3.bf16.msra.mxu0 %v1293_v20 }
  0x24   : > { %1191 = vmatprep.subr.bf16.mxu0 %v1331_v1  ;;  %1204 = vmatpush3.bf16.msra.mxu1 %v1296_v28 }
  0x25   : > { %1221 = vmatprep.subr.bf16.mxu1 %v1331_v1 }
  0x27   : > { %1192 = vmatpush3.bf16.msra.mxu0 %v1295_v25  ;;  %1206 = vmatmul.mubr.msk.bf16.vlgmr.msra.gmra.mrb[4].mxu1 %vm225_vm1, %v434_v32 }
  0x28   : > { %1209 = vmatprep.subr.bf16.mxu0 %v1331_v1  ;;  %1222 = vmatpush3.bf16.msra.mxu1 %v1301_v33 }
  0x29   : > { %1223 = vmatprep.subr.bf16.mxu1 %v1331_v1  ;;  %1229 = vmatprep.mubr.msk.bf16.mxu1 %vm1332_vm0, %v1331_v1 }
  0x2a   : > { %1194 = vmatmul.mubr.msk.bf16.vlgmr.msra.gmra.mrb[4].mxu0 %vm225_vm1, %v349_v31 }
  0x2b   : > { %1210 = vmatpush3.bf16.msra.mxu0 %v1298_v29  ;;  %1217 = vmatprep.mubr.msk.bf16.mxu0 %vm1332_vm0, %v1331_v1 }
  0x2c   : > { %1211 = vmatprep.subr.bf16.mxu0 %v1331_v1  ;;  %1224 = vmatpush3.bf16.msra.mxu1 %v1303_v36 }
  0x2d   : > { %1225 = vmatprep.subr.bf16.mxu1 %v1331_v1 }
  0x2f   : > { %1212 = vmatpush3.bf16.msra.mxu0 %v1302_v35 }
  0x30   : > { %1213 = vmatprep.subr.bf16.mxu0 %v1331_v1  ;;  %1226 = vmatpush3.bf16.msra.mxu1 %v1305_v40 }
  0x31   : > { %1227 = vmatprep.subr.bf16.mxu1 %v1331_v1 }
  0x33   : > { %1214 = vmatpush3.bf16.msra.mxu0 %v1304_v39 }
  0x34   : > { %1215 = vmatprep.subr.bf16.mxu0 %v1331_v1  ;;  %1228 = vmatpush3.bf16.msra.mxu1 %v1307_v46 }
  0x35   : > { %1245 = vmatprep.subr.bf16.mxu1 %v1331_v1 }
  0x37   : > { %1216 = vmatpush3.bf16.msra.mxu0 %v1306_v45  ;;  %1230 = vmatmul.mubr.msk.bf16.vlgmr.msra.gmra.mrb[8].mxu1 %vm225_vm1, %v605_v49 }
  0x38   : > { %1233 = vmatprep.subr.bf16.mxu0 %v1331_v1  ;;  %1246 = vmatpush3.bf16.msra.mxu1 %v1310_v50 }
  0x39   : > { %1247 = vmatprep.subr.bf16.mxu1 %v1331_v1  ;;  %1253 = vmatprep.mubr.msk.bf16.mxu1 %vm1332_vm0, %v1331_v1 }
  0x3a   : > { %1218 = vmatmul.mubr.msk.bf16.vlgmr.msra.gmra.mrb[8].mxu0 %vm225_vm1, %v523_v47 }
  0x3b   : > { %1234 = vmatpush3.bf16.msra.mxu0 %v1308_v48  ;;  %1241 = vmatprep.mubr.msk.bf16.mxu0 %vm1332_vm0, %v1331_v1  ;;  %v1113_v48 = vld [vmem:[%s1563_s2] ss:$0 sm:$0xff] }
  0x3c   : > { %1235 = vmatprep.subr.bf16.mxu0 %v1331_v1  ;;  %1248 = vmatpush3.bf16.msra.mxu1 %v1312_v55 }
  0x3d   : > { %1249 = vmatprep.subr.bf16.mxu1 %v1331_v1 }
  0x3f   : > { %1236 = vmatpush3.bf16.msra.mxu0 %v1311_v54 }
  0x40   : > { %1237 = vmatprep.subr.bf16.mxu0 %v1331_v1  ;;  %1250 = vmatpush3.bf16.msra.mxu1 %v1314_v58 }
  0x41   : > { %1251 = vmatprep.subr.bf16.mxu1 %v1331_v1 }
  0x43   : > { %1238 = vmatpush3.bf16.msra.mxu0 %v1313_v57 }
  0x44   : > { %1239 = vmatprep.subr.bf16.mxu0 %v1331_v1  ;;  %1252 = vmatpush3.bf16.msra.mxu1 %v1316_v62 }
  0x47   : > { %1240 = vmatpush3.bf16.msra.mxu0 %v1315_v61  ;;  %1254 = vmatmul.mubr.msk.bf16.vlgmr.msra.gmra.mrb[12].mxu1 %vm225_vm1, %v774_v63 }
  0x48   : > { %1257 = vmatprep.subr.bf16.mxu0 %v1331_v1 }
  0x4a   : > { %1242 = vmatmul.mubr.msk.bf16.vlgmr.msra.gmra.mrb[12].mxu0 %vm225_vm1, %v674_v0 }
  0x4b   : > { %1258 = vmatpush3.bf16.msra.mxu0 %v1317_v2  ;;  %1265 = vmatprep.mubr.msk.bf16.mxu0 %vm1332_vm0, %v1331_v1 }
  0x4c   : > { %1259 = vmatprep.subr.bf16.mxu0 %v1331_v1 }
  0x4f   : > { %1260 = vmatpush3.bf16.msra.mxu0 %v1319_v3 }
  0x50   : > { %1261 = vmatprep.subr.bf16.mxu0 %v1331_v1 }
  0x53   : > { %1262 = vmatpush3.bf16.msra.mxu0 %v1320_v4 }
  0x54   : > { %1263 = vmatprep.subr.bf16.mxu0 %v1331_v1 }
  0x57   : > { %1264 = vmatpush3.bf16.msra.mxu0 %v1321_v7 }
  0x5a   : > { %1266 = vmatmul.mubr.msk.bf16.vlgmr.msra.gmra.mrb[16].mxu0 %vm225_vm1, %v856_v8 }
  0xea   : > { %v330_v10 = vpop.f32.mrb[0].mxu1 }
  0xeb   : > { %v1183_v13 = vpop.f32.mrb[1].mxu1 }
  0xec   : > { %v333_v15 = vpop.f32.mrb[2].mxu1 }
  0xed   : > { %v263_v9 = vpop.f32.mrb[0].mxu0  ;;  %v1184_v17 = vpop.f32.mrb[3].mxu1 }
  0xee   : > { %v1171_v11 = vpop.f32.mrb[1].mxu0  ;;  %v331_v12 = vadd.f32 %v330_v10, %v263_v9 }
  0xef   : > { %v266_v14 = vpop.f32.mrb[2].mxu0 }
  0xf0   : > { %v1172_v16 = vpop.f32.mrb[3].mxu0 }
  0xfa   : > { %v496_v19 = vpop.f32.mrb[4].mxu1 }
  0xfb   : > { %v1207_v22 = vpop.f32.mrb[5].mxu1 }
  0xfc   : > { %v499_v1 = vpop.f32.mrb[6].mxu1 }
  0xfd   : > { %v411_v18 = vpop.f32.mrb[4].mxu0  ;;  %v1208_v26 = vpop.f32.mrb[7].mxu1 }
  0xfe   : > { %v417_v20 = vadd.f32 %v411_v18, %v331_v12  ;;  %v1195_v21 = vpop.f32.mrb[5].mxu0 }
  0xff   : > { %v414_v23 = vpop.f32.mrb[6].mxu0 }
 0x100   : > { %v502_v24 = vadd.f32 %v496_v19, %v417_v20  ;;  %v1196_v25 = vpop.f32.mrb[7].mxu0 }
 0x10a   : > { %v667_v28 = vpop.f32.mrb[8].mxu1 }
 0x10b   : > { %v1231_v31 = vpop.f32.mrb[9].mxu1 }
 0x10c   : > { %v670_v33 = vpop.f32.mrb[10].mxu1 }
 0x10d   : > { %v585_v27 = vpop.f32.mrb[8].mxu0  ;;  %v1232_v36 = vpop.f32.mrb[11].mxu1 }
 0x10e   : > { %v591_v29 = vadd.f32 %v585_v27, %v502_v24  ;;  %v1219_v30 = vpop.f32.mrb[9].mxu0 }
 0x10f   : > { %v588_v32 = vpop.f32.mrb[10].mxu0 }
 0x110   : > { %v673_v34 = vadd.f32 %v667_v28, %v591_v29  ;;  %v1220_v35 = vpop.f32.mrb[11].mxu0 }
 0x11a   : > { %v836_v38 = vpop.f32.mrb[12].mxu1 }
 0x11b   : > { %v1255_v41 = vpop.f32.mrb[13].mxu1 }
 0x11c   : > { %v839_v43 = vpop.f32.mrb[14].mxu1 }
 0x11d   : > { %v745_v37 = vpop.f32.mrb[12].mxu0  ;;  %v1256_v46 = vpop.f32.mrb[15].mxu1 }
 0x11e   : > { %v751_v39 = vadd.f32 %v745_v37, %v673_v34  ;;  %v1243_v40 = vpop.f32.mrb[13].mxu0 }
 0x11f   : > { %v748_v42 = vpop.f32.mrb[14].mxu0 }
 0x120   : > { %v842_v44 = vadd.f32 %v836_v38, %v751_v39  ;;  %v1244_v45 = vpop.f32.mrb[15].mxu0 }
 0x12d   : > { %v918_v47 = vpop.f32.mrb[16].mxu0 }
 0x12e   : > { %v924_v49 = vadd.f32 %v918_v47, %v842_v44  ;;  %v1267_v50 = vpop.f32.mrb[17].mxu0 }
 0x12f   : > { %v921_v51 = vpop.f32.mrb[18].mxu0 }
 0x130   : > { %v932_v52 = vadd.f32 %v1113_v48, %v924_v49  ;;  %v1268_v53 = vpop.f32.mrb[19].mxu0 }
 0x132   : > { %v933_v54 = vmax.f32 %v932_v52, 0.0 }
 0x134   : > { %v934_v55 = vpack.c.bf16 %v933_v54, %v933_v54 }
 0x136   : > { %936 = vst.msk [vmem:[%s168_s21] sm:$0xf] %vm935_vm2, %v934_v55 }
 0x137 PF: > { %s13_s12 = sadd.s32 1, %s1329_s12  }
 0x138   : > { %p10_p4 = scmp.ge.s32.totalorder %s13_s12, 4  }
 0x13a   :  { %12 = sbr.rel (!%p10_p4) target bundleno = 1 (0x1), region = 70 }

// kernel: backbone_forward.96
= control target key start
LH: loop header
LB: loop body
LE: loop exit
PB: predicated region body
PF: predicated region fallthrough
CT: control target
= control target key end

     0   :  { %s368_s1 = inlined_call_operand.vmem [shape: bf16[256,128], index: 1, kind: input, shape index: {}]   ;;  %s369_s0 = inlined_call_operand.vmem [shape: bf16[16,256], index: 0, kind: input, shape index: {}]   ;;  %s370_s2 = inlined_call_operand.vmem [shape: f32[1,128], index: 2, kind: input, shape index: {}]   ;;  %s371_s3 = inlined_call_operand.vmem [shape: bf16[16,128], index: 3, kind: output, shape index: {}]  }
   0x1   :  { %v269_v0 = vld [vmem:[%s368_s1 + $0x40] sm:$0xff]   ;;  %v271_v2 = vld [vmem:[%s368_s1 + $0x48] sm:$0xff]   ;;  %v273_v4 = vld [vmem:[%s368_s1 + $0x50] sm:$0xff]  }
   0x2   :  { %v270_v1 = vld [vmem:[%s368_s1] sm:$0xff]   ;;  %247 = vmatprep.subr.bf16.mxu0 %v269_v0  ;;  %v272_v3 = vld [vmem:[%s368_s1 + $0x8] sm:$0xff]   ;;  %v274_v5 = vld [vmem:[%s368_s1 + $0x10] sm:$0xff]  }
   0x3   :  { %248 = vmatpush3.bf16.msra.mxu0 %v270_v1  ;;  %v275_v6 = vld [vmem:[%s368_s1 + $0x58] sm:$0xff]   ;;  %v277_v8 = vld [vmem:[%s368_s1 + $0x60] sm:$0xff]   ;;  %v279_v10 = vld [vmem:[%s368_s1 + $0x68] sm:$0xff]  }
   0x4   :  { %249 = vmatprep.subr.bf16.mxu0 %v271_v2  ;;  %v276_v7 = vld [vmem:[%s368_s1 + $0x18] sm:$0xff]   ;;  %v278_v9 = vld [vmem:[%s368_s1 + $0x20] sm:$0xff]   ;;  %v280_v12 = vld [vmem:[%s368_s1 + $0x28] sm:$0xff]  }
   0x5   :  { %v287_v11 = vld [vmem:[%s369_s0 + $0x4] ss:$8 sps:$4 sm:$0xff]   ;;  %v281_v13 = vld [vmem:[%s368_s1 + $0x70] sm:$0xff]   ;;  %v283_v15 = vld [vmem:[%s368_s1 + $0x78] sm:$0xff]  }
   0x6   :  { %194 = vmatprep.mubr.bf16.mxu0 %v287_v11  ;;  %v282_v14 = vld [vmem:[%s368_s1 + $0x30] sm:$0xff]   ;;  %v284_v16 = vld [vmem:[%s368_s1 + $0x38] sm:$0xff]   ;;  %v285_v17 = vld [vmem:[%s369_s0] ss:$8 sps:$4 sm:$0xff]  }
   0x7   :  { %250 = vmatpush3.bf16.msra.mxu0 %v272_v3  ;;  %v219_v19 = vld [vmem:[%s370_s2] ss:$0 sm:$0xff] }
   0x8   :  { %251 = vmatprep.subr.bf16.mxu0 %v273_v4 }
   0xb   :  { %252 = vmatpush3.bf16.msra.mxu0 %v274_v5 }
   0xc   :  { %253 = vmatprep.subr.bf16.mxu0 %v275_v6 }
   0xf   :  { %254 = vmatpush3.bf16.msra.mxu0 %v276_v7 }
  0x10   :  { %255 = vmatprep.subr.bf16.mxu0 %v277_v8 }
  0x13   :  { %256 = vmatpush3.bf16.msra.mxu0 %v278_v9 }
  0x14   :  { %257 = vmatprep.subr.bf16.mxu0 %v279_v10 }
  0x17   :  { %258 = vmatpush3.bf16.msra.mxu0 %v280_v12 }
  0x18   :  { %259 = vmatprep.subr.bf16.mxu0 %v281_v13 }
  0x1b   :  { %260 = vmatpush3.bf16.msra.mxu0 %v282_v14 }
  0x1c   :  { %261 = vmatprep.subr.bf16.mxu0 %v283_v15 }
  0x1f   :  { %262 = vmatpush3.bf16.msra.mxu0 %v284_v16 }
  0x22   :  { %195 = vmatmul.mubr.bf16.vlgmr.msra.gmra.mrb[0].mxu0 %v285_v17 }
  0xf5   :  { %v263_v18 = vpop.f32.mrb[0].mxu0 }
  0xf6   :  { %v264_v20 = vpop.f32.mrb[1].mxu0 }
  0xf7   :  { %v265_v21 = vadd.f32 %v264_v20, %v263_v18  ;;  %v266_v22 = vpop.f32.mrb[2].mxu0 }
  0xf8   :  { %v267_v23 = vpop.f32.mrb[3].mxu0 }
  0xf9   :  { %v197_v24 = vadd.f32 %v265_v21, %v219_v19  ;;  %v268_v25 = vadd.f32 %v267_v23, %v266_v22 }
  0xfb   :  { %v200_v26 = vadd.f32 %v268_v25, %v219_v19  ;;  %v203_v27 = vmax.f32 %v197_v24, 0.0 }
  0xfd   :  { %v204_v28 = vmax.f32 %v200_v26, 0.0 }
  0xff   :  { %v245_v29 = vpack.c.bf16 %v204_v28, %v203_v27 }
 0x101   :  { %246 = vst [vmem:[%s371_s3] sm:$0xff] %v245_v29  }

// kernel: backbone_forward.99
= control target key start
LH: loop header
LB: loop body
LE: loop exit
PB: predicated region body
PF: predicated region fallthrough
CT: control target
= control target key end

     0   :  { %s938_s15 = smov 0   ;;  %s940_s16 = smov 0   ;;  %s1056_s0 = inlined_call_operand.vmem [shape: bf16[16,128], index: 0, kind: input, shape index: {}]   ;;  %s1057_s1 = inlined_call_operand.vmem [shape: bf16[128,512], index: 1, kind: input, shape index: {}]   ;;  %s1058_s2 = inlined_call_operand.vmem [shape: f32[1,512], index: 2, kind: input, shape index: {}]   ;;  %s1059_s3 = inlined_call_operand.vmem [shape: bf16[16,512], index: 3, kind: input, shape index: {}]   ;;  %s1060_s4 = inlined_call_operand.vmem [shape: bf16[16,512], index: 4, kind: output, shape index: {}]  }
   0x1   :  { %s942_s17 = smov 0   ;;  %s944_s18 = smov 0  }
   0x2   :  { %s946_s19 = smov 0  }
   0x3 LB: > { %s23_s20 = sadd.s32 1, %s906_s18  ;;  %s761_s21 = sadd.s32 4294967295, %s910_s19   ;;  %s910_s19 = sphi %s946_s19, %s14_s19   ;;  %s906_s18 = sphi %s944_s18, %s1066_s18   ;;  %s902_s17 = sphi %s942_s17, %s1065_s17   ;;  %s898_s16 = sphi %s940_s16, %s1064_s16   ;;  %s894_s15 = sphi %s938_s15, %s1063_s15  }
   0x4   : > { %p24_p0 = scmp.ge.s32.totalorder %s23_s20, 2  ;;  %p66_p1 = scmp.ne.s32.totalorder %s898_s16, %s894_s15 }
   0x5   : > { %p67_p2 = scmp.eq.s32.totalorder %s910_s19, 0  ;;  %p152_p4 = scmp.eq.s32.totalorder %s761_s21, 1 }
   0x6   : > { %s1068_s20 = smov (%p24_p0, %s23_s20), 0  ;;  %s59_s24 = sadd.s32 1, %s898_s16 }
   0x7   : > { %p970_p3 = por %p67_p2, %p66_p1  ;;  %s56_s23 = ssub.s32 %s906_s18, %s1068_s20 }
   0x8   : > { %p57_p5 = scmp.eq.s32.totalorder %s56_s23, 0  ;;  %p977_p6 = por %p152_p4, %p66_p1 }
   0x9   : > { %p765_p7 = scmp.ge.s32.totalorder %s910_s19, 2 }
   0xa   : > { %s982_s26 = scalar_select %p57_p5, %s898_s16, %s59_s24  }
   0xb   : > { %183 = sbr.rel (%p765_p7) target bundleno = 37 (0x25), region = 20 }
  0x12   : > { %186 = sbr.rel (!%p970_p3) target bundleno = 30 (0x1e), region = 24  ;;  %s188_s27 = sand.u32 (%p970_p3), 1, %s898_s16  }
  0x13   : > { %s801_s28 = sshll.u32 (%p970_p3), %s906_s18, 3  ;;  %s766_s29 = sshll.u32 (%p970_p3), %s188_s27, 7 }
  0x14   : > { %s992_s6 = scalar_lea.vmem (%p970_p3), %s1057_s1, %s801_s28  ;;  %s190_s7 = scalar_lea.vmem (%p970_p3), [#allocation2], %s766_s29 }
  0x15   : > { %v251_v0 = vld [vmem:[%s992_s6] sm:$0xff] (%p970_p3)  ;;  %v253_v1 = vld [vmem:[%s992_s6 + $0x10] sm:$0xff] (%p970_p3) }
  0x16   : > { %v255_v2 = vld [vmem:[%s992_s6 + $0x20] sm:$0xff] (%p970_p3)  ;;  %252 = vst [vmem:[%s190_s7] sm:$0xff] (%p970_p3), %v251_v0  ;;  %254 = vst [vmem:[%s190_s7 + $0x8] sm:$0xff] (%p970_p3), %v253_v1  ;;  %v257_v3 = vld [vmem:[%s992_s6 + $0x30] sm:$0xff] (%p970_p3) }
  0x17   : > { %256 = vst [vmem:[%s190_s7 + $0x10] sm:$0xff] (%p970_p3), %v255_v2  ;;  %v259_v4 = vld [vmem:[%s992_s6 + $0x40] sm:$0xff] (%p970_p3)  ;;  %v261_v5 = vld [vmem:[%s992_s6 + $0x50] sm:$0xff] (%p970_p3)  ;;  %258 = vst [vmem:[%s190_s7 + $0x18] sm:$0xff] (%p970_p3), %v257_v3 }
  0x18   : > { %260 = vst [vmem:[%s190_s7 + $0x20] sm:$0xff] (%p970_p3), %v259_v4  ;;  %262 = vst [vmem:[%s190_s7 + $0x28] sm:$0xff] (%p970_p3), %v261_v5  ;;  %v263_v6 = vld [vmem:[%s992_s6 + $0x60] sm:$0xff] (%p970_p3)  ;;  %v265_v7 = vld [vmem:[%s992_s6 + $0x70] sm:$0xff] (%p970_p3) }
  0x19   : > { %v267_v8 = vld [vmem:[%s992_s6 + $0x80] sm:$0xff]  ;;  %264 = vst [vmem:[%s190_s7 + $0x30] sm:$0xff] %v263_v6  ;;  %266 = vst [vmem:[%s190_s7 + $0x38] sm:$0xff] %v265_v7  ;;  %v269_v9 = vld [vmem:[%s992_s6 + $0x90] sm:$0xff] }
  0x1a   : > { %268 = vst [vmem:[%s190_s7 + $0x40] sm:$0xff] %v267_v8  ;;  %v271_v10 = vld [vmem:[%s992_s6 + $0xa0] sm:$0xff]  ;;  %v273_v11 = vld [vmem:[%s992_s6 + $0xb0] sm:$0xff]  ;;  %270 = vst [vmem:[%s190_s7 + $0x48] sm:$0xff] %v269_v9 }
  0x1b   : > { %272 = vst [vmem:[%s190_s7 + $0x50] sm:$0xff] %v271_v10  ;;  %274 = vst [vmem:[%s190_s7 + $0x58] sm:$0xff] %v273_v11  ;;  %v275_v12 = vld [vmem:[%s992_s6 + $0xc0] sm:$0xff]  ;;  %v277_v13 = vld [vmem:[%s992_s6 + $0xd0] sm:$0xff] }
  0x1c   : > { %v279_v14 = vld [vmem:[%s992_s6 + $0xe0] sm:$0xff]  ;;  %276 = vst [vmem:[%s190_s7 + $0x60] sm:$0xff] %v275_v12  ;;  %278 = vst [vmem:[%s190_s7 + $0x68] sm:$0xff] %v277_v13  ;;  %v281_v15 = vld [vmem:[%s992_s6 + $0xf0] sm:$0xff] }
  0x1d   : > { %280 = vst [vmem:[%s190_s7 + $0x70] sm:$0xff] %v279_v14  ;;  %282 = vst [vmem:[%s190_s7 + $0x78] sm:$0xff] %v281_v15 }
  0x1e PF: > { %296 = sbr.rel (!%p970_p3) target bundleno = 37 (0x25), region = 66  ;;  %s298_s8 = sand.u32 (%p970_p3), 1, %s898_s16  }
  0x1f   : > { %s802_s9 = sshll.u32 (%p970_p3), %s906_s18, 3  ;;  %s769_s10 = sshll.u32 (%p970_p3), %s298_s8, 4 }
  0x20   : > { %s306_s13 = scalar_lea.vmem (%p970_p3), %s1059_s3, %s802_s9  ;;  %s300_s14 = scalar_lea.vmem (%p970_p3), [#allocation3], %s769_s10 }
  0x21   : > { %v336_v16 = vld [vmem:[%s306_s13] sm:$0xff] (%p970_p3)  ;;  %v338_v17 = vld [vmem:[%s306_s13 + $0x10] sm:$0xff] (%p970_p3) }
  0x22   : > { %337 = vst [vmem:[%s300_s14] sm:$0xff] (%p970_p3), %v336_v16  ;;  %339 = vst [vmem:[%s300_s14 + $0x8] sm:$0xff] (%p970_p3), %v338_v17 }
  0x25 PF: > { %p772_p8 = scmp.ge.s32.totalorder %s910_s19, 1  ;;  %p344_p9 = scmp.lt.s32.totalorder %s910_s19, 3 }
  0x27   : > { %p345_p10 = pnand %p772_p8, %p344_p9 }
  0x28   : > { %s351_s21 = sand.u32 (!%p345_p10), 1, %s894_s15   ;;  %v912_v18 = vmov (!%p345_p10), 0   ;;  %v871_v35 = vld [vmem:[%s1056_s0] sm:$0xff] (!%p345_p10)   ;;  %s776_s28 = sshll.u32 (!%p345_p10), %s902_s17, 1  ;;  %v432_v36 = vlaneseq (!%p345_p10) }
  0x29   : > { %348 = sbr.rel (%p345_p10) target bundleno = 308 (0x134), region = 104  ;;  %s773_s22 = sshll.u32 (!%p345_p10), %s351_s21, 7  ;;  %560 = vmatprep.mubr.bf16.mxu0 (!%p345_p10), %v912_v18 }
  0x2a   : > { %s353_s23 = scalar_lea.vmem (!%p345_p10), [#allocation2], %s773_s22  ;;  %p403_p11 = scmp.lt.s32.totalorder (!%p345_p10), %s776_s28, 3  ;;  %v433_v37 = vshrl.u32 (!%p345_p10), %v432_v36, 7 }
  0x2b   : > { %v847_v19 = vld [vmem:[%s353_s23 + $0x4] ss:$8 sps:$4 sm:$0xff] (!%p345_p10)   ;;  %v849_v20 = vld [vmem:[%s353_s23] ss:$8 sps:$4 sm:$0xff] (!%p345_p10)   ;;  %v850_v21 = vld [vmem:[%s353_s23 + $0x14] ss:$8 sps:$4 sm:$0xff] (!%p345_p10)  }
  0x2c   : > { %528 = vmatprep.subr.bf16.mxu0 (!%p345_p10), %v847_v19  ;;  %v852_v22 = vld [vmem:[%s353_s23 + $0x10] ss:$8 sps:$4 sm:$0xff] (!%p345_p10)   ;;  %v853_v23 = vld [vmem:[%s353_s23 + $0x24] ss:$8 sps:$4 sm:$0xff] (!%p345_p10)   ;;  %v855_v24 = vld [vmem:[%s353_s23 + $0x20] ss:$8 sps:$4 sm:$0xff] (!%p345_p10)  }
  0x2d   : > { %529 = vmatpush1.bf16.msra.mxu0 (!%p345_p10), %v849_v20  ;;  %v856_v25 = vld [vmem:[%s353_s23 + $0x34] ss:$8 sps:$4 sm:$0xff] (!%p345_p10)   ;;  %v858_v26 = vld [vmem:[%s353_s23 + $0x30] ss:$8 sps:$4 sm:$0xff] (!%p345_p10)   ;;  %v859_v27 = vld [vmem:[%s353_s23 + $0x44] ss:$8 sps:$4 sm:$0xff] (!%p345_p10)  }
  0x2e   : > { %530 = vmatprep.subr.bf16.mxu0 (!%p345_p10), %v850_v21  ;;  %v861_v28 = vld [vmem:[%s353_s23 + $0x40] ss:$8 sps:$4 sm:$0xff] (!%p345_p10)   ;;  %v862_v29 = vld [vmem:[%s353_s23 + $0x54] ss:$8 sps:$4 sm:$0xff] (!%p345_p10)   ;;  %v864_v30 = vld [vmem:[%s353_s23 + $0x50] ss:$8 sps:$4 sm:$0xff] (!%p345_p10)  }
  0x2f   : > { %v865_v31 = vld [vmem:[%s353_s23 + $0x64] ss:$8 sps:$4 sm:$0xff] (!%p345_p10)   ;;  %v867_v32 = vld [vmem:[%s353_s23 + $0x60] ss:$8 sps:$4 sm:$0xff] (!%p345_p10)   ;;  %v868_v33 = vld [vmem:[%s353_s23 + $0x74] ss:$8 sps:$4 sm:$0xff] (!%p345_p10)  }
  0x30   : > { %v870_v34 = vld [vmem:[%s353_s23 + $0x70] ss:$8 sps:$4 sm:$0xff]   ;;  %s1070_s28 = smov (!%p403_p11, %s776_s28), 3  ;;  %s1028_s29 = sshll.u32 %s351_s21, 4  ;;  %v434_v38 = vsub.s32 0, %v433_v37  ;;  %v438_v40 = vsub.s32 1, %v433_v37 }
  0x31   : > { %531 = vmatpush1.bf16.msra.mxu0 %v852_v22  ;;  %s405_s6 = scalar_lea.vmem %s1058_s2, %s1070_s28  ;;  %s360_s7 = scalar_lea.vmem [#allocation3], %s1028_s29 }
  0x32   : > { %532 = vmatprep.subr.bf16.mxu0 %v853_v23  ;;  %v430_v39 = vld [vmem:[%s405_s6] sm:$0x3]  ;;  %v572_v44 = vld [vmem:[%s360_s7 + $0x8] sm:$0xff]  ;;  %s394_s15 = scalar_lea.vmem [#allocation4], %s1028_s29  ;;  %s805_s8 = sshll.u32 (%p977_p6), %s902_s17, 3 }
  0x33   : > { %v571_v41 = vld [vmem:[%s360_s7] sm:$0xff]  ;;  %v435_v42 = vrot.slane %v430_v39, %v434_v38  ;;  %v439_v43 = vrot.slane %v430_v39, %v438_v40  ;;  %v575_v50 = vunpack.c.l.bf16 %v572_v44  ;;  %v576_v53 = vunpack.c.h.bf16 %v572_v44  ;;  %s611_s11 = scalar_lea.vmem (%p977_p6), %s1060_s4, %s805_s8 }
  0x34   : > { %v573_v45 = vunpack.c.l.bf16 %v571_v41  ;;  %v574_v47 = vunpack.c.h.bf16 %v571_v41 }
  0x35   : > { %533 = vmatpush1.bf16.msra.mxu0 %v855_v24 }
  0x36   : > { %534 = vmatprep.subr.bf16.mxu0 %v856_v25 }
  0x39   : > { %535 = vmatpush1.bf16.msra.mxu0 %v858_v26 }
  0x3a   : > { %536 = vmatprep.subr.bf16.mxu0 %v859_v27 }
  0x3d   : > { %537 = vmatpush1.bf16.msra.mxu0 %v861_v28 }
  0x3e   : > { %538 = vmatprep.subr.bf16.mxu0 %v862_v29 }
  0x41   : > { %539 = vmatpush1.bf16.msra.mxu0 %v864_v30 }
  0x42   : > { %540 = vmatprep.subr.bf16.mxu0 %v865_v31 }
  0x45   : > { %541 = vmatpush1.bf16.msra.mxu0 %v867_v32 }
  0x46   : > { %542 = vmatprep.subr.bf16.mxu0 %v868_v33 }
  0x49   : > { %543 = vmatpush1.bf16.msra.mxu0 %v870_v34 }
  0x4c   : > { %561 = vmatmul.mubr.bf16.vlgmr.msra.gmra.mrb[0].mxu0 %v871_v35 }
 0x11f   : > { %v562_v46 = vpop.f32.mrb[0].mxu0 }
 0x120   : > { %v563_v48 = vadd.f32 %v562_v46, %v435_v42  ;;  %v564_v49 = vpop.f32.mrb[1].mxu0 }
 0x121   : > { %v565_v51 = vadd.f32 %v564_v49, %v439_v43  ;;  %v566_v52 = vpop.f32.mrb[2].mxu0 }
 0x122   : > { %v577_v54 = vadd.f32 %v573_v45, %v563_v48  ;;  %v567_v55 = vadd.f32 %v566_v52, %v435_v42  ;;  %v568_v56 = vpop.f32.mrb[3].mxu0 }
 0x123   : > { %v578_v57 = vadd.f32 %v574_v47, %v565_v51  ;;  %v569_v58 = vadd.f32 %v568_v56, %v439_v43 }
 0x124   : > { %v581_v59 = vmax.f32 %v577_v54, 0.0  ;;  %v579_v60 = vadd.f32 %v575_v50, %v567_v55 }
 0x125   : > { %v582_v61 = vmax.f32 %v578_v57, 0.0  ;;  %v580_v62 = vadd.f32 %v576_v53, %v569_v58  ;;  %605 = sbr.rel (!%p977_p6) target bundleno = 308 (0x134), region = 116 }
 0x126   : > { %v583_v63 = vmax.f32 %v579_v60, 0.0 }
 0x127   : > { %v803_v0 = vpack.c.bf16 %v582_v61, %v581_v59  ;;  %v584_v1 = vmax.f32 %v580_v62, 0.0 }
 0x129   : > { %597 = vst [vmem:[%s394_s15] sm:$0xff] %v803_v0  ;;  %v804_v2 = vpack.c.bf16 %v584_v1, %v583_v63 }
 0x12b   : > { %598 = vst [vmem:[%s394_s15 + $0x8] sm:$0xff] %v804_v2 }
 0x130   : > { %v641_v3 = vld [vmem:[%s394_s15] sm:$0xff] }
 0x131   : > { %642 = vst [vmem:[%s611_s11] sm:$0xff] %v641_v3 }
 0x132   : > { %v643_v4 = vld [vmem:[%s394_s15 + $0x8] sm:$0xff] }
 0x133   : > { %644 = vst [vmem:[%s611_s11 + $0x10] sm:$0xff] %v643_v4 }
 0x134 PF: > { %s14_s19 = sadd.s32 1, %s910_s19   ;;  %s1063_s15 = smov %s898_s16 }
 0x135   : > { %p11_p12 = scmp.ge.s32.totalorder %s14_s19, 4   ;;  %s1064_s16 = smov %s982_s26 }
 0x136   : > { %s1065_s17 = smov %s906_s18  ;;  %s1066_s18 = smov %s1068_s20 }
 0x137   :  { %13 = sbr.rel (!%p11_p12) target bundleno = 3 (0x3), region = 199 }

// kernel: backbone_forward.100
= control target key start
LH: loop header
LB: loop body
LE: loop exit
PB: predicated region body
PF: predicated region fallthrough
CT: control target
= control target key end

     0   :  { %s662_s1 = inlined_call_operand.vmem [shape: bf16[512,128], index: 1, kind: input, shape index: {}]   ;;  %s663_s0 = inlined_call_operand.vmem [shape: bf16[16,512], index: 0, kind: input, shape index: {}]   ;;  %s664_s2 = inlined_call_operand.vmem [shape: f32[1,128], index: 2, kind: input, shape index: {}]   ;;  %s665_s3 = inlined_call_operand.vmem [shape: bf16[16,128], index: 3, kind: output, shape index: {}]  }
   0x1   :  { %v490_v0 = vld [vmem:[%s662_s1 + $0x40] sm:$0xff]   ;;  %v494_v4 = vld [vmem:[%s662_s1 + $0x48] sm:$0xff]   ;;  %v498_v8 = vld [vmem:[%s662_s1 + $0x50] sm:$0xff]  }
   0x2   :  { %v491_v1 = vld [vmem:[%s662_s1 + $0xc0] sm:$0xff]   ;;  %446 = vmatprep.subr.bf16.mxu0 %v490_v0  ;;  %v495_v5 = vld [vmem:[%s662_s1 + $0xc8] sm:$0xff]   ;;  %v499_v9 = vld [vmem:[%s662_s1 + $0xd0] sm:$0xff]  }
   0x3   :  { %v492_v2 = vld [vmem:[%s662_s1] sm:$0xff]   ;;  %468 = vmatprep.subr.bf16.mxu1 %v491_v1  ;;  %v496_v6 = vld [vmem:[%s662_s1 + $0x8] sm:$0xff]   ;;  %v500_v10 = vld [vmem:[%s662_s1 + $0x10] sm:$0xff]  }
   0x4   :  { %v493_v3 = vld [vmem:[%s662_s1 + $0x80] sm:$0xff]   ;;  %447 = vmatpush3.bf16.msra.mxu0 %v492_v2  ;;  %v497_v7 = vld [vmem:[%s662_s1 + $0x88] sm:$0xff]   ;;  %v501_v11 = vld [vmem:[%s662_s1 + $0x90] sm:$0xff]  }
   0x5   :  { %469 = vmatpush3.bf16.msra.mxu1 %v493_v3  ;;  %448 = vmatprep.subr.bf16.mxu0 %v494_v4  ;;  %v502_v12 = vld [vmem:[%s662_s1 + $0x58] sm:$0xff]   ;;  %v506_v16 = vld [vmem:[%s662_s1 + $0x60] sm:$0xff]   ;;  %v510_v20 = vld [vmem:[%s662_s1 + $0x68] sm:$0xff]  }
   0x6   :  { %470 = vmatprep.subr.bf16.mxu1 %v495_v5  ;;  %v503_v13 = vld [vmem:[%s662_s1 + $0xd8] sm:$0xff]   ;;  %v507_v17 = vld [vmem:[%s662_s1 + $0xe0] sm:$0xff]   ;;  %v511_v21 = vld [vmem:[%s662_s1 + $0xe8] sm:$0xff]  }
   0x7   :  { %v504_v14 = vld [vmem:[%s662_s1 + $0x18] sm:$0xff]   ;;  %v508_v18 = vld [vmem:[%s662_s1 + $0x20] sm:$0xff]   ;;  %v512_v22 = vld [vmem:[%s662_s1 + $0x28] sm:$0xff]  }
   0x8   :  { %449 = vmatpush3.bf16.msra.mxu0 %v496_v6  ;;  %v505_v15 = vld [vmem:[%s662_s1 + $0x98] sm:$0xff]   ;;  %v509_v19 = vld [vmem:[%s662_s1 + $0xa0] sm:$0xff]   ;;  %v513_v23 = vld [vmem:[%s662_s1 + $0xa8] sm:$0xff]  }
   0x9   :  { %471 = vmatpush3.bf16.msra.mxu1 %v497_v7  ;;  %450 = vmatprep.subr.bf16.mxu0 %v498_v8  ;;  %v514_v24 = vld [vmem:[%s662_s1 + $0x70] sm:$0xff]   ;;  %v518_v28 = vld [vmem:[%s662_s1 + $0x78] sm:$0xff]   ;;  %v400_v38 = vld [vmem:[%s664_s2] ss:$0 sm:$0xff] }
   0xa   :  { %472 = vmatprep.subr.bf16.mxu1 %v499_v9  ;;  %v515_v25 = vld [vmem:[%s662_s1 + $0xf0] sm:$0xff]   ;;  %v519_v29 = vld [vmem:[%s662_s1 + $0xf8] sm:$0xff]  }
   0xb   :  { %v516_v26 = vld [vmem:[%s662_s1 + $0x30] sm:$0xff]   ;;  %v520_v30 = vld [vmem:[%s662_s1 + $0x38] sm:$0xff]  }
   0xc   :  { %451 = vmatpush3.bf16.msra.mxu0 %v500_v10  ;;  %v517_v27 = vld [vmem:[%s662_s1 + $0xb0] sm:$0xff]   ;;  %v521_v31 = vld [vmem:[%s662_s1 + $0xb8] sm:$0xff]  }
   0xd   :  { %473 = vmatpush3.bf16.msra.mxu1 %v501_v11  ;;  %452 = vmatprep.subr.bf16.mxu0 %v502_v12  ;;  %v522_v32 = vld [vmem:[%s663_s0] ss:$16 sps:$4 sm:$0xff]   ;;  %v524_v33 = vld [vmem:[%s663_s0 + $0x4] ss:$16 sps:$4 sm:$0xff]   ;;  %v525_v34 = vld [vmem:[%s663_s0 + $0x8] ss:$16 sps:$4 sm:$0xff]  }
   0xe   :  { %474 = vmatprep.subr.bf16.mxu1 %v503_v13  ;;  %v527_v35 = vld [vmem:[%s663_s0 + $0xc] ss:$16 sps:$4 sm:$0xff]   ;;  %334 = vmatprep.mubr.bf16.mxu0 %v524_v33 }
   0xf   :  { %375 = vmatprep.mubr.bf16.mxu1 %v527_v35 }
  0x10   :  { %453 = vmatpush3.bf16.msra.mxu0 %v504_v14 }
  0x11   :  { %475 = vmatpush3.bf16.msra.mxu1 %v505_v15  ;;  %454 = vmatprep.subr.bf16.mxu0 %v506_v16 }
  0x12   :  { %476 = vmatprep.subr.bf16.mxu1 %v507_v17 }
  0x14   :  { %455 = vmatpush3.bf16.msra.mxu0 %v508_v18 }
  0x15   :  { %477 = vmatpush3.bf16.msra.mxu1 %v509_v19  ;;  %456 = vmatprep.subr.bf16.mxu0 %v510_v20 }
  0x16   :  { %478 = vmatprep.subr.bf16.mxu1 %v511_v21 }
  0x18   :  { %457 = vmatpush3.bf16.msra.mxu0 %v512_v22 }
  0x19   :  { %479 = vmatpush3.bf16.msra.mxu1 %v513_v23  ;;  %458 = vmatprep.subr.bf16.mxu0 %v514_v24 }
  0x1a   :  { %480 = vmatprep.subr.bf16.mxu1 %v515_v25 }
  0x1c   :  { %459 = vmatpush3.bf16.msra.mxu0 %v516_v26 }
  0x1d   :  { %481 = vmatpush3.bf16.msra.mxu1 %v517_v27  ;;  %460 = vmatprep.subr.bf16.mxu0 %v518_v28 }
  0x1e   :  { %482 = vmatprep.subr.bf16.mxu1 %v519_v29 }
  0x20   :  { %461 = vmatpush3.bf16.msra.mxu0 %v520_v30 }
  0x21   :  { %483 = vmatpush3.bf16.msra.mxu1 %v521_v31 }
  0x23   :  { %335 = vmatmul.mubr.bf16.vlgmr.msra.gmra.mrb[0].mxu0 %v522_v32 }
  0x24   :  { %376 = vmatmul.mubr.bf16.vlgmr.msra.gmra.mrb[0].mxu1 %v525_v34 }
  0xf6   :  { %v462_v36 = vpop.f32.mrb[0].mxu0 }
  0xf7   :  { %v484_v37 = vpop.f32.mrb[0].mxu1  ;;  %v463_v39 = vpop.f32.mrb[1].mxu0 }
  0xf8   :  { %v464_v40 = vadd.f32 %v463_v39, %v462_v36  ;;  %v485_v41 = vpop.f32.mrb[1].mxu1  ;;  %v465_v42 = vpop.f32.mrb[2].mxu0 }
  0xf9   :  { %v486_v43 = vadd.f32 %v485_v41, %v484_v37  ;;  %v487_v44 = vpop.f32.mrb[2].mxu1  ;;  %v466_v45 = vpop.f32.mrb[3].mxu0 }
  0xfa   :  { %v337_v46 = vadd.f32 %v464_v40, %v400_v38  ;;  %v467_v47 = vadd.f32 %v466_v45, %v465_v42  ;;  %v488_v48 = vpop.f32.mrb[3].mxu1 }
  0xfb   :  { %v489_v49 = vadd.f32 %v488_v48, %v487_v44 }
  0xfc   :  { %v378_v50 = vadd.f32 %v486_v43, %v337_v46  ;;  %v340_v51 = vadd.f32 %v467_v47, %v400_v38 }
  0xfe   :  { %v381_v52 = vadd.f32 %v489_v49, %v340_v51  ;;  %v384_v53 = vmax.f32 %v378_v50, 0.0 }
 0x100   :  { %v385_v54 = vmax.f32 %v381_v52, 0.0 }
 0x102   :  { %v444_v55 = vpack.c.bf16 %v385_v54, %v384_v53 }
 0x104   :  { %445 = vst [vmem:[%s665_s3] sm:$0xff] %v444_v55  }

// kernel: backbone_forward.97
= control target key start
LH: loop header
LB: loop body
LE: loop exit
PB: predicated region body
PF: predicated region fallthrough
CT: control target
= control target key end

     0   :  { %vm1171_vm0 = vmmov 0   ;;  %s1441_s1 = inlined_call_operand.vmem [shape: bf16[1152,128], index: 1, kind: input, shape index: {}]   ;;  %s1442_s0 = inlined_call_operand.vmem [shape: bf16[16,1152], index: 0, kind: input, shape index: {}]   ;;  %s1443_s2 = inlined_call_operand.vmem [shape: f32[1,128], index: 2, kind: input, shape index: {}]   ;;  %s1444_s3 = inlined_call_operand.vmem [shape: bf16[16,128], index: 3, kind: output, shape index: {}]  }
   0x1   :  { %v1085_v0 = vld [vmem:[%s1441_s1 + $0x40] sm:$0xff]   ;;  %v1089_v4 = vld [vmem:[%s1441_s1 + $0x48] sm:$0xff]   ;;  %v1093_v8 = vld [vmem:[%s1441_s1 + $0x50] sm:$0xff]  }
   0x2   :  { %v1086_v1 = vld [vmem:[%s1441_s1] sm:$0xff]   ;;  %966 = vmatprep.subr.bf16.mxu0 %v1085_v0  ;;  %v1090_v5 = vld [vmem:[%s1441_s1 + $0x8] sm:$0xff]   ;;  %v1094_v9 = vld [vmem:[%s1441_s1 + $0x10] sm:$0xff]  }
   0x3   :  { %v1087_v2 = vld [vmem:[%s1441_s1 + $0xc0] sm:$0xff]   ;;  %967 = vmatpush3.bf16.msra.mxu0 %v1086_v1  ;;  %v1091_v6 = vld [vmem:[%s1441_s1 + $0xc8] sm:$0xff]   ;;  %v1095_v10 = vld [vmem:[%s1441_s1 + $0xd0] sm:$0xff]  }
   0x4   :  { %v1088_v3 = vld [vmem:[%s1441_s1 + $0x80] sm:$0xff]   ;;  %988 = vmatprep.subr.bf16.mxu1 %v1087_v2  ;;  %968 = vmatprep.subr.bf16.mxu0 %v1089_v4  ;;  %v1092_v7 = vld [vmem:[%s1441_s1 + $0x88] sm:$0xff]   ;;  %v1096_v11 = vld [vmem:[%s1441_s1 + $0x90] sm:$0xff]  }
   0x5   :  { %989 = vmatpush3.bf16.msra.mxu1 %v1088_v3  ;;  %v1097_v12 = vld [vmem:[%s1441_s1 + $0x58] sm:$0xff]   ;;  %v1101_v16 = vld [vmem:[%s1441_s1 + $0x60] sm:$0xff]   ;;  %v1105_v20 = vld [vmem:[%s1441_s1 + $0x68] sm:$0xff]  }
   0x6   :  { %990 = vmatprep.subr.bf16.mxu1 %v1091_v6  ;;  %v1098_v13 = vld [vmem:[%s1441_s1 + $0x18] sm:$0xff]   ;;  %v1102_v17 = vld [vmem:[%s1441_s1 + $0x20] sm:$0xff]   ;;  %v1106_v21 = vld [vmem:[%s1441_s1 + $0x28] sm:$0xff]   ;;  %v1170_v6 = vmov 0.0  }
   0x7   :  { %969 = vmatpush3.bf16.msra.mxu0 %v1090_v5  ;;  %v1099_v14 = vld [vmem:[%s1441_s1 + $0xd8] sm:$0xff]   ;;  %v1103_v18 = vld [vmem:[%s1441_s1 + $0xe0] sm:$0xff]   ;;  %v1107_v22 = vld [vmem:[%s1441_s1 + $0xe8] sm:$0xff]  }
   0x8   :  { %970 = vmatprep.subr.bf16.mxu0 %v1093_v8  ;;  %v1100_v15 = vld [vmem:[%s1441_s1 + $0x98] sm:$0xff]   ;;  %v1104_v19 = vld [vmem:[%s1441_s1 + $0xa0] sm:$0xff]   ;;  %v1108_v23 = vld [vmem:[%s1441_s1 + $0xa8] sm:$0xff]  }
   0x9   :  { %991 = vmatpush3.bf16.msra.mxu1 %v1092_v7  ;;  %v1109_v24 = vld [vmem:[%s1441_s1 + $0x70] sm:$0xff]   ;;  %v1113_v28 = vld [vmem:[%s1441_s1 + $0x78] sm:$0xff]   ;;  %v1116_v31 = vld [vmem:[%s1442_s0] ss:$36 sps:$4 sm:$0xff]  }
   0xa   :  { %992 = vmatprep.subr.bf16.mxu1 %v1095_v10  ;;  %v1110_v25 = vld [vmem:[%s1441_s1 + $0x30] sm:$0xff]   ;;  %v1114_v29 = vld [vmem:[%s1441_s1 + $0x38] sm:$0xff]   ;;  %v1118_v32 = vld [vmem:[%s1442_s0 + $0x4] ss:$36 sps:$4 sm:$0xff]  }
   0xb   :  { %971 = vmatpush3.bf16.msra.mxu0 %v1094_v9  ;;  %v1111_v26 = vld [vmem:[%s1441_s1 + $0xf0] sm:$0xff]   ;;  %v1115_v30 = vld [vmem:[%s1441_s1 + $0xf8] sm:$0xff]   ;;  %686 = vmatprep.mubr.bf16.mxu0 %v1118_v32  ;;  %v1120_v34 = vld [vmem:[%s1441_s1 + $0x140] sm:$0xff]  }
   0xc   :  { %972 = vmatprep.subr.bf16.mxu0 %v1097_v12  ;;  %v1112_v27 = vld [vmem:[%s1441_s1 + $0xb0] sm:$0xff]   ;;  %v1119_v33 = vld [vmem:[%s1441_s1 + $0xb8] sm:$0xff]   ;;  %v1121_v35 = vld [vmem:[%s1442_s0 + $0x8] ss:$36 sps:$4 sm:$0xff]  }
   0xd   :  { %993 = vmatpush3.bf16.msra.mxu1 %v1096_v11  ;;  %v1123_v36 = vld [vmem:[%s1442_s0 + $0xc] ss:$36 sps:$4 sm:$0xff]   ;;  %v1124_v37 = vld [vmem:[%s1441_s1 + $0x100] sm:$0xff]   ;;  %v1135_v48 = vld [vmem:[%s1441_s1 + $0x158] sm:$0xff]  }
   0xe   :  { %994 = vmatprep.subr.bf16.mxu1 %v1099_v14  ;;  %727 = vmatprep.mubr.bf16.mxu1 %v1123_v36  ;;  %v1125_v38 = vld [vmem:[%s1441_s1 + $0x1c0] sm:$0xff]   ;;  %v1127_v40 = vld [vmem:[%s1441_s1 + $0x148] sm:$0xff]   ;;  %v1131_v44 = vld [vmem:[%s1441_s1 + $0x150] sm:$0xff]  }
   0xf   :  { %973 = vmatpush3.bf16.msra.mxu0 %v1098_v13  ;;  %v1126_v39 = vld [vmem:[%s1441_s1 + $0x180] sm:$0xff]   ;;  %v1128_v41 = vld [vmem:[%s1441_s1 + $0x108] sm:$0xff]   ;;  %v1132_v45 = vld [vmem:[%s1441_s1 + $0x110] sm:$0xff]  }
  0x10   :  { %974 = vmatprep.subr.bf16.mxu0 %v1101_v16  ;;  %v1129_v42 = vld [vmem:[%s1441_s1 + $0x1c8] sm:$0xff]   ;;  %v1133_v46 = vld [vmem:[%s1441_s1 + $0x1d0] sm:$0xff]   ;;  %v1136_v49 = vld [vmem:[%s1441_s1 + $0x118] sm:$0xff]  }
  0x11   :  { %995 = vmatpush3.bf16.msra.mxu1 %v1100_v15  ;;  %v1130_v43 = vld [vmem:[%s1441_s1 + $0x188] sm:$0xff]   ;;  %v1134_v47 = vld [vmem:[%s1441_s1 + $0x190] sm:$0xff]   ;;  %v1137_v50 = vld [vmem:[%s1441_s1 + $0x1d8] sm:$0xff]  }
  0x12   :  { %996 = vmatprep.subr.bf16.mxu1 %v1103_v18  ;;  %v1138_v51 = vld [vmem:[%s1441_s1 + $0x198] sm:$0xff]   ;;  %v1139_v52 = vld [vmem:[%s1441_s1 + $0x160] sm:$0xff]   ;;  %v1143_v56 = vld [vmem:[%s1441_s1 + $0x168] sm:$0xff]  }
  0x13   :  { %975 = vmatpush3.bf16.msra.mxu0 %v1102_v17  ;;  %v1140_v53 = vld [vmem:[%s1441_s1 + $0x120] sm:$0xff]   ;;  %v1144_v57 = vld [vmem:[%s1441_s1 + $0x128] sm:$0xff]   ;;  %v1147_v60 = vld [vmem:[%s1441_s1 + $0x170] sm:$0xff]  }
  0x14   :  { %976 = vmatprep.subr.bf16.mxu0 %v1105_v20  ;;  %v1141_v54 = vld [vmem:[%s1441_s1 + $0x1e0] sm:$0xff]   ;;  %v1145_v58 = vld [vmem:[%s1441_s1 + $0x1e8] sm:$0xff]   ;;  %v1148_v61 = vld [vmem:[%s1441_s1 + $0x130] sm:$0xff]  }
  0x15   :  { %997 = vmatpush3.bf16.msra.mxu1 %v1104_v19  ;;  %v1142_v55 = vld [vmem:[%s1441_s1 + $0x1a0] sm:$0xff]   ;;  %v1146_v59 = vld [vmem:[%s1441_s1 + $0x1a8] sm:$0xff]   ;;  %v1149_v62 = vld [vmem:[%s1441_s1 + $0x1f0] sm:$0xff]  }
  0x16   :  { %998 = vmatprep.subr.bf16.mxu1 %v1107_v22  ;;  %v1150_v63 = vld [vmem:[%s1441_s1 + $0x1b0] sm:$0xff]   ;;  %v1151_v0 = vld [vmem:[%s1441_s1 + $0x178] sm:$0xff]   ;;  %v1161_v9 = vld [vmem:[%s1441_s1 + $0x200] sm:$0xff]  }
  0x17   :  { %977 = vmatpush3.bf16.msra.mxu0 %v1106_v21  ;;  %v1152_v1 = vld [vmem:[%s1441_s1 + $0x138] sm:$0xff]   ;;  %v1154_v3 = vld [vmem:[%s1442_s0 + $0x10] ss:$36 sps:$4 sm:$0xff]   ;;  %v1162_v10 = vld [vmem:[%s1441_s1 + $0x208] sm:$0xff]  }
  0x18   :  { %978 = vmatprep.subr.bf16.mxu0 %v1109_v24  ;;  %v1153_v2 = vld [vmem:[%s1441_s1 + $0x1f8] sm:$0xff]   ;;  %v1163_v11 = vld [vmem:[%s1441_s1 + $0x210] sm:$0xff]   ;;  %v1165_v13 = vld [vmem:[%s1441_s1 + $0x220] sm:$0xff]  }
  0x19   :  { %999 = vmatpush3.bf16.msra.mxu1 %v1108_v23  ;;  %v1156_v4 = vld [vmem:[%s1442_s0 + $0x14] ss:$36 sps:$4 sm:$0xff]   ;;  %v1160_v8 = vld [vmem:[%s1442_s0 + $0x1c] ss:$36 sps:$4 sm:$0xff]   ;;  %v1166_v14 = vld [vmem:[%s1441_s1 + $0x228] sm:$0xff]  }
  0x1a   :  { %1000 = vmatprep.subr.bf16.mxu1 %v1111_v26  ;;  %v1157_v5 = vld [vmem:[%s1441_s1 + $0x1b8] sm:$0xff]   ;;  %v1167_v15 = vld [vmem:[%s1441_s1 + $0x230] sm:$0xff]   ;;  %v1169_v17 = vld [vmem:[%s1442_s0 + $0x20] ss:$36 sps:$4 sm:$0xff]  }
  0x1b   :  { %979 = vmatpush3.bf16.msra.mxu0 %v1110_v25  ;;  %v1158_v7 = vld [vmem:[%s1442_s0 + $0x18] ss:$36 sps:$4 sm:$0xff]   ;;  %v875_v19 = vld [vmem:[%s1443_s2] ss:$0 sm:$0xff] }
  0x1c   :  { %980 = vmatprep.subr.bf16.mxu0 %v1113_v28  ;;  %v1164_v12 = vld [vmem:[%s1441_s1 + $0x218] sm:$0xff]  }
  0x1d   :  { %1001 = vmatpush3.bf16.msra.mxu1 %v1112_v27  ;;  %v1168_v16 = vld [vmem:[%s1441_s1 + $0x238] sm:$0xff]  }
  0x1e   :  { %1002 = vmatprep.subr.bf16.mxu1 %v1115_v30 }
  0x1f   :  { %981 = vmatpush3.bf16.msra.mxu0 %v1114_v29 }
  0x20   :  { %1010 = vmatprep.subr.bf16.mxu0 %v1120_v34 }
  0x21   :  { %1003 = vmatpush3.bf16.msra.mxu1 %v1119_v33 }
  0x22   :  { %687 = vmatmul.mubr.bf16.vlgmr.msra.gmra.mrb[0].mxu0 %v1116_v31  ;;  %1032 = vmatprep.subr.bf16.mxu1 %v1125_v38 }
  0x23   :  { %1011 = vmatpush3.bf16.msra.mxu0 %v1124_v37  ;;  %768 = vmatprep.mubr.bf16.mxu0 %v1156_v4 }
  0x24   :  { %728 = vmatmul.mubr.bf16.vlgmr.msra.gmra.mrb[0].mxu1 %v1121_v35  ;;  %1012 = vmatprep.subr.bf16.mxu0 %v1127_v40 }
  0x25   :  { %1033 = vmatpush3.bf16.msra.mxu1 %v1126_v39  ;;  %809 = vmatprep.mubr.bf16.mxu1 %v1160_v8 }
  0x26   :  { %1034 = vmatprep.subr.bf16.mxu1 %v1129_v42 }
  0x27   :  { %1013 = vmatpush3.bf16.msra.mxu0 %v1128_v41 }
  0x28   :  { %1014 = vmatprep.subr.bf16.mxu0 %v1131_v44 }
  0x29   :  { %1035 = vmatpush3.bf16.msra.mxu1 %v1130_v43 }
  0x2a   :  { %1036 = vmatprep.subr.bf16.mxu1 %v1133_v46 }
  0x2b   :  { %1015 = vmatpush3.bf16.msra.mxu0 %v1132_v45 }
  0x2c   :  { %1016 = vmatprep.subr.bf16.mxu0 %v1135_v48 }
  0x2d   :  { %1037 = vmatpush3.bf16.msra.mxu1 %v1134_v47 }
  0x2e   :  { %1038 = vmatprep.subr.bf16.mxu1 %v1137_v50 }
  0x2f   :  { %1017 = vmatpush3.bf16.msra.mxu0 %v1136_v49 }
  0x30   :  { %1018 = vmatprep.subr.bf16.mxu0 %v1139_v52 }
  0x31   :  { %1039 = vmatpush3.bf16.msra.mxu1 %v1138_v51 }
  0x32   :  { %1040 = vmatprep.subr.bf16.mxu1 %v1141_v54 }
  0x33   :  { %1019 = vmatpush3.bf16.msra.mxu0 %v1140_v53 }
  0x34   :  { %1020 = vmatprep.subr.bf16.mxu0 %v1143_v56 }
  0x35   :  { %1041 = vmatpush3.bf16.msra.mxu1 %v1142_v55 }
  0x36   :  { %1042 = vmatprep.subr.bf16.mxu1 %v1145_v58 }
  0x37   :  { %1021 = vmatpush3.bf16.msra.mxu0 %v1144_v57 }
  0x38   :  { %1022 = vmatprep.subr.bf16.mxu0 %v1147_v60 }
  0x39   :  { %1043 = vmatpush3.bf16.msra.mxu1 %v1146_v59 }
  0x3a   :  { %1044 = vmatprep.subr.bf16.mxu1 %v1149_v62 }
  0x3b   :  { %1023 = vmatpush3.bf16.msra.mxu0 %v1148_v61 }
  0x3c   :  { %1024 = vmatprep.subr.bf16.mxu0 %v1151_v0 }
  0x3d   :  { %1045 = vmatpush3.bf16.msra.mxu1 %v1150_v63 }
  0x3e   :  { %1046 = vmatprep.subr.bf16.mxu1 %v1153_v2 }
  0x3f   :  { %1025 = vmatpush3.bf16.msra.mxu0 %v1152_v1 }
  0x40   :  { %1063 = vmatprep.subr.bf16.mxu0 %v1170_v6 }
  0x41   :  { %1047 = vmatpush3.bf16.msra.mxu1 %v1157_v5 }
  0x42   :  { %769 = vmatmul.mubr.bf16.vlgmr.msra.gmra.mrb[4].mxu0 %v1154_v3 }
  0x43   :  { %1079 = vmatprep.mubr.msk.bf16.mxu0 %vm1171_vm0, %v1170_v6  ;;  %1064 = vmatpush3.bf16.msra.mxu0 %v1161_v9 }
  0x44   :  { %810 = vmatmul.mubr.bf16.vlgmr.msra.gmra.mrb[4].mxu1 %v1158_v7  ;;  %1065 = vmatprep.subr.bf16.mxu0 %v1170_v6 }
  0x47   :  { %1066 = vmatpush3.bf16.msra.mxu0 %v1162_v10 }
  0x48   :  { %1067 = vmatprep.subr.bf16.mxu0 %v1170_v6 }
  0x4b   :  { %1068 = vmatpush3.bf16.msra.mxu0 %v1163_v11 }
  0x4c   :  { %1069 = vmatprep.subr.bf16.mxu0 %v1170_v6 }
  0x4f   :  { %1070 = vmatpush3.bf16.msra.mxu0 %v1164_v12 }
  0x50   :  { %1071 = vmatprep.subr.bf16.mxu0 %v1170_v6 }
  0x53   :  { %1072 = vmatpush3.bf16.msra.mxu0 %v1165_v13 }
  0x54   :  { %1073 = vmatprep.subr.bf16.mxu0 %v1170_v6 }
  0x57   :  { %1074 = vmatpush3.bf16.msra.mxu0 %v1166_v14 }
  0x58   :  { %1075 = vmatprep.subr.bf16.mxu0 %v1170_v6 }
  0x5b   :  { %1076 = vmatpush3.bf16.msra.mxu0 %v1167_v15 }
  0x5c   :  { %1077 = vmatprep.subr.bf16.mxu0 %v1170_v6 }
  0x5f   :  { %1078 = vmatpush3.bf16.msra.mxu0 %v1168_v16 }
  0x62   :  { %1080 = vmatmul.mubr.bf16.vlgmr.msra.gmra.mrb[8].mxu0 %v1169_v17 }
  0xf5   :  { %v982_v18 = vpop.f32.mrb[0].mxu0 }
  0xf6   :  { %v983_v20 = vpop.f32.mrb[1].mxu0 }
  0xf7   :  { %v984_v21 = vadd.f32 %v983_v20, %v982_v18  ;;  %v985_v22 = vpop.f32.mrb[2].mxu0  ;;  %v1004_v23 = vpop.f32.mrb[0].mxu1 }
  0xf8   :  { %v986_v24 = vpop.f32.mrb[3].mxu0  ;;  %v1005_v27 = vpop.f32.mrb[1].mxu1 }
  0xf9   :  { %v689_v25 = vadd.f32 %v984_v21, %v875_v19  ;;  %v987_v26 = vadd.f32 %v986_v24, %v985_v22  ;;  %v1006_v28 = vadd.f32 %v1005_v27, %v1004_v23  ;;  %v1007_v29 = vpop.f32.mrb[2].mxu1 }
  0xfa   :  { %v1008_v31 = vpop.f32.mrb[3].mxu1 }
  0xfb   :  { %v692_v30 = vadd.f32 %v987_v26, %v875_v19  ;;  %v730_v32 = vadd.f32 %v1006_v28, %v689_v25  ;;  %v1009_v33 = vadd.f32 %v1008_v31, %v1007_v29 }
  0xfd   :  { %v733_v34 = vadd.f32 %v1009_v33, %v692_v30 }
 0x115   :  { %v1026_v35 = vpop.f32.mrb[4].mxu0 }
 0x116   :  { %v1027_v36 = vpop.f32.mrb[5].mxu0 }
 0x117   :  { %v1028_v37 = vadd.f32 %v1027_v36, %v1026_v35  ;;  %v1029_v38 = vpop.f32.mrb[6].mxu0  ;;  %v1048_v39 = vpop.f32.mrb[4].mxu1 }
 0x118   :  { %v1030_v40 = vpop.f32.mrb[7].mxu0  ;;  %v1049_v43 = vpop.f32.mrb[5].mxu1 }
 0x119   :  { %v771_v41 = vadd.f32 %v1028_v37, %v730_v32  ;;  %v1031_v42 = vadd.f32 %v1030_v40, %v1029_v38  ;;  %v1050_v44 = vadd.f32 %v1049_v43, %v1048_v39  ;;  %v1051_v45 = vpop.f32.mrb[6].mxu1 }
 0x11a   :  { %v1052_v47 = vpop.f32.mrb[7].mxu1 }
 0x11b   :  { %v774_v46 = vadd.f32 %v1031_v42, %v733_v34  ;;  %v1053_v48 = vadd.f32 %v1052_v47, %v1051_v45  ;;  %v812_v49 = vadd.f32 %v1050_v44, %v771_v41 }
 0x11d   :  { %v815_v50 = vadd.f32 %v1053_v48, %v774_v46 }
 0x135   :  { %v852_v51 = vpop.f32.mrb[8].mxu0 }
 0x136   :  { %v853_v52 = vadd.f32 %v852_v51, %v812_v49  ;;  %v1081_v53 = vpop.f32.mrb[9].mxu0 }
 0x137   :  { %v855_v54 = vpop.f32.mrb[10].mxu0 }
 0x138   :  { %v856_v55 = vadd.f32 %v855_v54, %v815_v50  ;;  %v1082_v56 = vpop.f32.mrb[11].mxu0  ;;  %v859_v57 = vmax.f32 %v853_v52, 0.0 }
 0x13a   :  { %v860_v58 = vmax.f32 %v856_v55, 0.0 }
 0x13c   :  { %v964_v59 = vpack.c.bf16 %v860_v58, %v859_v57 }
 0x13e   :  { %965 = vst [vmem:[%s1444_s3] sm:$0xff] %v964_v59  }

// kernel: backbone_forward.101
= control target key start
LH: loop header
LB: loop body
LE: loop exit
PB: predicated region body
PF: predicated region fallthrough
CT: control target
= control target key end

     0   :  { %s1857_s12 = smov 0   ;;  %s2210_s0 = inlined_call_operand.vmem [shape: bf16[2,16,128], index: 0, kind: input, shape index: {}]   ;;  %s2211_s1 = inlined_call_operand.vmem [shape: bf16[9,128,128], index: 1, kind: input, shape index: {}]   ;;  %s2212_s2 = inlined_call_operand.vmem [shape: f32[1,128], index: 2, kind: input, shape index: {}]   ;;  %s2213_s3 = inlined_call_operand.vmem [shape: bf16[2,8,128], index: 3, kind: output, shape index: {}]  }
   0x1 LB: > { %s1258_s13 = sadd.s32 4294967295, %s1833_s12   ;;  %p1262_p0 = scmp.ge.s32.totalorder %s1833_s12, 1  ;;  %s1833_s12 = sphi %s1857_s12, %s13_s12  }
   0x2   : > { %p137_p1 = scmp.lt.s32.totalorder %s1833_s12, 3 }
   0x4   : > { %p138_p2 = pnand %p1262_p0, %p137_p1 }
   0x5   : > { %v1748_v0 = vld [vmem:[%s2211_s1 + $0x40] sm:$0xff] (!%p138_p2)   ;;  %v1835_v1 = vmov (!%p138_p2), 0.0   ;;  %v1750_v3 = vld [vmem:[%s2211_s1 + $0x48] sm:$0xff] (!%p138_p2)   ;;  %vm1836_vm0 = vmmov (!%p138_p2), 0   ;;  %p160_p3 = scmp.lt.s32.totalorder (!%p138_p2), %s1258_s13, 1  ;;  %v1752_v5 = vld [vmem:[%s2211_s1 + $0x50] sm:$0xff] (!%p138_p2)  }
   0x6   : > { %141 = sbr.rel (%p138_p2) target bundleno = 387 (0x183), region = 32  ;;  %1558 = vmatprep.subr.bf16.mxu0 (!%p138_p2), %v1835_v1  ;;  %1578 = vmatprep.subr.bf16.mxu1 (!%p138_p2), %v1835_v1  ;;  %v1749_v2 = vld [vmem:[%s2211_s1] sm:$0xff] (!%p138_p2)   ;;  %v1751_v4 = vld [vmem:[%s2211_s1 + $0x8] sm:$0xff] (!%p138_p2)   ;;  %v1753_v6 = vld [vmem:[%s2211_s1 + $0x10] sm:$0xff] (!%p138_p2)  }
   0x7   : > { %1559 = vmatpush3.bf16.msra.mxu0 (!%p138_p2), %v1748_v0  ;;  %1574 = vmatprep.mubr.msk.bf16.mxu0 (!%p138_p2), %vm1836_vm0, %v1835_v1  ;;  %v1754_v7 = vld [vmem:[%s2211_s1 + $0x58] sm:$0xff] (!%p138_p2)   ;;  %v1756_v9 = vld [vmem:[%s2211_s1 + $0x60] sm:$0xff] (!%p138_p2)   ;;  %v1758_v14 = vld [vmem:[%s2211_s1 + $0x68] sm:$0xff] (!%p138_p2)  }
   0x8   : > { %1579 = vmatpush3.bf16.msra.mxu1 (!%p138_p2), %v1749_v2  ;;  %1560 = vmatprep.subr.bf16.mxu0 (!%p138_p2), %v1835_v1  ;;  %v1755_v8 = vld [vmem:[%s2211_s1 + $0x18] sm:$0xff] (!%p138_p2)   ;;  %v1757_v10 = vld [vmem:[%s2211_s1 + $0x20] sm:$0xff] (!%p138_p2)   ;;  %v1759_v15 = vld [vmem:[%s2211_s1 + $0x28] sm:$0xff] (!%p138_p2)  }
   0x9   : > { %1580 = vmatprep.subr.bf16.mxu1 (!%p138_p2), %v1835_v1  ;;  %1594 = vmatprep.mubr.msk.bf16.mxu1 (!%p138_p2), %vm1836_vm0, %v1835_v1  ;;  %v1760_v17 = vld [vmem:[%s2211_s1 + $0x70] sm:$0xff] (!%p138_p2)   ;;  %v1762_v21 = vld [vmem:[%s2211_s1 + $0x78] sm:$0xff] (!%p138_p2)   ;;  %v1765_v25 = vld [vmem:[%s2211_s1 + $0x80] sm:$0xff] (!%p138_p2)  }
   0xa   : > { %v1761_v18 = vld [vmem:[%s2211_s1 + $0x30] sm:$0xff] (!%p138_p2)   ;;  %v1763_v22 = vld [vmem:[%s2211_s1 + $0x38] sm:$0xff] (!%p138_p2)   ;;  %v1766_v26 = vld [vmem:[%s2211_s1 + $0xc0] sm:$0xff] (!%p138_p2)  }
   0xb   : > { %1561 = vmatpush3.bf16.msra.mxu0 (!%p138_p2), %v1750_v3  ;;  %v1767_v27 = vld [vmem:[%s2211_s1 + $0x88] sm:$0xff] (!%p138_p2)   ;;  %v1769_v29 = vld [vmem:[%s2211_s1 + $0x90] sm:$0xff] (!%p138_p2)   ;;  %v1771_v31 = vld [vmem:[%s2211_s1 + $0x98] sm:$0xff] (!%p138_p2)  }
   0xc   : > { %1581 = vmatpush3.bf16.msra.mxu1 (!%p138_p2), %v1751_v4  ;;  %1562 = vmatprep.subr.bf16.mxu0 (!%p138_p2), %v1835_v1  ;;  %v1768_v28 = vld [vmem:[%s2211_s1 + $0xc8] sm:$0xff] (!%p138_p2)   ;;  %v1770_v30 = vld [vmem:[%s2211_s1 + $0xd0] sm:$0xff] (!%p138_p2)   ;;  %v1772_v32 = vld [vmem:[%s2211_s1 + $0xd8] sm:$0xff] (!%p138_p2)  }
   0xd   : > { %s2215_s13 = smov (!%p160_p3, %s1258_s13), 1  ;;  %1582 = vmatprep.subr.bf16.mxu1 %v1835_v1  ;;  %v1773_v33 = vld [vmem:[%s2211_s1 + $0xa0] sm:$0xff]   ;;  %v1775_v38 = vld [vmem:[%s2211_s1 + $0xa8] sm:$0xff]   ;;  %v1777_v40 = vld [vmem:[%s2211_s1 + $0xb0] sm:$0xff]  }
   0xe   : > { %s1476_s28 = sshll.u32 %s2215_s13, 3  ;;  %v1774_v36 = vld [vmem:[%s2211_s1 + $0xe0] sm:$0xff]   ;;  %v1776_v39 = vld [vmem:[%s2211_s1 + $0xe8] sm:$0xff]   ;;  %v1778_v43 = vld [vmem:[%s2211_s1 + $0xf0] sm:$0xff]  }
   0xf   : > { %1563 = vmatpush3.bf16.msra.mxu0 %v1752_v5  ;;  %s1907_s6 = scalar_lea.vmem %s2210_s0, %s1476_s28  ;;  %v1779_v44 = vld [vmem:[%s2211_s1 + $0xb8] sm:$0xff]   ;;  %v1783_v50 = vld [vmem:[%s2211_s1 + $0x100] sm:$0xff]   ;;  %v1785_v53 = vld [vmem:[%s2211_s1 + $0x108] sm:$0xff]  }
  0x10   : > { %1583 = vmatpush3.bf16.msra.mxu1 %v1753_v6  ;;  %1564 = vmatprep.subr.bf16.mxu0 %v1835_v1  ;;  %v187_v11 = vld [vmem:[%s1907_s6] sm:$0xf]  ;;  %v1919_v12 = vld [vmem:[%s1907_s6 + $0x4] sm:$0x1]  ;;  %v1780_v48 = vld [vmem:[%s2211_s1 + $0xf8] sm:$0xff]  }
  0x11   : > { %1584 = vmatprep.subr.bf16.mxu1 %v1835_v1  ;;  %v1282_v13 = vcombine.low %v187_v11, %v1919_v12  ;;  %v170_v24 = vld [vmem:[%s1907_s6] sm:$0xf]  ;;  %v1988_v35 = vld [vmem:[%s1907_s6 + $0x4] sm:$0x3]  ;;  %v1786_v54 = vld [vmem:[%s2211_s1 + $0x148] sm:$0xff]  }
  0x12   : > { %v395_v34 = vld [vmem:[%s1907_s6] sm:$0xe]  ;;  %v1787_v55 = vld [vmem:[%s2211_s1 + $0x110] sm:$0xff]   ;;  %v1789_v57 = vld [vmem:[%s2211_s1 + $0x118] sm:$0xff]  }
  0x13   : > { %1565 = vmatpush3.bf16.msra.mxu0 %v1754_v7  ;;  %v214_v16 = vshll.u32 %v1282_v13, 16  ;;  %v212_v19 = vshrl.u32 %v1282_v13, 16  ;;  %v1340_v37 = vcombine.low %v395_v34, %v1988_v35  ;;  %v1315_v45 = vcombine.low %v395_v34, %v1919_v12  ;;  %v1784_v52 = vld [vmem:[%s2211_s1 + $0x140] sm:$0xff]   ;;  %v1788_v56 = vld [vmem:[%s2211_s1 + $0x150] sm:$0xff]   ;;  %v1790_v58 = vld [vmem:[%s2211_s1 + $0x158] sm:$0xff]  }
  0x14   : > { %1585 = vmatpush3.bf16.msra.mxu1 %v1755_v8  ;;  %1566 = vmatprep.subr.bf16.mxu0 %v1835_v1  ;;  %v1791_v59 = vld [vmem:[%s2211_s1 + $0x120] sm:$0xff]   ;;  %v1793_v63 = vld [vmem:[%s2211_s1 + $0x128] sm:$0xff]   ;;  %v1795_v3 = vld [vmem:[%s2211_s1 + $0x130] sm:$0xff]  }
  0x15   : > { %1586 = vmatprep.subr.bf16.mxu1 %v1835_v1  ;;  %v216_v20 = vrot.slane %v214_v16, 1  ;;  %v529_v41 = vshrl.u32 %v1340_v37, 16  ;;  %v532_v42 = vshll.u32 %v1340_v37, 16  ;;  %v416_v49 = vrot.slane %v1315_v45, 1  ;;  %v1792_v60 = vld [vmem:[%s2211_s1 + $0x160] sm:$0xff]   ;;  %v1794_v2 = vld [vmem:[%s2211_s1 + $0x168] sm:$0xff]  }
  0x16   : > { %v626_v61 = vld [vmem:[%s1907_s6] sm:$0xc]  ;;  %v2066_v62 = vld [vmem:[%s1907_s6 + $0x4] sm:$0x7]  ;;  %v1796_v6 = vld [vmem:[%s2211_s1 + $0x170] sm:$0xff]  }
  0x17   : > { %1567 = vmatpush3.bf16.msra.mxu0 %v1756_v9  ;;  %v217_v23 = vor.u32 %v216_v20, %v212_v19  ;;  %v531_v46 = vrot.slane %v529_v41, 1  ;;  %v534_v47 = vrot.slane %v532_v42, 2  ;;  %v1390_v0 = vcombine.low %v626_v61, %v2066_v62  ;;  %v1797_v8 = vld [vmem:[%s2211_s1 + $0x138] sm:$0xff]   ;;  %v1801_v13 = vld [vmem:[%s2211_s1 + $0x180] sm:$0xff]   ;;  %v1803_v16 = vld [vmem:[%s2211_s1 + $0x188] sm:$0xff]  }
  0x18   : > { %1587 = vmatpush3.bf16.msra.mxu1 %v1757_v10  ;;  %1568 = vmatprep.subr.bf16.mxu0 %v1835_v1  ;;  %v1365_v7 = vcombine.low %v626_v61, %v1988_v35  ;;  %v1798_v11 = vld [vmem:[%s2211_s1 + $0x178] sm:$0xff]   ;;  %v1806_v19 = vld [vmem:[%s2211_s1 + $0x1d0] sm:$0xff]   ;;  %v1820_v41 = vld [vmem:[%s2211_s1 + $0x208] sm:$0xff]  }
  0x19   : > { %1588 = vmatprep.subr.bf16.mxu1 %v1835_v1  ;;  %v535_v51 = vor.u32 %v534_v47, %v531_v46  ;;  %v760_v4 = vshrl.u32 %v1390_v0, 16  ;;  %v763_v5 = vshll.u32 %v1390_v0, 16  ;;  %v1807_v20 = vld [vmem:[%s2211_s1 + $0x198] sm:$0xff]   ;;  %v1821_v42 = vld [vmem:[%s2211_s1 + $0x210] sm:$0xff]   ;;  %v1824_v45 = vld [vmem:[%s2211_s1 + $0x228] sm:$0xff]  }
  0x1a   : > { %v647_v12 = vrot.slane %v1365_v7, 2  ;;  %v1815_v34 = vld [vmem:[%s2211_s1 + $0x1b8] sm:$0xff]   ;;  %v1825_v46 = vld [vmem:[%s2211_s1 + $0x230] sm:$0xff]  }
  0x1b   : > { %1569 = vmatpush3.bf16.msra.mxu0 %v1758_v14  ;;  %v762_v9 = vrot.slane %v760_v4, 2  ;;  %v765_v10 = vrot.slane %v763_v5, 3  ;;  %v1816_v37 = vld [vmem:[%s2211_s1 + $0x1f8] sm:$0xff]  }
  0x1c   : > { %1589 = vmatpush3.bf16.msra.mxu1 %v1759_v15  ;;  %1570 = vmatprep.subr.bf16.mxu0 %v1835_v1  ;;  %v1802_v15 = vld [vmem:[%s2211_s1 + $0x1c0] sm:$0xff]   ;;  %v1826_v47 = vld [vmem:[%s2211_s1 + $0x238] sm:$0xff]  }
  0x1d   : > { %1590 = vmatprep.subr.bf16.mxu1 %v1835_v1  ;;  %v766_v14 = vor.u32 %v765_v10, %v762_v9 }
  0x1f   : > { %1571 = vmatpush3.bf16.msra.mxu0 %v1760_v17  ;;  %v1804_v17 = vld [vmem:[%s2211_s1 + $0x1c8] sm:$0xff]  }
  0x20   : > { %1591 = vmatpush3.bf16.msra.mxu1 %v1761_v18  ;;  %1572 = vmatprep.subr.bf16.mxu0 %v1835_v1  ;;  %v1805_v18 = vld [vmem:[%s2211_s1 + $0x190] sm:$0xff]  }
  0x21   : > { %1592 = vmatprep.subr.bf16.mxu1 %v1835_v1 }
  0x23   : > { %1573 = vmatpush3.bf16.msra.mxu0 %v1762_v21  ;;  %v1808_v21 = vld [vmem:[%s2211_s1 + $0x1d8] sm:$0xff]  }
  0x24   : > { %1593 = vmatpush3.bf16.msra.mxu1 %v1763_v22  ;;  %1598 = vmatprep.subr.bf16.mxu0 %v1835_v1  ;;  %v1809_v22 = vld [vmem:[%s2211_s1 + $0x1a0] sm:$0xff]  }
  0x25   : > { %1618 = vmatprep.subr.bf16.mxu1 %v1835_v1 }
  0x26   : > { %1575 = vmatmul.mubr.bf16.vlgmr.msra.gmra.mrb[0].mxu0 %v217_v23  ;;  %v1810_v23 = vld [vmem:[%s2211_s1 + $0x1e0] sm:$0xff]  }
  0x27   : > { %1595 = vmatmul.mubr.bf16.vlgmr.msra.gmra.mrb[0].mxu1 %v170_v24  ;;  %1599 = vmatpush3.bf16.msra.mxu0 %v1765_v25  ;;  %v857_v24 = vld [vmem:[%s1907_s6] sm:$0x8]  ;;  %v969_v25 = vld [vmem:[%s1907_s6 + $0x4] sm:$0xf]  ;;  %s1265_s6 = sshll.u32 %s2215_s13, 2 }
  0x28   : > { %1619 = vmatpush3.bf16.msra.mxu1 %v1766_v26  ;;  %1600 = vmatprep.subr.bf16.mxu0 %v1835_v1  ;;  %v1811_v26 = vld [vmem:[%s2211_s1 + $0x1a8] sm:$0xff]   ;;  %s168_s20 = scalar_lea.vmem %s2213_s3, %s1265_s6 }
  0x29   : > { %1620 = vmatprep.subr.bf16.mxu1 %v1835_v1  ;;  %1614 = vmatprep.mubr.msk.bf16.mxu0 %vm1836_vm0, %v1835_v1 }
  0x2a   : > { %1634 = vmatprep.mubr.msk.bf16.mxu1 %vm1836_vm0, %v1835_v1 }
  0x2b   : > { %1601 = vmatpush3.bf16.msra.mxu0 %v1767_v27  ;;  %v1440_v27 = vcombine.low %v857_v24, %v969_v25 }
  0x2c   : > { %1621 = vmatpush3.bf16.msra.mxu1 %v1768_v28  ;;  %1602 = vmatprep.subr.bf16.mxu0 %v1835_v1  ;;  %v1812_v28 = vld [vmem:[%s2211_s1 + $0x1e8] sm:$0xff]  }
  0x2d   : > { %1622 = vmatprep.subr.bf16.mxu1 %v1835_v1 }
  0x2f   : > { %1603 = vmatpush3.bf16.msra.mxu0 %v1769_v29  ;;  %v1813_v29 = vld [vmem:[%s2211_s1 + $0x1b0] sm:$0xff]  }
  0x30   : > { %1623 = vmatpush3.bf16.msra.mxu1 %v1770_v30  ;;  %1604 = vmatprep.subr.bf16.mxu0 %v1835_v1  ;;  %v991_v30 = vshrl.u32 %v1440_v27, 16 }
  0x31   : > { %1624 = vmatprep.subr.bf16.mxu1 %v1835_v1 }
  0x32   : > { %v993_v35 = vrot.slane %v991_v30, 3 }
  0x33   : > { %1605 = vmatpush3.bf16.msra.mxu0 %v1771_v31  ;;  %v994_v31 = vshll.u32 %v1440_v27, 16 }
  0x34   : > { %1625 = vmatpush3.bf16.msra.mxu1 %v1772_v32  ;;  %1606 = vmatprep.subr.bf16.mxu0 %v1835_v1  ;;  %v1814_v32 = vld [vmem:[%s2211_s1 + $0x1f0] sm:$0xff]  }
  0x35   : > { %1626 = vmatprep.subr.bf16.mxu1 %v1835_v1 }
  0x37   : > { %1607 = vmatpush3.bf16.msra.mxu0 %v1773_v33  ;;  %v1415_v33 = vcombine.low %v857_v24, %v2066_v62  ;;  %v1473_v24 = vld [vmem:[%s2212_s2] ss:$0 sm:$0xff] }
  0x38   : > { %1627 = vmatpush3.bf16.msra.mxu1 %v1774_v36  ;;  %1608 = vmatprep.subr.bf16.mxu0 %v1835_v1  ;;  %v996_v36 = vrot.slane %v994_v31, 4 }
  0x39   : > { %1628 = vmatprep.subr.bf16.mxu1 %v1835_v1 }
  0x3b   : > { %1609 = vmatpush3.bf16.msra.mxu0 %v1775_v38  ;;  %v878_v38 = vrot.slane %v1415_v33, 3 }
  0x3c   : > { %1629 = vmatpush3.bf16.msra.mxu1 %v1776_v39  ;;  %1610 = vmatprep.subr.bf16.mxu0 %v1835_v1  ;;  %v1819_v39 = vld [vmem:[%s2211_s1 + $0x200] sm:$0xff]  }
  0x3d   : > { %1630 = vmatprep.subr.bf16.mxu1 %v1835_v1 }
  0x3f   : > { %1611 = vmatpush3.bf16.msra.mxu0 %v1777_v40  ;;  %v997_v40 = vor.u32 %v996_v36, %v993_v35 }
  0x40   : > { %1631 = vmatpush3.bf16.msra.mxu1 %v1778_v43  ;;  %1612 = vmatprep.subr.bf16.mxu0 %v1835_v1  ;;  %v1822_v43 = vld [vmem:[%s2211_s1 + $0x218] sm:$0xff]  }
  0x41   : > { %1632 = vmatprep.subr.bf16.mxu1 %v1835_v1 }
  0x43   : > { %1613 = vmatpush3.bf16.msra.mxu0 %v1779_v44  ;;  %v1823_v44 = vld [vmem:[%s2211_s1 + $0x220] sm:$0xff]  }
  0x44   : > { %1633 = vmatpush3.bf16.msra.mxu1 %v1780_v48  ;;  %1638 = vmatprep.subr.bf16.mxu0 %v1835_v1 }
  0x45   : > { %1658 = vmatprep.subr.bf16.mxu1 %v1835_v1 }
  0x46   : > { %1615 = vmatmul.mubr.bf16.vlgmr.msra.gmra.mrb[4].mxu0 %v416_v49 }
  0x47   : > { %1639 = vmatpush3.bf16.msra.mxu0 %v1783_v50  ;;  %1635 = vmatmul.mubr.bf16.vlgmr.msra.gmra.mrb[4].mxu1 %v535_v51 }
  0x48   : > { %1659 = vmatpush3.bf16.msra.mxu1 %v1784_v52  ;;  %1640 = vmatprep.subr.bf16.mxu0 %v1835_v1 }
  0x49   : > { %1660 = vmatprep.subr.bf16.mxu1 %v1835_v1  ;;  %1654 = vmatprep.mubr.msk.bf16.mxu0 %vm1836_vm0, %v1835_v1 }
  0x4a   : > { %1674 = vmatprep.mubr.msk.bf16.mxu1 %vm1836_vm0, %v1835_v1 }
  0x4b   : > { %1641 = vmatpush3.bf16.msra.mxu0 %v1785_v53 }
  0x4c   : > { %1661 = vmatpush3.bf16.msra.mxu1 %v1786_v54  ;;  %1642 = vmatprep.subr.bf16.mxu0 %v1835_v1 }
  0x4d   : > { %1662 = vmatprep.subr.bf16.mxu1 %v1835_v1 }
  0x4f   : > { %1643 = vmatpush3.bf16.msra.mxu0 %v1787_v55 }
  0x50   : > { %1663 = vmatpush3.bf16.msra.mxu1 %v1788_v56  ;;  %1644 = vmatprep.subr.bf16.mxu0 %v1835_v1 }
  0x51   : > { %1664 = vmatprep.subr.bf16.mxu1 %v1835_v1 }
  0x53   : > { %1645 = vmatpush3.bf16.msra.mxu0 %v1789_v57 }
  0x54   : > { %1665 = vmatpush3.bf16.msra.mxu1 %v1790_v58  ;;  %1646 = vmatprep.subr.bf16.mxu0 %v1835_v1 }
  0x55   : > { %1666 = vmatprep.subr.bf16.mxu1 %v1835_v1 }
  0x57   : > { %1647 = vmatpush3.bf16.msra.mxu0 %v1791_v59 }
  0x58   : > { %1667 = vmatpush3.bf16.msra.mxu1 %v1792_v60  ;;  %1648 = vmatprep.subr.bf16.mxu0 %v1835_v1 }
  0x59   : > { %1668 = vmatprep.subr.bf16.mxu1 %v1835_v1 }
  0x5b   : > { %1649 = vmatpush3.bf16.msra.mxu0 %v1793_v63 }
  0x5c   : > { %1669 = vmatpush3.bf16.msra.mxu1 %v1794_v2  ;;  %1650 = vmatprep.subr.bf16.mxu0 %v1835_v1 }
  0x5d   : > { %1670 = vmatprep.subr.bf16.mxu1 %v1835_v1 }
  0x5f   : > { %1651 = vmatpush3.bf16.msra.mxu0 %v1795_v3 }
  0x60   : > { %1671 = vmatpush3.bf16.msra.mxu1 %v1796_v6  ;;  %1652 = vmatprep.subr.bf16.mxu0 %v1835_v1 }
  0x61   : > { %1672 = vmatprep.subr.bf16.mxu1 %v1835_v1 }
  0x63   : > { %1653 = vmatpush3.bf16.msra.mxu0 %v1797_v8 }
  0x64   : > { %1673 = vmatpush3.bf16.msra.mxu1 %v1798_v11  ;;  %1678 = vmatprep.subr.bf16.mxu0 %v1835_v1 }
  0x65   : > { %1698 = vmatprep.subr.bf16.mxu1 %v1835_v1 }
  0x66   : > { %1655 = vmatmul.mubr.bf16.vlgmr.msra.gmra.mrb[8].mxu0 %v647_v12 }
  0x67   : > { %1679 = vmatpush3.bf16.msra.mxu0 %v1801_v13  ;;  %1675 = vmatmul.mubr.bf16.vlgmr.msra.gmra.mrb[8].mxu1 %v766_v14 }
  0x68   : > { %1699 = vmatpush3.bf16.msra.mxu1 %v1802_v15  ;;  %1680 = vmatprep.subr.bf16.mxu0 %v1835_v1 }
  0x69   : > { %1700 = vmatprep.subr.bf16.mxu1 %v1835_v1  ;;  %1694 = vmatprep.mubr.msk.bf16.mxu0 %vm1836_vm0, %v1835_v1 }
  0x6a   : > { %1714 = vmatprep.mubr.msk.bf16.mxu1 %vm1836_vm0, %v1835_v1 }
  0x6b   : > { %1681 = vmatpush3.bf16.msra.mxu0 %v1803_v16 }
  0x6c   : > { %1701 = vmatpush3.bf16.msra.mxu1 %v1804_v17  ;;  %1682 = vmatprep.subr.bf16.mxu0 %v1835_v1 }
  0x6d   : > { %1702 = vmatprep.subr.bf16.mxu1 %v1835_v1 }
  0x6f   : > { %1683 = vmatpush3.bf16.msra.mxu0 %v1805_v18 }
  0x70   : > { %1703 = vmatpush3.bf16.msra.mxu1 %v1806_v19  ;;  %1684 = vmatprep.subr.bf16.mxu0 %v1835_v1 }
  0x71   : > { %1704 = vmatprep.subr.bf16.mxu1 %v1835_v1 }
  0x73   : > { %1685 = vmatpush3.bf16.msra.mxu0 %v1807_v20 }
  0x74   : > { %1705 = vmatpush3.bf16.msra.mxu1 %v1808_v21  ;;  %1686 = vmatprep.subr.bf16.mxu0 %v1835_v1 }
  0x75   : > { %1706 = vmatprep.subr.bf16.mxu1 %v1835_v1 }
  0x77   : > { %1687 = vmatpush3.bf16.msra.mxu0 %v1809_v22 }
  0x78   : > { %1707 = vmatpush3.bf16.msra.mxu1 %v1810_v23  ;;  %1688 = vmatprep.subr.bf16.mxu0 %v1835_v1 }
  0x79   : > { %1708 = vmatprep.subr.bf16.mxu1 %v1835_v1 }
  0x7b   : > { %1689 = vmatpush3.bf16.msra.mxu0 %v1811_v26 }
  0x7c   : > { %1709 = vmatpush3.bf16.msra.mxu1 %v1812_v28  ;;  %1690 = vmatprep.subr.bf16.mxu0 %v1835_v1 }
  0x7d   : > { %1710 = vmatprep.subr.bf16.mxu1 %v1835_v1 }
  0x7f   : > { %1691 = vmatpush3.bf16.msra.mxu0 %v1813_v29 }
  0x80   : > { %1711 = vmatpush3.bf16.msra.mxu1 %v1814_v32  ;;  %1692 = vmatprep.subr.bf16.mxu0 %v1835_v1 }
  0x81   : > { %1712 = vmatprep.subr.bf16.mxu1 %v1835_v1 }
  0x83   : > { %1693 = vmatpush3.bf16.msra.mxu0 %v1815_v34 }
  0x84   : > { %1713 = vmatpush3.bf16.msra.mxu1 %v1816_v37  ;;  %1718 = vmatprep.subr.bf16.mxu0 %v1835_v1 }
  0x86   : > { %1695 = vmatmul.mubr.bf16.vlgmr.msra.gmra.mrb[12].mxu0 %v878_v38 }
  0x87   : > { %1719 = vmatpush3.bf16.msra.mxu0 %v1819_v39  ;;  %1715 = vmatmul.mubr.bf16.vlgmr.msra.gmra.mrb[12].mxu1 %v997_v40 }
  0x88   : > { %1720 = vmatprep.subr.bf16.mxu0 %v1835_v1  ;;  %1734 = vmatprep.mubr.msk.bf16.mxu0 %vm1836_vm0, %v1835_v1 }
  0x8b   : > { %1721 = vmatpush3.bf16.msra.mxu0 %v1820_v41 }
  0x8c   : > { %1722 = vmatprep.subr.bf16.mxu0 %v1835_v1 }
  0x8f   : > { %1723 = vmatpush3.bf16.msra.mxu0 %v1821_v42 }
  0x90   : > { %1724 = vmatprep.subr.bf16.mxu0 %v1835_v1 }
  0x93   : > { %1725 = vmatpush3.bf16.msra.mxu0 %v1822_v43 }
  0x94   : > { %1726 = vmatprep.subr.bf16.mxu0 %v1835_v1 }
  0x97   : > { %1727 = vmatpush3.bf16.msra.mxu0 %v1823_v44 }
  0x98   : > { %1728 = vmatprep.subr.bf16.mxu0 %v1835_v1 }
  0x9b   : > { %1729 = vmatpush3.bf16.msra.mxu0 %v1824_v45 }
  0x9c   : > { %1730 = vmatprep.subr.bf16.mxu0 %v1835_v1 }
  0x9f   : > { %1731 = vmatpush3.bf16.msra.mxu0 %v1825_v46 }
  0xa0   : > { %1732 = vmatprep.subr.bf16.mxu0 %v1835_v1 }
  0xa3   : > { %1733 = vmatpush3.bf16.msra.mxu0 %v1826_v47 }
  0xa6   : > { %1735 = vmatmul.mubr.bf16.vlgmr.msra.gmra.mrb[16].mxu0 %v969_v25 }
  0xf9   : > { %v301_v48 = vpop.f32.mrb[0].mxu0 }
  0xfa   : > { %v1576_v49 = vpop.f32.mrb[1].mxu0  ;;  %v389_v50 = vpop.f32.mrb[0].mxu1 }
  0xfb   : > { %v390_v51 = vadd.f32 %v389_v50, %v301_v48  ;;  %v304_v52 = vpop.f32.mrb[2].mxu0  ;;  %v1596_v53 = vpop.f32.mrb[1].mxu1 }
  0xfc   : > { %v1577_v54 = vpop.f32.mrb[3].mxu0  ;;  %v392_v55 = vpop.f32.mrb[2].mxu1 }
  0xfd   : > { %v1597_v56 = vpop.f32.mrb[3].mxu1 }
 0x119   : > { %v500_v57 = vpop.f32.mrb[4].mxu0 }
 0x11a   : > { %v506_v58 = vadd.f32 %v500_v57, %v390_v51  ;;  %v1616_v59 = vpop.f32.mrb[5].mxu0  ;;  %v619_v60 = vpop.f32.mrb[4].mxu1 }
 0x11b   : > { %v503_v61 = vpop.f32.mrb[6].mxu0  ;;  %v1636_v62 = vpop.f32.mrb[5].mxu1 }
 0x11c   : > { %v625_v63 = vadd.f32 %v619_v60, %v506_v58  ;;  %v1617_v0 = vpop.f32.mrb[7].mxu0  ;;  %v622_v1 = vpop.f32.mrb[6].mxu1 }
 0x11d   : > { %v1637_v2 = vpop.f32.mrb[7].mxu1 }
 0x139   : > { %v731_v3 = vpop.f32.mrb[8].mxu0 }
 0x13a   : > { %v737_v4 = vadd.f32 %v731_v3, %v625_v63  ;;  %v1656_v5 = vpop.f32.mrb[9].mxu0  ;;  %v850_v6 = vpop.f32.mrb[8].mxu1 }
 0x13b   : > { %v734_v7 = vpop.f32.mrb[10].mxu0  ;;  %v1676_v8 = vpop.f32.mrb[9].mxu1 }
 0x13c   : > { %v856_v9 = vadd.f32 %v850_v6, %v737_v4  ;;  %v1657_v10 = vpop.f32.mrb[11].mxu0  ;;  %v853_v11 = vpop.f32.mrb[10].mxu1 }
 0x13d   : > { %v1677_v12 = vpop.f32.mrb[11].mxu1 }
 0x159   : > { %v962_v13 = vpop.f32.mrb[12].mxu0 }
 0x15a   : > { %v968_v14 = vadd.f32 %v962_v13, %v856_v9  ;;  %v1696_v15 = vpop.f32.mrb[13].mxu0  ;;  %v1081_v16 = vpop.f32.mrb[12].mxu1 }
 0x15b   : > { %v965_v17 = vpop.f32.mrb[14].mxu0  ;;  %v1716_v18 = vpop.f32.mrb[13].mxu1 }
 0x15c   : > { %v1087_v19 = vadd.f32 %v1081_v16, %v968_v14  ;;  %v1697_v20 = vpop.f32.mrb[15].mxu0  ;;  %v1084_v21 = vpop.f32.mrb[14].mxu1 }
 0x15d   : > { %v1717_v22 = vpop.f32.mrb[15].mxu1 }
 0x179   : > { %v1187_v23 = vpop.f32.mrb[16].mxu0 }
 0x17a   : > { %v1193_v25 = vadd.f32 %v1187_v23, %v1087_v19  ;;  %v1736_v26 = vpop.f32.mrb[17].mxu0 }
 0x17b   : > { %v1190_v27 = vpop.f32.mrb[18].mxu0 }
 0x17c   : > { %v1201_v28 = vadd.f32 %v1473_v24, %v1193_v25  ;;  %v1737_v29 = vpop.f32.mrb[19].mxu0 }
 0x17e   : > { %v1202_v30 = vmax.f32 %v1201_v28, 0.0 }
 0x180   : > { %v1203_v31 = vpack.c.bf16 %v1202_v30, %v1202_v30 }
 0x182   : > { %1204 = vst [vmem:[%s168_s20] sm:$0xf] %v1203_v31 }
 0x183 PF: > { %s13_s12 = sadd.s32 1, %s1833_s12  }
 0x184   : > { %p10_p4 = scmp.ge.s32.totalorder %s13_s12, 4  }
 0x186   :  { %12 = sbr.rel (!%p10_p4) target bundleno = 1 (0x1), region = 70 }

</bundles_post_ra>
